<compile_context>
chip_gen: v7x
topology: tpu7x:2x2x1
jax: 0.10.0
libtpu: 0.0.40
codegen_flags: <defaults>
</compile_context>

<pallas_src>
import functools
import math

import numpy as np
import jax
import jax.numpy as jnp
from jax.experimental import pallas as pl
from jax.experimental.pallas import tpu as pltpu


def _round_up(x, m):
    return ((x + m - 1) // m) * m


# ---------------------------------------------------------------------------
# Kernel 1: relu((patches @ W_folded) + bias)   (conv1 / conv2, BN folded)
# ---------------------------------------------------------------------------
def _matmul_bias_relu_kernel(p_ref, w_ref, b_ref, o_ref):
    acc = jnp.dot(p_ref[...], w_ref[...], preferred_element_type=jnp.float32)
    o_ref[...] = jnp.maximum(acc + b_ref[...], 0.0).astype(o_ref.dtype)


def fused_matmul_bias_relu(patches, w_mat, bias):
    """patches (M, K) bf16, w_mat (K, C_pad) bf16 (BN scale folded, C padded to
    a multiple of 128), bias (1, C_pad) f32  ->  (M, C_pad) bf16."""
    M, K = patches.shape
    Kw, C_pad = w_mat.shape
    assert K == Kw and C_pad % 128 == 0

    # Row tiling: >= 2 tiles when M is non-trivial (keeps both v7x TensorCores
    # busy via "parallel"), tile size capped by an explicit VMEM budget
    # (2 double-buffered bf16 in/out tiles well under the 32 MiB default).
    bytes_per_row = 2 * 2 * (K + C_pad)               # bf16 in+out, 2 buffers
    tm_vmem_cap = max(256, ((12 << 20) // bytes_per_row) // 16 * 16)
    tm_cap = min(2048, tm_vmem_cap)
    n_tiles = max(2, math.ceil(M / tm_cap)) if M > 256 else 1
    tm = min(tm_cap, _round_up(math.ceil(M / n_tiles), 16))
    n_tiles = math.ceil(M / tm)
    M_pad = n_tiles * tm
    if M_pad != M:
        patches = jnp.pad(patches, ((0, M_pad - M), (0, 0)))

    out = pl.pallas_call(
        _matmul_bias_relu_kernel,
        out_shape=jax.ShapeDtypeStruct((M_pad, C_pad), jnp.bfloat16),
        grid=(n_tiles,),
        in_specs=[
            pl.BlockSpec((tm, K), lambda i: (i, 0)),       # patch row tile (K full-extent, no pad)
            pl.BlockSpec((K, C_pad), lambda i: (0, 0)),    # folded weights (resident)
            pl.BlockSpec((1, C_pad), lambda i: (0, 0)),    # folded BN bias
        ],
        out_specs=pl.BlockSpec((tm, C_pad), lambda i: (i, 0)),
        compiler_params=pltpu.CompilerParams(dimension_semantics=("parallel",)),
    )(patches, w_mat, bias)
    return out[:M]


# ---------------------------------------------------------------------------
# Kernel 2: fused tail, one image per grid step:
#   conv3 (im2col matmul) -> conv4 (16 tap matmuls via constant row-selection)
#   -> conv5 (full 3x3 contraction) -> conv_z (1x1)
# ---------------------------------------------------------------------------
def _tail_kernel(p3_ref, w3_ref, b3_ref, s4_ref, w4_ref, b4_ref,
                 w5_ref, b5_ref, wz_ref, bz_ref, o_ref):
    # conv3: (81, 1024) @ (1024, 128) + bias, ReLU
    h3 = jnp.dot(p3_ref[0], w3_ref[...], preferred_element_type=jnp.float32)
    h3 = jnp.maximum(h3 + b3_ref[...], 0.0).astype(jnp.bfloat16)          # (81, 128)

    # conv4: sum over the 16 kernel taps of (row-select @ h3) @ W4_tap.
    # s4_ref[t] is a constant 0/1 (9, 81) matrix implementing the padded,
    # stride-3 patch gather for tap t (zero rows where the tap hits padding).
    acc4 = jnp.zeros((9, 128), jnp.float32)
    for t in range(16):
        sel = jnp.dot(s4_ref[t], h3, preferred_element_type=jnp.float32)  # exact row gather
        acc4 = acc4 + jnp.dot(sel.astype(jnp.bfloat16), w4_ref[t],
                              preferred_element_type=jnp.float32)
    h4 = jnp.maximum(acc4 + b4_ref[...], 0.0)                             # (9, 128) f32

    # conv5: 3x3 valid over the 3x3 map == full contraction over the 9 rows.
    acc5 = jnp.zeros((1, 256), jnp.float32)
    for p in range(9):
        row = h4[p:p + 1, :].astype(jnp.bfloat16)                         # (1, 128)
        acc5 = acc5 + jnp.dot(row, w5_ref[p], preferred_element_type=jnp.float32)
    h5 = jnp.maximum(acc5 + b5_ref[...], 0.0).astype(jnp.bfloat16)        # (1, 256)

    # conv_z: 1x1
    z = jnp.dot(h5, wz_ref[...], preferred_element_type=jnp.float32) + bz_ref[...]
    o_ref[...] = z.reshape(1, 1, -1).astype(o_ref.dtype)


def tail_fused(p3, pp, output_dim):
    """p3: (N, 81, 1024) bf16 conv3 patches -> (N, output_dim) f32."""
    N, M3, K3 = p3.shape
    cz_pad = pp["wz"].shape[1]
    out = pl.pallas_call(
        _tail_kernel,
        out_shape=jax.ShapeDtypeStruct((N, 1, cz_pad), jnp.float32),
        grid=(N,),
        in_specs=[
            pl.BlockSpec((1, M3, K3), lambda n: (n, 0, 0)),     # conv3 patches (per image)
            pl.BlockSpec((K3, 128), lambda n: (0, 0)),          # conv3 folded weights
            pl.BlockSpec((1, 128), lambda n: (0, 0)),           # conv3 folded bias
            pl.BlockSpec((16, 9, M3), lambda n: (0, 0, 0)),     # conv4 tap selection
            pl.BlockSpec((16, 128, 128), lambda n: (0, 0, 0)),  # conv4 per-tap weights
            pl.BlockSpec((1, 128), lambda n: (0, 0)),           # conv4 folded bias
            pl.BlockSpec((9, 128, 256), lambda n: (0, 0, 0)),   # conv5 per-tap weights
            pl.BlockSpec((1, 256), lambda n: (0, 0)),           # conv5 folded bias
            pl.BlockSpec((256, cz_pad), lambda n: (0, 0)),      # conv_z weights (padded)
            pl.BlockSpec((1, cz_pad), lambda n: (0, 0)),        # conv_z bias (padded)
        ],
        out_specs=pl.BlockSpec((1, 1, cz_pad), lambda n: (n, 0, 0)),
        compiler_params=pltpu.CompilerParams(dimension_semantics=("parallel",)),
    )(p3, pp["w3"], pp["b3"], pp["s4"], pp["w4"], pp["b4"],
      pp["w5"], pp["b5"], pp["wz"], pp["bz"])
    return out[:, 0, :output_dim]


# ---------------------------------------------------------------------------
# im2col glue (NHWC, feature axis ordered (kh, kw, c_in)) — XLA side, bf16
# ---------------------------------------------------------------------------
def _im2col_nhwc(x_nhwc, KH, KW, stride, padding):
    N, H, W, C = x_nhwc.shape
    if padding > 0:
        x_nhwc = jnp.pad(
            x_nhwc, ((0, 0), (padding, padding), (padding, padding), (0, 0)))
    Hp, Wp = x_nhwc.shape[1], x_nhwc.shape[2]
    Ho = (Hp - KH) // stride + 1
    Wo = (Wp - KW) // stride + 1
    cols = []
    for kh in range(KH):
        for kw in range(KW):
            cols.append(
                x_nhwc[:,
                       kh: kh + stride * (Ho - 1) + 1: stride,
                       kw: kw + stride * (Wo - 1) + 1: stride,
                       :])
    patches = jnp.stack(cols, axis=3)                 # (N, Ho, Wo, KH*KW, C)
    patches = patches.reshape(N * Ho * Wo, KH * KW * C)
    return patches, (N, Ho, Wo)


def _weight_to_mat(w):
    """(C_out, C_in, KH, KW) PyTorch layout -> (KH*KW*C_in, C_out) matching im2col."""
    C_out, C_in, KH, KW = w.shape
    return jnp.transpose(w, (2, 3, 1, 0)).reshape(KH * KW * C_in, C_out)


def _conv4_tap_selection():
    """(16, 9, 81) 0/1 matrices: for tap (kh,kw) select, for each 3x3 output
    position, the matching row of the 9x9 conv3 output (zero if in padding)."""
    s = np.zeros((16, 9, 81), np.float32)
    for kh in range(4):
        for kw in range(4):
            t = kh * 4 + kw
            for ho in range(3):
                for wo in range(3):
                    hi = 3 * ho + kh - 1
                    wi = 3 * wo + kw - 1
                    if 0 <= hi <= 8 and 0 <= wi <= 8:
                        s[t, ho * 3 + wo, hi * 9 + wi] = 1.0
    return s


# ---------------------------------------------------------------------------
# Parameters (deterministic, PyTorch default-style init ranges)
# ---------------------------------------------------------------------------
def init_params(key, output_dim):
    conv_specs = [
        ("conv1", 3, 64, 4),
        ("conv2", 64, 64, 4),
        ("conv3", 64, 128, 4),
        ("conv4", 128, 128, 4),
        ("conv5", 128, 256, 3),
    ]
    params = {}
    for name, cin, cout, k in conv_specs:
        key, k1, k2, k3, k4, k5, k6 = jax.random.split(key, 7)
        bound = 1.0 / math.sqrt(cin * k * k)
        params[name] = dict(
            w=jax.random.uniform(k1, (cout, cin, k, k), jnp.float32, -bound, bound),
            b=jax.random.uniform(k2, (cout,), jnp.float32, -bound, bound),
            gamma=jax.random.uniform(k3, (cout,), jnp.float32, 0.5, 1.5),
            beta=jax.random.uniform(k4, (cout,), jnp.float32, -0.1, 0.1),
            mean=jax.random.uniform(k5, (cout,), jnp.float32, -0.1, 0.1),
            var=jax.random.uniform(k6, (cout,), jnp.float32, 0.5, 1.5),
        )
    key, k1, k2 = jax.random.split(key, 3)
    bound = 1.0 / math.sqrt(256)
    params["conv_z"] = dict(
        w=jax.random.uniform(k1, (output_dim, 256, 1, 1), jnp.float32, -bound, bound),
        b=jax.random.uniform(k2, (output_dim,), jnp.float32, -bound, bound),
    )
    return params


def _fold_bn(p, eps=1e-5):
    s = p["gamma"] / jnp.sqrt(p["var"] + eps)
    bias = (p["b"] - p["mean"]) * s + p["beta"]
    return s, bias


def prepare_params(params, output_dim):
    """One-time setup: fold BN, transpose/reshape/pad weights, cast to bf16,
    build the constant conv4 tap-selection matrices.  Done once, outside the
    hot forward path."""
    pp = {}
    # conv1 / conv2: im2col weight layout, BN folded, C padded to 128 (lane-dense stores)
    for name in ("conv1", "conv2"):
        p = params[name]
        s, b = _fold_bn(p)
        w_mat = _weight_to_mat(p["w"]) * s[None, :]
        c_out = w_mat.shape[1]
        c_pad = _round_up(c_out, 128)
        w_mat = jnp.pad(w_mat, ((0, 0), (0, c_pad - c_out)))
        b = jnp.pad(b, (0, c_pad - c_out))
        pp[name + "_w"] = w_mat.astype(jnp.bfloat16)
        pp[name + "_b"] = b.reshape(1, c_pad).astype(jnp.float32)

    # conv3: plain im2col layout (1024, 128)
    p3 = params["conv3"]
    s3, b3 = _fold_bn(p3)
    pp["w3"] = (_weight_to_mat(p3["w"]) * s3[None, :]).astype(jnp.bfloat16)
    pp["b3"] = b3.reshape(1, 128).astype(jnp.float32)

    # conv4: per-tap (C_in, C_out) weights + constant selection matrices
    p4 = params["conv4"]
    s4, b4 = _fold_bn(p4)
    w4_taps = jnp.transpose(p4["w"], (2, 3, 1, 0)).reshape(16, 128, 128)
    pp["w4"] = (w4_taps * s4[None, None, :]).astype(jnp.bfloat16)
    pp["b4"] = b4.reshape(1, 128).astype(jnp.float32)
    pp["s4"] = jnp.asarray(_conv4_tap_selection(), jnp.bfloat16)

    # conv5: per-tap (C_in, C_out) weights
    p5 = params["conv5"]
    s5, b5 = _fold_bn(p5)
    w5_taps = jnp.transpose(p5["w"], (2, 3, 1, 0)).reshape(9, 128, 256)
    pp["w5"] = (w5_taps * s5[None, None, :]).astype(jnp.bfloat16)
    pp["b5"] = b5.reshape(1, 256).astype(jnp.float32)

    # conv_z: (256, output_dim) padded to a lane-dense 128 multiple
    pz = params["conv_z"]
    cz_pad = _round_up(output_dim, 128)
    wz = pz["w"].reshape(output_dim, 256).T
    pp["wz"] = jnp.pad(wz, ((0, 0), (0, cz_pad - output_dim))).astype(jnp.bfloat16)
    pp["bz"] = jnp.pad(pz["b"], (0, cz_pad - output_dim)).reshape(1, cz_pad).astype(jnp.float32)
    return pp


# ---------------------------------------------------------------------------
# Full forward pass (matches ConvEncoder_HEP_SL.forward, eval-mode BN)
# ---------------------------------------------------------------------------
@functools.partial(jax.jit, static_argnums=2)
def conv_encoder_hep_sl(x, pp, output_dim):
    h = x.reshape(-1, 3, 111, 111)
    h = jnp.transpose(h, (0, 2, 3, 1)).astype(jnp.bfloat16)   # NCHW -> NHWC bf16, once

    # conv1: 4x4, stride 2, pad 1 -> (N, 55, 55, 64)
    p, (N, Ho, Wo) = _im2col_nhwc(h, 4, 4, 2, 1)
    h = fused_matmul_bias_relu(p, pp["conv1_w"], pp["conv1_b"])[:, :64]
    h = h.reshape(N, Ho, Wo, 64)

    # conv2: 4x4, stride 2, pad 1 -> (N, 27, 27, 64)
    p, (N, Ho, Wo) = _im2col_nhwc(h, 4, 4, 2, 1)
    h = fused_matmul_bias_relu(p, pp["conv2_w"], pp["conv2_b"])[:, :64]
    h = h.reshape(N, Ho, Wo, 64)

    # conv3 patches feed the single fused tail kernel (conv3+conv4+conv5+conv_z)
    p3, (N, Ho, Wo) = _im2col_nhwc(h, 4, 4, 3, 1)             # Ho = Wo = 9
    p3 = p3.reshape(N, Ho * Wo, 4 * 4 * 64)                   # (N, 81, 1024)
    z = tail_fused(p3, pp, output_dim)                        # (N, output_dim) f32
    return z.reshape(x.shape[0], output_dim)


if __name__ == "__main__":
    key = jax.random.PRNGKey(0)
    kx, kp = jax.random.split(key)

    output_dim = 10
    batch = 2
    # forward hard-codes view(-1, 3, 111, 111) -> input must be 3x111x111
    x = jax.random.normal(kx, (batch, 3, 111, 111), jnp.float32)
    params = init_params(kp, output_dim)
    prepped = prepare_params(params, output_dim)   # one-time weight folding/layout

    z = conv_encoder_hep_sl(x, prepped, output_dim)
    jax.block_until_ready(z)
    assert z.shape == (batch, output_dim)
    assert z.dtype == jnp.float32
    assert bool(jnp.all(jnp.isfinite(z)))
    print("KERNEL_OK")
</pallas_src>

<mosaic_0001>
module attributes {stable_mosaic.version = 11 : i64} {
  func.func @_matmul_bias_relu_kernel(%arg0: i32, %arg1: memref<2032x48xbf16, #tpu.memory_space<vmem>>, %arg2: memref<48x128xbf16, #tpu.memory_space<vmem>>, %arg3: memref<1x128xf32, #tpu.memory_space<vmem>>, %arg4: memref<2032x128xbf16, #tpu.memory_space<vmem>>) attributes {dimension_semantics = [#tpu.dimension_semantics<parallel>], iteration_bounds = array<i64: 3>, scalar_prefetch = 0 : i64, scratch_operands = 0 : i64, tpu.core_type = #tpu.core_type<tc>, window_params = [{transform_indices = @transform_0, window_bounds = array<i64: 2032, 48>}, {pipeline_mode = #tpu.pipeline_mode<synchronous>, transform_indices = @transform_1, window_bounds = array<i64: 48, 128>}, {pipeline_mode = #tpu.pipeline_mode<synchronous>, transform_indices = @transform_2, window_bounds = array<i64: 1, 128>}, {transform_indices = @transform_3, window_bounds = array<i64: 2032, 128>}]} {
    %c0 = arith.constant 0 : index
    %c0_0 = arith.constant 0 : index
    %0 = vector.load %arg1[%c0, %c0_0] : memref<2032x48xbf16, #tpu.memory_space<vmem>>, vector<2032x48xbf16>
    %c0_1 = arith.constant 0 : index
    %c0_2 = arith.constant 0 : index
    %1 = vector.load %arg2[%c0_1, %c0_2] : memref<48x128xbf16, #tpu.memory_space<vmem>>, vector<48x128xbf16>
    %cst = arith.constant dense<0.000000e+00> : vector<2032x128xf32>
    %2 = tpu.matmul %0, %1, %cst {dimension_numbers = #tpu.dot_dimension_numbers<[1], [0], [0], [1], [0, 0, 1, 1], [], []>} : vector<2032x48xbf16>, vector<48x128xbf16>, vector<2032x128xf32> -> vector<2032x128xf32>
    %c0_3 = arith.constant 0 : index
    %c0_4 = arith.constant 0 : index
    %3 = vector.load %arg3[%c0_3, %c0_4] : memref<1x128xf32, #tpu.memory_space<vmem>>, vector<1x128xf32>
    %4 = vector.broadcast %3 : vector<1x128xf32> to vector<2032x128xf32>
    %5 = arith.addf %2, %4 : vector<2032x128xf32>
    %cst_5 = arith.constant 0.000000e+00 : f32
    %6 = vector.broadcast %cst_5 : f32 to vector<2032x128xf32>
    %7 = arith.maximumf %5, %6 : vector<2032x128xf32>
    %8 = arith.truncf %7 : vector<2032x128xf32> to vector<2032x128xbf16>
    %c0_6 = arith.constant 0 : index
    %c0_7 = arith.constant 0 : index
    %9 = vector.load %arg4[%c0_6, %c0_7] : memref<2032x128xbf16, #tpu.memory_space<vmem>>, vector<2032x128xbf16>
    tpu.vector_store %arg4[%c0_6, %c0_7], %8 {strides = array<i32>} : memref<2032x128xbf16, #tpu.memory_space<vmem>>, vector<2032x128xbf16>,
    return
  }
  func.func @transform_0(%arg0: i32) -> (i32, i32) {
    %c0_i32 = arith.constant 0 : i32
    %c0_i32_0 = arith.constant 0 : i32
    return %arg0, %c0_i32 : i32, i32
  }
  func.func @transform_1(%arg0: i32) -> (i32, i32) {
    %c0_i32 = arith.constant 0 : i32
    %c0_i32_0 = arith.constant 0 : i32
    %c0_i32_1 = arith.constant 0 : i32
    return %c0_i32, %c0_i32_0 : i32, i32
  }
  func.func @transform_2(%arg0: i32) -> (i32, i32) {
    %c0_i32 = arith.constant 0 : i32
    %c0_i32_0 = arith.constant 0 : i32
    %c0_i32_1 = arith.constant 0 : i32
    return %c0_i32, %c0_i32_0 : i32, i32
  }
  func.func @transform_3(%arg0: i32) -> (i32, i32) {
    %c0_i32 = arith.constant 0 : i32
    %c0_i32_0 = arith.constant 0 : i32
    return %arg0, %c0_i32 : i32, i32
  }
}

module attributes {stable_mosaic.version = 11 : i64} {
  func.func @_matmul_bias_relu_kernel(%arg0: i32, %arg1: memref<736x1024xbf16, #tpu.memory_space<vmem>>, %arg2: memref<1024x128xbf16, #tpu.memory_space<vmem>>, %arg3: memref<1x128xf32, #tpu.memory_space<vmem>>, %arg4: memref<736x128xbf16, #tpu.memory_space<vmem>>) attributes {dimension_semantics = [#tpu.dimension_semantics<parallel>], iteration_bounds = array<i64: 2>, scalar_prefetch = 0 : i64, scratch_operands = 0 : i64, tpu.core_type = #tpu.core_type<tc>, window_params = [{transform_indices = @transform_0, window_bounds = array<i64: 736, 1024>}, {pipeline_mode = #tpu.pipeline_mode<synchronous>, transform_indices = @transform_1, window_bounds = array<i64: 1024, 128>}, {pipeline_mode = #tpu.pipeline_mode<synchronous>, transform_indices = @transform_2, window_bounds = array<i64: 1, 128>}, {transform_indices = @transform_3, window_bounds = array<i64: 736, 128>}]} {
    %c0 = arith.constant 0 : index
    %c0_0 = arith.constant 0 : index
    %0 = vector.load %arg1[%c0, %c0_0] : memref<736x1024xbf16, #tpu.memory_space<vmem>>, vector<736x1024xbf16>
    %c0_1 = arith.constant 0 : index
    %c0_2 = arith.constant 0 : index
    %1 = vector.load %arg2[%c0_1, %c0_2] : memref<1024x128xbf16, #tpu.memory_space<vmem>>, vector<1024x128xbf16>
    %cst = arith.constant dense<0.000000e+00> : vector<736x128xf32>
    %2 = tpu.matmul %0, %1, %cst {dimension_numbers = #tpu.dot_dimension_numbers<[1], [0], [0], [1], [0, 0, 1, 1], [], []>} : vector<736x1024xbf16>, vector<1024x128xbf16>, vector<736x128xf32> -> vector<736x128xf32>
    %c0_3 = arith.constant 0 : index
    %c0_4 = arith.constant 0 : index
    %3 = vector.load %arg3[%c0_3, %c0_4] : memref<1x128xf32, #tpu.memory_space<vmem>>, vector<1x128xf32>
    %4 = vector.broadcast %3 : vector<1x128xf32> to vector<736x128xf32>
    %5 = arith.addf %2, %4 : vector<736x128xf32>
    %cst_5 = arith.constant 0.000000e+00 : f32
    %6 = vector.broadcast %cst_5 : f32 to vector<736x128xf32>
    %7 = arith.maximumf %5, %6 : vector<736x128xf32>
    %8 = arith.truncf %7 : vector<736x128xf32> to vector<736x128xbf16>
    %c0_6 = arith.constant 0 : index
    %c0_7 = arith.constant 0 : index
    %9 = vector.load %arg4[%c0_6, %c0_7] : memref<736x128xbf16, #tpu.memory_space<vmem>>, vector<736x128xbf16>
    tpu.vector_store %arg4[%c0_6, %c0_7], %8 {strides = array<i32>} : memref<736x128xbf16, #tpu.memory_space<vmem>>, vector<736x128xbf16>,
    return
  }
  func.func @transform_0(%arg0: i32) -> (i32, i32) {
    %c0_i32 = arith.constant 0 : i32
    %c0_i32_0 = arith.constant 0 : i32
    return %arg0, %c0_i32 : i32, i32
  }
  func.func @transform_1(%arg0: i32) -> (i32, i32) {
    %c0_i32 = arith.constant 0 : i32
    %c0_i32_0 = arith.constant 0 : i32
    %c0_i32_1 = arith.constant 0 : i32
    return %c0_i32, %c0_i32_0 : i32, i32
  }
  func.func @transform_2(%arg0: i32) -> (i32, i32) {
    %c0_i32 = arith.constant 0 : i32
    %c0_i32_0 = arith.constant 0 : i32
    %c0_i32_1 = arith.constant 0 : i32
    return %c0_i32, %c0_i32_0 : i32, i32
  }
  func.func @transform_3(%arg0: i32) -> (i32, i32) {
    %c0_i32 = arith.constant 0 : i32
    %c0_i32_0 = arith.constant 0 : i32
    return %arg0, %c0_i32 : i32, i32
  }
}

module attributes {stable_mosaic.version = 11 : i64} {
  func.func @_tail_kernel(%arg0: i32, %arg1: memref<1x81x1024xbf16, #tpu.memory_space<vmem>>, %arg2: memref<1024x128xbf16, #tpu.memory_space<vmem>>, %arg3: memref<1x128xf32, #tpu.memory_space<vmem>>, %arg4: memref<16x9x81xbf16, #tpu.memory_space<vmem>>, %arg5: memref<16x128x128xbf16, #tpu.memory_space<vmem>>, %arg6: memref<1x128xf32, #tpu.memory_space<vmem>>, %arg7: memref<9x128x256xbf16, #tpu.memory_space<vmem>>, %arg8: memref<1x256xf32, #tpu.memory_space<vmem>>, %arg9: memref<256x128xbf16, #tpu.memory_space<vmem>>, %arg10: memref<1x128xf32, #tpu.memory_space<vmem>>, %arg11: memref<1x1x128xf32, #tpu.memory_space<vmem>>) attributes {dimension_semantics = [#tpu.dimension_semantics<parallel>], iteration_bounds = array<i64: 2>, scalar_prefetch = 0 : i64, scratch_operands = 0 : i64, tpu.core_type = #tpu.core_type<tc>, window_params = [{transform_indices = @transform_0, window_bounds = array<i64: 1, 81, 1024>}, {pipeline_mode = #tpu.pipeline_mode<synchronous>, transform_indices = @transform_1, window_bounds = array<i64: 1024, 128>}, {pipeline_mode = #tpu.pipeline_mode<synchronous>, transform_indices = @transform_2, window_bounds = array<i64: 1, 128>}, {pipeline_mode = #tpu.pipeline_mode<synchronous>, transform_indices = @transform_3, window_bounds = array<i64: 16, 9, 81>}, {pipeline_mode = #tpu.pipeline_mode<synchronous>, transform_indices = @transform_4, window_bounds = array<i64: 16, 128, 128>}, {pipeline_mode = #tpu.pipeline_mode<synchronous>, transform_indices = @transform_5, window_bounds = array<i64: 1, 128>}, {pipeline_mode = #tpu.pipeline_mode<synchronous>, transform_indices = @transform_6, window_bounds = array<i64: 9, 128, 256>}, {pipeline_mode = #tpu.pipeline_mode<synchronous>, transform_indices = @transform_7, window_bounds = array<i64: 1, 256>}, {pipeline_mode = #tpu.pipeline_mode<synchronous>, transform_indices = @transform_8, window_bounds = array<i64: 256, 128>}, {pipeline_mode = #tpu.pipeline_mode<synchronous>, transform_indices = @transform_9, window_bounds = array<i64: 1, 128>}, {transform_indices = @transform_10, window_bounds = array<i64: 1, 1, 128>}]} {
    %c0 = arith.constant 0 : index
    %c0_0 = arith.constant 0 : index
    %c0_1 = arith.constant 0 : index
    %0 = vector.load %arg1[%c0, %c0_0, %c0_1] : memref<1x81x1024xbf16, #tpu.memory_space<vmem>>, vector<1x81x1024xbf16>
    %1 = vector.shape_cast %0 : vector<1x81x1024xbf16> to vector<81x1024xbf16>
    %c0_2 = arith.constant 0 : index
    %c0_3 = arith.constant 0 : index
    %2 = vector.load %arg2[%c0_2, %c0_3] : memref<1024x128xbf16, #tpu.memory_space<vmem>>, vector<1024x128xbf16>
    %cst = arith.constant dense<0.000000e+00> : vector<81x128xf32>
    %3 = tpu.matmul %1, %2, %cst {dimension_numbers = #tpu.dot_dimension_numbers<[1], [0], [0], [1], [0, 0, 1, 1], [], []>} : vector<81x1024xbf16>, vector<1024x128xbf16>, vector<81x128xf32> -> vector<81x128xf32>
    %c0_4 = arith.constant 0 : index
    %c0_5 = arith.constant 0 : index
    %4 = vector.load %arg3[%c0_4, %c0_5] : memref<1x128xf32, #tpu.memory_space<vmem>>, vector<1x128xf32>
    %5 = vector.broadcast %4 : vector<1x128xf32> to vector<81x128xf32>
    %6 = arith.addf %3, %5 : vector<81x128xf32>
    %cst_6 = arith.constant 0.000000e+00 : f32
    %7 = vector.broadcast %cst_6 : f32 to vector<81x128xf32>
    %8 = arith.maximumf %6, %7 : vector<81x128xf32>
    %9 = arith.truncf %8 : vector<81x128xf32> to vector<81x128xbf16>
    %cst_7 = arith.constant 0.000000e+00 : f32
    %10 = vector.broadcast %cst_7 : f32 to vector<9x128xf32>
    %c0_8 = arith.constant 0 : index
    %c0_9 = arith.constant 0 : index
    %c0_10 = arith.constant 0 : index
    %11 = vector.load %arg4[%c0_8, %c0_9, %c0_10] : memref<16x9x81xbf16, #tpu.memory_space<vmem>>, vector<1x9x81xbf16>
    %12 = vector.shape_cast %11 : vector<1x9x81xbf16> to vector<9x81xbf16>
    %cst_11 = arith.constant dense<0.000000e+00> : vector<9x128xf32>
    %13 = tpu.matmul %12, %9, %cst_11 {dimension_numbers = #tpu.dot_dimension_numbers<[1], [0], [0], [1], [0, 0, 1, 1], [], []>} : vector<9x81xbf16>, vector<81x128xbf16>, vector<9x128xf32> -> vector<9x128xf32>
    %14 = arith.truncf %13 : vector<9x128xf32> to vector<9x128xbf16>
    %c0_12 = arith.constant 0 : index
    %c0_13 = arith.constant 0 : index
    %c0_14 = arith.constant 0 : index
    %15 = vector.load %arg5[%c0_12, %c0_13, %c0_14] : memref<16x128x128xbf16, #tpu.memory_space<vmem>>, vector<1x128x128xbf16>
    %16 = vector.shape_cast %15 : vector<1x128x128xbf16> to vector<128x128xbf16>
    %cst_15 = arith.constant dense<0.000000e+00> : vector<9x128xf32>
    %17 = tpu.matmul %14, %16, %cst_15 {dimension_numbers = #tpu.dot_dimension_numbers<[1], [0], [0], [1], [0, 0, 1, 1], [], []>} : vector<9x128xbf16>, vector<128x128xbf16>, vector<9x128xf32> -> vector<9x128xf32>
    %18 = arith.addf %10, %17 : vector<9x128xf32>
    %c1 = arith.constant 1 : index
    %c0_16 = arith.constant 0 : index
    %c0_17 = arith.constant 0 : index
    %19 = vector.load %arg4[%c1, %c0_16, %c0_17] : memref<16x9x81xbf16, #tpu.memory_space<vmem>>, vector<1x9x81xbf16>
    %20 = vector.shape_cast %19 : vector<1x9x81xbf16> to vector<9x81xbf16>
    %cst_18 = arith.constant dense<0.000000e+00> : vector<9x128xf32>
    %21 = tpu.matmul %20, %9, %cst_18 {dimension_numbers = #tpu.dot_dimension_numbers<[1], [0], [0], [1], [0, 0, 1, 1], [], []>} : vector<9x81xbf16>, vector<81x128xbf16>, vector<9x128xf32> -> vector<9x128xf32>
    %22 = arith.truncf %21 : vector<9x128xf32> to vector<9x128xbf16>
    %c1_19 = arith.constant 1 : index
    %c0_20 = arith.constant 0 : index
    %c0_21 = arith.constant 0 : index
    %23 = vector.load %arg5[%c1_19, %c0_20, %c0_21] : memref<16x128x128xbf16, #tpu.memory_space<vmem>>, vector<1x128x128xbf16>
    %24 = vector.shape_cast %23 : vector<1x128x128xbf16> to vector<128x128xbf16>
    %cst_22 = arith.constant dense<0.000000e+00> : vector<9x128xf32>
    %25 = tpu.matmul %22, %24, %cst_22 {dimension_numbers = #tpu.dot_dimension_numbers<[1], [0], [0], [1], [0, 0, 1, 1], [], []>} : vector<9x128xbf16>, vector<128x128xbf16>, vector<9x128xf32> -> vector<9x128xf32>
    %26 = arith.addf %18, %25 : vector<9x128xf32>
    %c2 = arith.constant 2 : index
    %c0_23 = arith.constant 0 : index
    %c0_24 = arith.constant 0 : index
    %27 = vector.load %arg4[%c2, %c0_23, %c0_24] : memref<16x9x81xbf16, #tpu.memory_space<vmem>>, vector<1x9x81xbf16>
    %28 = vector.shape_cast %27 : vector<1x9x81xbf16> to vector<9x81xbf16>
    %cst_25 = arith.constant dense<0.000000e+00> : vector<9x128xf32>
    %29 = tpu.matmul %28, %9, %cst_25 {dimension_numbers = #tpu.dot_dimension_numbers<[1], [0], [0], [1], [0, 0, 1, 1], [], []>} : vector<9x81xbf16>, vector<81x128xbf16>, vector<9x128xf32> -> vector<9x128xf32>
    %30 = arith.truncf %29 : vector<9x128xf32> to vector<9x128xbf16>
    %c2_26 = arith.constant 2 : index
    %c0_27 = arith.constant 0 : index
    %c0_28 = arith.constant 0 : index
    %31 = vector.load %arg5[%c2_26, %c0_27, %c0_28] : memref<16x128x128xbf16, #tpu.memory_space<vmem>>, vector<1x128x128xbf16>
    %32 = vector.shape_cast %31 : vector<1x128x128xbf16> to vector<128x128xbf16>
    %cst_29 = arith.constant dense<0.000000e+00> : vector<9x128xf32>
    %33 = tpu.matmul %30, %32, %cst_29 {dimension_numbers = #tpu.dot_dimension_numbers<[1], [0], [0], [1], [0, 0, 1, 1], [], []>} : vector<9x128xbf16>, vector<128x128xbf16>, vector<9x128xf32> -> vector<9x128xf32>
    %34 = arith.addf %26, %33 : vector<9x128xf32>
    %c3 = arith.constant 3 : index
    %c0_30 = arith.constant 0 : index
    %c0_31 = arith.constant 0 : index
    %35 = vector.load %arg4[%c3, %c0_30, %c0_31] : memref<16x9x81xbf16, #tpu.memory_space<vmem>>, vector<1x9x81xbf16>
    %36 = vector.shape_cast %35 : vector<1x9x81xbf16> to vector<9x81xbf16>
    %cst_32 = arith.constant dense<0.000000e+00> : vector<9x128xf32>
    %37 = tpu.matmul %36, %9, %cst_32 {dimension_numbers = #tpu.dot_dimension_numbers<[1], [0], [0], [1], [0, 0, 1, 1], [], []>} : vector<9x81xbf16>, vector<81x128xbf16>, vector<9x128xf32> -> vector<9x128xf32>
    %38 = arith.truncf %37 : vector<9x128xf32> to vector<9x128xbf16>
    %c3_33 = arith.constant 3 : index
    %c0_34 = arith.constant 0 : index
    %c0_35 = arith.constant 0 : index
    %39 = vector.load %arg5[%c3_33, %c0_34, %c0_35] : memref<16x128x128xbf16, #tpu.memory_space<vmem>>, vector<1x128x128xbf16>
    %40 = vector.shape_cast %39 : vector<1x128x128xbf16> to vector<128x128xbf16>
    %cst_36 = arith.constant dense<0.000000e+00> : vector<9x128xf32>
    %41 = tpu.matmul %38, %40, %cst_36 {dimension_numbers = #tpu.dot_dimension_numbers<[1], [0], [0], [1], [0, 0, 1, 1], [], []>} : vector<9x128xbf16>, vector<128x128xbf16>, vector<9x128xf32> -> vector<9x128xf32>
    %42 = arith.addf %34, %41 : vector<9x128xf32>
    %c4 = arith.constant 4 : index
    %c0_37 = arith.constant 0 : index
    %c0_38 = arith.constant 0 : index
    %43 = vector.load %arg4[%c4, %c0_37, %c0_38] : memref<16x9x81xbf16, #tpu.memory_space<vmem>>, vector<1x9x81xbf16>
    %44 = vector.shape_cast %43 : vector<1x9x81xbf16> to vector<9x81xbf16>
    %cst_39 = arith.constant dense<0.000000e+00> : vector<9x128xf32>
    %45 = tpu.matmul %44, %9, %cst_39 {dimension_numbers = #tpu.dot_dimension_numbers<[1], [0], [0], [1], [0, 0, 1, 1], [], []>} : vector<9x81xbf16>, vector<81x128xbf16>, vector<9x128xf32> -> vector<9x128xf32>
    %46 = arith.truncf %45 : vector<9x128xf32> to vector<9x128xbf16>
    %c4_40 = arith.constant 4 : index
    %c0_41 = arith.constant 0 : index
    %c0_42 = arith.constant 0 : index
    %47 = vector.load %arg5[%c4_40, %c0_41, %c0_42] : memref<16x128x128xbf16, #tpu.memory_space<vmem>>, vector<1x128x128xbf16>
    %48 = vector.shape_cast %47 : vector<1x128x128xbf16> to vector<128x128xbf16>
    %cst_43 = arith.constant dense<0.000000e+00> : vector<9x128xf32>
    %49 = tpu.matmul %46, %48, %cst_43 {dimension_numbers = #tpu.dot_dimension_numbers<[1], [0], [0], [1], [0, 0, 1, 1], [], []>} : vector<9x128xbf16>, vector<128x128xbf16>, vector<9x128xf32> -> vector<9x128xf32>
    %50 = arith.addf %42, %49 : vector<9x128xf32>
    %c5 = arith.constant 5 : index
    %c0_44 = arith.constant 0 : index
    %c0_45 = arith.constant 0 : index
    %51 = vector.load %arg4[%c5, %c0_44, %c0_45] : memref<16x9x81xbf16, #tpu.memory_space<vmem>>, vector<1x9x81xbf16>
    %52 = vector.shape_cast %51 : vector<1x9x81xbf16> to vector<9x81xbf16>
    %cst_46 = arith.constant dense<0.000000e+00> : vector<9x128xf32>
    %53 = tpu.matmul %52, %9, %cst_46 {dimension_numbers = #tpu.dot_dimension_numbers<[1], [0], [0], [1], [0, 0, 1, 1], [], []>} : vector<9x81xbf16>, vector<81x128xbf16>, vector<9x128xf32> -> vector<9x128xf32>
    %54 = arith.truncf %53 : vector<9x128xf32> to vector<9x128xbf16>
    %c5_47 = arith.constant 5 : index
    %c0_48 = arith.constant 0 : index
    %c0_49 = arith.constant 0 : index
    %55 = vector.load %arg5[%c5_47, %c0_48, %c0_49] : memref<16x128x128xbf16, #tpu.memory_space<vmem>>, vector<1x128x128xbf16>
    %56 = vector.shape_cast %55 : vector<1x128x128xbf16> to vector<128x128xbf16>
    %cst_50 = arith.constant dense<0.000000e+00> : vector<9x128xf32>
    %57 = tpu.matmul %54, %56, %cst_50 {dimension_numbers = #tpu.dot_dimension_numbers<[1], [0], [0], [1], [0, 0, 1, 1], [], []>} : vector<9x128xbf16>, vector<128x128xbf16>, vector<9x128xf32> -> vector<9x128xf32>
    %58 = arith.addf %50, %57 : vector<9x128xf32>
    %c6 = arith.constant 6 : index
    %c0_51 = arith.constant 0 : index
    %c0_52 = arith.constant 0 : index
    %59 = vector.load %arg4[%c6, %c0_51, %c0_52] : memref<16x9x81xbf16, #tpu.memory_space<vmem>>, vector<1x9x81xbf16>
    %60 = vector.shape_cast %59 : vector<1x9x81xbf16> to vector<9x81xbf16>
    %cst_53 = arith.constant dense<0.000000e+00> : vector<9x128xf32>
    %61 = tpu.matmul %60, %9, %cst_53 {dimension_numbers = #tpu.dot_dimension_numbers<[1], [0], [0], [1], [0, 0, 1, 1], [], []>} : vector<9x81xbf16>, vector<81x128xbf16>, vector<9x128xf32> -> vector<9x128xf32>
    %62 = arith.truncf %61 : vector<9x128xf32> to vector<9x128xbf16>
    %c6_54 = arith.constant 6 : index
    %c0_55 = arith.constant 0 : index
    %c0_56 = arith.constant 0 : index
    %63 = vector.load %arg5[%c6_54, %c0_55, %c0_56] : memref<16x128x128xbf16, #tpu.memory_space<vmem>>, vector<1x128x128xbf16>
    %64 = vector.shape_cast %63 : vector<1x128x128xbf16> to vector<128x128xbf16>
    %cst_57 = arith.constant dense<0.000000e+00> : vector<9x128xf32>
    %65 = tpu.matmul %62, %64, %cst_57 {dimension_numbers = #tpu.dot_dimension_numbers<[1], [0], [0], [1], [0, 0, 1, 1], [], []>} : vector<9x128xbf16>, vector<128x128xbf16>, vector<9x128xf32> -> vector<9x128xf32>
    %66 = arith.addf %58, %65 : vector<9x128xf32>
    %c7 = arith.constant 7 : index
    %c0_58 = arith.constant 0 : index
    %c0_59 = arith.constant 0 : index
    %67 = vector.load %arg4[%c7, %c0_58, %c0_59] : memref<16x9x81xbf16, #tpu.memory_space<vmem>>, vector<1x9x81xbf16>
    %68 = vector.shape_cast %67 : vector<1x9x81xbf16> to vector<9x81xbf16>
    %cst_60 = arith.constant dense<0.000000e+00> : vector<9x128xf32>
    %69 = tpu.matmul %68, %9, %cst_60 {dimension_numbers = #tpu.dot_dimension_numbers<[1], [0], [0], [1], [0, 0, 1, 1], [], []>} : vector<9x81xbf16>, vector<81x128xbf16>, vector<9x128xf32> -> vector<9x128xf32>
    %70 = arith.truncf %69 : vector<9x128xf32> to vector<9x128xbf16>
    %c7_61 = arith.constant 7 : index
    %c0_62 = arith.constant 0 : index
    %c0_63 = arith.constant 0 : index
    %71 = vector.load %arg5[%c7_61, %c0_62, %c0_63] : memref<16x128x128xbf16, #tpu.memory_space<vmem>>, vector<1x128x128xbf16>
    %72 = vector.shape_cast %71 : vector<1x128x128xbf16> to vector<128x128xbf16>
    %cst_64 = arith.constant dense<0.000000e+00> : vector<9x128xf32>
    %73 = tpu.matmul %70, %72, %cst_64 {dimension_numbers = #tpu.dot_dimension_numbers<[1], [0], [0], [1], [0, 0, 1, 1], [], []>} : vector<9x128xbf16>, vector<128x128xbf16>, vector<9x128xf32> -> vector<9x128xf32>
    %74 = arith.addf %66, %73 : vector<9x128xf32>
    %c8 = arith.constant 8 : index
    %c0_65 = arith.constant 0 : index
    %c0_66 = arith.constant 0 : index
    %75 = vector.load %arg4[%c8, %c0_65, %c0_66] : memref<16x9x81xbf16, #tpu.memory_space<vmem>>, vector<1x9x81xbf16>
    %76 = vector.shape_cast %75 : vector<1x9x81xbf16> to vector<9x81xbf16>
    %cst_67 = arith.constant dense<0.000000e+00> : vector<9x128xf32>
    %77 = tpu.matmul %76, %9, %cst_67 {dimension_numbers = #tpu.dot_dimension_numbers<[1], [0], [0], [1], [0, 0, 1, 1], [], []>} : vector<9x81xbf16>, vector<81x128xbf16>, vector<9x128xf32> -> vector<9x128xf32>
    %78 = arith.truncf %77 : vector<9x128xf32> to vector<9x128xbf16>
    %c8_68 = arith.constant 8 : index
    %c0_69 = arith.constant 0 : index
    %c0_70 = arith.constant 0 : index
    %79 = vector.load %arg5[%c8_68, %c0_69, %c0_70] : memref<16x128x128xbf16, #tpu.memory_space<vmem>>, vector<1x128x128xbf16>
    %80 = vector.shape_cast %79 : vector<1x128x128xbf16> to vector<128x128xbf16>
    %cst_71 = arith.constant dense<0.000000e+00> : vector<9x128xf32>
    %81 = tpu.matmul %78, %80, %cst_71 {dimension_numbers = #tpu.dot_dimension_numbers<[1], [0], [0], [1], [0, 0, 1, 1], [], []>} : vector<9x128xbf16>, vector<128x128xbf16>, vector<9x128xf32> -> vector<9x128xf32>
    %82 = arith.addf %74, %81 : vector<9x128xf32>
    %c9 = arith.constant 9 : index
    %c0_72 = arith.constant 0 : index
    %c0_73 = arith.constant 0 : index
    %83 = vector.load %arg4[%c9, %c0_72, %c0_73] : memref<16x9x81xbf16, #tpu.memory_space<vmem>>, vector<1x9x81xbf16>
    %84 = vector.shape_cast %83 : vector<1x9x81xbf16> to vector<9x81xbf16>
    %cst_74 = arith.constant dense<0.000000e+00> : vector<9x128xf32>
    %85 = tpu.matmul %84, %9, %cst_74 {dimension_numbers = #tpu.dot_dimension_numbers<[1], [0], [0], [1], [0, 0, 1, 1], [], []>} : vector<9x81xbf16>, vector<81x128xbf16>, vector<9x128xf32> -> vector<9x128xf32>
    %86 = arith.truncf %85 : vector<9x128xf32> to vector<9x128xbf16>
    %c9_75 = arith.constant 9 : index
    %c0_76 = arith.constant 0 : index
    %c0_77 = arith.constant 0 : index
    %87 = vector.load %arg5[%c9_75, %c0_76, %c0_77] : memref<16x128x128xbf16, #tpu.memory_space<vmem>>, vector<1x128x128xbf16>
    %88 = vector.shape_cast %87 : vector<1x128x128xbf16> to vector<128x128xbf16>
    %cst_78 = arith.constant dense<0.000000e+00> : vector<9x128xf32>
    %89 = tpu.matmul %86, %88, %cst_78 {dimension_numbers = #tpu.dot_dimension_numbers<[1], [0], [0], [1], [0, 0, 1, 1], [], []>} : vector<9x128xbf16>, vector<128x128xbf16>, vector<9x128xf32> -> vector<9x128xf32>
    %90 = arith.addf %82, %89 : vector<9x128xf32>
    %c10 = arith.constant 10 : index
    %c0_79 = arith.constant 0 : index
    %c0_80 = arith.constant 0 : index
    %91 = vector.load %arg4[%c10, %c0_79, %c0_80] : memref<16x9x81xbf16, #tpu.memory_space<vmem>>, vector<1x9x81xbf16>
    %92 = vector.shape_cast %91 : vector<1x9x81xbf16> to vector<9x81xbf16>
    %cst_81 = arith.constant dense<0.000000e+00> : vector<9x128xf32>
    %93 = tpu.matmul %92, %9, %cst_81 {dimension_numbers = #tpu.dot_dimension_numbers<[1], [0], [0], [1], [0, 0, 1, 1], [], []>} : vector<9x81xbf16>, vector<81x128xbf16>, vector<9x128xf32> -> vector<9x128xf32>
    %94 = arith.truncf %93 : vector<9x128xf32> to vector<9x128xbf16>
    %c10_82 = arith.constant 10 : index
    %c0_83 = arith.constant 0 : index
    %c0_84 = arith.constant 0 : index
    %95 = vector.load %arg5[%c10_82, %c0_83, %c0_84] : memref<16x128x128xbf16, #tpu.memory_space<vmem>>, vector<1x128x128xbf16>
    %96 = vector.shape_cast %95 : vector<1x128x128xbf16> to vector<128x128xbf16>
    %cst_85 = arith.constant dense<0.000000e+00> : vector<9x128xf32>
    %97 = tpu.matmul %94, %96, %cst_85 {dimension_numbers = #tpu.dot_dimension_numbers<[1], [0], [0], [1], [0, 0, 1, 1], [], []>} : vector<9x128xbf16>, vector<128x128xbf16>, vector<9x128xf32> -> vector<9x128xf32>
    %98 = arith.addf %90, %97 : vector<9x128xf32>
    %c11 = arith.constant 11 : index
    %c0_86 = arith.constant 0 : index
    %c0_87 = arith.constant 0 : index
    %99 = vector.load %arg4[%c11, %c0_86, %c0_87] : memref<16x9x81xbf16, #tpu.memory_space<vmem>>, vector<1x9x81xbf16>
    %100 = vector.shape_cast %99 : vector<1x9x81xbf16> to vector<9x81xbf16>
    %cst_88 = arith.constant dense<0.000000e+00> : vector<9x128xf32>
    %101 = tpu.matmul %100, %9, %cst_88 {dimension_numbers = #tpu.dot_dimension_numbers<[1], [0], [0], [1], [0, 0, 1, 1], [], []>} : vector<9x81xbf16>, vector<81x128xbf16>, vector<9x128xf32> -> vector<9x128xf32>
    %102 = arith.truncf %101 : vector<9x128xf32> to vector<9x128xbf16>
    %c11_89 = arith.constant 11 : index
    %c0_90 = arith.constant 0 : index
    %c0_91 = arith.constant 0 : index
    %103 = vector.load %arg5[%c11_89, %c0_90, %c0_91] : memref<16x128x128xbf16, #tpu.memory_space<vmem>>, vector<1x128x128xbf16>
    %104 = vector.shape_cast %103 : vector<1x128x128xbf16> to vector<128x128xbf16>
    %cst_92 = arith.constant dense<0.000000e+00> : vector<9x128xf32>
    %105 = tpu.matmul %102, %104, %cst_92 {dimension_numbers = #tpu.dot_dimension_numbers<[1], [0], [0], [1], [0, 0, 1, 1], [], []>} : vector<9x128xbf16>, vector<128x128xbf16>, vector<9x128xf32> -> vector<9x128xf32>
    %106 = arith.addf %98, %105 : vector<9x128xf32>
    %c12 = arith.constant 12 : index
    %c0_93 = arith.constant 0 : index
    %c0_94 = arith.constant 0 : index
    %107 = vector.load %arg4[%c12, %c0_93, %c0_94] : memref<16x9x81xbf16, #tpu.memory_space<vmem>>, vector<1x9x81xbf16>
    %108 = vector.shape_cast %107 : vector<1x9x81xbf16> to vector<9x81xbf16>
    %cst_95 = arith.constant dense<0.000000e+00> : vector<9x128xf32>
    %109 = tpu.matmul %108, %9, %cst_95 {dimension_numbers = #tpu.dot_dimension_numbers<[1], [0], [0], [1], [0, 0, 1, 1], [], []>} : vector<9x81xbf16>, vector<81x128xbf16>, vector<9x128xf32> -> vector<9x128xf32>
    %110 = arith.truncf %109 : vector<9x128xf32> to vector<9x128xbf16>
    %c12_96 = arith.constant 12 : index
    %c0_97 = arith.constant 0 : index
    %c0_98 = arith.constant 0 : index
    %111 = vector.load %arg5[%c12_96, %c0_97, %c0_98] : memref<16x128x128xbf16, #tpu.memory_space<vmem>>, vector<1x128x128xbf16>
    %112 = vector.shape_cast %111 : vector<1x128x128xbf16> to vector<128x128xbf16>
    %cst_99 = arith.constant dense<0.000000e+00> : vector<9x128xf32>
    %113 = tpu.matmul %110, %112, %cst_99 {dimension_numbers = #tpu.dot_dimension_numbers<[1], [0], [0], [1], [0, 0, 1, 1], [], []>} : vector<9x128xbf16>, vector<128x128xbf16>, vector<9x128xf32> -> vector<9x128xf32>
    %114 = arith.addf %106, %113 : vector<9x128xf32>
    %c13 = arith.constant 13 : index
    %c0_100 = arith.constant 0 : index
    %c0_101 = arith.constant 0 : index
    %115 = vector.load %arg4[%c13, %c0_100, %c0_101] : memref<16x9x81xbf16, #tpu.memory_space<vmem>>, vector<1x9x81xbf16>
    %116 = vector.shape_cast %115 : vector<1x9x81xbf16> to vector<9x81xbf16>
    %cst_102 = arith.constant dense<0.000000e+00> : vector<9x128xf32>
    %117 = tpu.matmul %116, %9, %cst_102 {dimension_numbers = #tpu.dot_dimension_numbers<[1], [0], [0], [1], [0, 0, 1, 1], [], []>} : vector<9x81xbf16>, vector<81x128xbf16>, vector<9x128xf32> -> vector<9x128xf32>
    %118 = arith.truncf %117 : vector<9x128xf32> to vector<9x128xbf16>
    %c13_103 = arith.constant 13 : index
    %c0_104 = arith.constant 0 : index
    %c0_105 = arith.constant 0 : index
    %119 = vector.load %arg5[%c13_103, %c0_104, %c0_105] : memref<16x128x128xbf16, #tpu.memory_space<vmem>>, vector<1x128x128xbf16>
    %120 = vector.shape_cast %119 : vector<1x128x128xbf16> to vector<128x128xbf16>
    %cst_106 = arith.constant dense<0.000000e+00> : vector<9x128xf32>
    %121 = tpu.matmul %118, %120, %cst_106 {dimension_numbers = #tpu.dot_dimension_numbers<[1], [0], [0], [1], [0, 0, 1, 1], [], []>} : vector<9x128xbf16>, vector<128x128xbf16>, vector<9x128xf32> -> vector<9x128xf32>
    %122 = arith.addf %114, %121 : vector<9x128xf32>
    %c14 = arith.constant 14 : index
    %c0_107 = arith.constant 0 : index
    %c0_108 = arith.constant 0 : index
    %123 = vector.load %arg4[%c14, %c0_107, %c0_108] : memref<16x9x81xbf16, #tpu.memory_space<vmem>>, vector<1x9x81xbf16>
    %124 = vector.shape_cast %123 : vector<1x9x81xbf16> to vector<9x81xbf16>
    %cst_109 = arith.constant dense<0.000000e+00> : vector<9x128xf32>
    %125 = tpu.matmul %124, %9, %cst_109 {dimension_numbers = #tpu.dot_dimension_numbers<[1], [0], [0], [1], [0, 0, 1, 1], [], []>} : vector<9x81xbf16>, vector<81x128xbf16>, vector<9x128xf32> -> vector<9x128xf32>
    %126 = arith.truncf %125 : vector<9x128xf32> to vector<9x128xbf16>
    %c14_110 = arith.constant 14 : index
    %c0_111 = arith.constant 0 : index
    %c0_112 = arith.constant 0 : index
    %127 = vector.load %arg5[%c14_110, %c0_111, %c0_112] : memref<16x128x128xbf16, #tpu.memory_space<vmem>>, vector<1x128x128xbf16>
    %128 = vector.shape_cast %127 : vector<1x128x128xbf16> to vector<128x128xbf16>
    %cst_113 = arith.constant dense<0.000000e+00> : vector<9x128xf32>
    %129 = tpu.matmul %126, %128, %cst_113 {dimension_numbers = #tpu.dot_dimension_numbers<[1], [0], [0], [1], [0, 0, 1, 1], [], []>} : vector<9x128xbf16>, vector<128x128xbf16>, vector<9x128xf32> -> vector<9x128xf32>
    %130 = arith.addf %122, %129 : vector<9x128xf32>
    %c15 = arith.constant 15 : index
    %c0_114 = arith.constant 0 : index
    %c0_115 = arith.constant 0 : index
    %131 = vector.load %arg4[%c15, %c0_114, %c0_115] : memref<16x9x81xbf16, #tpu.memory_space<vmem>>, vector<1x9x81xbf16>
    %132 = vector.shape_cast %131 : vector<1x9x81xbf16> to vector<9x81xbf16>
    %cst_116 = arith.constant dense<0.000000e+00> : vector<9x128xf32>
    %133 = tpu.matmul %132, %9, %cst_116 {dimension_numbers = #tpu.dot_dimension_numbers<[1], [0], [0], [1], [0, 0, 1, 1], [], []>} : vector<9x81xbf16>, vector<81x128xbf16>, vector<9x128xf32> -> vector<9x128xf32>
    %134 = arith.truncf %133 : vector<9x128xf32> to vector<9x128xbf16>
    %c15_117 = arith.constant 15 : index
    %c0_118 = arith.constant 0 : index
    %c0_119 = arith.constant 0 : index
    %135 = vector.load %arg5[%c15_117, %c0_118, %c0_119] : memref<16x128x128xbf16, #tpu.memory_space<vmem>>, vector<1x128x128xbf16>
    %136 = vector.shape_cast %135 : vector<1x128x128xbf16> to vector<128x128xbf16>
    %cst_120 = arith.constant dense<0.000000e+00> : vector<9x128xf32>
    %137 = tpu.matmul %134, %136, %cst_120 {dimension_numbers = #tpu.dot_dimension_numbers<[1], [0], [0], [1], [0, 0, 1, 1], [], []>} : vector<9x128xbf16>, vector<128x128xbf16>, vector<9x128xf32> -> vector<9x128xf32>
    %138 = arith.addf %130, %137 : vector<9x128xf32>
    %c0_121 = arith.constant 0 : index
    %c0_122 = arith.constant 0 : index
    %139 = vector.load %arg6[%c0_121, %c0_122] : memref<1x128xf32, #tpu.memory_space<vmem>>, vector<1x128xf32>
    %140 = vector.broadcast %139 : vector<1x128xf32> to vector<9x128xf32>
    %141 = arith.addf %138, %140 : vector<9x128xf32>
    %cst_123 = arith.constant 0.000000e+00 : f32
    %142 = vector.broadcast %cst_123 : f32 to vector<9x128xf32>
    %143 = arith.maximumf %141, %142 : vector<9x128xf32>
    %cst_124 = arith.constant 0.000000e+00 : f32
    %144 = vector.broadcast %cst_124 : f32 to vector<1x256xf32>
    %145 = vector.extract_strided_slice %143 {offsets = [0, 0], sizes = [1, 128], strides = [1, 1]} : vector<9x128xf32> to vector<1x128xf32>
    %146 = arith.truncf %145 : vector<1x128xf32> to vector<1x128xbf16>
    %c0_125 = arith.constant 0 : index
    %c0_126 = arith.constant 0 : index
    %c0_127 = arith.constant 0 : index
    %147 = vector.load %arg7[%c0_125, %c0_126, %c0_127] : memref<9x128x256xbf16, #tpu.memory_space<vmem>>, vector<1x128x256xbf16>
    %148 = vector.shape_cast %147 : vector<1x128x256xbf16> to vector<128x256xbf16>
    %cst_128 = arith.constant dense<0.000000e+00> : vector<1x256xf32>
    %149 = tpu.matmul %146, %148, %cst_128 {dimension_numbers = #tpu.dot_dimension_numbers<[1], [0], [0], [1], [0, 0, 1, 1], [], []>} : vector<1x128xbf16>, vector<128x256xbf16>, vector<1x256xf32> -> vector<1x256xf32>
    %150 = arith.addf %144, %149 : vector<1x256xf32>
    %151 = vector.extract_strided_slice %143 {offsets = [1, 0], sizes = [1, 128], strides = [1, 1]} : vector<9x128xf32> to vector<1x128xf32>
    %152 = arith.truncf %151 : vector<1x128xf32> to vector<1x128xbf16>
    %c1_129 = arith.constant 1 : index
    %c0_130 = arith.constant 0 : index
    %c0_131 = arith.constant 0 : index
    %153 = vector.load %arg7[%c1_129, %c0_130, %c0_131] : memref<9x128x256xbf16, #tpu.memory_space<vmem>>, vector<1x128x256xbf16>
    %154 = vector.shape_cast %153 : vector<1x128x256xbf16> to vector<128x256xbf16>
    %cst_132 = arith.constant dense<0.000000e+00> : vector<1x256xf32>
    %155 = tpu.matmul %152, %154, %cst_132 {dimension_numbers = #tpu.dot_dimension_numbers<[1], [0], [0], [1], [0, 0, 1, 1], [], []>} : vector<1x128xbf16>, vector<128x256xbf16>, vector<1x256xf32> -> vector<1x256xf32>
    %156 = arith.addf %150, %155 : vector<1x256xf32>
    %157 = vector.extract_strided_slice %143 {offsets = [2, 0], sizes = [1, 128], strides = [1, 1]} : vector<9x128xf32> to vector<1x128xf32>
    %158 = arith.truncf %157 : vector<1x128xf32> to vector<1x128xbf16>
    %c2_133 = arith.constant 2 : index
    %c0_134 = arith.constant 0 : index
    %c0_135 = arith.constant 0 : index
    %159 = vector.load %arg7[%c2_133, %c0_134, %c0_135] : memref<9x128x256xbf16, #tpu.memory_space<vmem>>, vector<1x128x256xbf16>
    %160 = vector.shape_cast %159 : vector<1x128x256xbf16> to vector<128x256xbf16>
    %cst_136 = arith.constant dense<0.000000e+00> : vector<1x256xf32>
    %161 = tpu.matmul %158, %160, %cst_136 {dimension_numbers = #tpu.dot_dimension_numbers<[1], [0], [0], [1], [0, 0, 1, 1], [], []>} : vector<1x128xbf16>, vector<128x256xbf16>, vector<1x256xf32> -> vector<1x256xf32>
    %162 = arith.addf %156, %161 : vector<1x256xf32>
    %163 = vector.extract_strided_slice %143 {offsets = [3, 0], sizes = [1, 128], strides = [1, 1]} : vector<9x128xf32> to vector<1x128xf32>
    %164 = arith.truncf %163 : vector<1x128xf32> to vector<1x128xbf16>
    %c3_137 = arith.constant 3 : index
    %c0_138 = arith.constant 0 : index
    %c0_139 = arith.constant 0 : index
    %165 = vector.load %arg7[%c3_137, %c0_138, %c0_139] : memref<9x128x256xbf16, #tpu.memory_space<vmem>>, vector<1x128x256xbf16>
    %166 = vector.shape_cast %165 : vector<1x128x256xbf16> to vector<128x256xbf16>
    %cst_140 = arith.constant dense<0.000000e+00> : vector<1x256xf32>
    %167 = tpu.matmul %164, %166, %cst_140 {dimension_numbers = #tpu.dot_dimension_numbers<[1], [0], [0], [1], [0, 0, 1, 1], [], []>} : vector<1x128xbf16>, vector<128x256xbf16>, vector<1x256xf32> -> vector<1x256xf32>
    %168 = arith.addf %162, %167 : vector<1x256xf32>
    %169 = vector.extract_strided_slice %143 {offsets = [4, 0], sizes = [1, 128], strides = [1, 1]} : vector<9x128xf32> to vector<1x128xf32>
    %170 = arith.truncf %169 : vector<1x128xf32> to vector<1x128xbf16>
    %c4_141 = arith.constant 4 : index
    %c0_142 = arith.constant 0 : index
    %c0_143 = arith.constant 0 : index
    %171 = vector.load %arg7[%c4_141, %c0_142, %c0_143] : memref<9x128x256xbf16, #tpu.memory_space<vmem>>, vector<1x128x256xbf16>
    %172 = vector.shape_cast %171 : vector<1x128x256xbf16> to vector<128x256xbf16>
    %cst_144 = arith.constant dense<0.000000e+00> : vector<1x256xf32>
    %173 = tpu.matmul %170, %172, %cst_144 {dimension_numbers = #tpu.dot_dimension_numbers<[1], [0], [0], [1], [0, 0, 1, 1], [], []>} : vector<1x128xbf16>, vector<128x256xbf16>, vector<1x256xf32> -> vector<1x256xf32>
    %174 = arith.addf %168, %173 : vector<1x256xf32>
    %175 = vector.extract_strided_slice %143 {offsets = [5, 0], sizes = [1, 128], strides = [1, 1]} : vector<9x128xf32> to vector<1x128xf32>
    %176 = arith.truncf %175 : vector<1x128xf32> to vector<1x128xbf16>
    %c5_145 = arith.constant 5 : index
    %c0_146 = arith.constant 0 : index
    %c0_147 = arith.constant 0 : index
    %177 = vector.load %arg7[%c5_145, %c0_146, %c0_147] : memref<9x128x256xbf16, #tpu.memory_space<vmem>>, vector<1x128x256xbf16>
    %178 = vector.shape_cast %177 : vector<1x128x256xbf16> to vector<128x256xbf16>
    %cst_148 = arith.constant dense<0.000000e+00> : vector<1x256xf32>
    %179 = tpu.matmul %176, %178, %cst_148 {dimension_numbers = #tpu.dot_dimension_numbers<[1], [0], [0], [1], [0, 0, 1, 1], [], []>} : vector<1x128xbf16>, vector<128x256xbf16>, vector<1x256xf32> -> vector<1x256xf32>
    %180 = arith.addf %174, %179 : vector<1x256xf32>
    %181 = vector.extract_strided_slice %143 {offsets = [6, 0], sizes = [1, 128], strides = [1, 1]} : vector<9x128xf32> to vector<1x128xf32>
    %182 = arith.truncf %181 : vector<1x128xf32> to vector<1x128xbf16>
    %c6_149 = arith.constant 6 : index
    %c0_150 = arith.constant 0 : index
    %c0_151 = arith.constant 0 : index
    %183 = vector.load %arg7[%c6_149, %c0_150, %c0_151] : memref<9x128x256xbf16, #tpu.memory_space<vmem>>, vector<1x128x256xbf16>
    %184 = vector.shape_cast %183 : vector<1x128x256xbf16> to vector<128x256xbf16>
    %cst_152 = arith.constant dense<0.000000e+00> : vector<1x256xf32>
    %185 = tpu.matmul %182, %184, %cst_152 {dimension_numbers = #tpu.dot_dimension_numbers<[1], [0], [0], [1], [0, 0, 1, 1], [], []>} : vector<1x128xbf16>, vector<128x256xbf16>, vector<1x256xf32> -> vector<1x256xf32>
    %186 = arith.addf %180, %185 : vector<1x256xf32>
    %187 = vector.extract_strided_slice %143 {offsets = [7, 0], sizes = [1, 128], strides = [1, 1]} : vector<9x128xf32> to vector<1x128xf32>
    %188 = arith.truncf %187 : vector<1x128xf32> to vector<1x128xbf16>
    %c7_153 = arith.constant 7 : index
    %c0_154 = arith.constant 0 : index
    %c0_155 = arith.constant 0 : index
    %189 = vector.load %arg7[%c7_153, %c0_154, %c0_155] : memref<9x128x256xbf16, #tpu.memory_space<vmem>>, vector<1x128x256xbf16>
    %190 = vector.shape_cast %189 : vector<1x128x256xbf16> to vector<128x256xbf16>
    %cst_156 = arith.constant dense<0.000000e+00> : vector<1x256xf32>
    %191 = tpu.matmul %188, %190, %cst_156 {dimension_numbers = #tpu.dot_dimension_numbers<[1], [0], [0], [1], [0, 0, 1, 1], [], []>} : vector<1x128xbf16>, vector<128x256xbf16>, vector<1x256xf32> -> vector<1x256xf32>
    %192 = arith.addf %186, %191 : vector<1x256xf32>
    %193 = vector.extract_strided_slice %143 {offsets = [8, 0], sizes = [1, 128], strides = [1, 1]} : vector<9x128xf32> to vector<1x128xf32>
    %194 = arith.truncf %193 : vector<1x128xf32> to vector<1x128xbf16>
    %c8_157 = arith.constant 8 : index
    %c0_158 = arith.constant 0 : index
    %c0_159 = arith.constant 0 : index
    %195 = vector.load %arg7[%c8_157, %c0_158, %c0_159] : memref<9x128x256xbf16, #tpu.memory_space<vmem>>, vector<1x128x256xbf16>
    %196 = vector.shape_cast %195 : vector<1x128x256xbf16> to vector<128x256xbf16>
    %cst_160 = arith.constant dense<0.000000e+00> : vector<1x256xf32>
    %197 = tpu.matmul %194, %196, %cst_160 {dimension_numbers = #tpu.dot_dimension_numbers<[1], [0], [0], [1], [0, 0, 1, 1], [], []>} : vector<1x128xbf16>, vector<128x256xbf16>, vector<1x256xf32> -> vector<1x256xf32>
    %198 = arith.addf %192, %197 : vector<1x256xf32>
    %c0_161 = arith.constant 0 : index
    %c0_162 = arith.constant 0 : index
    %199 = vector.load %arg8[%c0_161, %c0_162] : memref<1x256xf32, #tpu.memory_space<vmem>>, vector<1x256xf32>
    %200 = arith.addf %198, %199 : vector<1x256xf32>
    %cst_163 = arith.constant 0.000000e+00 : f32
    %201 = vector.broadcast %cst_163 : f32 to vector<1x256xf32>
    %202 = arith.maximumf %200, %201 : vector<1x256xf32>
    %203 = arith.truncf %202 : vector<1x256xf32> to vector<1x256xbf16>
    %c0_164 = arith.constant 0 : index
    %c0_165 = arith.constant 0 : index
    %204 = vector.load %arg9[%c0_164, %c0_165] : memref<256x128xbf16, #tpu.memory_space<vmem>>, vector<256x128xbf16>
    %cst_166 = arith.constant dense<0.000000e+00> : vector<1x128xf32>
    %205 = tpu.matmul %203, %204, %cst_166 {dimension_numbers = #tpu.dot_dimension_numbers<[1], [0], [0], [1], [0, 0, 1, 1], [], []>} : vector<1x256xbf16>, vector<256x128xbf16>, vector<1x128xf32> -> vector<1x128xf32>
    %c0_167 = arith.constant 0 : index
    %c0_168 = arith.constant 0 : index
    %206 = vector.load %arg10[%c0_167, %c0_168] : memref<1x128xf32, #tpu.memory_space<vmem>>, vector<1x128xf32>
    %207 = arith.addf %205, %206 : vector<1x128xf32>
    %208 = vector.shape_cast %207 : vector<1x128xf32> to vector<1x1x128xf32>
    %c0_169 = arith.constant 0 : index
    %c0_170 = arith.constant 0 : index
    %c0_171 = arith.constant 0 : index
    %209 = vector.load %arg11[%c0_169, %c0_170, %c0_171] : memref<1x1x128xf32, #tpu.memory_space<vmem>>, vector<1x1x128xf32>
    tpu.vector_store %arg11[%c0_169, %c0_170, %c0_171], %208 {strides = array<i32>} : memref<1x1x128xf32, #tpu.memory_space<vmem>>, vector<1x1x128xf32>,
    return
  }
  func.func @transform_0(%arg0: i32) -> (i32, i32, i32) {
    %c0_i32 = arith.constant 0 : i32
    %c0_i32_0 = arith.constant 0 : i32
    %c0_i32_1 = arith.constant 0 : i32
    return %arg0, %c0_i32, %c0_i32_0 : i32, i32, i32
  }
  func.func @transform_1(%arg0: i32) -> (i32, i32) {
    %c0_i32 = arith.constant 0 : i32
    %c0_i32_0 = arith.constant 0 : i32
    %c0_i32_1 = arith.constant 0 : i32
    return %c0_i32, %c0_i32_0 : i32, i32
  }
  func.func @transform_2(%arg0: i32) -> (i32, i32) {
    %c0_i32 = arith.constant 0 : i32
    %c0_i32_0 = arith.constant 0 : i32
    %c0_i32_1 = arith.constant 0 : i32
    return %c0_i32, %c0_i32_0 : i32, i32
  }
  func.func @transform_3(%arg0: i32) -> (i32, i32, i32) {
    %c0_i32 = arith.constant 0 : i32
    %c0_i32_0 = arith.constant 0 : i32
    %c0_i32_1 = arith.constant 0 : i32
    %c0_i32_2 = arith.constant 0 : i32
    return %c0_i32, %c0_i32_0, %c0_i32_1 : i32, i32, i32
  }
  func.func @transform_4(%arg0: i32) -> (i32, i32, i32) {
    %c0_i32 = arith.constant 0 : i32
    %c0_i32_0 = arith.constant 0 : i32
    %c0_i32_1 = arith.constant 0 : i32
    %c0_i32_2 = arith.constant 0 : i32
    return %c0_i32, %c0_i32_0, %c0_i32_1 : i32, i32, i32
  }
  func.func @transform_5(%arg0: i32) -> (i32, i32) {
    %c0_i32 = arith.constant 0 : i32
    %c0_i32_0 = arith.constant 0 : i32
    %c0_i32_1 = arith.constant 0 : i32
    return %c0_i32, %c0_i32_0 : i32, i32
  }
  func.func @transform_6(%arg0: i32) -> (i32, i32, i32) {
    %c0_i32 = arith.constant 0 : i32
    %c0_i32_0 = arith.constant 0 : i32
    %c0_i32_1 = arith.constant 0 : i32
    %c0_i32_2 = arith.constant 0 : i32
    return %c0_i32, %c0_i32_0, %c0_i32_1 : i32, i32, i32
  }
  func.func @transform_7(%arg0: i32) -> (i32, i32) {
    %c0_i32 = arith.constant 0 : i32
    %c0_i32_0 = arith.constant 0 : i32
    %c0_i32_1 = arith.constant 0 : i32
    return %c0_i32, %c0_i32_0 : i32, i32
  }
  func.func @transform_8(%arg0: i32) -> (i32, i32) {
    %c0_i32 = arith.constant 0 : i32
    %c0_i32_0 = arith.constant 0 : i32
    %c0_i32_1 = arith.constant 0 : i32
    return %c0_i32, %c0_i32_0 : i32, i32
  }
  func.func @transform_9(%arg0: i32) -> (i32, i32) {
    %c0_i32 = arith.constant 0 : i32
    %c0_i32_0 = arith.constant 0 : i32
    %c0_i32_1 = arith.constant 0 : i32
    return %c0_i32, %c0_i32_0 : i32, i32
  }
  func.func @transform_10(%arg0: i32) -> (i32, i32, i32) {
    %c0_i32 = arith.constant 0 : i32
    %c0_i32_0 = arith.constant 0 : i32
    %c0_i32_1 = arith.constant 0 : i32
    return %arg0, %c0_i32, %c0_i32_0 : i32, i32, i32
  }
}

</mosaic_0001>

<bundles_post_ra>
// kernel: conv_encoder_hep_sl.3
= control target key start
LH: loop header
LB: loop body
LE: loop exit
PB: predicated region body
PF: predicated region fallthrough
CT: control target
= control target key end

     0   :  { %s6464_s12 = smov 0   ;;  %s7411_s0 = inlined_call_operand.vmem [shape: bf16[6096,48], index: 0, kind: input, shape index: {}]   ;;  %s7412_s1 = inlined_call_operand.vmem [shape: bf16[48,128], index: 1, kind: input, shape index: {}]   ;;  %s7413_s2 = inlined_call_operand.vmem [shape: f32[1,128], index: 2, kind: input, shape index: {}]   ;;  %s7414_s3 = inlined_call_operand.vmem [shape: bf16[6096,128], index: 3, kind: output, shape index: {}]  }
   0x1 LB: > { %s4106_s13 = sadd.s32 4294967295, %s6440_s12   ;;  %p4110_p0 = scmp.ge.s32.totalorder %s6440_s12, 1  ;;  %s6440_s12 = sphi %s6464_s12, %s13_s12  }
   0x2   : > { %p138_p1 = scmp.lt.s32.totalorder %s6440_s12, 4 }
   0x4   : > { %p139_p2 = pnand %p4110_p0, %p138_p1 }
   0x5   : > { %v6302_v0 = vld [vmem:[%s7412_s1] sm:$0xff] (!%p139_p2)   ;;  %v6442_v1 = vmov (!%p139_p2), 0.0   ;;  %v6303_v2 = vld [vmem:[%s7412_s1 + $0x8] sm:$0xff] (!%p139_p2)   ;;  %s162_s18 = smul.u32 (!%p139_p2), 254, %s4106_s13  ;;  %vm6443_vm0 = vmmov (!%p139_p2), 0   ;;  %v6304_v3 = vld [vmem:[%s7412_s1 + $0x10] sm:$0xff] (!%p139_p2)  }
   0x6   : > { %142 = sbr.rel (%p139_p2) target bundleno = 743 (0x2e7), region = 32  ;;  %5772 = vmatprep.subr.bf16.mxu0 (!%p139_p2), %v6442_v1  ;;  %6286 = vmatprep.subr.bf16.mxu1 (!%p139_p2), %v6442_v1  ;;  %vm1095_vm1 = vcmask (!%p139_p2), 392192   ;;  %v6716_v58 = vld [vmem:[%s7413_s2] ss:$0 sm:$0xff] (!%p139_p2) }
   0x7   : > { %5773 = vmatpush3.bf16.msra.mxu0 (!%p139_p2), %v6302_v0  ;;  %6289 = vmatpush3.bf16.msra.mxu1 (!%p139_p2), %v6302_v0  ;;  %p163_p3 = scmp.lt.s32.totalorder (!%p139_p2), %s162_s18, 761 }
   0x8   : > { %5774 = vmatprep.subr.bf16.mxu0 (!%p139_p2), %v6442_v1  ;;  %6287 = vmatprep.subr.bf16.mxu1 (!%p139_p2), %v6442_v1 }
   0x9   : > { %5778 = vmatprep.mubr.msk.bf16.mxu0 (!%p139_p2), %vm6443_vm0, %v6442_v1  ;;  %6034 = vmatprep.mubr.msk.bf16.mxu1 (!%p139_p2), %vm6443_vm0, %v6442_v1 }
   0xb   : > { %5775 = vmatpush3.bf16.msra.mxu0 (!%p139_p2), %v6303_v2  ;;  %6290 = vmatpush3.bf16.msra.mxu1 (!%p139_p2), %v6303_v2 }
   0xc   : > { %5776 = vmatprep.subr.bf16.mxu0 (!%p139_p2), %v6442_v1  ;;  %6288 = vmatprep.subr.bf16.mxu1 (!%p139_p2), %v6442_v1 }
   0xd   : > { %s7416_s18 = smov (!%p163_p3, %s162_s18), 761 }
   0xe   : > { %s4111_s21 = sshll.u32 %s7416_s18, 2 }
   0xf   : > { %s6499_s24 = scalar_lea.vmem %s7411_s0, %s4111_s21  ;;  %5777 = vmatpush3.bf16.msra.mxu0 %v6304_v3  ;;  %6291 = vmatpush3.bf16.msra.mxu1 %v6304_v3  ;;  %s6735_s29 = scalar_lea.vmem %s7414_s3, %s4111_s21 }
  0x10   : > { %v6305_v4 = vld [vmem:[%s6499_s24] sm:$0xff]   ;;  %v6307_v6 = vld [vmem:[%s6499_s24 + $0x8] sm:$0xff]   ;;  %v6309_v8 = vld [vmem:[%s6499_s24 + $0x10] sm:$0xff]  }
  0x11   : > { %v6306_v5 = vld [vmem:[%s6499_s24 + $0x200] sm:$0xff]   ;;  %v6308_v7 = vld [vmem:[%s6499_s24 + $0x208] sm:$0xff]   ;;  %v6310_v9 = vld [vmem:[%s6499_s24 + $0x210] sm:$0xff]  }
  0x12   : > { %5779 = vmatmul.mubr.msk.bf16.vlgmr.msra.gmra.mrb[0].mxu0 %vm1095_vm1, %v6305_v4  ;;  %6035 = vmatmul.mubr.msk.bf16.vlgmr.msra.gmra.mrb[0].mxu1 %vm1095_vm1, %v6306_v5  ;;  %v6311_v10 = vld [vmem:[%s6499_s24 + $0x18] sm:$0xff]   ;;  %v6313_v12 = vld [vmem:[%s6499_s24 + $0x20] sm:$0xff]   ;;  %v6315_v14 = vld [vmem:[%s6499_s24 + $0x28] sm:$0xff]  }
  0x13   : > { %5782 = vmatprep.mubr.msk.bf16.mxu0 %vm6443_vm0, %v6442_v1  ;;  %6038 = vmatprep.mubr.msk.bf16.mxu1 %vm6443_vm0, %v6442_v1  ;;  %v6312_v11 = vld [vmem:[%s6499_s24 + $0x218] sm:$0xff]   ;;  %v6314_v13 = vld [vmem:[%s6499_s24 + $0x220] sm:$0xff]   ;;  %v6316_v15 = vld [vmem:[%s6499_s24 + $0x228] sm:$0xff]  }
  0x14   : > { %v6317_v16 = vld [vmem:[%s6499_s24 + $0x30] sm:$0xff]   ;;  %v6319_v18 = vld [vmem:[%s6499_s24 + $0x38] sm:$0xff]   ;;  %v6321_v20 = vld [vmem:[%s6499_s24 + $0x40] sm:$0xff]  }
  0x15   : > { %v6318_v17 = vld [vmem:[%s6499_s24 + $0x230] sm:$0xff]   ;;  %v6320_v19 = vld [vmem:[%s6499_s24 + $0x238] sm:$0xff]   ;;  %v6322_v21 = vld [vmem:[%s6499_s24 + $0x240] sm:$0xff]  }
  0x16   : > { %v6323_v22 = vld [vmem:[%s6499_s24 + $0x48] sm:$0xff]   ;;  %v6325_v24 = vld [vmem:[%s6499_s24 + $0x50] sm:$0xff]   ;;  %v6327_v26 = vld [vmem:[%s6499_s24 + $0x58] sm:$0xff]  }
  0x17   : > { %v6324_v23 = vld [vmem:[%s6499_s24 + $0x248] sm:$0xff]   ;;  %v6326_v25 = vld [vmem:[%s6499_s24 + $0x250] sm:$0xff]   ;;  %v6328_v27 = vld [vmem:[%s6499_s24 + $0x258] sm:$0xff]  }
  0x18   : > { %v6329_v28 = vld [vmem:[%s6499_s24 + $0x60] sm:$0xff]   ;;  %v6331_v30 = vld [vmem:[%s6499_s24 + $0x68] sm:$0xff]   ;;  %v6333_v32 = vld [vmem:[%s6499_s24 + $0x70] sm:$0xff]  }
  0x19   : > { %v6330_v29 = vld [vmem:[%s6499_s24 + $0x260] sm:$0xff]   ;;  %v6332_v31 = vld [vmem:[%s6499_s24 + $0x268] sm:$0xff]   ;;  %v6334_v33 = vld [vmem:[%s6499_s24 + $0x270] sm:$0xff]  }
  0x1a   : > { %5783 = vmatmul.mubr.msk.bf16.gmra.mrb[4].mxu0 %vm1095_vm1, %v6307_v6  ;;  %6039 = vmatmul.mubr.msk.bf16.gmra.mrb[4].mxu1 %vm1095_vm1, %v6308_v7  ;;  %v6335_v34 = vld [vmem:[%s6499_s24 + $0x78] sm:$0xff]   ;;  %v6337_v36 = vld [vmem:[%s6499_s24 + $0x80] sm:$0xff]   ;;  %v6339_v38 = vld [vmem:[%s6499_s24 + $0x88] sm:$0xff]  }
  0x1b   : > { %5786 = vmatprep.mubr.msk.bf16.mxu0 %vm6443_vm0, %v6442_v1  ;;  %6042 = vmatprep.mubr.msk.bf16.mxu1 %vm6443_vm0, %v6442_v1  ;;  %v6336_v35 = vld [vmem:[%s6499_s24 + $0x278] sm:$0xff]   ;;  %v6338_v37 = vld [vmem:[%s6499_s24 + $0x280] sm:$0xff]   ;;  %v6340_v39 = vld [vmem:[%s6499_s24 + $0x288] sm:$0xff]  }
  0x1c   : > { %v6341_v40 = vld [vmem:[%s6499_s24 + $0x90] sm:$0xff]   ;;  %v6343_v42 = vld [vmem:[%s6499_s24 + $0x98] sm:$0xff]   ;;  %v6345_v44 = vld [vmem:[%s6499_s24 + $0xa0] sm:$0xff]  }
  0x1d   : > { %v6342_v41 = vld [vmem:[%s6499_s24 + $0x290] sm:$0xff]   ;;  %v6344_v43 = vld [vmem:[%s6499_s24 + $0x298] sm:$0xff]   ;;  %v6346_v45 = vld [vmem:[%s6499_s24 + $0x2a0] sm:$0xff]  }
  0x1e   : > { %v6347_v46 = vld [vmem:[%s6499_s24 + $0xa8] sm:$0xff]   ;;  %v6349_v48 = vld [vmem:[%s6499_s24 + $0xb0] sm:$0xff]   ;;  %v6351_v50 = vld [vmem:[%s6499_s24 + $0xb8] sm:$0xff]  }
  0x1f   : > { %v6348_v47 = vld [vmem:[%s6499_s24 + $0x2a8] sm:$0xff]   ;;  %v6350_v49 = vld [vmem:[%s6499_s24 + $0x2b0] sm:$0xff]   ;;  %v6352_v51 = vld [vmem:[%s6499_s24 + $0x2b8] sm:$0xff]  }
  0x20   : > { %v6353_v52 = vld [vmem:[%s6499_s24 + $0xc0] sm:$0xff]   ;;  %v6355_v54 = vld [vmem:[%s6499_s24 + $0xc8] sm:$0xff]   ;;  %v6357_v56 = vld [vmem:[%s6499_s24 + $0xd0] sm:$0xff]  }
  0x21   : > { %v6354_v53 = vld [vmem:[%s6499_s24 + $0x2c0] sm:$0xff]   ;;  %v6356_v55 = vld [vmem:[%s6499_s24 + $0x2c8] sm:$0xff]   ;;  %v6358_v57 = vld [vmem:[%s6499_s24 + $0x2d0] sm:$0xff]  }
  0x22   : > { %5787 = vmatmul.mubr.msk.bf16.gmra.mrb[8].mxu0 %vm1095_vm1, %v6309_v8  ;;  %6043 = vmatmul.mubr.msk.bf16.gmra.mrb[8].mxu1 %vm1095_vm1, %v6310_v9  ;;  %v6359_v63 = vld [vmem:[%s6499_s24 + $0xd8] sm:$0xff]  }
  0x23   : > { %5790 = vmatprep.mubr.msk.bf16.mxu0 %vm6443_vm0, %v6442_v1  ;;  %6046 = vmatprep.mubr.msk.bf16.mxu1 %vm6443_vm0, %v6442_v1  ;;  %v6360_v3 = vld [vmem:[%s6499_s24 + $0x2d8] sm:$0xff]  }
  0x2a   : > { %5791 = vmatmul.mubr.msk.bf16.gmra.mrb[12].mxu0 %vm1095_vm1, %v6311_v10  ;;  %6047 = vmatmul.mubr.msk.bf16.gmra.mrb[12].mxu1 %vm1095_vm1, %v6312_v11 }
  0x2b   : > { %5794 = vmatprep.mubr.msk.bf16.mxu0 %vm6443_vm0, %v6442_v1  ;;  %6050 = vmatprep.mubr.msk.bf16.mxu1 %vm6443_vm0, %v6442_v1 }
  0x32   : > { %5795 = vmatmul.mubr.msk.bf16.gmra.mrb[16].mxu0 %vm1095_vm1, %v6313_v12  ;;  %6051 = vmatmul.mubr.msk.bf16.gmra.mrb[16].mxu1 %vm1095_vm1, %v6314_v13 }
  0x33   : > { %5798 = vmatprep.mubr.msk.bf16.mxu0 %vm6443_vm0, %v6442_v1  ;;  %6054 = vmatprep.mubr.msk.bf16.mxu1 %vm6443_vm0, %v6442_v1 }
  0x3a   : > { %5799 = vmatmul.mubr.msk.bf16.gmra.mrb[20].mxu0 %vm1095_vm1, %v6315_v14  ;;  %6055 = vmatmul.mubr.msk.bf16.gmra.mrb[20].mxu1 %vm1095_vm1, %v6316_v15 }
  0x3b   : > { %5802 = vmatprep.mubr.msk.bf16.mxu0 %vm6443_vm0, %v6442_v1  ;;  %6058 = vmatprep.mubr.msk.bf16.mxu1 %vm6443_vm0, %v6442_v1 }
  0x42   : > { %5803 = vmatmul.mubr.msk.bf16.gmra.mrb[24].mxu0 %vm1095_vm1, %v6317_v16  ;;  %6059 = vmatmul.mubr.msk.bf16.gmra.mrb[24].mxu1 %vm1095_vm1, %v6318_v17 }
  0x43   : > { %5806 = vmatprep.mubr.msk.bf16.mxu0 %vm6443_vm0, %v6442_v1  ;;  %6062 = vmatprep.mubr.msk.bf16.mxu1 %vm6443_vm0, %v6442_v1 }
  0x4a   : > { %5807 = vmatmul.mubr.msk.bf16.gmra.mrb[28].mxu0 %vm1095_vm1, %v6319_v18  ;;  %6063 = vmatmul.mubr.msk.bf16.gmra.mrb[28].mxu1 %vm1095_vm1, %v6320_v19 }
  0x4b   : > { %5810 = vmatprep.mubr.msk.bf16.mxu0 %vm6443_vm0, %v6442_v1  ;;  %6066 = vmatprep.mubr.msk.bf16.mxu1 %vm6443_vm0, %v6442_v1 }
  0x52   : > { %5811 = vmatmul.mubr.msk.bf16.gmra.mrb[32].mxu0 %vm1095_vm1, %v6321_v20  ;;  %6067 = vmatmul.mubr.msk.bf16.gmra.mrb[32].mxu1 %vm1095_vm1, %v6322_v21  ;;  %v6361_v20 = vld [vmem:[%s6499_s24 + $0xe0] sm:$0xff]  }
  0x53   : > { %5814 = vmatprep.mubr.msk.bf16.mxu0 %vm6443_vm0, %v6442_v1  ;;  %6070 = vmatprep.mubr.msk.bf16.mxu1 %vm6443_vm0, %v6442_v1 }
  0x5a   : > { %5815 = vmatmul.mubr.msk.bf16.gmra.mrb[36].mxu0 %vm1095_vm1, %v6323_v22  ;;  %6071 = vmatmul.mubr.msk.bf16.gmra.mrb[36].mxu1 %vm1095_vm1, %v6324_v23  ;;  %v6362_v23 = vld [vmem:[%s6499_s24 + $0x2e0] sm:$0xff]  }
  0x5b   : > { %5818 = vmatprep.mubr.msk.bf16.mxu0 %vm6443_vm0, %v6442_v1  ;;  %6074 = vmatprep.mubr.msk.bf16.mxu1 %vm6443_vm0, %v6442_v1 }
  0x62   : > { %5819 = vmatmul.mubr.msk.bf16.gmra.mrb[40].mxu0 %vm1095_vm1, %v6325_v24  ;;  %6075 = vmatmul.mubr.msk.bf16.gmra.mrb[40].mxu1 %vm1095_vm1, %v6326_v25 }
  0x63   : > { %5822 = vmatprep.mubr.msk.bf16.mxu0 %vm6443_vm0, %v6442_v1  ;;  %6078 = vmatprep.mubr.msk.bf16.mxu1 %vm6443_vm0, %v6442_v1 }
  0x6a   : > { %5823 = vmatmul.mubr.msk.bf16.gmra.mrb[44].mxu0 %vm1095_vm1, %v6327_v26  ;;  %6079 = vmatmul.mubr.msk.bf16.gmra.mrb[44].mxu1 %vm1095_vm1, %v6328_v27 }
  0x6b   : > { %5826 = vmatprep.mubr.msk.bf16.mxu0 %vm6443_vm0, %v6442_v1  ;;  %6082 = vmatprep.mubr.msk.bf16.mxu1 %vm6443_vm0, %v6442_v1 }
  0x72   : > { %5827 = vmatmul.mubr.msk.bf16.gmra.mrb[48].mxu0 %vm1095_vm1, %v6329_v28  ;;  %6083 = vmatmul.mubr.msk.bf16.gmra.mrb[48].mxu1 %vm1095_vm1, %v6330_v29 }
  0x73   : > { %5830 = vmatprep.mubr.msk.bf16.mxu0 %vm6443_vm0, %v6442_v1  ;;  %6086 = vmatprep.mubr.msk.bf16.mxu1 %vm6443_vm0, %v6442_v1 }
  0x7a   : > { %5831 = vmatmul.mubr.msk.bf16.gmra.mrb[52].mxu0 %vm1095_vm1, %v6331_v30  ;;  %6087 = vmatmul.mubr.msk.bf16.gmra.mrb[52].mxu1 %vm1095_vm1, %v6332_v31 }
  0x7b   : > { %5834 = vmatprep.mubr.msk.bf16.mxu0 %vm6443_vm0, %v6442_v1  ;;  %6090 = vmatprep.mubr.msk.bf16.mxu1 %vm6443_vm0, %v6442_v1 }
  0x82   : > { %5835 = vmatmul.mubr.msk.bf16.gmra.mrb[56].mxu0 %vm1095_vm1, %v6333_v32  ;;  %6091 = vmatmul.mubr.msk.bf16.gmra.mrb[56].mxu1 %vm1095_vm1, %v6334_v33 }
  0x83   : > { %5838 = vmatprep.mubr.msk.bf16.mxu0 %vm6443_vm0, %v6442_v1  ;;  %6094 = vmatprep.mubr.msk.bf16.mxu1 %vm6443_vm0, %v6442_v1 }
  0x8a   : > { %5839 = vmatmul.mubr.msk.bf16.gmra.mrb[60].mxu0 %vm1095_vm1, %v6335_v34  ;;  %6095 = vmatmul.mubr.msk.bf16.gmra.mrb[60].mxu1 %vm1095_vm1, %v6336_v35 }
  0x8b   : > { %5842 = vmatprep.mubr.msk.bf16.mxu0 %vm6443_vm0, %v6442_v1  ;;  %6098 = vmatprep.mubr.msk.bf16.mxu1 %vm6443_vm0, %v6442_v1 }
  0x92   : > { %5843 = vmatmul.mubr.msk.bf16.gmra.mrb[64].mxu0 %vm1095_vm1, %v6337_v36  ;;  %6099 = vmatmul.mubr.msk.bf16.gmra.mrb[64].mxu1 %vm1095_vm1, %v6338_v37 }
  0x93   : > { %5846 = vmatprep.mubr.msk.bf16.mxu0 %vm6443_vm0, %v6442_v1  ;;  %6102 = vmatprep.mubr.msk.bf16.mxu1 %vm6443_vm0, %v6442_v1 }
  0x9a   : > { %5847 = vmatmul.mubr.msk.bf16.gmra.mrb[68].mxu0 %vm1095_vm1, %v6339_v38  ;;  %6103 = vmatmul.mubr.msk.bf16.gmra.mrb[68].mxu1 %vm1095_vm1, %v6340_v39 }
  0x9b   : > { %5850 = vmatprep.mubr.msk.bf16.mxu0 %vm6443_vm0, %v6442_v1  ;;  %6106 = vmatprep.mubr.msk.bf16.mxu1 %vm6443_vm0, %v6442_v1 }
  0xa2   : > { %5851 = vmatmul.mubr.msk.bf16.gmra.mrb[72].mxu0 %vm1095_vm1, %v6341_v40  ;;  %6107 = vmatmul.mubr.msk.bf16.gmra.mrb[72].mxu1 %vm1095_vm1, %v6342_v41  ;;  %v6363_v40 = vld [vmem:[%s6499_s24 + $0xe8] sm:$0xff]  }
  0xa3   : > { %5854 = vmatprep.mubr.msk.bf16.mxu0 %vm6443_vm0, %v6442_v1  ;;  %6110 = vmatprep.mubr.msk.bf16.mxu1 %vm6443_vm0, %v6442_v1 }
  0xaa   : > { %5855 = vmatmul.mubr.msk.bf16.gmra.mrb[76].mxu0 %vm1095_vm1, %v6343_v42  ;;  %6111 = vmatmul.mubr.msk.bf16.gmra.mrb[76].mxu1 %vm1095_vm1, %v6344_v43  ;;  %v6364_v43 = vld [vmem:[%s6499_s24 + $0x2e8] sm:$0xff]  }
  0xab   : > { %5858 = vmatprep.mubr.msk.bf16.mxu0 %vm6443_vm0, %v6442_v1  ;;  %6114 = vmatprep.mubr.msk.bf16.mxu1 %vm6443_vm0, %v6442_v1 }
  0xb2   : > { %5859 = vmatmul.mubr.msk.bf16.gmra.mrb[80].mxu0 %vm1095_vm1, %v6345_v44  ;;  %6115 = vmatmul.mubr.msk.bf16.gmra.mrb[80].mxu1 %vm1095_vm1, %v6346_v45 }
  0xb3   : > { %5862 = vmatprep.mubr.msk.bf16.mxu0 %vm6443_vm0, %v6442_v1  ;;  %6118 = vmatprep.mubr.msk.bf16.mxu1 %vm6443_vm0, %v6442_v1 }
  0xba   : > { %5863 = vmatmul.mubr.msk.bf16.gmra.mrb[84].mxu0 %vm1095_vm1, %v6347_v46  ;;  %6119 = vmatmul.mubr.msk.bf16.gmra.mrb[84].mxu1 %vm1095_vm1, %v6348_v47 }
  0xbb   : > { %5866 = vmatprep.mubr.msk.bf16.mxu0 %vm6443_vm0, %v6442_v1  ;;  %6122 = vmatprep.mubr.msk.bf16.mxu1 %vm6443_vm0, %v6442_v1 }
  0xc2   : > { %5867 = vmatmul.mubr.msk.bf16.gmra.mrb[88].mxu0 %vm1095_vm1, %v6349_v48  ;;  %6123 = vmatmul.mubr.msk.bf16.gmra.mrb[88].mxu1 %vm1095_vm1, %v6350_v49 }
  0xc3   : > { %5870 = vmatprep.mubr.msk.bf16.mxu0 %vm6443_vm0, %v6442_v1  ;;  %6126 = vmatprep.mubr.msk.bf16.mxu1 %vm6443_vm0, %v6442_v1 }
  0xca   : > { %5871 = vmatmul.mubr.msk.bf16.gmra.mrb[92].mxu0 %vm1095_vm1, %v6351_v50  ;;  %6127 = vmatmul.mubr.msk.bf16.gmra.mrb[92].mxu1 %vm1095_vm1, %v6352_v51 }
  0xcb   : > { %5874 = vmatprep.mubr.msk.bf16.mxu0 %vm6443_vm0, %v6442_v1  ;;  %6130 = vmatprep.mubr.msk.bf16.mxu1 %vm6443_vm0, %v6442_v1 }
  0xd2   : > { %5875 = vmatmul.mubr.msk.bf16.gmra.mrb[96].mxu0 %vm1095_vm1, %v6353_v52  ;;  %6131 = vmatmul.mubr.msk.bf16.gmra.mrb[96].mxu1 %vm1095_vm1, %v6354_v53 }
  0xd3   : > { %5878 = vmatprep.mubr.msk.bf16.mxu0 %vm6443_vm0, %v6442_v1  ;;  %6134 = vmatprep.mubr.msk.bf16.mxu1 %vm6443_vm0, %v6442_v1 }
  0xda   : > { %5879 = vmatmul.mubr.msk.bf16.gmra.mrb[100].mxu0 %vm1095_vm1, %v6355_v54  ;;  %6135 = vmatmul.mubr.msk.bf16.gmra.mrb[100].mxu1 %vm1095_vm1, %v6356_v55 }
  0xdb   : > { %5882 = vmatprep.mubr.msk.bf16.mxu0 %vm6443_vm0, %v6442_v1  ;;  %6138 = vmatprep.mubr.msk.bf16.mxu1 %vm6443_vm0, %v6442_v1 }
  0xe2   : > { %5883 = vmatmul.mubr.msk.bf16.gmra.mrb[104].mxu0 %vm1095_vm1, %v6357_v56  ;;  %6139 = vmatmul.mubr.msk.bf16.gmra.mrb[104].mxu1 %vm1095_vm1, %v6358_v57 }
  0xe3   : > { %5886 = vmatprep.mubr.msk.bf16.mxu0 %vm6443_vm0, %v6442_v1  ;;  %6142 = vmatprep.mubr.msk.bf16.mxu1 %vm6443_vm0, %v6442_v1 }
  0xe5   : > { %v1511_v59 = vpop.f32.mrb[0].mxu0  ;;  %v2023_v60 = vpop.f32.mrb[0].mxu1 }
  0xe6   : > { %v1512_v61 = vadd.f32 %v6716_v58, %v1511_v59  ;;  %v5780_v62 = vpop.f32.mrb[1].mxu0  ;;  %v2024_v0 = vadd.f32 %v6716_v58, %v2023_v60  ;;  %v6036_v2 = vpop.f32.mrb[1].mxu1 }
  0xe7   : > { %v1514_v4 = vpop.f32.mrb[2].mxu0  ;;  %v2026_v5 = vpop.f32.mrb[2].mxu1 }
  0xe8   : > { %v1515_v6 = vadd.f32 %v6716_v58, %v1514_v4  ;;  %v5781_v7 = vpop.f32.mrb[3].mxu0  ;;  %v2654_v8 = vmax.f32 %v2024_v0, 0.0  ;;  %v2027_v9 = vadd.f32 %v6716_v58, %v2026_v5  ;;  %v6037_v10 = vpop.f32.mrb[3].mxu1  ;;  %v2526_v11 = vmax.f32 %v1512_v61, 0.0  ;;  %v6365_v61 = vld [vmem:[%s6499_s24 + $0xf0] sm:$0xff]  }
  0xe9   : > { %v6366_v0 = vld [vmem:[%s6499_s24 + $0x2f0] sm:$0xff]  }
  0xea   : > { %v2527_v12 = vmax.f32 %v1515_v6, 0.0  ;;  %5887 = vmatmul.mubr.msk.bf16.gmra.mrb[108].mxu0 %vm1095_vm1, %v6359_v63  ;;  %v2655_v13 = vmax.f32 %v2027_v9, 0.0  ;;  %6143 = vmatmul.mubr.msk.bf16.gmra.mrb[108].mxu1 %vm1095_vm1, %v6360_v3 }
  0xeb   : > { %5890 = vmatprep.mubr.msk.bf16.mxu0 %vm6443_vm0, %v6442_v1  ;;  %6146 = vmatprep.mubr.msk.bf16.mxu1 %vm6443_vm0, %v6442_v1 }
  0xec   : > { %v4884_v14 = vpack.c.bf16 %v2527_v12, %v2526_v11  ;;  %v5204_v15 = vpack.c.bf16 %v2655_v13, %v2654_v8 }
  0xed   : > { %v1519_v16 = vpop.f32.mrb[4].mxu0  ;;  %v2031_v17 = vpop.f32.mrb[4].mxu1 }
  0xee   : > { %4885 = vst [vmem:[%s6735_s29] sm:$0xff] %v4884_v14   ;;  %5579 = vst [vmem:[%s6735_s29 + $0x200] sm:$0xff] %v5204_v15   ;;  %v1520_v18 = vadd.f32 %v6716_v58, %v1519_v16  ;;  %v5784_v19 = vpop.f32.mrb[5].mxu0  ;;  %v2032_v21 = vadd.f32 %v6716_v58, %v2031_v17  ;;  %v6040_v22 = vpop.f32.mrb[5].mxu1 }
  0xef   : > { %v1522_v24 = vpop.f32.mrb[6].mxu0  ;;  %v2034_v25 = vpop.f32.mrb[6].mxu1 }
  0xf0   : > { %v1523_v26 = vadd.f32 %v6716_v58, %v1522_v24  ;;  %v5785_v27 = vpop.f32.mrb[7].mxu0  ;;  %v2656_v28 = vmax.f32 %v2032_v21, 0.0  ;;  %v2035_v29 = vadd.f32 %v6716_v58, %v2034_v25  ;;  %v6041_v30 = vpop.f32.mrb[7].mxu1  ;;  %v2528_v31 = vmax.f32 %v1520_v18, 0.0  ;;  %v6367_v18 = vld [vmem:[%s6499_s24 + $0xf8] sm:$0xff]  }
  0xf1   : > { %v6368_v21 = vld [vmem:[%s6499_s24 + $0x2f8] sm:$0xff]  }
  0xf2   : > { %v2529_v32 = vmax.f32 %v1523_v26, 0.0  ;;  %5891 = vmatmul.mubr.msk.bf16.gmra.mrb[112].mxu0 %vm1095_vm1, %v6361_v20  ;;  %v2657_v33 = vmax.f32 %v2035_v29, 0.0  ;;  %6147 = vmatmul.mubr.msk.bf16.gmra.mrb[112].mxu1 %vm1095_vm1, %v6362_v23 }
  0xf3   : > { %5894 = vmatprep.mubr.msk.bf16.mxu0 %vm6443_vm0, %v6442_v1  ;;  %6150 = vmatprep.mubr.msk.bf16.mxu1 %vm6443_vm0, %v6442_v1 }
  0xf4   : > { %v4889_v34 = vpack.c.bf16 %v2529_v32, %v2528_v31  ;;  %v5209_v35 = vpack.c.bf16 %v2657_v33, %v2656_v28 }
  0xf5   : > { %v1527_v36 = vpop.f32.mrb[8].mxu0  ;;  %v2039_v37 = vpop.f32.mrb[8].mxu1 }
  0xf6   : > { %5516 = vst [vmem:[%s6735_s29 + $0x8] sm:$0xff] %v4889_v34   ;;  %5580 = vst [vmem:[%s6735_s29 + $0x208] sm:$0xff] %v5209_v35   ;;  %v1528_v38 = vadd.f32 %v6716_v58, %v1527_v36  ;;  %v5788_v39 = vpop.f32.mrb[9].mxu0  ;;  %v2040_v41 = vadd.f32 %v6716_v58, %v2039_v37  ;;  %v6044_v42 = vpop.f32.mrb[9].mxu1 }
  0xf7   : > { %v1530_v44 = vpop.f32.mrb[10].mxu0  ;;  %v2042_v45 = vpop.f32.mrb[10].mxu1 }
  0xf8   : > { %v1531_v46 = vadd.f32 %v6716_v58, %v1530_v44  ;;  %v5789_v47 = vpop.f32.mrb[11].mxu0  ;;  %v2658_v48 = vmax.f32 %v2040_v41, 0.0  ;;  %v2043_v49 = vadd.f32 %v6716_v58, %v2042_v45  ;;  %v6045_v50 = vpop.f32.mrb[11].mxu1  ;;  %v2530_v51 = vmax.f32 %v1528_v38, 0.0  ;;  %v6369_v38 = vld [vmem:[%s6499_s24 + $0x100] sm:$0xff]  }
  0xf9   : > { %v6370_v41 = vld [vmem:[%s6499_s24 + $0x300] sm:$0xff]  }
  0xfa   : > { %v2531_v52 = vmax.f32 %v1531_v46, 0.0  ;;  %5895 = vmatmul.mubr.msk.bf16.gmra.mrb[116].mxu0 %vm1095_vm1, %v6363_v40  ;;  %v2659_v53 = vmax.f32 %v2043_v49, 0.0  ;;  %6151 = vmatmul.mubr.msk.bf16.gmra.mrb[116].mxu1 %vm1095_vm1, %v6364_v43 }
  0xfb   : > { %5898 = vmatprep.mubr.msk.bf16.mxu0 %vm6443_vm0, %v6442_v1  ;;  %6154 = vmatprep.mubr.msk.bf16.mxu1 %vm6443_vm0, %v6442_v1 }
  0xfc   : > { %v4894_v54 = vpack.c.bf16 %v2531_v52, %v2530_v51  ;;  %v5214_v55 = vpack.c.bf16 %v2659_v53, %v2658_v48 }
  0xfd   : > { %v1535_v56 = vpop.f32.mrb[12].mxu0  ;;  %v2047_v57 = vpop.f32.mrb[12].mxu1 }
  0xfe   : > { %5517 = vst [vmem:[%s6735_s29 + $0x10] sm:$0xff] %v4894_v54   ;;  %5581 = vst [vmem:[%s6735_s29 + $0x210] sm:$0xff] %v5214_v55   ;;  %v1536_v59 = vadd.f32 %v6716_v58, %v1535_v56  ;;  %v5792_v60 = vpop.f32.mrb[13].mxu0  ;;  %v2048_v62 = vadd.f32 %v6716_v58, %v2047_v57  ;;  %v6048_v63 = vpop.f32.mrb[13].mxu1 }
  0xff   : > { %v1538_v2 = vpop.f32.mrb[14].mxu0  ;;  %v2050_v3 = vpop.f32.mrb[14].mxu1 }
 0x100   : > { %v1539_v4 = vadd.f32 %v6716_v58, %v1538_v2  ;;  %v5793_v5 = vpop.f32.mrb[15].mxu0  ;;  %v2660_v6 = vmax.f32 %v2048_v62, 0.0  ;;  %v2051_v7 = vadd.f32 %v6716_v58, %v2050_v3  ;;  %v6049_v8 = vpop.f32.mrb[15].mxu1  ;;  %v2532_v9 = vmax.f32 %v1536_v59, 0.0  ;;  %v6371_v59 = vld [vmem:[%s6499_s24 + $0x108] sm:$0xff]  }
 0x101   : > { %v6372_v62 = vld [vmem:[%s6499_s24 + $0x308] sm:$0xff]  }
 0x102   : > { %v2533_v10 = vmax.f32 %v1539_v4, 0.0  ;;  %5899 = vmatmul.mubr.msk.bf16.gmra.mrb[120].mxu0 %vm1095_vm1, %v6365_v61  ;;  %v2661_v11 = vmax.f32 %v2051_v7, 0.0  ;;  %6155 = vmatmul.mubr.msk.bf16.gmra.mrb[120].mxu1 %vm1095_vm1, %v6366_v0 }
 0x103   : > { %5902 = vmatprep.mubr.msk.bf16.mxu0 %vm6443_vm0, %v6442_v1  ;;  %6158 = vmatprep.mubr.msk.bf16.mxu1 %vm6443_vm0, %v6442_v1 }
 0x104   : > { %v4899_v12 = vpack.c.bf16 %v2533_v10, %v2532_v9  ;;  %v5219_v13 = vpack.c.bf16 %v2661_v11, %v2660_v6 }
 0x105   : > { %v1543_v14 = vpop.f32.mrb[16].mxu0  ;;  %v2055_v15 = vpop.f32.mrb[16].mxu1 }
 0x106   : > { %5518 = vst [vmem:[%s6735_s29 + $0x18] sm:$0xff] %v4899_v12   ;;  %5582 = vst [vmem:[%s6735_s29 + $0x218] sm:$0xff] %v5219_v13   ;;  %v1544_v16 = vadd.f32 %v6716_v58, %v1543_v14  ;;  %v5796_v17 = vpop.f32.mrb[17].mxu0  ;;  %v2056_v19 = vadd.f32 %v6716_v58, %v2055_v15  ;;  %v6052_v20 = vpop.f32.mrb[17].mxu1 }
 0x107   : > { %v1546_v22 = vpop.f32.mrb[18].mxu0  ;;  %v2058_v23 = vpop.f32.mrb[18].mxu1 }
 0x108   : > { %v1547_v24 = vadd.f32 %v6716_v58, %v1546_v22  ;;  %v5797_v25 = vpop.f32.mrb[19].mxu0  ;;  %v2662_v26 = vmax.f32 %v2056_v19, 0.0  ;;  %v2059_v27 = vadd.f32 %v6716_v58, %v2058_v23  ;;  %v6053_v28 = vpop.f32.mrb[19].mxu1  ;;  %v2534_v29 = vmax.f32 %v1544_v16, 0.0  ;;  %v6373_v16 = vld [vmem:[%s6499_s24 + $0x110] sm:$0xff]  }
 0x109   : > { %v6374_v19 = vld [vmem:[%s6499_s24 + $0x310] sm:$0xff]  }
 0x10a   : > { %v2535_v30 = vmax.f32 %v1547_v24, 0.0  ;;  %5903 = vmatmul.mubr.msk.bf16.gmra.mrb[124].mxu0 %vm1095_vm1, %v6367_v18  ;;  %v2663_v31 = vmax.f32 %v2059_v27, 0.0  ;;  %6159 = vmatmul.mubr.msk.bf16.gmra.mrb[124].mxu1 %vm1095_vm1, %v6368_v21 }
 0x10b   : > { %5906 = vmatprep.mubr.msk.bf16.mxu0 %vm6443_vm0, %v6442_v1  ;;  %6162 = vmatprep.mubr.msk.bf16.mxu1 %vm6443_vm0, %v6442_v1 }
 0x10c   : > { %v4904_v32 = vpack.c.bf16 %v2535_v30, %v2534_v29  ;;  %v5224_v33 = vpack.c.bf16 %v2663_v31, %v2662_v26 }
 0x10d   : > { %v1551_v34 = vpop.f32.mrb[20].mxu0  ;;  %v2063_v35 = vpop.f32.mrb[20].mxu1 }
 0x10e   : > { %5519 = vst [vmem:[%s6735_s29 + $0x20] sm:$0xff] %v4904_v32   ;;  %5583 = vst [vmem:[%s6735_s29 + $0x220] sm:$0xff] %v5224_v33   ;;  %v1552_v36 = vadd.f32 %v6716_v58, %v1551_v34  ;;  %v5800_v37 = vpop.f32.mrb[21].mxu0  ;;  %v2064_v39 = vadd.f32 %v6716_v58, %v2063_v35  ;;  %v6056_v40 = vpop.f32.mrb[21].mxu1 }
 0x10f   : > { %v1554_v42 = vpop.f32.mrb[22].mxu0  ;;  %v2066_v43 = vpop.f32.mrb[22].mxu1 }
 0x110   : > { %v1555_v44 = vadd.f32 %v6716_v58, %v1554_v42  ;;  %v5801_v45 = vpop.f32.mrb[23].mxu0  ;;  %v2664_v46 = vmax.f32 %v2064_v39, 0.0  ;;  %v2067_v47 = vadd.f32 %v6716_v58, %v2066_v43  ;;  %v6057_v48 = vpop.f32.mrb[23].mxu1  ;;  %v2536_v49 = vmax.f32 %v1552_v36, 0.0  ;;  %v6375_v36 = vld [vmem:[%s6499_s24 + $0x118] sm:$0xff]  }
 0x111   : > { %v6376_v39 = vld [vmem:[%s6499_s24 + $0x318] sm:$0xff]  }
 0x112   : > { %v2537_v50 = vmax.f32 %v1555_v44, 0.0  ;;  %5907 = vmatmul.mubr.msk.bf16.gmra.mrb[128].mxu0 %vm1095_vm1, %v6369_v38  ;;  %v2665_v51 = vmax.f32 %v2067_v47, 0.0  ;;  %6163 = vmatmul.mubr.msk.bf16.gmra.mrb[128].mxu1 %vm1095_vm1, %v6370_v41 }
 0x113   : > { %5910 = vmatprep.mubr.msk.bf16.mxu0 %vm6443_vm0, %v6442_v1  ;;  %6166 = vmatprep.mubr.msk.bf16.mxu1 %vm6443_vm0, %v6442_v1 }
 0x114   : > { %v4909_v52 = vpack.c.bf16 %v2537_v50, %v2536_v49  ;;  %v5229_v53 = vpack.c.bf16 %v2665_v51, %v2664_v46 }
 0x115   : > { %v1559_v54 = vpop.f32.mrb[24].mxu0  ;;  %v2071_v55 = vpop.f32.mrb[24].mxu1 }
 0x116   : > { %5520 = vst [vmem:[%s6735_s29 + $0x28] sm:$0xff] %v4909_v52   ;;  %5584 = vst [vmem:[%s6735_s29 + $0x228] sm:$0xff] %v5229_v53   ;;  %v1560_v56 = vadd.f32 %v6716_v58, %v1559_v54  ;;  %v5804_v57 = vpop.f32.mrb[25].mxu0  ;;  %v2072_v60 = vadd.f32 %v6716_v58, %v2071_v55  ;;  %v6060_v61 = vpop.f32.mrb[25].mxu1 }
 0x117   : > { %v1562_v63 = vpop.f32.mrb[26].mxu0  ;;  %v2074_v0 = vpop.f32.mrb[26].mxu1 }
 0x118   : > { %v1563_v2 = vadd.f32 %v6716_v58, %v1562_v63  ;;  %v5805_v3 = vpop.f32.mrb[27].mxu0  ;;  %v2666_v4 = vmax.f32 %v2072_v60, 0.0  ;;  %v2075_v5 = vadd.f32 %v6716_v58, %v2074_v0  ;;  %v6061_v6 = vpop.f32.mrb[27].mxu1  ;;  %v2538_v7 = vmax.f32 %v1560_v56, 0.0  ;;  %v6377_v56 = vld [vmem:[%s6499_s24 + $0x120] sm:$0xff]  }
 0x119   : > { %v6378_v60 = vld [vmem:[%s6499_s24 + $0x320] sm:$0xff]  }
 0x11a   : > { %v2539_v8 = vmax.f32 %v1563_v2, 0.0  ;;  %5911 = vmatmul.mubr.msk.bf16.gmra.mrb[132].mxu0 %vm1095_vm1, %v6371_v59  ;;  %v2667_v9 = vmax.f32 %v2075_v5, 0.0  ;;  %6167 = vmatmul.mubr.msk.bf16.gmra.mrb[132].mxu1 %vm1095_vm1, %v6372_v62 }
 0x11b   : > { %5914 = vmatprep.mubr.msk.bf16.mxu0 %vm6443_vm0, %v6442_v1  ;;  %6170 = vmatprep.mubr.msk.bf16.mxu1 %vm6443_vm0, %v6442_v1 }
 0x11c   : > { %v4914_v10 = vpack.c.bf16 %v2539_v8, %v2538_v7  ;;  %v5234_v11 = vpack.c.bf16 %v2667_v9, %v2666_v4 }
 0x11d   : > { %v1567_v12 = vpop.f32.mrb[28].mxu0  ;;  %v2079_v13 = vpop.f32.mrb[28].mxu1 }
 0x11e   : > { %5521 = vst [vmem:[%s6735_s29 + $0x30] sm:$0xff] %v4914_v10   ;;  %5585 = vst [vmem:[%s6735_s29 + $0x230] sm:$0xff] %v5234_v11   ;;  %v1568_v14 = vadd.f32 %v6716_v58, %v1567_v12  ;;  %v5808_v15 = vpop.f32.mrb[29].mxu0  ;;  %v2080_v17 = vadd.f32 %v6716_v58, %v2079_v13  ;;  %v6064_v18 = vpop.f32.mrb[29].mxu1 }
 0x11f   : > { %v1570_v20 = vpop.f32.mrb[30].mxu0  ;;  %v2082_v21 = vpop.f32.mrb[30].mxu1 }
 0x120   : > { %v1571_v22 = vadd.f32 %v6716_v58, %v1570_v20  ;;  %v5809_v23 = vpop.f32.mrb[31].mxu0  ;;  %v2668_v24 = vmax.f32 %v2080_v17, 0.0  ;;  %v2083_v25 = vadd.f32 %v6716_v58, %v2082_v21  ;;  %v6065_v26 = vpop.f32.mrb[31].mxu1  ;;  %v2540_v27 = vmax.f32 %v1568_v14, 0.0  ;;  %v6379_v14 = vld [vmem:[%s6499_s24 + $0x128] sm:$0xff]  }
 0x121   : > { %v6380_v17 = vld [vmem:[%s6499_s24 + $0x328] sm:$0xff]  }
 0x122   : > { %v2541_v28 = vmax.f32 %v1571_v22, 0.0  ;;  %5915 = vmatmul.mubr.msk.bf16.gmra.mrb[136].mxu0 %vm1095_vm1, %v6373_v16  ;;  %v2669_v29 = vmax.f32 %v2083_v25, 0.0  ;;  %6171 = vmatmul.mubr.msk.bf16.gmra.mrb[136].mxu1 %vm1095_vm1, %v6374_v19 }
 0x123   : > { %5918 = vmatprep.mubr.msk.bf16.mxu0 %vm6443_vm0, %v6442_v1  ;;  %6174 = vmatprep.mubr.msk.bf16.mxu1 %vm6443_vm0, %v6442_v1 }
 0x124   : > { %v4919_v30 = vpack.c.bf16 %v2541_v28, %v2540_v27  ;;  %v5239_v31 = vpack.c.bf16 %v2669_v29, %v2668_v24 }
 0x125   : > { %v1575_v32 = vpop.f32.mrb[32].mxu0  ;;  %v2087_v33 = vpop.f32.mrb[32].mxu1 }
 0x126   : > { %5522 = vst [vmem:[%s6735_s29 + $0x38] sm:$0xff] %v4919_v30   ;;  %5586 = vst [vmem:[%s6735_s29 + $0x238] sm:$0xff] %v5239_v31   ;;  %v1576_v34 = vadd.f32 %v6716_v58, %v1575_v32  ;;  %v5812_v35 = vpop.f32.mrb[33].mxu0  ;;  %v2088_v37 = vadd.f32 %v6716_v58, %v2087_v33  ;;  %v6068_v38 = vpop.f32.mrb[33].mxu1 }
 0x127   : > { %v1578_v40 = vpop.f32.mrb[34].mxu0  ;;  %v2090_v41 = vpop.f32.mrb[34].mxu1 }
 0x128   : > { %v1579_v42 = vadd.f32 %v6716_v58, %v1578_v40  ;;  %v5813_v43 = vpop.f32.mrb[35].mxu0  ;;  %v2670_v44 = vmax.f32 %v2088_v37, 0.0  ;;  %v2091_v45 = vadd.f32 %v6716_v58, %v2090_v41  ;;  %v6069_v46 = vpop.f32.mrb[35].mxu1  ;;  %v2542_v47 = vmax.f32 %v1576_v34, 0.0  ;;  %v6381_v34 = vld [vmem:[%s6499_s24 + $0x130] sm:$0xff]  }
 0x129   : > { %v6382_v37 = vld [vmem:[%s6499_s24 + $0x330] sm:$0xff]  }
 0x12a   : > { %v2543_v48 = vmax.f32 %v1579_v42, 0.0  ;;  %5919 = vmatmul.mubr.msk.bf16.gmra.mrb[140].mxu0 %vm1095_vm1, %v6375_v36  ;;  %v2671_v49 = vmax.f32 %v2091_v45, 0.0  ;;  %6175 = vmatmul.mubr.msk.bf16.gmra.mrb[140].mxu1 %vm1095_vm1, %v6376_v39 }
 0x12b   : > { %5922 = vmatprep.mubr.msk.bf16.mxu0 %vm6443_vm0, %v6442_v1  ;;  %6178 = vmatprep.mubr.msk.bf16.mxu1 %vm6443_vm0, %v6442_v1 }
 0x12c   : > { %v4924_v50 = vpack.c.bf16 %v2543_v48, %v2542_v47  ;;  %v5244_v51 = vpack.c.bf16 %v2671_v49, %v2670_v44 }
 0x12d   : > { %v1583_v52 = vpop.f32.mrb[36].mxu0  ;;  %v2095_v53 = vpop.f32.mrb[36].mxu1 }
 0x12e   : > { %5523 = vst [vmem:[%s6735_s29 + $0x40] sm:$0xff] %v4924_v50   ;;  %5587 = vst [vmem:[%s6735_s29 + $0x240] sm:$0xff] %v5244_v51   ;;  %v1584_v54 = vadd.f32 %v6716_v58, %v1583_v52  ;;  %v5816_v55 = vpop.f32.mrb[37].mxu0  ;;  %v2096_v57 = vadd.f32 %v6716_v58, %v2095_v53  ;;  %v6072_v59 = vpop.f32.mrb[37].mxu1 }
 0x12f   : > { %v1586_v61 = vpop.f32.mrb[38].mxu0  ;;  %v2098_v62 = vpop.f32.mrb[38].mxu1 }
 0x130   : > { %v1587_v63 = vadd.f32 %v6716_v58, %v1586_v61  ;;  %v5817_v0 = vpop.f32.mrb[39].mxu0  ;;  %v2672_v2 = vmax.f32 %v2096_v57, 0.0  ;;  %v2099_v3 = vadd.f32 %v6716_v58, %v2098_v62  ;;  %v6073_v4 = vpop.f32.mrb[39].mxu1  ;;  %v2544_v5 = vmax.f32 %v1584_v54, 0.0  ;;  %v6383_v54 = vld [vmem:[%s6499_s24 + $0x138] sm:$0xff]  }
 0x131   : > { %v6384_v57 = vld [vmem:[%s6499_s24 + $0x338] sm:$0xff]  }
 0x132   : > { %v2545_v6 = vmax.f32 %v1587_v63, 0.0  ;;  %5923 = vmatmul.mubr.msk.bf16.gmra.mrb[144].mxu0 %vm1095_vm1, %v6377_v56  ;;  %v2673_v7 = vmax.f32 %v2099_v3, 0.0  ;;  %6179 = vmatmul.mubr.msk.bf16.gmra.mrb[144].mxu1 %vm1095_vm1, %v6378_v60 }
 0x133   : > { %5926 = vmatprep.mubr.msk.bf16.mxu0 %vm6443_vm0, %v6442_v1  ;;  %6182 = vmatprep.mubr.msk.bf16.mxu1 %vm6443_vm0, %v6442_v1 }
 0x134   : > { %v4929_v8 = vpack.c.bf16 %v2545_v6, %v2544_v5  ;;  %v5249_v9 = vpack.c.bf16 %v2673_v7, %v2672_v2 }
 0x135   : > { %v1591_v10 = vpop.f32.mrb[40].mxu0  ;;  %v2103_v11 = vpop.f32.mrb[40].mxu1 }
 0x136   : > { %5524 = vst [vmem:[%s6735_s29 + $0x48] sm:$0xff] %v4929_v8   ;;  %5588 = vst [vmem:[%s6735_s29 + $0x248] sm:$0xff] %v5249_v9   ;;  %v1592_v12 = vadd.f32 %v6716_v58, %v1591_v10  ;;  %v5820_v13 = vpop.f32.mrb[41].mxu0  ;;  %v2104_v15 = vadd.f32 %v6716_v58, %v2103_v11  ;;  %v6076_v16 = vpop.f32.mrb[41].mxu1 }
 0x137   : > { %v1594_v18 = vpop.f32.mrb[42].mxu0  ;;  %v2106_v19 = vpop.f32.mrb[42].mxu1 }
 0x138   : > { %v1595_v20 = vadd.f32 %v6716_v58, %v1594_v18  ;;  %v5821_v21 = vpop.f32.mrb[43].mxu0  ;;  %v2674_v22 = vmax.f32 %v2104_v15, 0.0  ;;  %v2107_v23 = vadd.f32 %v6716_v58, %v2106_v19  ;;  %v6077_v24 = vpop.f32.mrb[43].mxu1  ;;  %v2546_v25 = vmax.f32 %v1592_v12, 0.0  ;;  %v6385_v12 = vld [vmem:[%s6499_s24 + $0x140] sm:$0xff]  }
 0x139   : > { %v6386_v15 = vld [vmem:[%s6499_s24 + $0x340] sm:$0xff]  }
 0x13a   : > { %v2547_v26 = vmax.f32 %v1595_v20, 0.0  ;;  %5927 = vmatmul.mubr.msk.bf16.gmra.mrb[148].mxu0 %vm1095_vm1, %v6379_v14  ;;  %v2675_v27 = vmax.f32 %v2107_v23, 0.0  ;;  %6183 = vmatmul.mubr.msk.bf16.gmra.mrb[148].mxu1 %vm1095_vm1, %v6380_v17 }
 0x13b   : > { %5930 = vmatprep.mubr.msk.bf16.mxu0 %vm6443_vm0, %v6442_v1  ;;  %6186 = vmatprep.mubr.msk.bf16.mxu1 %vm6443_vm0, %v6442_v1 }
 0x13c   : > { %v4934_v28 = vpack.c.bf16 %v2547_v26, %v2546_v25  ;;  %v5254_v29 = vpack.c.bf16 %v2675_v27, %v2674_v22 }
 0x13d   : > { %v1599_v30 = vpop.f32.mrb[44].mxu0  ;;  %v2111_v31 = vpop.f32.mrb[44].mxu1 }
 0x13e   : > { %5525 = vst [vmem:[%s6735_s29 + $0x50] sm:$0xff] %v4934_v28   ;;  %5589 = vst [vmem:[%s6735_s29 + $0x250] sm:$0xff] %v5254_v29   ;;  %v1600_v32 = vadd.f32 %v6716_v58, %v1599_v30  ;;  %v5824_v33 = vpop.f32.mrb[45].mxu0  ;;  %v2112_v35 = vadd.f32 %v6716_v58, %v2111_v31  ;;  %v6080_v36 = vpop.f32.mrb[45].mxu1 }
 0x13f   : > { %v1602_v38 = vpop.f32.mrb[46].mxu0  ;;  %v2114_v39 = vpop.f32.mrb[46].mxu1 }
 0x140   : > { %v1603_v40 = vadd.f32 %v6716_v58, %v1602_v38  ;;  %v5825_v41 = vpop.f32.mrb[47].mxu0  ;;  %v2676_v42 = vmax.f32 %v2112_v35, 0.0  ;;  %v2115_v43 = vadd.f32 %v6716_v58, %v2114_v39  ;;  %v6081_v44 = vpop.f32.mrb[47].mxu1  ;;  %v2548_v45 = vmax.f32 %v1600_v32, 0.0  ;;  %v6387_v32 = vld [vmem:[%s6499_s24 + $0x148] sm:$0xff]  }
 0x141   : > { %v6388_v35 = vld [vmem:[%s6499_s24 + $0x348] sm:$0xff]  }
 0x142   : > { %v2549_v46 = vmax.f32 %v1603_v40, 0.0  ;;  %5931 = vmatmul.mubr.msk.bf16.gmra.mrb[152].mxu0 %vm1095_vm1, %v6381_v34  ;;  %v2677_v47 = vmax.f32 %v2115_v43, 0.0  ;;  %6187 = vmatmul.mubr.msk.bf16.gmra.mrb[152].mxu1 %vm1095_vm1, %v6382_v37 }
 0x143   : > { %5934 = vmatprep.mubr.msk.bf16.mxu0 %vm6443_vm0, %v6442_v1  ;;  %6190 = vmatprep.mubr.msk.bf16.mxu1 %vm6443_vm0, %v6442_v1 }
 0x144   : > { %v4939_v48 = vpack.c.bf16 %v2549_v46, %v2548_v45  ;;  %v5259_v49 = vpack.c.bf16 %v2677_v47, %v2676_v42 }
 0x145   : > { %v1607_v50 = vpop.f32.mrb[48].mxu0  ;;  %v2119_v51 = vpop.f32.mrb[48].mxu1 }
 0x146   : > { %5526 = vst [vmem:[%s6735_s29 + $0x58] sm:$0xff] %v4939_v48   ;;  %5590 = vst [vmem:[%s6735_s29 + $0x258] sm:$0xff] %v5259_v49   ;;  %v1608_v52 = vadd.f32 %v6716_v58, %v1607_v50  ;;  %v5828_v53 = vpop.f32.mrb[49].mxu0  ;;  %v2120_v55 = vadd.f32 %v6716_v58, %v2119_v51  ;;  %v6084_v56 = vpop.f32.mrb[49].mxu1 }
 0x147   : > { %v1610_v59 = vpop.f32.mrb[50].mxu0  ;;  %v2122_v60 = vpop.f32.mrb[50].mxu1 }
 0x148   : > { %v1611_v61 = vadd.f32 %v6716_v58, %v1610_v59  ;;  %v5829_v62 = vpop.f32.mrb[51].mxu0  ;;  %v2678_v63 = vmax.f32 %v2120_v55, 0.0  ;;  %v2123_v0 = vadd.f32 %v6716_v58, %v2122_v60  ;;  %v6085_v2 = vpop.f32.mrb[51].mxu1  ;;  %v2550_v3 = vmax.f32 %v1608_v52, 0.0  ;;  %v6389_v52 = vld [vmem:[%s6499_s24 + $0x150] sm:$0xff]  }
 0x149   : > { %v6390_v55 = vld [vmem:[%s6499_s24 + $0x350] sm:$0xff]  }
 0x14a   : > { %v2551_v4 = vmax.f32 %v1611_v61, 0.0  ;;  %5935 = vmatmul.mubr.msk.bf16.gmra.mrb[156].mxu0 %vm1095_vm1, %v6383_v54  ;;  %v2679_v5 = vmax.f32 %v2123_v0, 0.0  ;;  %6191 = vmatmul.mubr.msk.bf16.gmra.mrb[156].mxu1 %vm1095_vm1, %v6384_v57 }
 0x14b   : > { %5938 = vmatprep.mubr.msk.bf16.mxu0 %vm6443_vm0, %v6442_v1  ;;  %6194 = vmatprep.mubr.msk.bf16.mxu1 %vm6443_vm0, %v6442_v1 }
 0x14c   : > { %v4944_v6 = vpack.c.bf16 %v2551_v4, %v2550_v3  ;;  %v5264_v7 = vpack.c.bf16 %v2679_v5, %v2678_v63 }
 0x14d   : > { %v1615_v8 = vpop.f32.mrb[52].mxu0  ;;  %v2127_v9 = vpop.f32.mrb[52].mxu1 }
 0x14e   : > { %5527 = vst [vmem:[%s6735_s29 + $0x60] sm:$0xff] %v4944_v6   ;;  %5591 = vst [vmem:[%s6735_s29 + $0x260] sm:$0xff] %v5264_v7   ;;  %v1616_v10 = vadd.f32 %v6716_v58, %v1615_v8  ;;  %v5832_v11 = vpop.f32.mrb[53].mxu0  ;;  %v2128_v13 = vadd.f32 %v6716_v58, %v2127_v9  ;;  %v6088_v14 = vpop.f32.mrb[53].mxu1 }
 0x14f   : > { %v1618_v16 = vpop.f32.mrb[54].mxu0  ;;  %v2130_v17 = vpop.f32.mrb[54].mxu1 }
 0x150   : > { %v1619_v18 = vadd.f32 %v6716_v58, %v1618_v16  ;;  %v5833_v19 = vpop.f32.mrb[55].mxu0  ;;  %v2680_v20 = vmax.f32 %v2128_v13, 0.0  ;;  %v2131_v21 = vadd.f32 %v6716_v58, %v2130_v17  ;;  %v6089_v22 = vpop.f32.mrb[55].mxu1  ;;  %v2552_v23 = vmax.f32 %v1616_v10, 0.0  ;;  %v6391_v10 = vld [vmem:[%s6499_s24 + $0x158] sm:$0xff]  }
 0x151   : > { %v6392_v13 = vld [vmem:[%s6499_s24 + $0x358] sm:$0xff]  }
 0x152   : > { %v2553_v24 = vmax.f32 %v1619_v18, 0.0  ;;  %5939 = vmatmul.mubr.msk.bf16.gmra.mrb[160].mxu0 %vm1095_vm1, %v6385_v12  ;;  %v2681_v25 = vmax.f32 %v2131_v21, 0.0  ;;  %6195 = vmatmul.mubr.msk.bf16.gmra.mrb[160].mxu1 %vm1095_vm1, %v6386_v15 }
 0x153   : > { %5942 = vmatprep.mubr.msk.bf16.mxu0 %vm6443_vm0, %v6442_v1  ;;  %6198 = vmatprep.mubr.msk.bf16.mxu1 %vm6443_vm0, %v6442_v1 }
 0x154   : > { %v4949_v26 = vpack.c.bf16 %v2553_v24, %v2552_v23  ;;  %v5269_v27 = vpack.c.bf16 %v2681_v25, %v2680_v20 }
 0x155   : > { %v1623_v28 = vpop.f32.mrb[56].mxu0  ;;  %v2135_v29 = vpop.f32.mrb[56].mxu1 }
 0x156   : > { %5528 = vst [vmem:[%s6735_s29 + $0x68] sm:$0xff] %v4949_v26   ;;  %5592 = vst [vmem:[%s6735_s29 + $0x268] sm:$0xff] %v5269_v27   ;;  %v1624_v30 = vadd.f32 %v6716_v58, %v1623_v28  ;;  %v5836_v31 = vpop.f32.mrb[57].mxu0  ;;  %v2136_v33 = vadd.f32 %v6716_v58, %v2135_v29  ;;  %v6092_v34 = vpop.f32.mrb[57].mxu1 }
 0x157   : > { %v1626_v36 = vpop.f32.mrb[58].mxu0  ;;  %v2138_v37 = vpop.f32.mrb[58].mxu1 }
 0x158   : > { %v1627_v38 = vadd.f32 %v6716_v58, %v1626_v36  ;;  %v5837_v39 = vpop.f32.mrb[59].mxu0  ;;  %v2682_v40 = vmax.f32 %v2136_v33, 0.0  ;;  %v2139_v41 = vadd.f32 %v6716_v58, %v2138_v37  ;;  %v6093_v42 = vpop.f32.mrb[59].mxu1  ;;  %v2554_v43 = vmax.f32 %v1624_v30, 0.0  ;;  %v6393_v30 = vld [vmem:[%s6499_s24 + $0x160] sm:$0xff]  }
 0x159   : > { %v6394_v33 = vld [vmem:[%s6499_s24 + $0x360] sm:$0xff]  }
 0x15a   : > { %v2555_v44 = vmax.f32 %v1627_v38, 0.0  ;;  %5943 = vmatmul.mubr.msk.bf16.gmra.mrb[164].mxu0 %vm1095_vm1, %v6387_v32  ;;  %v2683_v45 = vmax.f32 %v2139_v41, 0.0  ;;  %6199 = vmatmul.mubr.msk.bf16.gmra.mrb[164].mxu1 %vm1095_vm1, %v6388_v35 }
 0x15b   : > { %5946 = vmatprep.mubr.msk.bf16.mxu0 %vm6443_vm0, %v6442_v1  ;;  %6202 = vmatprep.mubr.msk.bf16.mxu1 %vm6443_vm0, %v6442_v1 }
 0x15c   : > { %v4954_v46 = vpack.c.bf16 %v2555_v44, %v2554_v43  ;;  %v5274_v47 = vpack.c.bf16 %v2683_v45, %v2682_v40 }
 0x15d   : > { %v1631_v48 = vpop.f32.mrb[60].mxu0  ;;  %v2143_v49 = vpop.f32.mrb[60].mxu1 }
 0x15e   : > { %5529 = vst [vmem:[%s6735_s29 + $0x70] sm:$0xff] %v4954_v46   ;;  %5593 = vst [vmem:[%s6735_s29 + $0x270] sm:$0xff] %v5274_v47   ;;  %v1632_v50 = vadd.f32 %v6716_v58, %v1631_v48  ;;  %v5840_v51 = vpop.f32.mrb[61].mxu0  ;;  %v2144_v53 = vadd.f32 %v6716_v58, %v2143_v49  ;;  %v6096_v54 = vpop.f32.mrb[61].mxu1 }
 0x15f   : > { %v1634_v56 = vpop.f32.mrb[62].mxu0  ;;  %v2146_v57 = vpop.f32.mrb[62].mxu1 }
 0x160   : > { %v1635_v59 = vadd.f32 %v6716_v58, %v1634_v56  ;;  %v5841_v60 = vpop.f32.mrb[63].mxu0  ;;  %v2684_v61 = vmax.f32 %v2144_v53, 0.0  ;;  %v2147_v62 = vadd.f32 %v6716_v58, %v2146_v57  ;;  %v6097_v63 = vpop.f32.mrb[63].mxu1  ;;  %v2556_v0 = vmax.f32 %v1632_v50, 0.0  ;;  %v6395_v50 = vld [vmem:[%s6499_s24 + $0x168] sm:$0xff]  }
 0x161   : > { %v6396_v53 = vld [vmem:[%s6499_s24 + $0x368] sm:$0xff]  }
 0x162   : > { %v2557_v2 = vmax.f32 %v1635_v59, 0.0  ;;  %5947 = vmatmul.mubr.msk.bf16.gmra.mrb[168].mxu0 %vm1095_vm1, %v6389_v52  ;;  %v2685_v3 = vmax.f32 %v2147_v62, 0.0  ;;  %6203 = vmatmul.mubr.msk.bf16.gmra.mrb[168].mxu1 %vm1095_vm1, %v6390_v55 }
 0x163   : > { %5950 = vmatprep.mubr.msk.bf16.mxu0 %vm6443_vm0, %v6442_v1  ;;  %6206 = vmatprep.mubr.msk.bf16.mxu1 %vm6443_vm0, %v6442_v1 }
 0x164   : > { %v4959_v4 = vpack.c.bf16 %v2557_v2, %v2556_v0  ;;  %v5279_v5 = vpack.c.bf16 %v2685_v3, %v2684_v61 }
 0x165   : > { %v1639_v6 = vpop.f32.mrb[64].mxu0  ;;  %v2151_v7 = vpop.f32.mrb[64].mxu1 }
 0x166   : > { %5530 = vst [vmem:[%s6735_s29 + $0x78] sm:$0xff] %v4959_v4   ;;  %5594 = vst [vmem:[%s6735_s29 + $0x278] sm:$0xff] %v5279_v5   ;;  %v1640_v8 = vadd.f32 %v6716_v58, %v1639_v6  ;;  %v5844_v9 = vpop.f32.mrb[65].mxu0  ;;  %v2152_v11 = vadd.f32 %v6716_v58, %v2151_v7  ;;  %v6100_v12 = vpop.f32.mrb[65].mxu1 }
 0x167   : > { %v1642_v14 = vpop.f32.mrb[66].mxu0  ;;  %v2154_v15 = vpop.f32.mrb[66].mxu1 }
 0x168   : > { %v1643_v16 = vadd.f32 %v6716_v58, %v1642_v14  ;;  %v5845_v17 = vpop.f32.mrb[67].mxu0  ;;  %v2686_v18 = vmax.f32 %v2152_v11, 0.0  ;;  %v2155_v19 = vadd.f32 %v6716_v58, %v2154_v15  ;;  %v6101_v20 = vpop.f32.mrb[67].mxu1  ;;  %v2558_v21 = vmax.f32 %v1640_v8, 0.0  ;;  %v6397_v8 = vld [vmem:[%s6499_s24 + $0x170] sm:$0xff]  }
 0x169   : > { %v6398_v11 = vld [vmem:[%s6499_s24 + $0x370] sm:$0xff]  }
 0x16a   : > { %v2559_v22 = vmax.f32 %v1643_v16, 0.0  ;;  %5951 = vmatmul.mubr.msk.bf16.gmra.mrb[172].mxu0 %vm1095_vm1, %v6391_v10  ;;  %v2687_v23 = vmax.f32 %v2155_v19, 0.0  ;;  %6207 = vmatmul.mubr.msk.bf16.gmra.mrb[172].mxu1 %vm1095_vm1, %v6392_v13 }
 0x16b   : > { %5954 = vmatprep.mubr.msk.bf16.mxu0 %vm6443_vm0, %v6442_v1  ;;  %6210 = vmatprep.mubr.msk.bf16.mxu1 %vm6443_vm0, %v6442_v1 }
 0x16c   : > { %v4964_v24 = vpack.c.bf16 %v2559_v22, %v2558_v21  ;;  %v5284_v25 = vpack.c.bf16 %v2687_v23, %v2686_v18 }
 0x16d   : > { %v1647_v26 = vpop.f32.mrb[68].mxu0  ;;  %v2159_v27 = vpop.f32.mrb[68].mxu1 }
 0x16e   : > { %5531 = vst [vmem:[%s6735_s29 + $0x80] sm:$0xff] %v4964_v24   ;;  %5595 = vst [vmem:[%s6735_s29 + $0x280] sm:$0xff] %v5284_v25   ;;  %v1648_v28 = vadd.f32 %v6716_v58, %v1647_v26  ;;  %v5848_v29 = vpop.f32.mrb[69].mxu0  ;;  %v2160_v31 = vadd.f32 %v6716_v58, %v2159_v27  ;;  %v6104_v32 = vpop.f32.mrb[69].mxu1  ;;  %v7012_v25 = vld [vmem:[%s7413_s2] ss:$0 sm:$0xff] }
 0x16f   : > { %v1650_v34 = vpop.f32.mrb[70].mxu0  ;;  %v2162_v35 = vpop.f32.mrb[70].mxu1 }
 0x170   : > { %v1651_v36 = vadd.f32 %v6716_v58, %v1650_v34  ;;  %v5849_v37 = vpop.f32.mrb[71].mxu0  ;;  %v2688_v38 = vmax.f32 %v2160_v31, 0.0  ;;  %v2163_v39 = vadd.f32 %v6716_v58, %v2162_v35  ;;  %v6105_v40 = vpop.f32.mrb[71].mxu1  ;;  %v2560_v41 = vmax.f32 %v1648_v28, 0.0  ;;  %v6399_v28 = vld [vmem:[%s6499_s24 + $0x178] sm:$0xff]  }
 0x171   : > { %v6400_v31 = vld [vmem:[%s6499_s24 + $0x378] sm:$0xff]  }
 0x172   : > { %v2561_v42 = vmax.f32 %v1651_v36, 0.0  ;;  %5955 = vmatmul.mubr.msk.bf16.gmra.mrb[176].mxu0 %vm1095_vm1, %v6393_v30  ;;  %v2689_v43 = vmax.f32 %v2163_v39, 0.0  ;;  %6211 = vmatmul.mubr.msk.bf16.gmra.mrb[176].mxu1 %vm1095_vm1, %v6394_v33 }
 0x173   : > { %5958 = vmatprep.mubr.msk.bf16.mxu0 %vm6443_vm0, %v6442_v1  ;;  %6214 = vmatprep.mubr.msk.bf16.mxu1 %vm6443_vm0, %v6442_v1 }
 0x174   : > { %v4969_v44 = vpack.c.bf16 %v2561_v42, %v2560_v41  ;;  %v5289_v45 = vpack.c.bf16 %v2689_v43, %v2688_v38 }
 0x175   : > { %v1655_v46 = vpop.f32.mrb[72].mxu0  ;;  %v2167_v47 = vpop.f32.mrb[72].mxu1 }
 0x176   : > { %5532 = vst [vmem:[%s6735_s29 + $0x88] sm:$0xff] %v4969_v44   ;;  %5596 = vst [vmem:[%s6735_s29 + $0x288] sm:$0xff] %v5289_v45   ;;  %v1656_v48 = vadd.f32 %v6716_v58, %v1655_v46  ;;  %v5852_v49 = vpop.f32.mrb[73].mxu0  ;;  %v2168_v51 = vadd.f32 %v6716_v58, %v2167_v47  ;;  %v6108_v52 = vpop.f32.mrb[73].mxu1 }
 0x177   : > { %v1658_v54 = vpop.f32.mrb[74].mxu0  ;;  %v2170_v55 = vpop.f32.mrb[74].mxu1 }
 0x178   : > { %v1659_v56 = vadd.f32 %v6716_v58, %v1658_v54  ;;  %v5853_v57 = vpop.f32.mrb[75].mxu0  ;;  %v2690_v59 = vmax.f32 %v2168_v51, 0.0  ;;  %v2171_v60 = vadd.f32 %v6716_v58, %v2170_v55  ;;  %v6109_v61 = vpop.f32.mrb[75].mxu1  ;;  %v2562_v62 = vmax.f32 %v1656_v48, 0.0  ;;  %v6401_v48 = vld [vmem:[%s6499_s24 + $0x180] sm:$0xff]  }
 0x179   : > { %v6402_v51 = vld [vmem:[%s6499_s24 + $0x380] sm:$0xff]  }
 0x17a   : > { %v2563_v63 = vmax.f32 %v1659_v56, 0.0  ;;  %5959 = vmatmul.mubr.msk.bf16.gmra.mrb[180].mxu0 %vm1095_vm1, %v6395_v50  ;;  %v2691_v0 = vmax.f32 %v2171_v60, 0.0  ;;  %6215 = vmatmul.mubr.msk.bf16.gmra.mrb[180].mxu1 %vm1095_vm1, %v6396_v53 }
 0x17b   : > { %5962 = vmatprep.mubr.msk.bf16.mxu0 %vm6443_vm0, %v6442_v1  ;;  %6218 = vmatprep.mubr.msk.bf16.mxu1 %vm6443_vm0, %v6442_v1 }
 0x17c   : > { %v4974_v2 = vpack.c.bf16 %v2563_v63, %v2562_v62  ;;  %v5294_v3 = vpack.c.bf16 %v2691_v0, %v2690_v59 }
 0x17d   : > { %v1663_v4 = vpop.f32.mrb[76].mxu0  ;;  %v2175_v5 = vpop.f32.mrb[76].mxu1 }
 0x17e   : > { %5533 = vst [vmem:[%s6735_s29 + $0x90] sm:$0xff] %v4974_v2   ;;  %5597 = vst [vmem:[%s6735_s29 + $0x290] sm:$0xff] %v5294_v3   ;;  %v1664_v6 = vadd.f32 %v6716_v58, %v1663_v4  ;;  %v5856_v7 = vpop.f32.mrb[77].mxu0  ;;  %v2176_v9 = vadd.f32 %v6716_v58, %v2175_v5  ;;  %v6112_v10 = vpop.f32.mrb[77].mxu1 }
 0x17f   : > { %v1666_v12 = vpop.f32.mrb[78].mxu0  ;;  %v2178_v13 = vpop.f32.mrb[78].mxu1 }
 0x180   : > { %v1667_v14 = vadd.f32 %v6716_v58, %v1666_v12  ;;  %v5857_v15 = vpop.f32.mrb[79].mxu0  ;;  %v2692_v16 = vmax.f32 %v2176_v9, 0.0  ;;  %v2179_v17 = vadd.f32 %v6716_v58, %v2178_v13  ;;  %v6113_v18 = vpop.f32.mrb[79].mxu1  ;;  %v2564_v19 = vmax.f32 %v1664_v6, 0.0  ;;  %v6403_v6 = vld [vmem:[%s6499_s24 + $0x188] sm:$0xff]  }
 0x181   : > { %v6404_v9 = vld [vmem:[%s6499_s24 + $0x388] sm:$0xff]  }
 0x182   : > { %v2565_v20 = vmax.f32 %v1667_v14, 0.0  ;;  %5963 = vmatmul.mubr.msk.bf16.gmra.mrb[184].mxu0 %vm1095_vm1, %v6397_v8  ;;  %v2693_v21 = vmax.f32 %v2179_v17, 0.0  ;;  %6219 = vmatmul.mubr.msk.bf16.gmra.mrb[184].mxu1 %vm1095_vm1, %v6398_v11 }
 0x183   : > { %5966 = vmatprep.mubr.msk.bf16.mxu0 %vm6443_vm0, %v6442_v1  ;;  %6222 = vmatprep.mubr.msk.bf16.mxu1 %vm6443_vm0, %v6442_v1 }
 0x184   : > { %v4979_v22 = vpack.c.bf16 %v2565_v20, %v2564_v19  ;;  %v5299_v23 = vpack.c.bf16 %v2693_v21, %v2692_v16 }
 0x185   : > { %v1671_v24 = vpop.f32.mrb[80].mxu0  ;;  %v2183_v58 = vpop.f32.mrb[80].mxu1 }
 0x186   : > { %5534 = vst [vmem:[%s6735_s29 + $0x98] sm:$0xff] %v4979_v22   ;;  %5598 = vst [vmem:[%s6735_s29 + $0x298] sm:$0xff] %v5299_v23   ;;  %v1672_v26 = vadd.f32 %v7012_v25, %v1671_v24  ;;  %v5860_v27 = vpop.f32.mrb[81].mxu0  ;;  %v2184_v29 = vadd.f32 %v7012_v25, %v2183_v58  ;;  %v6116_v30 = vpop.f32.mrb[81].mxu1 }
 0x187   : > { %v1674_v32 = vpop.f32.mrb[82].mxu0  ;;  %v2186_v33 = vpop.f32.mrb[82].mxu1 }
 0x188   : > { %v1675_v34 = vadd.f32 %v7012_v25, %v1674_v32  ;;  %v5861_v35 = vpop.f32.mrb[83].mxu0  ;;  %v2694_v36 = vmax.f32 %v2184_v29, 0.0  ;;  %v2187_v37 = vadd.f32 %v7012_v25, %v2186_v33  ;;  %v6117_v38 = vpop.f32.mrb[83].mxu1  ;;  %v2566_v39 = vmax.f32 %v1672_v26, 0.0  ;;  %v6405_v26 = vld [vmem:[%s6499_s24 + $0x190] sm:$0xff]  }
 0x189   : > { %v6406_v29 = vld [vmem:[%s6499_s24 + $0x390] sm:$0xff]  }
 0x18a   : > { %v2567_v40 = vmax.f32 %v1675_v34, 0.0  ;;  %5967 = vmatmul.mubr.msk.bf16.gmra.mrb[188].mxu0 %vm1095_vm1, %v6399_v28  ;;  %v2695_v41 = vmax.f32 %v2187_v37, 0.0  ;;  %6223 = vmatmul.mubr.msk.bf16.gmra.mrb[188].mxu1 %vm1095_vm1, %v6400_v31 }
 0x18b   : > { %5970 = vmatprep.mubr.msk.bf16.mxu0 %vm6443_vm0, %v6442_v1  ;;  %6226 = vmatprep.mubr.msk.bf16.mxu1 %vm6443_vm0, %v6442_v1 }
 0x18c   : > { %v4984_v42 = vpack.c.bf16 %v2567_v40, %v2566_v39  ;;  %v5304_v43 = vpack.c.bf16 %v2695_v41, %v2694_v36 }
 0x18d   : > { %v1679_v44 = vpop.f32.mrb[84].mxu0  ;;  %v2191_v45 = vpop.f32.mrb[84].mxu1 }
 0x18e   : > { %5535 = vst [vmem:[%s6735_s29 + $0xa0] sm:$0xff] %v4984_v42   ;;  %5599 = vst [vmem:[%s6735_s29 + $0x2a0] sm:$0xff] %v5304_v43   ;;  %v1680_v46 = vadd.f32 %v7012_v25, %v1679_v44  ;;  %v5864_v47 = vpop.f32.mrb[85].mxu0  ;;  %v2192_v49 = vadd.f32 %v7012_v25, %v2191_v45  ;;  %v6120_v50 = vpop.f32.mrb[85].mxu1 }
 0x18f   : > { %v1682_v52 = vpop.f32.mrb[86].mxu0  ;;  %v2194_v53 = vpop.f32.mrb[86].mxu1 }
 0x190   : > { %v1683_v54 = vadd.f32 %v7012_v25, %v1682_v52  ;;  %v5865_v55 = vpop.f32.mrb[87].mxu0  ;;  %v2696_v56 = vmax.f32 %v2192_v49, 0.0  ;;  %v2195_v57 = vadd.f32 %v7012_v25, %v2194_v53  ;;  %v6121_v59 = vpop.f32.mrb[87].mxu1  ;;  %v2568_v60 = vmax.f32 %v1680_v46, 0.0  ;;  %v6407_v46 = vld [vmem:[%s6499_s24 + $0x198] sm:$0xff]  }
 0x191   : > { %v6408_v49 = vld [vmem:[%s6499_s24 + $0x398] sm:$0xff]  }
 0x192   : > { %v2569_v61 = vmax.f32 %v1683_v54, 0.0  ;;  %5971 = vmatmul.mubr.msk.bf16.gmra.mrb[192].mxu0 %vm1095_vm1, %v6401_v48  ;;  %v2697_v62 = vmax.f32 %v2195_v57, 0.0  ;;  %6227 = vmatmul.mubr.msk.bf16.gmra.mrb[192].mxu1 %vm1095_vm1, %v6402_v51 }
 0x193   : > { %5974 = vmatprep.mubr.msk.bf16.mxu0 %vm6443_vm0, %v6442_v1  ;;  %6230 = vmatprep.mubr.msk.bf16.mxu1 %vm6443_vm0, %v6442_v1 }
 0x194   : > { %v4989_v63 = vpack.c.bf16 %v2569_v61, %v2568_v60  ;;  %v5309_v0 = vpack.c.bf16 %v2697_v62, %v2696_v56 }
 0x195   : > { %v1687_v2 = vpop.f32.mrb[88].mxu0  ;;  %v2199_v3 = vpop.f32.mrb[88].mxu1 }
 0x196   : > { %5536 = vst [vmem:[%s6735_s29 + $0xa8] sm:$0xff] %v4989_v63   ;;  %5600 = vst [vmem:[%s6735_s29 + $0x2a8] sm:$0xff] %v5309_v0   ;;  %v1688_v4 = vadd.f32 %v7012_v25, %v1687_v2  ;;  %v5868_v5 = vpop.f32.mrb[89].mxu0  ;;  %v2200_v7 = vadd.f32 %v7012_v25, %v2199_v3  ;;  %v6124_v8 = vpop.f32.mrb[89].mxu1 }
 0x197   : > { %v1690_v10 = vpop.f32.mrb[90].mxu0  ;;  %v2202_v11 = vpop.f32.mrb[90].mxu1 }
 0x198   : > { %v1691_v12 = vadd.f32 %v7012_v25, %v1690_v10  ;;  %v5869_v13 = vpop.f32.mrb[91].mxu0  ;;  %v2698_v14 = vmax.f32 %v2200_v7, 0.0  ;;  %v2203_v15 = vadd.f32 %v7012_v25, %v2202_v11  ;;  %v6125_v16 = vpop.f32.mrb[91].mxu1  ;;  %v2570_v17 = vmax.f32 %v1688_v4, 0.0  ;;  %v6409_v4 = vld [vmem:[%s6499_s24 + $0x1a0] sm:$0xff]  }
 0x199   : > { %v6410_v7 = vld [vmem:[%s6499_s24 + $0x3a0] sm:$0xff]  }
 0x19a   : > { %v2571_v18 = vmax.f32 %v1691_v12, 0.0  ;;  %5975 = vmatmul.mubr.msk.bf16.gmra.mrb[196].mxu0 %vm1095_vm1, %v6403_v6  ;;  %v2699_v19 = vmax.f32 %v2203_v15, 0.0  ;;  %6231 = vmatmul.mubr.msk.bf16.gmra.mrb[196].mxu1 %vm1095_vm1, %v6404_v9 }
 0x19b   : > { %5978 = vmatprep.mubr.msk.bf16.mxu0 %vm6443_vm0, %v6442_v1  ;;  %6234 = vmatprep.mubr.msk.bf16.mxu1 %vm6443_vm0, %v6442_v1 }
 0x19c   : > { %v4994_v20 = vpack.c.bf16 %v2571_v18, %v2570_v17  ;;  %v5314_v21 = vpack.c.bf16 %v2699_v19, %v2698_v14 }
 0x19d   : > { %v1695_v22 = vpop.f32.mrb[92].mxu0  ;;  %v2207_v23 = vpop.f32.mrb[92].mxu1 }
 0x19e   : > { %5537 = vst [vmem:[%s6735_s29 + $0xb0] sm:$0xff] %v4994_v20   ;;  %5601 = vst [vmem:[%s6735_s29 + $0x2b0] sm:$0xff] %v5314_v21   ;;  %v1696_v24 = vadd.f32 %v7012_v25, %v1695_v22  ;;  %v5872_v58 = vpop.f32.mrb[93].mxu0  ;;  %v2208_v27 = vadd.f32 %v7012_v25, %v2207_v23  ;;  %v6128_v28 = vpop.f32.mrb[93].mxu1 }
 0x19f   : > { %v1698_v30 = vpop.f32.mrb[94].mxu0  ;;  %v2210_v31 = vpop.f32.mrb[94].mxu1 }
 0x1a0   : > { %v1699_v32 = vadd.f32 %v7012_v25, %v1698_v30  ;;  %v5873_v33 = vpop.f32.mrb[95].mxu0  ;;  %v2700_v34 = vmax.f32 %v2208_v27, 0.0  ;;  %v2211_v35 = vadd.f32 %v7012_v25, %v2210_v31  ;;  %v6129_v36 = vpop.f32.mrb[95].mxu1  ;;  %v2572_v37 = vmax.f32 %v1696_v24, 0.0  ;;  %v6411_v24 = vld [vmem:[%s6499_s24 + $0x1a8] sm:$0xff]  }
 0x1a1   : > { %v6412_v27 = vld [vmem:[%s6499_s24 + $0x3a8] sm:$0xff]  }
 0x1a2   : > { %v2573_v38 = vmax.f32 %v1699_v32, 0.0  ;;  %5979 = vmatmul.mubr.msk.bf16.gmra.mrb[200].mxu0 %vm1095_vm1, %v6405_v26  ;;  %v2701_v39 = vmax.f32 %v2211_v35, 0.0  ;;  %6235 = vmatmul.mubr.msk.bf16.gmra.mrb[200].mxu1 %vm1095_vm1, %v6406_v29 }
 0x1a3   : > { %5982 = vmatprep.mubr.msk.bf16.mxu0 %vm6443_vm0, %v6442_v1  ;;  %6238 = vmatprep.mubr.msk.bf16.mxu1 %vm6443_vm0, %v6442_v1 }
 0x1a4   : > { %v4999_v40 = vpack.c.bf16 %v2573_v38, %v2572_v37  ;;  %v5319_v41 = vpack.c.bf16 %v2701_v39, %v2700_v34 }
 0x1a5   : > { %v1703_v42 = vpop.f32.mrb[96].mxu0  ;;  %v2215_v43 = vpop.f32.mrb[96].mxu1 }
 0x1a6   : > { %5538 = vst [vmem:[%s6735_s29 + $0xb8] sm:$0xff] %v4999_v40   ;;  %5602 = vst [vmem:[%s6735_s29 + $0x2b8] sm:$0xff] %v5319_v41   ;;  %v1704_v44 = vadd.f32 %v7012_v25, %v1703_v42  ;;  %v5876_v45 = vpop.f32.mrb[97].mxu0  ;;  %v2216_v47 = vadd.f32 %v7012_v25, %v2215_v43  ;;  %v6132_v48 = vpop.f32.mrb[97].mxu1 }
 0x1a7   : > { %v1706_v50 = vpop.f32.mrb[98].mxu0  ;;  %v2218_v51 = vpop.f32.mrb[98].mxu1 }
 0x1a8   : > { %v1707_v52 = vadd.f32 %v7012_v25, %v1706_v50  ;;  %v5877_v53 = vpop.f32.mrb[99].mxu0  ;;  %v2702_v54 = vmax.f32 %v2216_v47, 0.0  ;;  %v2219_v55 = vadd.f32 %v7012_v25, %v2218_v51  ;;  %v6133_v56 = vpop.f32.mrb[99].mxu1  ;;  %v2574_v57 = vmax.f32 %v1704_v44, 0.0  ;;  %v6413_v44 = vld [vmem:[%s6499_s24 + $0x1b0] sm:$0xff]  }
 0x1a9   : > { %v6414_v47 = vld [vmem:[%s6499_s24 + $0x3b0] sm:$0xff]  }
 0x1aa   : > { %v2575_v59 = vmax.f32 %v1707_v52, 0.0  ;;  %5983 = vmatmul.mubr.msk.bf16.gmra.mrb[204].mxu0 %vm1095_vm1, %v6407_v46  ;;  %v2703_v60 = vmax.f32 %v2219_v55, 0.0  ;;  %6239 = vmatmul.mubr.msk.bf16.gmra.mrb[204].mxu1 %vm1095_vm1, %v6408_v49 }
 0x1ab   : > { %5986 = vmatprep.mubr.msk.bf16.mxu0 %vm6443_vm0, %v6442_v1  ;;  %6242 = vmatprep.mubr.msk.bf16.mxu1 %vm6443_vm0, %v6442_v1 }
 0x1ac   : > { %v5004_v61 = vpack.c.bf16 %v2575_v59, %v2574_v57  ;;  %v5324_v62 = vpack.c.bf16 %v2703_v60, %v2702_v54 }
 0x1ad   : > { %v1711_v63 = vpop.f32.mrb[100].mxu0  ;;  %v2223_v0 = vpop.f32.mrb[100].mxu1 }
 0x1ae   : > { %5539 = vst [vmem:[%s6735_s29 + $0xc0] sm:$0xff] %v5004_v61   ;;  %5603 = vst [vmem:[%s6735_s29 + $0x2c0] sm:$0xff] %v5324_v62   ;;  %v1712_v2 = vadd.f32 %v7012_v25, %v1711_v63  ;;  %v5880_v3 = vpop.f32.mrb[101].mxu0  ;;  %v2224_v5 = vadd.f32 %v7012_v25, %v2223_v0  ;;  %v6136_v6 = vpop.f32.mrb[101].mxu1 }
 0x1af   : > { %v1714_v8 = vpop.f32.mrb[102].mxu0  ;;  %v2226_v9 = vpop.f32.mrb[102].mxu1 }
 0x1b0   : > { %v1715_v10 = vadd.f32 %v7012_v25, %v1714_v8  ;;  %v5881_v11 = vpop.f32.mrb[103].mxu0  ;;  %v2704_v12 = vmax.f32 %v2224_v5, 0.0  ;;  %v2227_v13 = vadd.f32 %v7012_v25, %v2226_v9  ;;  %v6137_v14 = vpop.f32.mrb[103].mxu1  ;;  %v2576_v15 = vmax.f32 %v1712_v2, 0.0  ;;  %v6415_v2 = vld [vmem:[%s6499_s24 + $0x1b8] sm:$0xff]  }
 0x1b1   : > { %v6416_v5 = vld [vmem:[%s6499_s24 + $0x3b8] sm:$0xff]  }
 0x1b2   : > { %v2577_v16 = vmax.f32 %v1715_v10, 0.0  ;;  %5987 = vmatmul.mubr.msk.bf16.gmra.mrb[208].mxu0 %vm1095_vm1, %v6409_v4  ;;  %v2705_v17 = vmax.f32 %v2227_v13, 0.0  ;;  %6243 = vmatmul.mubr.msk.bf16.gmra.mrb[208].mxu1 %vm1095_vm1, %v6410_v7 }
 0x1b3   : > { %5990 = vmatprep.mubr.msk.bf16.mxu0 %vm6443_vm0, %v6442_v1  ;;  %6246 = vmatprep.mubr.msk.bf16.mxu1 %vm6443_vm0, %v6442_v1 }
 0x1b4   : > { %v5009_v18 = vpack.c.bf16 %v2577_v16, %v2576_v15  ;;  %v5329_v19 = vpack.c.bf16 %v2705_v17, %v2704_v12 }
 0x1b5   : > { %v1719_v20 = vpop.f32.mrb[104].mxu0  ;;  %v2231_v21 = vpop.f32.mrb[104].mxu1 }
 0x1b6   : > { %5540 = vst [vmem:[%s6735_s29 + $0xc8] sm:$0xff] %v5009_v18   ;;  %5604 = vst [vmem:[%s6735_s29 + $0x2c8] sm:$0xff] %v5329_v19   ;;  %v1720_v22 = vadd.f32 %v7012_v25, %v1719_v20  ;;  %v5884_v23 = vpop.f32.mrb[105].mxu0  ;;  %v2232_v58 = vadd.f32 %v7012_v25, %v2231_v21  ;;  %v6140_v26 = vpop.f32.mrb[105].mxu1 }
 0x1b7   : > { %v1722_v28 = vpop.f32.mrb[106].mxu0  ;;  %v2234_v29 = vpop.f32.mrb[106].mxu1 }
 0x1b8   : > { %v1723_v30 = vadd.f32 %v7012_v25, %v1722_v28  ;;  %v5885_v31 = vpop.f32.mrb[107].mxu0  ;;  %v2706_v32 = vmax.f32 %v2232_v58, 0.0  ;;  %v2235_v33 = vadd.f32 %v7012_v25, %v2234_v29  ;;  %v6141_v34 = vpop.f32.mrb[107].mxu1  ;;  %v2578_v35 = vmax.f32 %v1720_v22, 0.0  ;;  %v6417_v22 = vld [vmem:[%s6499_s24 + $0x1c0] sm:$0xff]  }
 0x1b9   : > { %v6418_v58 = vld [vmem:[%s6499_s24 + $0x3c0] sm:$0xff]  }
 0x1ba   : > { %v2579_v36 = vmax.f32 %v1723_v30, 0.0  ;;  %5991 = vmatmul.mubr.msk.bf16.gmra.mrb[212].mxu0 %vm1095_vm1, %v6411_v24  ;;  %v2707_v37 = vmax.f32 %v2235_v33, 0.0  ;;  %6247 = vmatmul.mubr.msk.bf16.gmra.mrb[212].mxu1 %vm1095_vm1, %v6412_v27 }
 0x1bb   : > { %5994 = vmatprep.mubr.msk.bf16.mxu0 %vm6443_vm0, %v6442_v1  ;;  %6250 = vmatprep.mubr.msk.bf16.mxu1 %vm6443_vm0, %v6442_v1 }
 0x1bc   : > { %v5014_v38 = vpack.c.bf16 %v2579_v36, %v2578_v35  ;;  %v5334_v39 = vpack.c.bf16 %v2707_v37, %v2706_v32 }
 0x1bd   : > { %v1727_v40 = vpop.f32.mrb[108].mxu0  ;;  %v2239_v41 = vpop.f32.mrb[108].mxu1 }
 0x1be   : > { %5541 = vst [vmem:[%s6735_s29 + $0xd0] sm:$0xff] %v5014_v38   ;;  %5605 = vst [vmem:[%s6735_s29 + $0x2d0] sm:$0xff] %v5334_v39   ;;  %v1728_v42 = vadd.f32 %v7012_v25, %v1727_v40  ;;  %v5888_v43 = vpop.f32.mrb[109].mxu0  ;;  %v2240_v45 = vadd.f32 %v7012_v25, %v2239_v41  ;;  %v6144_v46 = vpop.f32.mrb[109].mxu1 }
 0x1bf   : > { %v1730_v48 = vpop.f32.mrb[110].mxu0  ;;  %v2242_v49 = vpop.f32.mrb[110].mxu1 }
 0x1c0   : > { %v1731_v50 = vadd.f32 %v7012_v25, %v1730_v48  ;;  %v5889_v51 = vpop.f32.mrb[111].mxu0  ;;  %v2708_v52 = vmax.f32 %v2240_v45, 0.0  ;;  %v2243_v53 = vadd.f32 %v7012_v25, %v2242_v49  ;;  %v6145_v54 = vpop.f32.mrb[111].mxu1  ;;  %v2580_v55 = vmax.f32 %v1728_v42, 0.0  ;;  %v6419_v42 = vld [vmem:[%s6499_s24 + $0x1c8] sm:$0xff]  }
 0x1c1   : > { %v6420_v45 = vld [vmem:[%s6499_s24 + $0x3c8] sm:$0xff]  }
 0x1c2   : > { %v2581_v56 = vmax.f32 %v1731_v50, 0.0  ;;  %5995 = vmatmul.mubr.msk.bf16.gmra.mrb[216].mxu0 %vm1095_vm1, %v6413_v44  ;;  %v2709_v57 = vmax.f32 %v2243_v53, 0.0  ;;  %6251 = vmatmul.mubr.msk.bf16.gmra.mrb[216].mxu1 %vm1095_vm1, %v6414_v47 }
 0x1c3   : > { %5998 = vmatprep.mubr.msk.bf16.mxu0 %vm6443_vm0, %v6442_v1  ;;  %6254 = vmatprep.mubr.msk.bf16.mxu1 %vm6443_vm0, %v6442_v1 }
 0x1c4   : > { %v5019_v59 = vpack.c.bf16 %v2581_v56, %v2580_v55  ;;  %v5339_v60 = vpack.c.bf16 %v2709_v57, %v2708_v52 }
 0x1c5   : > { %v1735_v61 = vpop.f32.mrb[112].mxu0  ;;  %v2247_v62 = vpop.f32.mrb[112].mxu1 }
 0x1c6   : > { %5542 = vst [vmem:[%s6735_s29 + $0xd8] sm:$0xff] %v5019_v59   ;;  %5606 = vst [vmem:[%s6735_s29 + $0x2d8] sm:$0xff] %v5339_v60   ;;  %v1736_v63 = vadd.f32 %v7012_v25, %v1735_v61  ;;  %v5892_v0 = vpop.f32.mrb[113].mxu0  ;;  %v2248_v3 = vadd.f32 %v7012_v25, %v2247_v62  ;;  %v6148_v4 = vpop.f32.mrb[113].mxu1 }
 0x1c7   : > { %v1738_v6 = vpop.f32.mrb[114].mxu0  ;;  %v2250_v7 = vpop.f32.mrb[114].mxu1 }
 0x1c8   : > { %v1739_v8 = vadd.f32 %v7012_v25, %v1738_v6  ;;  %v5893_v9 = vpop.f32.mrb[115].mxu0  ;;  %v2710_v10 = vmax.f32 %v2248_v3, 0.0  ;;  %v2251_v11 = vadd.f32 %v7012_v25, %v2250_v7  ;;  %v6149_v12 = vpop.f32.mrb[115].mxu1  ;;  %v2582_v13 = vmax.f32 %v1736_v63, 0.0  ;;  %v6421_v63 = vld [vmem:[%s6499_s24 + $0x1d0] sm:$0xff]  }
 0x1c9   : > { %v6422_v3 = vld [vmem:[%s6499_s24 + $0x3d0] sm:$0xff]  }
 0x1ca   : > { %v2583_v14 = vmax.f32 %v1739_v8, 0.0  ;;  %5999 = vmatmul.mubr.msk.bf16.gmra.mrb[220].mxu0 %vm1095_vm1, %v6415_v2  ;;  %v2711_v15 = vmax.f32 %v2251_v11, 0.0  ;;  %6255 = vmatmul.mubr.msk.bf16.gmra.mrb[220].mxu1 %vm1095_vm1, %v6416_v5 }
 0x1cb   : > { %6002 = vmatprep.mubr.msk.bf16.mxu0 %vm6443_vm0, %v6442_v1  ;;  %6258 = vmatprep.mubr.msk.bf16.mxu1 %vm6443_vm0, %v6442_v1 }
 0x1cc   : > { %v5024_v16 = vpack.c.bf16 %v2583_v14, %v2582_v13  ;;  %v5344_v17 = vpack.c.bf16 %v2711_v15, %v2710_v10 }
 0x1cd   : > { %v1743_v18 = vpop.f32.mrb[116].mxu0  ;;  %v2255_v19 = vpop.f32.mrb[116].mxu1 }
 0x1ce   : > { %5543 = vst [vmem:[%s6735_s29 + $0xe0] sm:$0xff] %v5024_v16   ;;  %5607 = vst [vmem:[%s6735_s29 + $0x2e0] sm:$0xff] %v5344_v17   ;;  %v1744_v20 = vadd.f32 %v7012_v25, %v1743_v18  ;;  %v5896_v21 = vpop.f32.mrb[117].mxu0  ;;  %v2256_v23 = vadd.f32 %v7012_v25, %v2255_v19  ;;  %v6152_v24 = vpop.f32.mrb[117].mxu1 }
 0x1cf   : > { %v1746_v26 = vpop.f32.mrb[118].mxu0  ;;  %v2258_v27 = vpop.f32.mrb[118].mxu1 }
 0x1d0   : > { %v1747_v28 = vadd.f32 %v7012_v25, %v1746_v26  ;;  %v5897_v29 = vpop.f32.mrb[119].mxu0  ;;  %v2712_v30 = vmax.f32 %v2256_v23, 0.0  ;;  %v2259_v31 = vadd.f32 %v7012_v25, %v2258_v27  ;;  %v6153_v32 = vpop.f32.mrb[119].mxu1  ;;  %v2584_v33 = vmax.f32 %v1744_v20, 0.0  ;;  %v6423_v20 = vld [vmem:[%s6499_s24 + $0x1d8] sm:$0xff]  }
 0x1d1   : > { %v6424_v23 = vld [vmem:[%s6499_s24 + $0x3d8] sm:$0xff]  }
 0x1d2   : > { %v2585_v34 = vmax.f32 %v1747_v28, 0.0  ;;  %6003 = vmatmul.mubr.msk.bf16.gmra.mrb[224].mxu0 %vm1095_vm1, %v6417_v22  ;;  %v2713_v35 = vmax.f32 %v2259_v31, 0.0  ;;  %6259 = vmatmul.mubr.msk.bf16.gmra.mrb[224].mxu1 %vm1095_vm1, %v6418_v58 }
 0x1d3   : > { %6006 = vmatprep.mubr.msk.bf16.mxu0 %vm6443_vm0, %v6442_v1  ;;  %6262 = vmatprep.mubr.msk.bf16.mxu1 %vm6443_vm0, %v6442_v1 }
 0x1d4   : > { %v5029_v36 = vpack.c.bf16 %v2585_v34, %v2584_v33  ;;  %v5349_v37 = vpack.c.bf16 %v2713_v35, %v2712_v30 }
 0x1d5   : > { %v1751_v38 = vpop.f32.mrb[120].mxu0  ;;  %v2263_v39 = vpop.f32.mrb[120].mxu1 }
 0x1d6   : > { %5544 = vst [vmem:[%s6735_s29 + $0xe8] sm:$0xff] %v5029_v36   ;;  %5608 = vst [vmem:[%s6735_s29 + $0x2e8] sm:$0xff] %v5349_v37   ;;  %v1752_v40 = vadd.f32 %v7012_v25, %v1751_v38  ;;  %v5900_v41 = vpop.f32.mrb[121].mxu0  ;;  %v2264_v43 = vadd.f32 %v7012_v25, %v2263_v39  ;;  %v6156_v44 = vpop.f32.mrb[121].mxu1 }
 0x1d7   : > { %v1754_v46 = vpop.f32.mrb[122].mxu0  ;;  %v2266_v47 = vpop.f32.mrb[122].mxu1 }
 0x1d8   : > { %v1755_v48 = vadd.f32 %v7012_v25, %v1754_v46  ;;  %v5901_v49 = vpop.f32.mrb[123].mxu0  ;;  %v2714_v50 = vmax.f32 %v2264_v43, 0.0  ;;  %v2267_v51 = vadd.f32 %v7012_v25, %v2266_v47  ;;  %v6157_v52 = vpop.f32.mrb[123].mxu1  ;;  %v2586_v53 = vmax.f32 %v1752_v40, 0.0  ;;  %v6425_v40 = vld [vmem:[%s6499_s24 + $0x1e0] sm:$0xff]  }
 0x1d9   : > { %v6426_v43 = vld [vmem:[%s6499_s24 + $0x3e0] sm:$0xff]  }
 0x1da   : > { %v2587_v54 = vmax.f32 %v1755_v48, 0.0  ;;  %6007 = vmatmul.mubr.msk.bf16.gmra.mrb[228].mxu0 %vm1095_vm1, %v6419_v42  ;;  %v2715_v55 = vmax.f32 %v2267_v51, 0.0  ;;  %6263 = vmatmul.mubr.msk.bf16.gmra.mrb[228].mxu1 %vm1095_vm1, %v6420_v45 }
 0x1db   : > { %6010 = vmatprep.mubr.msk.bf16.mxu0 %vm6443_vm0, %v6442_v1  ;;  %6266 = vmatprep.mubr.msk.bf16.mxu1 %vm6443_vm0, %v6442_v1 }
 0x1dc   : > { %v5034_v56 = vpack.c.bf16 %v2587_v54, %v2586_v53  ;;  %v5354_v57 = vpack.c.bf16 %v2715_v55, %v2714_v50 }
 0x1dd   : > { %v1759_v59 = vpop.f32.mrb[124].mxu0  ;;  %v2271_v60 = vpop.f32.mrb[124].mxu1 }
 0x1de   : > { %5545 = vst [vmem:[%s6735_s29 + $0xf0] sm:$0xff] %v5034_v56   ;;  %5609 = vst [vmem:[%s6735_s29 + $0x2f0] sm:$0xff] %v5354_v57   ;;  %v1760_v61 = vadd.f32 %v7012_v25, %v1759_v59  ;;  %v5904_v62 = vpop.f32.mrb[125].mxu0  ;;  %v2272_v0 = vadd.f32 %v7012_v25, %v2271_v60  ;;  %v6160_v2 = vpop.f32.mrb[125].mxu1 }
 0x1df   : > { %v1762_v4 = vpop.f32.mrb[126].mxu0  ;;  %v2274_v5 = vpop.f32.mrb[126].mxu1 }
 0x1e0   : > { %v1763_v6 = vadd.f32 %v7012_v25, %v1762_v4  ;;  %v5905_v7 = vpop.f32.mrb[127].mxu0  ;;  %v2716_v8 = vmax.f32 %v2272_v0, 0.0  ;;  %v2275_v9 = vadd.f32 %v7012_v25, %v2274_v5  ;;  %v6161_v10 = vpop.f32.mrb[127].mxu1  ;;  %v2588_v11 = vmax.f32 %v1760_v61, 0.0  ;;  %v6427_v61 = vld [vmem:[%s6499_s24 + $0x1e8] sm:$0xff]  }
 0x1e1   : > { %v6428_v0 = vld [vmem:[%s6499_s24 + $0x3e8] sm:$0xff]  }
 0x1e2   : > { %v2589_v12 = vmax.f32 %v1763_v6, 0.0  ;;  %6011 = vmatmul.mubr.msk.bf16.gmra.mrb[232].mxu0 %vm1095_vm1, %v6421_v63  ;;  %v2717_v13 = vmax.f32 %v2275_v9, 0.0  ;;  %6267 = vmatmul.mubr.msk.bf16.gmra.mrb[232].mxu1 %vm1095_vm1, %v6422_v3 }
 0x1e3   : > { %6014 = vmatprep.mubr.msk.bf16.mxu0 %vm6443_vm0, %v6442_v1  ;;  %6270 = vmatprep.mubr.msk.bf16.mxu1 %vm6443_vm0, %v6442_v1 }
 0x1e4   : > { %v5039_v14 = vpack.c.bf16 %v2589_v12, %v2588_v11  ;;  %v5359_v15 = vpack.c.bf16 %v2717_v13, %v2716_v8 }
 0x1e5   : > { %v1767_v16 = vpop.f32.mrb[128].mxu0  ;;  %v2279_v17 = vpop.f32.mrb[128].mxu1 }
 0x1e6   : > { %5546 = vst [vmem:[%s6735_s29 + $0xf8] sm:$0xff] %v5039_v14   ;;  %5610 = vst [vmem:[%s6735_s29 + $0x2f8] sm:$0xff] %v5359_v15   ;;  %v1768_v18 = vadd.f32 %v7012_v25, %v1767_v16  ;;  %v5908_v19 = vpop.f32.mrb[129].mxu0  ;;  %v2280_v21 = vadd.f32 %v7012_v25, %v2279_v17  ;;  %v6164_v22 = vpop.f32.mrb[129].mxu1 }
 0x1e7   : > { %v1770_v24 = vpop.f32.mrb[130].mxu0  ;;  %v2282_v58 = vpop.f32.mrb[130].mxu1 }
 0x1e8   : > { %v1771_v26 = vadd.f32 %v7012_v25, %v1770_v24  ;;  %v5909_v27 = vpop.f32.mrb[131].mxu0  ;;  %v2718_v28 = vmax.f32 %v2280_v21, 0.0  ;;  %v2283_v29 = vadd.f32 %v7012_v25, %v2282_v58  ;;  %v6165_v30 = vpop.f32.mrb[131].mxu1  ;;  %v2590_v31 = vmax.f32 %v1768_v18, 0.0  ;;  %v6429_v18 = vld [vmem:[%s6499_s24 + $0x1f0] sm:$0xff]  }
 0x1e9   : > { %v6430_v21 = vld [vmem:[%s6499_s24 + $0x3f0] sm:$0xff]  }
 0x1ea   : > { %v2591_v32 = vmax.f32 %v1771_v26, 0.0  ;;  %6015 = vmatmul.mubr.msk.bf16.gmra.mrb[236].mxu0 %vm1095_vm1, %v6423_v20  ;;  %v2719_v33 = vmax.f32 %v2283_v29, 0.0  ;;  %6271 = vmatmul.mubr.msk.bf16.gmra.mrb[236].mxu1 %vm1095_vm1, %v6424_v23 }
 0x1eb   : > { %6018 = vmatprep.mubr.msk.bf16.mxu0 %vm6443_vm0, %v6442_v1  ;;  %6274 = vmatprep.mubr.msk.bf16.mxu1 %vm6443_vm0, %v6442_v1 }
 0x1ec   : > { %v5044_v34 = vpack.c.bf16 %v2591_v32, %v2590_v31  ;;  %v5364_v35 = vpack.c.bf16 %v2719_v33, %v2718_v28 }
 0x1ed   : > { %v1775_v36 = vpop.f32.mrb[132].mxu0  ;;  %v2287_v37 = vpop.f32.mrb[132].mxu1 }
 0x1ee   : > { %5547 = vst [vmem:[%s6735_s29 + $0x100] sm:$0xff] %v5044_v34   ;;  %5611 = vst [vmem:[%s6735_s29 + $0x300] sm:$0xff] %v5364_v35   ;;  %v1776_v38 = vadd.f32 %v7012_v25, %v1775_v36  ;;  %v5912_v39 = vpop.f32.mrb[133].mxu0  ;;  %v2288_v41 = vadd.f32 %v7012_v25, %v2287_v37  ;;  %v6168_v42 = vpop.f32.mrb[133].mxu1 }
 0x1ef   : > { %v1778_v44 = vpop.f32.mrb[134].mxu0  ;;  %v2290_v45 = vpop.f32.mrb[134].mxu1 }
 0x1f0   : > { %v1779_v46 = vadd.f32 %v7012_v25, %v1778_v44  ;;  %v5913_v47 = vpop.f32.mrb[135].mxu0  ;;  %v2720_v48 = vmax.f32 %v2288_v41, 0.0  ;;  %v2291_v49 = vadd.f32 %v7012_v25, %v2290_v45  ;;  %v6169_v50 = vpop.f32.mrb[135].mxu1  ;;  %v2592_v51 = vmax.f32 %v1776_v38, 0.0  ;;  %v6431_v38 = vld [vmem:[%s6499_s24 + $0x1f8] sm:$0xff]  }
 0x1f2   : > { %v2593_v52 = vmax.f32 %v1779_v46, 0.0  ;;  %6019 = vmatmul.mubr.msk.bf16.gmra.mrb[240].mxu0 %vm1095_vm1, %v6425_v40  ;;  %v2721_v53 = vmax.f32 %v2291_v49, 0.0  ;;  %6275 = vmatmul.mubr.msk.bf16.gmra.mrb[240].mxu1 %vm1095_vm1, %v6426_v43 }
 0x1f3   : > { %6022 = vmatprep.mubr.msk.bf16.mxu0 %vm6443_vm0, %v6442_v1  ;;  %6278 = vmatprep.mubr.msk.bf16.mxu1 %vm6443_vm0, %v6442_v1 }
 0x1f4   : > { %v5049_v54 = vpack.c.bf16 %v2593_v52, %v2592_v51  ;;  %v5369_v55 = vpack.c.bf16 %v2721_v53, %v2720_v48 }
 0x1f5   : > { %v1783_v56 = vpop.f32.mrb[136].mxu0  ;;  %v2295_v57 = vpop.f32.mrb[136].mxu1 }
 0x1f6   : > { %5548 = vst [vmem:[%s6735_s29 + $0x108] sm:$0xff] %v5049_v54   ;;  %5612 = vst [vmem:[%s6735_s29 + $0x308] sm:$0xff] %v5369_v55   ;;  %v1784_v59 = vadd.f32 %v7012_v25, %v1783_v56  ;;  %v5916_v60 = vpop.f32.mrb[137].mxu0  ;;  %v2296_v62 = vadd.f32 %v7012_v25, %v2295_v57  ;;  %v6172_v63 = vpop.f32.mrb[137].mxu1 }
 0x1f7   : > { %v1786_v2 = vpop.f32.mrb[138].mxu0  ;;  %v2298_v3 = vpop.f32.mrb[138].mxu1 }
 0x1f8   : > { %v1787_v4 = vadd.f32 %v7012_v25, %v1786_v2  ;;  %v5917_v5 = vpop.f32.mrb[139].mxu0  ;;  %v2722_v6 = vmax.f32 %v2296_v62, 0.0  ;;  %v2299_v7 = vadd.f32 %v7012_v25, %v2298_v3  ;;  %v6173_v8 = vpop.f32.mrb[139].mxu1  ;;  %v2594_v9 = vmax.f32 %v1784_v59, 0.0 }
 0x1fa   : > { %v2595_v10 = vmax.f32 %v1787_v4, 0.0  ;;  %6023 = vmatmul.mubr.msk.bf16.gmra.mrb[244].mxu0 %vm1095_vm1, %v6427_v61  ;;  %v2723_v11 = vmax.f32 %v2299_v7, 0.0  ;;  %6279 = vmatmul.mubr.msk.bf16.gmra.mrb[244].mxu1 %vm1095_vm1, %v6428_v0 }
 0x1fb   : > { %6026 = vmatprep.mubr.msk.bf16.mxu0 %vm6443_vm0, %v6442_v1  ;;  %6282 = vmatprep.mubr.msk.bf16.mxu1 %vm6443_vm0, %v6442_v1 }
 0x1fc   : > { %v5054_v12 = vpack.c.bf16 %v2595_v10, %v2594_v9  ;;  %v5374_v13 = vpack.c.bf16 %v2723_v11, %v2722_v6 }
 0x1fd   : > { %v1791_v14 = vpop.f32.mrb[140].mxu0  ;;  %v2303_v15 = vpop.f32.mrb[140].mxu1 }
 0x1fe   : > { %5549 = vst [vmem:[%s6735_s29 + $0x110] sm:$0xff] %v5054_v12   ;;  %5613 = vst [vmem:[%s6735_s29 + $0x310] sm:$0xff] %v5374_v13   ;;  %v1792_v16 = vadd.f32 %v7012_v25, %v1791_v14  ;;  %v5920_v17 = vpop.f32.mrb[141].mxu0  ;;  %v2304_v19 = vadd.f32 %v7012_v25, %v2303_v15  ;;  %v6176_v20 = vpop.f32.mrb[141].mxu1 }
 0x1ff   : > { %v1794_v22 = vpop.f32.mrb[142].mxu0  ;;  %v2306_v23 = vpop.f32.mrb[142].mxu1 }
 0x200   : > { %v1795_v24 = vadd.f32 %v7012_v25, %v1794_v22  ;;  %v5921_v58 = vpop.f32.mrb[143].mxu0  ;;  %v2724_v26 = vmax.f32 %v2304_v19, 0.0  ;;  %v2307_v27 = vadd.f32 %v7012_v25, %v2306_v23  ;;  %v6177_v28 = vpop.f32.mrb[143].mxu1  ;;  %v2596_v29 = vmax.f32 %v1792_v16, 0.0 }
 0x202   : > { %v2597_v30 = vmax.f32 %v1795_v24, 0.0  ;;  %6027 = vmatmul.mubr.msk.bf16.gmra.mrb[248].mxu0 %vm1095_vm1, %v6429_v18  ;;  %v2725_v31 = vmax.f32 %v2307_v27, 0.0  ;;  %6283 = vmatmul.mubr.msk.bf16.gmra.mrb[248].mxu1 %vm1095_vm1, %v6430_v21 }
 0x203   : > { %6030 = vmatprep.mubr.msk.bf16.mxu0 %vm6443_vm0, %v6442_v1 }
 0x204   : > { %v5059_v32 = vpack.c.bf16 %v2597_v30, %v2596_v29  ;;  %v5379_v33 = vpack.c.bf16 %v2725_v31, %v2724_v26 }
 0x205   : > { %v1799_v34 = vpop.f32.mrb[144].mxu0  ;;  %v2311_v35 = vpop.f32.mrb[144].mxu1 }
 0x206   : > { %5550 = vst [vmem:[%s6735_s29 + $0x118] sm:$0xff] %v5059_v32   ;;  %5614 = vst [vmem:[%s6735_s29 + $0x318] sm:$0xff] %v5379_v33   ;;  %v1800_v36 = vadd.f32 %v7012_v25, %v1799_v34  ;;  %v5924_v37 = vpop.f32.mrb[145].mxu0  ;;  %v2312_v39 = vadd.f32 %v7012_v25, %v2311_v35  ;;  %v6180_v40 = vpop.f32.mrb[145].mxu1 }
 0x207   : > { %v1802_v41 = vpop.f32.mrb[146].mxu0  ;;  %v2314_v42 = vpop.f32.mrb[146].mxu1 }
 0x208   : > { %v1803_v43 = vadd.f32 %v7012_v25, %v1802_v41  ;;  %v5925_v1 = vpop.f32.mrb[147].mxu0  ;;  %v2726_v44 = vmax.f32 %v2312_v39, 0.0  ;;  %v2315_v45 = vadd.f32 %v7012_v25, %v2314_v42  ;;  %v6181_v46 = vpop.f32.mrb[147].mxu1  ;;  %v2598_v47 = vmax.f32 %v1800_v36, 0.0 }
 0x20a   : > { %v2599_v48 = vmax.f32 %v1803_v43, 0.0  ;;  %6031 = vmatmul.mubr.msk.bf16.gmra.mrb[252].mxu0 %vm1095_vm1, %v6431_v38  ;;  %v2727_v49 = vmax.f32 %v2315_v45, 0.0 }
 0x20c   : > { %v5064_v50 = vpack.c.bf16 %v2599_v48, %v2598_v47  ;;  %v5384_v51 = vpack.c.bf16 %v2727_v49, %v2726_v44 }
 0x20d   : > { %v1807_v52 = vpop.f32.mrb[148].mxu0  ;;  %v2319_v53 = vpop.f32.mrb[148].mxu1 }
 0x20e   : > { %5551 = vst [vmem:[%s6735_s29 + $0x120] sm:$0xff] %v5064_v50   ;;  %5615 = vst [vmem:[%s6735_s29 + $0x320] sm:$0xff] %v5384_v51   ;;  %v1808_v54 = vadd.f32 %v7012_v25, %v1807_v52  ;;  %v5928_v55 = vpop.f32.mrb[149].mxu0  ;;  %v2320_v56 = vadd.f32 %v7012_v25, %v2319_v53  ;;  %v6184_v57 = vpop.f32.mrb[149].mxu1 }
 0x20f   : > { %v1810_v59 = vpop.f32.mrb[150].mxu0  ;;  %v2322_v60 = vpop.f32.mrb[150].mxu1 }
 0x210   : > { %v1811_v61 = vadd.f32 %v7012_v25, %v1810_v59  ;;  %v5929_v62 = vpop.f32.mrb[151].mxu0  ;;  %v2728_v63 = vmax.f32 %v2320_v56, 0.0  ;;  %v2323_v0 = vadd.f32 %v7012_v25, %v2322_v60  ;;  %v6185_v2 = vpop.f32.mrb[151].mxu1  ;;  %v2600_v3 = vmax.f32 %v1808_v54, 0.0 }
 0x212   : > { %v2601_v4 = vmax.f32 %v1811_v61, 0.0  ;;  %v2729_v5 = vmax.f32 %v2323_v0, 0.0  ;;  %v7271_v0 = vld [vmem:[%s7413_s2] ss:$0 sm:$0xff] }
 0x214   : > { %v5069_v6 = vpack.c.bf16 %v2601_v4, %v2600_v3  ;;  %v5389_v7 = vpack.c.bf16 %v2729_v5, %v2728_v63 }
 0x215   : > { %v1815_v8 = vpop.f32.mrb[152].mxu0  ;;  %v2327_v9 = vpop.f32.mrb[152].mxu1 }
 0x216   : > { %5552 = vst [vmem:[%s6735_s29 + $0x128] sm:$0xff] %v5069_v6   ;;  %5616 = vst [vmem:[%s6735_s29 + $0x328] sm:$0xff] %v5389_v7   ;;  %v1816_v10 = vadd.f32 %v7012_v25, %v1815_v8  ;;  %v5932_v11 = vpop.f32.mrb[153].mxu0  ;;  %v2328_v12 = vadd.f32 %v7012_v25, %v2327_v9  ;;  %v6188_v13 = vpop.f32.mrb[153].mxu1 }
 0x217   : > { %v1818_v14 = vpop.f32.mrb[154].mxu0  ;;  %v2330_v15 = vpop.f32.mrb[154].mxu1 }
 0x218   : > { %v1819_v16 = vadd.f32 %v7012_v25, %v1818_v14  ;;  %v5933_v17 = vpop.f32.mrb[155].mxu0  ;;  %v2730_v18 = vmax.f32 %v2328_v12, 0.0  ;;  %v2331_v19 = vadd.f32 %v7012_v25, %v2330_v15  ;;  %v6189_v20 = vpop.f32.mrb[155].mxu1  ;;  %v2602_v21 = vmax.f32 %v1816_v10, 0.0 }
 0x21a   : > { %v2603_v22 = vmax.f32 %v1819_v16, 0.0  ;;  %v2731_v23 = vmax.f32 %v2331_v19, 0.0 }
 0x21c   : > { %v5074_v24 = vpack.c.bf16 %v2603_v22, %v2602_v21  ;;  %v5394_v58 = vpack.c.bf16 %v2731_v23, %v2730_v18 }
 0x21d   : > { %v1823_v26 = vpop.f32.mrb[156].mxu0  ;;  %v2335_v27 = vpop.f32.mrb[156].mxu1 }
 0x21e   : > { %5553 = vst [vmem:[%s6735_s29 + $0x130] sm:$0xff] %v5074_v24   ;;  %5617 = vst [vmem:[%s6735_s29 + $0x330] sm:$0xff] %v5394_v58   ;;  %v1824_v28 = vadd.f32 %v7012_v25, %v1823_v26  ;;  %v5936_v29 = vpop.f32.mrb[157].mxu0  ;;  %v2336_v30 = vadd.f32 %v7012_v25, %v2335_v27  ;;  %v6192_v31 = vpop.f32.mrb[157].mxu1 }
 0x21f   : > { %v1826_v32 = vpop.f32.mrb[158].mxu0  ;;  %v2338_v33 = vpop.f32.mrb[158].mxu1 }
 0x220   : > { %v1827_v34 = vadd.f32 %v7012_v25, %v1826_v32  ;;  %v5937_v35 = vpop.f32.mrb[159].mxu0  ;;  %v2732_v36 = vmax.f32 %v2336_v30, 0.0  ;;  %v2339_v37 = vadd.f32 %v7012_v25, %v2338_v33  ;;  %v6193_v38 = vpop.f32.mrb[159].mxu1  ;;  %v2604_v39 = vmax.f32 %v1824_v28, 0.0 }
 0x222   : > { %v2605_v40 = vmax.f32 %v1827_v34, 0.0  ;;  %v2733_v41 = vmax.f32 %v2339_v37, 0.0 }
 0x224   : > { %v5079_v42 = vpack.c.bf16 %v2605_v40, %v2604_v39  ;;  %v5399_v43 = vpack.c.bf16 %v2733_v41, %v2732_v36 }
 0x225   : > { %v1831_v1 = vpop.f32.mrb[160].mxu0  ;;  %v2343_v44 = vpop.f32.mrb[160].mxu1 }
 0x226   : > { %5554 = vst [vmem:[%s6735_s29 + $0x138] sm:$0xff] %v5079_v42   ;;  %5618 = vst [vmem:[%s6735_s29 + $0x338] sm:$0xff] %v5399_v43   ;;  %v1832_v45 = vadd.f32 %v7012_v25, %v1831_v1  ;;  %v5940_v46 = vpop.f32.mrb[161].mxu0  ;;  %v2344_v47 = vadd.f32 %v7012_v25, %v2343_v44  ;;  %v6196_v48 = vpop.f32.mrb[161].mxu1 }
 0x227   : > { %v1834_v49 = vpop.f32.mrb[162].mxu0  ;;  %v2346_v50 = vpop.f32.mrb[162].mxu1 }
 0x228   : > { %v1835_v51 = vadd.f32 %v7012_v25, %v1834_v49  ;;  %v5941_v52 = vpop.f32.mrb[163].mxu0  ;;  %v2734_v53 = vmax.f32 %v2344_v47, 0.0  ;;  %v2347_v54 = vadd.f32 %v7012_v25, %v2346_v50  ;;  %v6197_v55 = vpop.f32.mrb[163].mxu1  ;;  %v2606_v56 = vmax.f32 %v1832_v45, 0.0 }
 0x22a   : > { %v2607_v57 = vmax.f32 %v1835_v51, 0.0  ;;  %v2735_v59 = vmax.f32 %v2347_v54, 0.0 }
 0x22c   : > { %v5084_v60 = vpack.c.bf16 %v2607_v57, %v2606_v56  ;;  %v5404_v61 = vpack.c.bf16 %v2735_v59, %v2734_v53 }
 0x22d   : > { %v1839_v62 = vpop.f32.mrb[164].mxu0  ;;  %v2351_v63 = vpop.f32.mrb[164].mxu1 }
 0x22e   : > { %5555 = vst [vmem:[%s6735_s29 + $0x140] sm:$0xff] %v5084_v60   ;;  %5619 = vst [vmem:[%s6735_s29 + $0x340] sm:$0xff] %v5404_v61   ;;  %v1840_v2 = vadd.f32 %v7271_v0, %v1839_v62  ;;  %v5944_v3 = vpop.f32.mrb[165].mxu0  ;;  %v2352_v25 = vadd.f32 %v7271_v0, %v2351_v63  ;;  %v6200_v4 = vpop.f32.mrb[165].mxu1 }
 0x22f   : > { %v1842_v5 = vpop.f32.mrb[166].mxu0  ;;  %v2354_v6 = vpop.f32.mrb[166].mxu1 }
 0x230   : > { %v1843_v7 = vadd.f32 %v7271_v0, %v1842_v5  ;;  %v5945_v8 = vpop.f32.mrb[167].mxu0  ;;  %v2736_v9 = vmax.f32 %v2352_v25, 0.0  ;;  %v2355_v10 = vadd.f32 %v7271_v0, %v2354_v6  ;;  %v6201_v11 = vpop.f32.mrb[167].mxu1  ;;  %v2608_v12 = vmax.f32 %v1840_v2, 0.0 }
 0x232   : > { %v2609_v13 = vmax.f32 %v1843_v7, 0.0  ;;  %v2737_v14 = vmax.f32 %v2355_v10, 0.0 }
 0x234   : > { %v5089_v15 = vpack.c.bf16 %v2609_v13, %v2608_v12  ;;  %v5409_v16 = vpack.c.bf16 %v2737_v14, %v2736_v9 }
 0x235   : > { %v1847_v17 = vpop.f32.mrb[168].mxu0  ;;  %v2359_v18 = vpop.f32.mrb[168].mxu1 }
 0x236   : > { %5556 = vst [vmem:[%s6735_s29 + $0x148] sm:$0xff] %v5089_v15   ;;  %5620 = vst [vmem:[%s6735_s29 + $0x348] sm:$0xff] %v5409_v16   ;;  %v1848_v19 = vadd.f32 %v7271_v0, %v1847_v17  ;;  %v5948_v20 = vpop.f32.mrb[169].mxu0  ;;  %v2360_v21 = vadd.f32 %v7271_v0, %v2359_v18  ;;  %v6204_v22 = vpop.f32.mrb[169].mxu1 }
 0x237   : > { %v1850_v23 = vpop.f32.mrb[170].mxu0  ;;  %v2362_v24 = vpop.f32.mrb[170].mxu1 }
 0x238   : > { %v1851_v58 = vadd.f32 %v7271_v0, %v1850_v23  ;;  %v5949_v26 = vpop.f32.mrb[171].mxu0  ;;  %v2738_v27 = vmax.f32 %v2360_v21, 0.0  ;;  %v2363_v28 = vadd.f32 %v7271_v0, %v2362_v24  ;;  %v6205_v29 = vpop.f32.mrb[171].mxu1  ;;  %v2610_v30 = vmax.f32 %v1848_v19, 0.0 }
 0x23a   : > { %v2611_v31 = vmax.f32 %v1851_v58, 0.0  ;;  %v2739_v32 = vmax.f32 %v2363_v28, 0.0 }
 0x23c   : > { %v5094_v33 = vpack.c.bf16 %v2611_v31, %v2610_v30  ;;  %v5414_v34 = vpack.c.bf16 %v2739_v32, %v2738_v27 }
 0x23d   : > { %v1855_v35 = vpop.f32.mrb[172].mxu0  ;;  %v2367_v36 = vpop.f32.mrb[172].mxu1 }
 0x23e   : > { %5557 = vst [vmem:[%s6735_s29 + $0x150] sm:$0xff] %v5094_v33   ;;  %5621 = vst [vmem:[%s6735_s29 + $0x350] sm:$0xff] %v5414_v34   ;;  %v1856_v37 = vadd.f32 %v7271_v0, %v1855_v35  ;;  %v5952_v38 = vpop.f32.mrb[173].mxu0  ;;  %v2368_v39 = vadd.f32 %v7271_v0, %v2367_v36  ;;  %v6208_v40 = vpop.f32.mrb[173].mxu1 }
 0x23f   : > { %v1858_v41 = vpop.f32.mrb[174].mxu0  ;;  %v2370_v42 = vpop.f32.mrb[174].mxu1 }
 0x240   : > { %v1859_v43 = vadd.f32 %v7271_v0, %v1858_v41  ;;  %v5953_v1 = vpop.f32.mrb[175].mxu0  ;;  %v2740_v44 = vmax.f32 %v2368_v39, 0.0  ;;  %v2371_v45 = vadd.f32 %v7271_v0, %v2370_v42  ;;  %v6209_v46 = vpop.f32.mrb[175].mxu1  ;;  %v2612_v47 = vmax.f32 %v1856_v37, 0.0 }
 0x242   : > { %v2613_v48 = vmax.f32 %v1859_v43, 0.0  ;;  %v2741_v49 = vmax.f32 %v2371_v45, 0.0 }
 0x244   : > { %v5099_v50 = vpack.c.bf16 %v2613_v48, %v2612_v47  ;;  %v5419_v51 = vpack.c.bf16 %v2741_v49, %v2740_v44 }
 0x245   : > { %v1863_v52 = vpop.f32.mrb[176].mxu0  ;;  %v2375_v53 = vpop.f32.mrb[176].mxu1 }
 0x246   : > { %5558 = vst [vmem:[%s6735_s29 + $0x158] sm:$0xff] %v5099_v50   ;;  %5622 = vst [vmem:[%s6735_s29 + $0x358] sm:$0xff] %v5419_v51   ;;  %v1864_v54 = vadd.f32 %v7271_v0, %v1863_v52  ;;  %v5956_v55 = vpop.f32.mrb[177].mxu0  ;;  %v2376_v56 = vadd.f32 %v7271_v0, %v2375_v53  ;;  %v6212_v57 = vpop.f32.mrb[177].mxu1 }
 0x247   : > { %v1866_v59 = vpop.f32.mrb[178].mxu0  ;;  %v2378_v60 = vpop.f32.mrb[178].mxu1 }
 0x248   : > { %v1867_v61 = vadd.f32 %v7271_v0, %v1866_v59  ;;  %v5957_v62 = vpop.f32.mrb[179].mxu0  ;;  %v2742_v63 = vmax.f32 %v2376_v56, 0.0  ;;  %v2379_v2 = vadd.f32 %v7271_v0, %v2378_v60  ;;  %v6213_v3 = vpop.f32.mrb[179].mxu1  ;;  %v2614_v25 = vmax.f32 %v1864_v54, 0.0 }
 0x24a   : > { %v2615_v4 = vmax.f32 %v1867_v61, 0.0  ;;  %v2743_v5 = vmax.f32 %v2379_v2, 0.0 }
 0x24c   : > { %v5104_v6 = vpack.c.bf16 %v2615_v4, %v2614_v25  ;;  %v5424_v7 = vpack.c.bf16 %v2743_v5, %v2742_v63 }
 0x24d   : > { %v1871_v8 = vpop.f32.mrb[180].mxu0  ;;  %v2383_v9 = vpop.f32.mrb[180].mxu1 }
 0x24e   : > { %5559 = vst [vmem:[%s6735_s29 + $0x160] sm:$0xff] %v5104_v6   ;;  %5623 = vst [vmem:[%s6735_s29 + $0x360] sm:$0xff] %v5424_v7   ;;  %v1872_v10 = vadd.f32 %v7271_v0, %v1871_v8  ;;  %v5960_v11 = vpop.f32.mrb[181].mxu0  ;;  %v2384_v12 = vadd.f32 %v7271_v0, %v2383_v9  ;;  %v6216_v13 = vpop.f32.mrb[181].mxu1 }
 0x24f   : > { %v1874_v14 = vpop.f32.mrb[182].mxu0  ;;  %v2386_v15 = vpop.f32.mrb[182].mxu1 }
 0x250   : > { %v1875_v16 = vadd.f32 %v7271_v0, %v1874_v14  ;;  %v5961_v17 = vpop.f32.mrb[183].mxu0  ;;  %v2744_v18 = vmax.f32 %v2384_v12, 0.0  ;;  %v2387_v19 = vadd.f32 %v7271_v0, %v2386_v15  ;;  %v6217_v20 = vpop.f32.mrb[183].mxu1  ;;  %v2616_v21 = vmax.f32 %v1872_v10, 0.0 }
 0x252   : > { %v2617_v22 = vmax.f32 %v1875_v16, 0.0  ;;  %v2745_v23 = vmax.f32 %v2387_v19, 0.0 }
 0x254   : > { %v5109_v24 = vpack.c.bf16 %v2617_v22, %v2616_v21  ;;  %v5429_v58 = vpack.c.bf16 %v2745_v23, %v2744_v18 }
 0x255   : > { %v1879_v26 = vpop.f32.mrb[184].mxu0  ;;  %v2391_v27 = vpop.f32.mrb[184].mxu1 }
 0x256   : > { %5560 = vst [vmem:[%s6735_s29 + $0x168] sm:$0xff] %v5109_v24   ;;  %5624 = vst [vmem:[%s6735_s29 + $0x368] sm:$0xff] %v5429_v58   ;;  %v1880_v28 = vadd.f32 %v7271_v0, %v1879_v26  ;;  %v5964_v29 = vpop.f32.mrb[185].mxu0  ;;  %v2392_v30 = vadd.f32 %v7271_v0, %v2391_v27  ;;  %v6220_v31 = vpop.f32.mrb[185].mxu1 }
 0x257   : > { %v1882_v32 = vpop.f32.mrb[186].mxu0  ;;  %v2394_v33 = vpop.f32.mrb[186].mxu1 }
 0x258   : > { %v1883_v34 = vadd.f32 %v7271_v0, %v1882_v32  ;;  %v5965_v35 = vpop.f32.mrb[187].mxu0  ;;  %v2746_v36 = vmax.f32 %v2392_v30, 0.0  ;;  %v2395_v37 = vadd.f32 %v7271_v0, %v2394_v33  ;;  %v6221_v38 = vpop.f32.mrb[187].mxu1  ;;  %v2618_v39 = vmax.f32 %v1880_v28, 0.0 }
 0x25a   : > { %v2619_v40 = vmax.f32 %v1883_v34, 0.0  ;;  %v2747_v41 = vmax.f32 %v2395_v37, 0.0 }
 0x25c   : > { %v5114_v42 = vpack.c.bf16 %v2619_v40, %v2618_v39  ;;  %v5434_v43 = vpack.c.bf16 %v2747_v41, %v2746_v36 }
 0x25d   : > { %v1887_v1 = vpop.f32.mrb[188].mxu0  ;;  %v2399_v44 = vpop.f32.mrb[188].mxu1 }
 0x25e   : > { %5561 = vst [vmem:[%s6735_s29 + $0x170] sm:$0xff] %v5114_v42   ;;  %5625 = vst [vmem:[%s6735_s29 + $0x370] sm:$0xff] %v5434_v43   ;;  %v1888_v45 = vadd.f32 %v7271_v0, %v1887_v1  ;;  %v5968_v46 = vpop.f32.mrb[189].mxu0  ;;  %v2400_v47 = vadd.f32 %v7271_v0, %v2399_v44  ;;  %v6224_v48 = vpop.f32.mrb[189].mxu1 }
 0x25f   : > { %v1890_v49 = vpop.f32.mrb[190].mxu0  ;;  %v2402_v50 = vpop.f32.mrb[190].mxu1 }
 0x260   : > { %v1891_v51 = vadd.f32 %v7271_v0, %v1890_v49  ;;  %v5969_v52 = vpop.f32.mrb[191].mxu0  ;;  %v2748_v53 = vmax.f32 %v2400_v47, 0.0  ;;  %v2403_v54 = vadd.f32 %v7271_v0, %v2402_v50  ;;  %v6225_v55 = vpop.f32.mrb[191].mxu1  ;;  %v2620_v56 = vmax.f32 %v1888_v45, 0.0 }
 0x262   : > { %v2621_v57 = vmax.f32 %v1891_v51, 0.0  ;;  %v2749_v59 = vmax.f32 %v2403_v54, 0.0 }
 0x264   : > { %v5119_v60 = vpack.c.bf16 %v2621_v57, %v2620_v56  ;;  %v5439_v61 = vpack.c.bf16 %v2749_v59, %v2748_v53 }
 0x265   : > { %v1895_v62 = vpop.f32.mrb[192].mxu0  ;;  %v2407_v63 = vpop.f32.mrb[192].mxu1 }
 0x266   : > { %5562 = vst [vmem:[%s6735_s29 + $0x178] sm:$0xff] %v5119_v60   ;;  %5626 = vst [vmem:[%s6735_s29 + $0x378] sm:$0xff] %v5439_v61   ;;  %v1896_v2 = vadd.f32 %v7271_v0, %v1895_v62  ;;  %v5972_v3 = vpop.f32.mrb[193].mxu0  ;;  %v2408_v25 = vadd.f32 %v7271_v0, %v2407_v63  ;;  %v6228_v4 = vpop.f32.mrb[193].mxu1 }
 0x267   : > { %v1898_v5 = vpop.f32.mrb[194].mxu0  ;;  %v2410_v6 = vpop.f32.mrb[194].mxu1 }
 0x268   : > { %v1899_v7 = vadd.f32 %v7271_v0, %v1898_v5  ;;  %v5973_v8 = vpop.f32.mrb[195].mxu0  ;;  %v2750_v9 = vmax.f32 %v2408_v25, 0.0  ;;  %v2411_v10 = vadd.f32 %v7271_v0, %v2410_v6  ;;  %v6229_v11 = vpop.f32.mrb[195].mxu1  ;;  %v2622_v12 = vmax.f32 %v1896_v2, 0.0 }
 0x26a   : > { %v2623_v13 = vmax.f32 %v1899_v7, 0.0  ;;  %v2751_v14 = vmax.f32 %v2411_v10, 0.0 }
 0x26c   : > { %v5124_v15 = vpack.c.bf16 %v2623_v13, %v2622_v12  ;;  %v5444_v16 = vpack.c.bf16 %v2751_v14, %v2750_v9 }
 0x26d   : > { %v1903_v17 = vpop.f32.mrb[196].mxu0  ;;  %v2415_v18 = vpop.f32.mrb[196].mxu1 }
 0x26e   : > { %5563 = vst [vmem:[%s6735_s29 + $0x180] sm:$0xff] %v5124_v15   ;;  %5627 = vst [vmem:[%s6735_s29 + $0x380] sm:$0xff] %v5444_v16   ;;  %v1904_v19 = vadd.f32 %v7271_v0, %v1903_v17  ;;  %v5976_v20 = vpop.f32.mrb[197].mxu0  ;;  %v2416_v21 = vadd.f32 %v7271_v0, %v2415_v18  ;;  %v6232_v22 = vpop.f32.mrb[197].mxu1 }
 0x26f   : > { %v1906_v23 = vpop.f32.mrb[198].mxu0  ;;  %v2418_v24 = vpop.f32.mrb[198].mxu1 }
 0x270   : > { %v1907_v58 = vadd.f32 %v7271_v0, %v1906_v23  ;;  %v5977_v26 = vpop.f32.mrb[199].mxu0  ;;  %v2752_v27 = vmax.f32 %v2416_v21, 0.0  ;;  %v2419_v28 = vadd.f32 %v7271_v0, %v2418_v24  ;;  %v6233_v29 = vpop.f32.mrb[199].mxu1  ;;  %v2624_v30 = vmax.f32 %v1904_v19, 0.0 }
 0x272   : > { %v2625_v31 = vmax.f32 %v1907_v58, 0.0  ;;  %v2753_v32 = vmax.f32 %v2419_v28, 0.0 }
 0x274   : > { %v5129_v33 = vpack.c.bf16 %v2625_v31, %v2624_v30  ;;  %v5449_v34 = vpack.c.bf16 %v2753_v32, %v2752_v27 }
 0x275   : > { %v1911_v35 = vpop.f32.mrb[200].mxu0  ;;  %v2423_v36 = vpop.f32.mrb[200].mxu1 }
 0x276   : > { %5564 = vst [vmem:[%s6735_s29 + $0x188] sm:$0xff] %v5129_v33   ;;  %5628 = vst [vmem:[%s6735_s29 + $0x388] sm:$0xff] %v5449_v34   ;;  %v1912_v37 = vadd.f32 %v7271_v0, %v1911_v35  ;;  %v5980_v38 = vpop.f32.mrb[201].mxu0  ;;  %v2424_v39 = vadd.f32 %v7271_v0, %v2423_v36  ;;  %v6236_v40 = vpop.f32.mrb[201].mxu1 }
 0x277   : > { %v1914_v41 = vpop.f32.mrb[202].mxu0  ;;  %v2426_v42 = vpop.f32.mrb[202].mxu1 }
 0x278   : > { %v1915_v43 = vadd.f32 %v7271_v0, %v1914_v41  ;;  %v5981_v1 = vpop.f32.mrb[203].mxu0  ;;  %v2754_v44 = vmax.f32 %v2424_v39, 0.0  ;;  %v2427_v45 = vadd.f32 %v7271_v0, %v2426_v42  ;;  %v6237_v46 = vpop.f32.mrb[203].mxu1  ;;  %v2626_v47 = vmax.f32 %v1912_v37, 0.0 }
 0x27a   : > { %v2627_v48 = vmax.f32 %v1915_v43, 0.0  ;;  %v2755_v49 = vmax.f32 %v2427_v45, 0.0 }
 0x27c   : > { %v5134_v50 = vpack.c.bf16 %v2627_v48, %v2626_v47  ;;  %v5454_v51 = vpack.c.bf16 %v2755_v49, %v2754_v44 }
 0x27d   : > { %v1919_v52 = vpop.f32.mrb[204].mxu0  ;;  %v2431_v53 = vpop.f32.mrb[204].mxu1 }
 0x27e   : > { %5565 = vst [vmem:[%s6735_s29 + $0x190] sm:$0xff] %v5134_v50   ;;  %5629 = vst [vmem:[%s6735_s29 + $0x390] sm:$0xff] %v5454_v51   ;;  %v1920_v54 = vadd.f32 %v7271_v0, %v1919_v52  ;;  %v5984_v55 = vpop.f32.mrb[205].mxu0  ;;  %v2432_v56 = vadd.f32 %v7271_v0, %v2431_v53  ;;  %v6240_v57 = vpop.f32.mrb[205].mxu1 }
 0x27f   : > { %v1922_v59 = vpop.f32.mrb[206].mxu0  ;;  %v2434_v60 = vpop.f32.mrb[206].mxu1 }
 0x280   : > { %v1923_v61 = vadd.f32 %v7271_v0, %v1922_v59  ;;  %v5985_v62 = vpop.f32.mrb[207].mxu0  ;;  %v2756_v63 = vmax.f32 %v2432_v56, 0.0  ;;  %v2435_v2 = vadd.f32 %v7271_v0, %v2434_v60  ;;  %v6241_v3 = vpop.f32.mrb[207].mxu1  ;;  %v2628_v25 = vmax.f32 %v1920_v54, 0.0 }
 0x282   : > { %v2629_v4 = vmax.f32 %v1923_v61, 0.0  ;;  %v2757_v5 = vmax.f32 %v2435_v2, 0.0 }
 0x284   : > { %v5139_v6 = vpack.c.bf16 %v2629_v4, %v2628_v25  ;;  %v5459_v7 = vpack.c.bf16 %v2757_v5, %v2756_v63 }
 0x285   : > { %v1927_v8 = vpop.f32.mrb[208].mxu0  ;;  %v2439_v9 = vpop.f32.mrb[208].mxu1 }
 0x286   : > { %5566 = vst [vmem:[%s6735_s29 + $0x198] sm:$0xff] %v5139_v6   ;;  %5630 = vst [vmem:[%s6735_s29 + $0x398] sm:$0xff] %v5459_v7   ;;  %v1928_v10 = vadd.f32 %v7271_v0, %v1927_v8  ;;  %v5988_v11 = vpop.f32.mrb[209].mxu0  ;;  %v2440_v12 = vadd.f32 %v7271_v0, %v2439_v9  ;;  %v6244_v13 = vpop.f32.mrb[209].mxu1 }
 0x287   : > { %v1930_v14 = vpop.f32.mrb[210].mxu0  ;;  %v2442_v15 = vpop.f32.mrb[210].mxu1 }
 0x288   : > { %v1931_v16 = vadd.f32 %v7271_v0, %v1930_v14  ;;  %v5989_v17 = vpop.f32.mrb[211].mxu0  ;;  %v2758_v18 = vmax.f32 %v2440_v12, 0.0  ;;  %v2443_v19 = vadd.f32 %v7271_v0, %v2442_v15  ;;  %v6245_v20 = vpop.f32.mrb[211].mxu1  ;;  %v2630_v21 = vmax.f32 %v1928_v10, 0.0 }
 0x28a   : > { %v2631_v22 = vmax.f32 %v1931_v16, 0.0  ;;  %v2759_v23 = vmax.f32 %v2443_v19, 0.0 }
 0x28c   : > { %v5144_v24 = vpack.c.bf16 %v2631_v22, %v2630_v21  ;;  %v5464_v58 = vpack.c.bf16 %v2759_v23, %v2758_v18 }
 0x28d   : > { %v1935_v26 = vpop.f32.mrb[212].mxu0  ;;  %v2447_v27 = vpop.f32.mrb[212].mxu1 }
 0x28e   : > { %5567 = vst [vmem:[%s6735_s29 + $0x1a0] sm:$0xff] %v5144_v24   ;;  %5631 = vst [vmem:[%s6735_s29 + $0x3a0] sm:$0xff] %v5464_v58   ;;  %v1936_v28 = vadd.f32 %v7271_v0, %v1935_v26  ;;  %v5992_v29 = vpop.f32.mrb[213].mxu0  ;;  %v2448_v30 = vadd.f32 %v7271_v0, %v2447_v27  ;;  %v6248_v31 = vpop.f32.mrb[213].mxu1 }
 0x28f   : > { %v1938_v32 = vpop.f32.mrb[214].mxu0  ;;  %v2450_v33 = vpop.f32.mrb[214].mxu1 }
 0x290   : > { %v1939_v34 = vadd.f32 %v7271_v0, %v1938_v32  ;;  %v5993_v35 = vpop.f32.mrb[215].mxu0  ;;  %v2760_v36 = vmax.f32 %v2448_v30, 0.0  ;;  %v2451_v37 = vadd.f32 %v7271_v0, %v2450_v33  ;;  %v6249_v38 = vpop.f32.mrb[215].mxu1  ;;  %v2632_v39 = vmax.f32 %v1936_v28, 0.0 }
 0x292   : > { %v2633_v40 = vmax.f32 %v1939_v34, 0.0  ;;  %v2761_v41 = vmax.f32 %v2451_v37, 0.0 }
 0x294   : > { %v5149_v42 = vpack.c.bf16 %v2633_v40, %v2632_v39  ;;  %v5469_v43 = vpack.c.bf16 %v2761_v41, %v2760_v36 }
 0x295   : > { %v1943_v1 = vpop.f32.mrb[216].mxu0  ;;  %v2455_v44 = vpop.f32.mrb[216].mxu1 }
 0x296   : > { %5568 = vst [vmem:[%s6735_s29 + $0x1a8] sm:$0xff] %v5149_v42   ;;  %5632 = vst [vmem:[%s6735_s29 + $0x3a8] sm:$0xff] %v5469_v43   ;;  %v1944_v45 = vadd.f32 %v7271_v0, %v1943_v1  ;;  %v5996_v46 = vpop.f32.mrb[217].mxu0  ;;  %v2456_v47 = vadd.f32 %v7271_v0, %v2455_v44  ;;  %v6252_v48 = vpop.f32.mrb[217].mxu1 }
 0x297   : > { %v1946_v49 = vpop.f32.mrb[218].mxu0  ;;  %v2458_v50 = vpop.f32.mrb[218].mxu1 }
 0x298   : > { %v1947_v51 = vadd.f32 %v7271_v0, %v1946_v49  ;;  %v5997_v52 = vpop.f32.mrb[219].mxu0  ;;  %v2762_v53 = vmax.f32 %v2456_v47, 0.0  ;;  %v2459_v54 = vadd.f32 %v7271_v0, %v2458_v50  ;;  %v6253_v55 = vpop.f32.mrb[219].mxu1  ;;  %v2634_v56 = vmax.f32 %v1944_v45, 0.0 }
 0x29a   : > { %v2635_v57 = vmax.f32 %v1947_v51, 0.0  ;;  %v2763_v59 = vmax.f32 %v2459_v54, 0.0 }
 0x29c   : > { %v5154_v60 = vpack.c.bf16 %v2635_v57, %v2634_v56  ;;  %v5474_v61 = vpack.c.bf16 %v2763_v59, %v2762_v53 }
 0x29d   : > { %v1951_v62 = vpop.f32.mrb[220].mxu0  ;;  %v2463_v63 = vpop.f32.mrb[220].mxu1 }
 0x29e   : > { %5569 = vst [vmem:[%s6735_s29 + $0x1b0] sm:$0xff] %v5154_v60   ;;  %5633 = vst [vmem:[%s6735_s29 + $0x3b0] sm:$0xff] %v5474_v61   ;;  %v1952_v2 = vadd.f32 %v7271_v0, %v1951_v62  ;;  %v6000_v3 = vpop.f32.mrb[221].mxu0  ;;  %v2464_v25 = vadd.f32 %v7271_v0, %v2463_v63  ;;  %v6256_v4 = vpop.f32.mrb[221].mxu1 }
 0x29f   : > { %v1954_v5 = vpop.f32.mrb[222].mxu0  ;;  %v2466_v6 = vpop.f32.mrb[222].mxu1 }
 0x2a0   : > { %v1955_v7 = vadd.f32 %v7271_v0, %v1954_v5  ;;  %v6001_v8 = vpop.f32.mrb[223].mxu0  ;;  %v2764_v9 = vmax.f32 %v2464_v25, 0.0  ;;  %v2467_v10 = vadd.f32 %v7271_v0, %v2466_v6  ;;  %v6257_v11 = vpop.f32.mrb[223].mxu1  ;;  %v2636_v12 = vmax.f32 %v1952_v2, 0.0 }
 0x2a2   : > { %v2637_v13 = vmax.f32 %v1955_v7, 0.0  ;;  %v2765_v14 = vmax.f32 %v2467_v10, 0.0 }
 0x2a4   : > { %v5159_v15 = vpack.c.bf16 %v2637_v13, %v2636_v12  ;;  %v5479_v16 = vpack.c.bf16 %v2765_v14, %v2764_v9 }
 0x2a5   : > { %v1959_v17 = vpop.f32.mrb[224].mxu0  ;;  %v2471_v18 = vpop.f32.mrb[224].mxu1 }
 0x2a6   : > { %5570 = vst [vmem:[%s6735_s29 + $0x1b8] sm:$0xff] %v5159_v15   ;;  %5634 = vst [vmem:[%s6735_s29 + $0x3b8] sm:$0xff] %v5479_v16   ;;  %v1960_v19 = vadd.f32 %v7271_v0, %v1959_v17  ;;  %v6004_v20 = vpop.f32.mrb[225].mxu0  ;;  %v2472_v21 = vadd.f32 %v7271_v0, %v2471_v18  ;;  %v6260_v22 = vpop.f32.mrb[225].mxu1 }
 0x2a7   : > { %v1962_v23 = vpop.f32.mrb[226].mxu0  ;;  %v2474_v24 = vpop.f32.mrb[226].mxu1 }
 0x2a8   : > { %v1963_v58 = vadd.f32 %v7271_v0, %v1962_v23  ;;  %v6005_v26 = vpop.f32.mrb[227].mxu0  ;;  %v2766_v27 = vmax.f32 %v2472_v21, 0.0  ;;  %v2475_v28 = vadd.f32 %v7271_v0, %v2474_v24  ;;  %v6261_v29 = vpop.f32.mrb[227].mxu1  ;;  %v2638_v30 = vmax.f32 %v1960_v19, 0.0 }
 0x2aa   : > { %v2639_v31 = vmax.f32 %v1963_v58, 0.0  ;;  %v2767_v32 = vmax.f32 %v2475_v28, 0.0 }
 0x2ac   : > { %v5164_v33 = vpack.c.bf16 %v2639_v31, %v2638_v30  ;;  %v5484_v34 = vpack.c.bf16 %v2767_v32, %v2766_v27 }
 0x2ad   : > { %v1967_v35 = vpop.f32.mrb[228].mxu0  ;;  %v2479_v36 = vpop.f32.mrb[228].mxu1 }
 0x2ae   : > { %5571 = vst [vmem:[%s6735_s29 + $0x1c0] sm:$0xff] %v5164_v33   ;;  %5635 = vst [vmem:[%s6735_s29 + $0x3c0] sm:$0xff] %v5484_v34   ;;  %v1968_v37 = vadd.f32 %v7271_v0, %v1967_v35  ;;  %v6008_v38 = vpop.f32.mrb[229].mxu0  ;;  %v2480_v39 = vadd.f32 %v7271_v0, %v2479_v36  ;;  %v6264_v40 = vpop.f32.mrb[229].mxu1 }
 0x2af   : > { %v1970_v41 = vpop.f32.mrb[230].mxu0  ;;  %v2482_v42 = vpop.f32.mrb[230].mxu1 }
 0x2b0   : > { %v1971_v43 = vadd.f32 %v7271_v0, %v1970_v41  ;;  %v6009_v1 = vpop.f32.mrb[231].mxu0  ;;  %v2768_v44 = vmax.f32 %v2480_v39, 0.0  ;;  %v2483_v45 = vadd.f32 %v7271_v0, %v2482_v42  ;;  %v6265_v46 = vpop.f32.mrb[231].mxu1  ;;  %v2640_v47 = vmax.f32 %v1968_v37, 0.0 }
 0x2b2   : > { %v2641_v48 = vmax.f32 %v1971_v43, 0.0  ;;  %v2769_v49 = vmax.f32 %v2483_v45, 0.0 }
 0x2b4   : > { %v5169_v50 = vpack.c.bf16 %v2641_v48, %v2640_v47  ;;  %v5489_v51 = vpack.c.bf16 %v2769_v49, %v2768_v44 }
 0x2b5   : > { %v1975_v52 = vpop.f32.mrb[232].mxu0  ;;  %v2487_v53 = vpop.f32.mrb[232].mxu1 }
 0x2b6   : > { %5572 = vst [vmem:[%s6735_s29 + $0x1c8] sm:$0xff] %v5169_v50   ;;  %5636 = vst [vmem:[%s6735_s29 + $0x3c8] sm:$0xff] %v5489_v51   ;;  %v1976_v54 = vadd.f32 %v7271_v0, %v1975_v52  ;;  %v6012_v55 = vpop.f32.mrb[233].mxu0  ;;  %v2488_v56 = vadd.f32 %v7271_v0, %v2487_v53  ;;  %v6268_v57 = vpop.f32.mrb[233].mxu1 }
 0x2b7   : > { %v1978_v59 = vpop.f32.mrb[234].mxu0  ;;  %v2490_v60 = vpop.f32.mrb[234].mxu1 }
 0x2b8   : > { %v1979_v61 = vadd.f32 %v7271_v0, %v1978_v59  ;;  %v6013_v62 = vpop.f32.mrb[235].mxu0  ;;  %v2770_v63 = vmax.f32 %v2488_v56, 0.0  ;;  %v2491_v2 = vadd.f32 %v7271_v0, %v2490_v60  ;;  %v6269_v3 = vpop.f32.mrb[235].mxu1  ;;  %v2642_v25 = vmax.f32 %v1976_v54, 0.0 }
 0x2ba   : > { %v2643_v4 = vmax.f32 %v1979_v61, 0.0  ;;  %v2771_v5 = vmax.f32 %v2491_v2, 0.0 }
 0x2bc   : > { %v5174_v6 = vpack.c.bf16 %v2643_v4, %v2642_v25  ;;  %v5494_v7 = vpack.c.bf16 %v2771_v5, %v2770_v63 }
 0x2bd   : > { %v1983_v8 = vpop.f32.mrb[236].mxu0  ;;  %v2495_v9 = vpop.f32.mrb[236].mxu1 }
 0x2be   : > { %5573 = vst [vmem:[%s6735_s29 + $0x1d0] sm:$0xff] %v5174_v6   ;;  %5637 = vst [vmem:[%s6735_s29 + $0x3d0] sm:$0xff] %v5494_v7   ;;  %v1984_v10 = vadd.f32 %v7271_v0, %v1983_v8  ;;  %v6016_v11 = vpop.f32.mrb[237].mxu0  ;;  %v2496_v12 = vadd.f32 %v7271_v0, %v2495_v9  ;;  %v6272_v13 = vpop.f32.mrb[237].mxu1 }
 0x2bf   : > { %v1986_v14 = vpop.f32.mrb[238].mxu0  ;;  %v2498_v15 = vpop.f32.mrb[238].mxu1 }
 0x2c0   : > { %v1987_v16 = vadd.f32 %v7271_v0, %v1986_v14  ;;  %v6017_v17 = vpop.f32.mrb[239].mxu0  ;;  %v2772_v18 = vmax.f32 %v2496_v12, 0.0  ;;  %v2499_v19 = vadd.f32 %v7271_v0, %v2498_v15  ;;  %v6273_v20 = vpop.f32.mrb[239].mxu1  ;;  %v2644_v21 = vmax.f32 %v1984_v10, 0.0 }
 0x2c2   : > { %v2645_v22 = vmax.f32 %v1987_v16, 0.0  ;;  %v2773_v23 = vmax.f32 %v2499_v19, 0.0 }
 0x2c4   : > { %v5179_v24 = vpack.c.bf16 %v2645_v22, %v2644_v21  ;;  %v5499_v58 = vpack.c.bf16 %v2773_v23, %v2772_v18 }
 0x2c5   : > { %v1991_v26 = vpop.f32.mrb[240].mxu0  ;;  %v2503_v27 = vpop.f32.mrb[240].mxu1 }
 0x2c6   : > { %5574 = vst [vmem:[%s6735_s29 + $0x1d8] sm:$0xff] %v5179_v24   ;;  %5638 = vst [vmem:[%s6735_s29 + $0x3d8] sm:$0xff] %v5499_v58   ;;  %v1992_v28 = vadd.f32 %v7271_v0, %v1991_v26  ;;  %v6020_v29 = vpop.f32.mrb[241].mxu0  ;;  %v2504_v30 = vadd.f32 %v7271_v0, %v2503_v27  ;;  %v6276_v31 = vpop.f32.mrb[241].mxu1 }
 0x2c7   : > { %v1994_v32 = vpop.f32.mrb[242].mxu0  ;;  %v2506_v33 = vpop.f32.mrb[242].mxu1 }
 0x2c8   : > { %v1995_v34 = vadd.f32 %v7271_v0, %v1994_v32  ;;  %v6021_v35 = vpop.f32.mrb[243].mxu0  ;;  %v2774_v36 = vmax.f32 %v2504_v30, 0.0  ;;  %v2507_v37 = vadd.f32 %v7271_v0, %v2506_v33  ;;  %v6277_v38 = vpop.f32.mrb[243].mxu1  ;;  %v2646_v39 = vmax.f32 %v1992_v28, 0.0 }
 0x2ca   : > { %v2647_v40 = vmax.f32 %v1995_v34, 0.0  ;;  %v2775_v41 = vmax.f32 %v2507_v37, 0.0 }
 0x2cc   : > { %v5184_v42 = vpack.c.bf16 %v2647_v40, %v2646_v39  ;;  %v5504_v43 = vpack.c.bf16 %v2775_v41, %v2774_v36 }
 0x2cd   : > { %v1999_v1 = vpop.f32.mrb[244].mxu0  ;;  %v2511_v44 = vpop.f32.mrb[244].mxu1 }
 0x2ce   : > { %5575 = vst [vmem:[%s6735_s29 + $0x1e0] sm:$0xff] %v5184_v42   ;;  %5639 = vst [vmem:[%s6735_s29 + $0x3e0] sm:$0xff] %v5504_v43   ;;  %v2000_v45 = vadd.f32 %v7271_v0, %v1999_v1  ;;  %v6024_v46 = vpop.f32.mrb[245].mxu0  ;;  %v2512_v47 = vadd.f32 %v7271_v0, %v2511_v44  ;;  %v6280_v48 = vpop.f32.mrb[245].mxu1 }
 0x2cf   : > { %v2002_v49 = vpop.f32.mrb[246].mxu0  ;;  %v2514_v50 = vpop.f32.mrb[246].mxu1 }
 0x2d0   : > { %v2003_v51 = vadd.f32 %v7271_v0, %v2002_v49  ;;  %v6025_v52 = vpop.f32.mrb[247].mxu0  ;;  %v2776_v53 = vmax.f32 %v2512_v47, 0.0  ;;  %v2515_v54 = vadd.f32 %v7271_v0, %v2514_v50  ;;  %v6281_v55 = vpop.f32.mrb[247].mxu1  ;;  %v2648_v56 = vmax.f32 %v2000_v45, 0.0 }
 0x2d2   : > { %v2649_v57 = vmax.f32 %v2003_v51, 0.0  ;;  %v2777_v59 = vmax.f32 %v2515_v54, 0.0 }
 0x2d4   : > { %v5189_v60 = vpack.c.bf16 %v2649_v57, %v2648_v56  ;;  %v5509_v61 = vpack.c.bf16 %v2777_v59, %v2776_v53 }
 0x2d5   : > { %v2007_v62 = vpop.f32.mrb[248].mxu0  ;;  %v2519_v63 = vpop.f32.mrb[248].mxu1 }
 0x2d6   : > { %5576 = vst [vmem:[%s6735_s29 + $0x1e8] sm:$0xff] %v5189_v60   ;;  %5640 = vst [vmem:[%s6735_s29 + $0x3e8] sm:$0xff] %v5509_v61   ;;  %v2008_v2 = vadd.f32 %v7271_v0, %v2007_v62  ;;  %v6028_v3 = vpop.f32.mrb[249].mxu0  ;;  %v2520_v25 = vadd.f32 %v7271_v0, %v2519_v63  ;;  %v6284_v4 = vpop.f32.mrb[249].mxu1 }
 0x2d7   : > { %v2010_v5 = vpop.f32.mrb[250].mxu0  ;;  %v2522_v6 = vpop.f32.mrb[250].mxu1 }
 0x2d8   : > { %v2011_v7 = vadd.f32 %v7271_v0, %v2010_v5  ;;  %v6029_v8 = vpop.f32.mrb[251].mxu0  ;;  %v2778_v9 = vmax.f32 %v2520_v25, 0.0  ;;  %v2523_v10 = vadd.f32 %v7271_v0, %v2522_v6  ;;  %v6285_v11 = vpop.f32.mrb[251].mxu1  ;;  %v2650_v12 = vmax.f32 %v2008_v2, 0.0 }
 0x2da   : > { %v2651_v13 = vmax.f32 %v2011_v7, 0.0  ;;  %v2779_v14 = vmax.f32 %v2523_v10, 0.0 }
 0x2dc   : > { %v5194_v15 = vpack.c.bf16 %v2651_v13, %v2650_v12  ;;  %v5514_v16 = vpack.c.bf16 %v2779_v14, %v2778_v9 }
 0x2dd   : > { %v2015_v17 = vpop.f32.mrb[252].mxu0 }
 0x2de   : > { %5577 = vst [vmem:[%s6735_s29 + $0x1f0] sm:$0xff] %v5194_v15   ;;  %5641 = vst [vmem:[%s6735_s29 + $0x3f0] sm:$0xff] %v5514_v16   ;;  %v2016_v18 = vadd.f32 %v7271_v0, %v2015_v17  ;;  %v6032_v19 = vpop.f32.mrb[253].mxu0 }
 0x2df   : > { %v2018_v20 = vpop.f32.mrb[254].mxu0 }
 0x2e0   : > { %v2019_v21 = vadd.f32 %v7271_v0, %v2018_v20  ;;  %v6033_v22 = vpop.f32.mrb[255].mxu0  ;;  %v2652_v23 = vmax.f32 %v2016_v18, 0.0 }
 0x2e2   : > { %v2653_v24 = vmax.f32 %v2019_v21, 0.0 }
 0x2e4   : > { %v5199_v58 = vpack.c.bf16 %v2653_v24, %v2652_v23 }
 0x2e6   : > { %5578 = vst [vmem:[%s6735_s29 + $0x1f8] sm:$0xff] %v5199_v58  }
 0x2e7 PF: > { %s13_s12 = sadd.s32 1, %s6440_s12  }
 0x2e8   : > { %p10_p4 = scmp.ge.s32.totalorder %s13_s12, 5  }
 0x2ea   :  { %12 = sbr.rel (!%p10_p4) target bundleno = 1 (0x1), region = 62 }

// kernel: conv_encoder_hep_sl.4
= control target key start
LH: loop header
LB: loop body
LE: loop exit
PB: predicated region body
PF: predicated region fallthrough
CT: control target
= control target key end

     0   :  { %s6675_s12 = smov 0   ;;  %s7486_s0 = inlined_call_operand.vmem [shape: bf16[1472,1024], index: 0, kind: input, shape index: {}]   ;;  %s7487_s1 = inlined_call_operand.vmem [shape: bf16[1024,128], index: 1, kind: input, shape index: {}]   ;;  %s7488_s2 = inlined_call_operand.vmem [shape: f32[1,128], index: 2, kind: input, shape index: {}]   ;;  %s7489_s3 = inlined_call_operand.vmem [shape: bf16[1472,128], index: 3, kind: output, shape index: {}]  }
   0x1 LB: > { %s5117_s13 = sadd.s32 4294967295, %s6652_s12   ;;  %p5121_p0 = scmp.ge.s32.totalorder %s6652_s12, 1  ;;  %s6652_s12 = sphi %s6675_s12, %s13_s12  }
   0x2   : > { %p139_p1 = scmp.lt.s32.totalorder %s6652_s12, 3 }
   0x4   : > { %p140_p2 = pnand %p5121_p0, %p139_p1 }
   0x5   : > { %v6581_v0 = vld [vmem:[%s7487_s1] sm:$0xff] (!%p140_p2)   ;;  %v6654_v1 = vmov (!%p140_p2), 0   ;;  %v6583_v3 = vld [vmem:[%s7487_s1 + $0x8] sm:$0xff] (!%p140_p2)   ;;  %v6585_v5 = vld [vmem:[%s7487_s1 + $0x10] sm:$0xff] (!%p140_p2)   ;;  %s164_s5 = smul.u32 (!%p140_p2), 92, %s5117_s13 }
   0x6   : > { %143 = sbr.rel (%p140_p2) target bundleno = 1021 (0x3fd), region = 32  ;;  %2905 = vmatprep.subr.bf16.mxu1 (!%p140_p2), %v6654_v1  ;;  %3707 = vmatprep.subr.bf16.mxu0 (!%p140_p2), %v6654_v1  ;;  %v6582_v2 = vld [vmem:[%s7487_s1 + $0x100] sm:$0xff] (!%p140_p2)   ;;  %v6584_v4 = vld [vmem:[%s7487_s1 + $0x108] sm:$0xff] (!%p140_p2)   ;;  %v6586_v6 = vld [vmem:[%s7487_s1 + $0x110] sm:$0xff] (!%p140_p2)  }
   0x7   : > { %2906 = vmatpush1.bf16.msra.mxu1 (!%p140_p2), %v6581_v0  ;;  %3708 = vmatpush1.bf16.msra.mxu0 (!%p140_p2), %v6582_v2  ;;  %v6587_v7 = vld [vmem:[%s7487_s1 + $0x18] sm:$0xff] (!%p140_p2)   ;;  %v6589_v9 = vld [vmem:[%s7487_s1 + $0x20] sm:$0xff] (!%p140_p2)   ;;  %v6591_v11 = vld [vmem:[%s7487_s1 + $0x28] sm:$0xff] (!%p140_p2)   ;;  %p165_p3 = scmp.lt.s32.totalorder (!%p140_p2), %s164_s5, 183 }
   0x8   : > { %2907 = vmatprep.subr.bf16.mxu1 (!%p140_p2), %v6654_v1  ;;  %3709 = vmatprep.subr.bf16.mxu0 (!%p140_p2), %v6654_v1  ;;  %v6588_v8 = vld [vmem:[%s7487_s1 + $0x118] sm:$0xff] (!%p140_p2)   ;;  %v6590_v10 = vld [vmem:[%s7487_s1 + $0x120] sm:$0xff] (!%p140_p2)   ;;  %v6592_v12 = vld [vmem:[%s7487_s1 + $0x128] sm:$0xff] (!%p140_p2)  }
   0x9   : > { %v6593_v13 = vld [vmem:[%s7487_s1 + $0x30] sm:$0xff] (!%p140_p2)   ;;  %v6595_v15 = vld [vmem:[%s7487_s1 + $0x38] sm:$0xff] (!%p140_p2)   ;;  %v6597_v17 = vld [vmem:[%s7487_s1 + $0x40] sm:$0xff] (!%p140_p2)  }
   0xa   : > { %v6594_v14 = vld [vmem:[%s7487_s1 + $0x130] sm:$0xff] (!%p140_p2)   ;;  %v6596_v16 = vld [vmem:[%s7487_s1 + $0x138] sm:$0xff] (!%p140_p2)   ;;  %v6598_v18 = vld [vmem:[%s7487_s1 + $0x140] sm:$0xff] (!%p140_p2)  }
   0xb   : > { %2908 = vmatpush1.bf16.msra.mxu1 (!%p140_p2), %v6583_v3  ;;  %3710 = vmatpush1.bf16.msra.mxu0 (!%p140_p2), %v6584_v4  ;;  %v6599_v24 = vld [vmem:[%s7487_s1 + $0x48] sm:$0xff] (!%p140_p2)   ;;  %v6601_v27 = vld [vmem:[%s7487_s1 + $0x50] sm:$0xff] (!%p140_p2)   ;;  %v6603_v29 = vld [vmem:[%s7487_s1 + $0x58] sm:$0xff] (!%p140_p2)  }
   0xc   : > { %2909 = vmatprep.subr.bf16.mxu1 (!%p140_p2), %v6654_v1  ;;  %3711 = vmatprep.subr.bf16.mxu0 (!%p140_p2), %v6654_v1  ;;  %v6600_v26 = vld [vmem:[%s7487_s1 + $0x148] sm:$0xff] (!%p140_p2)   ;;  %v6602_v28 = vld [vmem:[%s7487_s1 + $0x150] sm:$0xff] (!%p140_p2)   ;;  %v6604_v30 = vld [vmem:[%s7487_s1 + $0x158] sm:$0xff] (!%p140_p2)  }
   0xd   : > { %s7491_s5 = smov (!%p165_p3, %s164_s5), 183  ;;  %v6605_v31 = vld [vmem:[%s7487_s1 + $0x60] sm:$0xff]   ;;  %v6607_v33 = vld [vmem:[%s7487_s1 + $0x68] sm:$0xff]   ;;  %v6609_v35 = vld [vmem:[%s7487_s1 + $0x70] sm:$0xff]  }
   0xe   : > { %s5652_s19 = sshll.u32 %s7491_s5, 5  ;;  %v6606_v32 = vld [vmem:[%s7487_s1 + $0x160] sm:$0xff]   ;;  %v6608_v34 = vld [vmem:[%s7487_s1 + $0x168] sm:$0xff]   ;;  %v6610_v36 = vld [vmem:[%s7487_s1 + $0x170] sm:$0xff]   ;;  %s5124_s27 = sshll.u32 %s7491_s5, 2 }
   0xf   : > { %2910 = vmatpush1.bf16.msra.mxu1 %v6585_v5  ;;  %3712 = vmatpush1.bf16.msra.mxu0 %v6586_v6  ;;  %s6755_s24 = scalar_lea.vmem %s7486_s0, %s5652_s19  ;;  %v6611_v37 = vld [vmem:[%s7487_s1 + $0x78] sm:$0xff]   ;;  %v6613_v45 = vld [vmem:[%s7487_s1 + $0x80] sm:$0xff]   ;;  %v6615_v51 = vld [vmem:[%s7487_s1 + $0x88] sm:$0xff]   ;;  %s7274_s30 = scalar_lea.vmem %s7489_s3, %s5124_s27 }
  0x10   : > { %2911 = vmatprep.subr.bf16.mxu1 %v6654_v1  ;;  %3713 = vmatprep.subr.bf16.mxu0 %v6654_v1  ;;  %v6766_v19 = vld [vmem:[%s6755_s24] sm:$0xff]  ;;  %v6772_v21 = vld [vmem:[%s6755_s24 + $0x10] sm:$0xff]  ;;  %v6612_v38 = vld [vmem:[%s7487_s1 + $0x178] sm:$0xff]  }
  0x11   : > { %v6769_v20 = vld [vmem:[%s6755_s24 + $0x20] sm:$0xff]  ;;  %v184_v23 = vld [vmem:[%s6755_s24 + $0x30] sm:$0xff]  ;;  %v6616_v54 = vld [vmem:[%s7487_s1 + $0x188] sm:$0xff]  }
  0x12   : > { %v5127_v22 = vcombine.high %v6766_v19, %v6769_v20  ;;  %v5131_v25 = vcombine.high %v6772_v21, %v184_v23  ;;  %v186_v39 = vld [vmem:[%s6755_s24 + $0x40] sm:$0xff]  ;;  %v5126_v41 = vcombine.low %v6766_v19, %v6769_v20  ;;  %v188_v42 = vld [vmem:[%s6755_s24 + $0x50] sm:$0xff]  ;;  %v5130_v44 = vcombine.low %v6772_v21, %v184_v23  ;;  %v6619_v2 = vld [vmem:[%s7487_s1 + $0x98] sm:$0xff]  }
  0x13   : > { %2912 = vmatpush1.bf16.msra.mxu1 %v6587_v7  ;;  %3714 = vmatpush1.bf16.msra.mxu0 %v6588_v8  ;;  %v190_v40 = vld [vmem:[%s6755_s24 + $0x60] sm:$0xff]  ;;  %v192_v43 = vld [vmem:[%s6755_s24 + $0x70] sm:$0xff]  ;;  %v6620_v3 = vld [vmem:[%s7487_s1 + $0x198] sm:$0xff]  }
  0x14   : > { %2913 = vmatprep.subr.bf16.mxu1 %v6654_v1  ;;  %3715 = vmatprep.subr.bf16.mxu0 %v6654_v1  ;;  %v6614_v46 = vld [vmem:[%s7487_s1 + $0x180] sm:$0xff]   ;;  %v5135_v47 = vcombine.high %v186_v39, %v190_v40  ;;  %v5139_v48 = vcombine.high %v188_v42, %v192_v43  ;;  %v196_v52 = vld [vmem:[%s6755_s24 + $0x90] sm:$0xff]  ;;  %v5134_v55 = vcombine.low %v186_v39, %v190_v40 }
  0x15   : > { %2937 = vmatprep.mubr.bf16.mxu1 %v5127_v22  ;;  %3739 = vmatprep.mubr.bf16.mxu0 %v5131_v25  ;;  %v194_v49 = vld [vmem:[%s6755_s24 + $0x80] sm:$0xff]  ;;  %v200_v53 = vld [vmem:[%s6755_s24 + $0xb0] sm:$0xff]  ;;  %v5138_v57 = vcombine.low %v188_v42, %v192_v43 }
  0x16   : > { %v198_v50 = vld [vmem:[%s6755_s24 + $0xa0] sm:$0xff]  ;;  %v6617_v56 = vld [vmem:[%s7487_s1 + $0x90] sm:$0xff]   ;;  %v5147_v60 = vcombine.high %v196_v52, %v200_v53  ;;  %v5146_v6 = vcombine.low %v196_v52, %v200_v53 }
  0x17   : > { %2914 = vmatpush1.bf16.msra.mxu1 %v6589_v9  ;;  %3716 = vmatpush1.bf16.msra.mxu0 %v6590_v10  ;;  %v5143_v58 = vcombine.high %v194_v49, %v198_v50  ;;  %v6618_v59 = vld [vmem:[%s7487_s1 + $0x190] sm:$0xff]   ;;  %v202_v61 = vld [vmem:[%s6755_s24 + $0xc0] sm:$0xff]  ;;  %v5142_v4 = vcombine.low %v194_v49, %v198_v50 }
  0x18   : > { %2915 = vmatprep.subr.bf16.mxu1 %v6654_v1  ;;  %3717 = vmatprep.subr.bf16.mxu0 %v6654_v1  ;;  %v206_v62 = vld [vmem:[%s6755_s24 + $0xe0] sm:$0xff]  ;;  %v204_v63 = vld [vmem:[%s6755_s24 + $0xd0] sm:$0xff] }
  0x19   : > { %v208_v0 = vld [vmem:[%s6755_s24 + $0xf0] sm:$0xff]  ;;  %v6621_v5 = vld [vmem:[%s7487_s1 + $0xa0] sm:$0xff]   ;;  %v5151_v7 = vcombine.high %v202_v61, %v206_v62 }
  0x1a   : > { %v6622_v8 = vld [vmem:[%s7487_s1 + $0x1a0] sm:$0xff]   ;;  %v5155_v9 = vcombine.high %v204_v63, %v208_v0  ;;  %v6625_v20 = vld [vmem:[%s7487_s1 + $0xb0] sm:$0xff]  }
  0x1b   : > { %2916 = vmatpush1.bf16.msra.mxu1 %v6591_v11  ;;  %3718 = vmatpush1.bf16.msra.mxu0 %v6592_v12  ;;  %v210_v10 = vld [vmem:[%s6755_s24 + $0x100] sm:$0xff]  ;;  %v212_v12 = vld [vmem:[%s6755_s24 + $0x110] sm:$0xff] }
  0x1c   : > { %2917 = vmatprep.subr.bf16.mxu1 %v6654_v1  ;;  %3719 = vmatprep.subr.bf16.mxu0 %v6654_v1  ;;  %v214_v11 = vld [vmem:[%s6755_s24 + $0x120] sm:$0xff]  ;;  %v6626_v21 = vld [vmem:[%s7487_s1 + $0x1b0] sm:$0xff]  }
  0x1d   : > { %v218_v22 = vld [vmem:[%s6755_s24 + $0x140] sm:$0xff]  ;;  %v224_v25 = vld [vmem:[%s6755_s24 + $0x170] sm:$0xff] }
  0x1e   : > { %v222_v23 = vld [vmem:[%s6755_s24 + $0x160] sm:$0xff]  ;;  %v236_v42 = vld [vmem:[%s6755_s24 + $0x1d0] sm:$0xff] }
  0x1f   : > { %2918 = vmatpush1.bf16.msra.mxu1 %v6593_v13  ;;  %3720 = vmatpush1.bf16.msra.mxu0 %v6594_v14  ;;  %v216_v13 = vld [vmem:[%s6755_s24 + $0x130] sm:$0xff]  ;;  %v6623_v14 = vld [vmem:[%s7487_s1 + $0xa8] sm:$0xff]   ;;  %v234_v40 = vld [vmem:[%s6755_s24 + $0x1c0] sm:$0xff] }
  0x20   : > { %2919 = vmatprep.subr.bf16.mxu1 %v6654_v1  ;;  %3721 = vmatprep.subr.bf16.mxu0 %v6654_v1  ;;  %v5163_v19 = vcombine.high %v212_v12, %v216_v13  ;;  %v240_v43 = vld [vmem:[%s6755_s24 + $0x1f0] sm:$0xff]  ;;  %v246_v49 = vld [vmem:[%s6755_s24 + $0x220] sm:$0xff] }
  0x21   : > { %v244_v50 = vld [vmem:[%s6755_s24 + $0x210] sm:$0xff]  ;;  %v5186_v53 = vcombine.low %v236_v42, %v240_v43 }
  0x23   : > { %2920 = vmatpush1.bf16.msra.mxu1 %v6595_v15  ;;  %3722 = vmatpush1.bf16.msra.mxu0 %v6596_v16  ;;  %v6624_v15 = vld [vmem:[%s7487_s1 + $0x1a8] sm:$0xff]   ;;  %v5150_v16 = vcombine.low %v202_v61, %v206_v62  ;;  %v256_v61 = vld [vmem:[%s6755_s24 + $0x270] sm:$0xff] }
  0x24   : > { %2921 = vmatprep.subr.bf16.mxu1 %v6654_v1  ;;  %3723 = vmatprep.subr.bf16.mxu0 %v6654_v1 }
  0x27   : > { %2922 = vmatpush1.bf16.msra.mxu1 %v6597_v17  ;;  %3724 = vmatpush1.bf16.msra.mxu0 %v6598_v18  ;;  %v5154_v17 = vcombine.low %v204_v63, %v208_v0  ;;  %v5159_v18 = vcombine.high %v210_v10, %v214_v11 }
  0x28   : > { %2923 = vmatprep.subr.bf16.mxu1 %v6654_v1  ;;  %3725 = vmatprep.subr.bf16.mxu0 %v6654_v1 }
  0x2b   : > { %2924 = vmatpush1.bf16.msra.mxu1 %v6599_v24  ;;  %3726 = vmatpush1.bf16.msra.mxu0 %v6600_v26  ;;  %v220_v24 = vld [vmem:[%s6755_s24 + $0x150] sm:$0xff]  ;;  %v5158_v26 = vcombine.low %v210_v10, %v214_v11  ;;  %v266_v11 = vld [vmem:[%s6755_s24 + $0x2c0] sm:$0xff] }
  0x2c   : > { %2925 = vmatprep.subr.bf16.mxu1 %v6654_v1  ;;  %3727 = vmatprep.subr.bf16.mxu0 %v6654_v1 }
  0x2f   : > { %2926 = vmatpush1.bf16.msra.mxu1 %v6601_v27  ;;  %3728 = vmatpush1.bf16.msra.mxu0 %v6602_v28  ;;  %v5162_v27 = vcombine.low %v212_v12, %v216_v13  ;;  %v5167_v28 = vcombine.high %v218_v22, %v222_v23  ;;  %v270_v12 = vld [vmem:[%s6755_s24 + $0x2e0] sm:$0xff]  ;;  %v268_v13 = vld [vmem:[%s6755_s24 + $0x2d0] sm:$0xff] }
  0x30   : > { %2927 = vmatprep.subr.bf16.mxu1 %v6654_v1  ;;  %3729 = vmatprep.subr.bf16.mxu0 %v6654_v1 }
  0x33   : > { %2928 = vmatpush1.bf16.msra.mxu1 %v6603_v29  ;;  %3730 = vmatpush1.bf16.msra.mxu0 %v6604_v30  ;;  %v5171_v29 = vcombine.high %v220_v24, %v224_v25  ;;  %v6627_v30 = vld [vmem:[%s7487_s1 + $0xb8] sm:$0xff]  }
  0x34   : > { %2929 = vmatprep.subr.bf16.mxu1 %v6654_v1  ;;  %3731 = vmatprep.subr.bf16.mxu0 %v6654_v1 }
  0x37   : > { %2930 = vmatpush1.bf16.msra.mxu1 %v6605_v31  ;;  %3732 = vmatpush1.bf16.msra.mxu0 %v6606_v32  ;;  %v6628_v31 = vld [vmem:[%s7487_s1 + $0x1b8] sm:$0xff]   ;;  %v226_v32 = vld [vmem:[%s6755_s24 + $0x180] sm:$0xff] }
  0x38   : > { %2931 = vmatprep.subr.bf16.mxu1 %v6654_v1  ;;  %3733 = vmatprep.subr.bf16.mxu0 %v6654_v1 }
  0x3b   : > { %2932 = vmatpush1.bf16.msra.mxu1 %v6607_v33  ;;  %3734 = vmatpush1.bf16.msra.mxu0 %v6608_v34  ;;  %v230_v33 = vld [vmem:[%s6755_s24 + $0x1a0] sm:$0xff]  ;;  %v228_v34 = vld [vmem:[%s6755_s24 + $0x190] sm:$0xff] }
  0x3c   : > { %2933 = vmatprep.subr.bf16.mxu1 %v6654_v1  ;;  %3735 = vmatprep.subr.bf16.mxu0 %v6654_v1 }
  0x3f   : > { %2934 = vmatpush1.bf16.msra.mxu1 %v6609_v35  ;;  %3736 = vmatpush1.bf16.msra.mxu0 %v6610_v36  ;;  %v232_v35 = vld [vmem:[%s6755_s24 + $0x1b0] sm:$0xff]  ;;  %v5166_v36 = vcombine.low %v218_v22, %v222_v23  ;;  %v278_v22 = vld [vmem:[%s6755_s24 + $0x320] sm:$0xff] }
  0x40   : > { %2935 = vmatprep.subr.bf16.mxu1 %v6654_v1  ;;  %3737 = vmatprep.subr.bf16.mxu0 %v6654_v1  ;;  %v5179_v39 = vcombine.high %v228_v34, %v232_v35  ;;  %v276_v23 = vld [vmem:[%s6755_s24 + $0x310] sm:$0xff] }
  0x43   : > { %2936 = vmatpush1.bf16.msra.mxu1 %v6611_v37  ;;  %3738 = vmatpush1.bf16.msra.mxu0 %v6612_v38  ;;  %v5170_v37 = vcombine.low %v220_v24, %v224_v25  ;;  %v5175_v38 = vcombine.high %v226_v32, %v230_v33  ;;  %v280_v24 = vld [vmem:[%s6755_s24 + $0x330] sm:$0xff]  ;;  %v5214_v25 = vcombine.low %v266_v11, %v270_v12 }
  0x44   : > { %3306 = vmatprep.subr.bf16.mxu1 %v6654_v1  ;;  %4108 = vmatprep.subr.bf16.mxu0 %v6654_v1 }
  0x46   : > { %2938 = vmatmul.mubr.bf16.vlgmr.msra.gmra.mrb[0].mxu1 %v5126_v41  ;;  %3740 = vmatmul.mubr.bf16.vlgmr.msra.gmra.mrb[0].mxu0 %v5130_v44  ;;  %v238_v41 = vld [vmem:[%s6755_s24 + $0x1e0] sm:$0xff]  ;;  %v5174_v44 = vcombine.low %v226_v32, %v230_v33  ;;  %v288_v32 = vld [vmem:[%s6755_s24 + $0x370] sm:$0xff] }
  0x47   : > { %3307 = vmatpush1.bf16.msra.mxu1 %v6613_v45  ;;  %4109 = vmatpush1.bf16.msra.mxu0 %v6614_v46  ;;  %v5178_v45 = vcombine.low %v228_v34, %v232_v35  ;;  %v5183_v46 = vcombine.high %v234_v40, %v238_v41  ;;  %v5182_v52 = vcombine.low %v234_v40, %v238_v41  ;;  %v292_v40 = vld [vmem:[%s6755_s24 + $0x390] sm:$0xff] }
  0x48   : > { %2945 = vmatprep.mubr.bf16.mxu1 %v5135_v47  ;;  %3747 = vmatprep.mubr.bf16.mxu0 %v5139_v48  ;;  %v5187_v47 = vcombine.high %v236_v42, %v240_v43  ;;  %v242_v48 = vld [vmem:[%s6755_s24 + $0x200] sm:$0xff]  ;;  %v5226_v34 = vcombine.low %v276_v23, %v280_v24  ;;  %v296_v41 = vld [vmem:[%s6755_s24 + $0x3b0] sm:$0xff] }
  0x49   : > { %3308 = vmatprep.subr.bf16.mxu1 %v6654_v1  ;;  %4110 = vmatprep.subr.bf16.mxu0 %v6654_v1  ;;  %v5190_v62 = vcombine.low %v242_v48, %v246_v49 }
  0x4b   : > { %3309 = vmatpush1.bf16.msra.mxu1 %v6615_v51  ;;  %4111 = vmatpush1.bf16.msra.mxu0 %v6616_v54  ;;  %v248_v51 = vld [vmem:[%s6755_s24 + $0x230] sm:$0xff]  ;;  %v5191_v54 = vcombine.high %v242_v48, %v246_v49  ;;  %v302_v48 = vld [vmem:[%s6755_s24 + $0x3e0] sm:$0xff] }
  0x4c   : > { %3310 = vmatprep.subr.bf16.mxu1 %v6654_v1  ;;  %4112 = vmatprep.subr.bf16.mxu0 %v6654_v1  ;;  %v5194_v63 = vcombine.low %v244_v50, %v248_v51  ;;  %v300_v49 = vld [vmem:[%s6755_s24 + $0x3d0] sm:$0xff] }
  0x4e   : > { %2946 = vmatmul.mubr.bf16.gmra.mrb[4].mxu1 %v5134_v55  ;;  %3748 = vmatmul.mubr.bf16.gmra.mrb[4].mxu0 %v5138_v57  ;;  %v5195_v55 = vcombine.high %v244_v50, %v248_v51  ;;  %v6630_v57 = vld [vmem:[%s7487_s1 + $0x1c0] sm:$0xff]   ;;  %v304_v50 = vld [vmem:[%s6755_s24 + $0x3f0] sm:$0xff] }
  0x4f   : > { %2953 = vmatprep.mubr.bf16.mxu1 %v5143_v58  ;;  %3755 = vmatprep.mubr.bf16.mxu0 %v5147_v60  ;;  %v250_v58 = vld [vmem:[%s6755_s24 + $0x240] sm:$0xff]  ;;  %v252_v60 = vld [vmem:[%s6755_s24 + $0x250] sm:$0xff] }
  0x50   : > { %3311 = vmatpush1.bf16.msra.mxu1 %v6617_v56  ;;  %4113 = vmatpush1.bf16.msra.mxu0 %v6618_v59  ;;  %v6629_v56 = vld [vmem:[%s7487_s1 + $0xc0] sm:$0xff]  }
  0x51   : > { %3312 = vmatprep.subr.bf16.mxu1 %v6654_v1  ;;  %4114 = vmatprep.subr.bf16.mxu0 %v6654_v1  ;;  %v254_v59 = vld [vmem:[%s6755_s24 + $0x260] sm:$0xff] }
  0x52   : > { %v5199_v0 = vcombine.high %v250_v58, %v254_v59 }
  0x54   : > { %3313 = vmatpush1.bf16.msra.mxu1 %v6619_v2  ;;  %4115 = vmatpush1.bf16.msra.mxu0 %v6620_v3  ;;  %v5203_v2 = vcombine.high %v252_v60, %v256_v61  ;;  %v258_v3 = vld [vmem:[%s6755_s24 + $0x280] sm:$0xff] }
  0x55   : > { %3314 = vmatprep.subr.bf16.mxu1 %v6654_v1  ;;  %4116 = vmatprep.subr.bf16.mxu0 %v6654_v1 }
  0x56   : > { %2954 = vmatmul.mubr.bf16.gmra.mrb[8].mxu1 %v5142_v4  ;;  %3756 = vmatmul.mubr.bf16.gmra.mrb[8].mxu0 %v5146_v6  ;;  %v262_v4 = vld [vmem:[%s6755_s24 + $0x2a0] sm:$0xff]  ;;  %v264_v6 = vld [vmem:[%s6755_s24 + $0x2b0] sm:$0xff] }
  0x57   : > { %2961 = vmatprep.mubr.bf16.mxu1 %v5151_v7  ;;  %3763 = vmatprep.mubr.bf16.mxu0 %v5155_v9  ;;  %v5198_v7 = vcombine.low %v250_v58, %v254_v59  ;;  %v5207_v9 = vcombine.high %v258_v3, %v262_v4  ;;  %v312_v58 = vld [vmem:[%s6755_s24 + $0x430] sm:$0xff] }
  0x58   : > { %3315 = vmatpush1.bf16.msra.mxu1 %v6621_v5  ;;  %4117 = vmatpush1.bf16.msra.mxu0 %v6622_v8  ;;  %v260_v5 = vld [vmem:[%s6755_s24 + $0x290] sm:$0xff]  ;;  %v5202_v8 = vcombine.low %v252_v60, %v256_v61  ;;  %v5250_v60 = vcombine.low %v300_v49, %v304_v50 }
  0x59   : > { %3316 = vmatprep.subr.bf16.mxu1 %v6654_v1  ;;  %4118 = vmatprep.subr.bf16.mxu0 %v6654_v1  ;;  %v5211_v10 = vcombine.high %v260_v5, %v264_v6 }
  0x5c   : > { %3317 = vmatpush1.bf16.msra.mxu1 %v6623_v14  ;;  %4119 = vmatpush1.bf16.msra.mxu0 %v6624_v15  ;;  %v272_v14 = vld [vmem:[%s6755_s24 + $0x2f0] sm:$0xff]  ;;  %v5206_v15 = vcombine.low %v258_v3, %v262_v4 }
  0x5d   : > { %3318 = vmatprep.subr.bf16.mxu1 %v6654_v1  ;;  %4120 = vmatprep.subr.bf16.mxu0 %v6654_v1  ;;  %v316_v3 = vld [vmem:[%s6755_s24 + $0x450] sm:$0xff] }
  0x5e   : > { %2962 = vmatmul.mubr.bf16.gmra.mrb[12].mxu1 %v5150_v16  ;;  %3764 = vmatmul.mubr.bf16.gmra.mrb[12].mxu0 %v5154_v17  ;;  %v5210_v16 = vcombine.low %v260_v5, %v264_v6  ;;  %v5215_v17 = vcombine.high %v266_v11, %v270_v12  ;;  %v320_v4 = vld [vmem:[%s6755_s24 + $0x470] sm:$0xff]  ;;  %v326_v11 = vld [vmem:[%s6755_s24 + $0x4a0] sm:$0xff] }
  0x5f   : > { %2969 = vmatprep.mubr.bf16.mxu1 %v5159_v18  ;;  %3771 = vmatprep.mubr.bf16.mxu0 %v5163_v19  ;;  %v5219_v18 = vcombine.high %v268_v13, %v272_v14  ;;  %v6631_v19 = vld [vmem:[%s7487_s1 + $0xc8] sm:$0xff]   ;;  %v324_v12 = vld [vmem:[%s6755_s24 + $0x490] sm:$0xff] }
  0x60   : > { %3319 = vmatpush1.bf16.msra.mxu1 %v6625_v20  ;;  %4121 = vmatpush1.bf16.msra.mxu0 %v6626_v21  ;;  %v6632_v20 = vld [vmem:[%s7487_s1 + $0x1c8] sm:$0xff]   ;;  %v274_v21 = vld [vmem:[%s6755_s24 + $0x300] sm:$0xff] }
  0x61   : > { %3320 = vmatprep.subr.bf16.mxu1 %v6654_v1  ;;  %4122 = vmatprep.subr.bf16.mxu0 %v6654_v1  ;;  %v5222_v33 = vcombine.low %v274_v21, %v278_v22 }
  0x64   : > { %3321 = vmatpush1.bf16.msra.mxu1 %v6627_v30  ;;  %4123 = vmatpush1.bf16.msra.mxu0 %v6628_v31  ;;  %v286_v30 = vld [vmem:[%s6755_s24 + $0x360] sm:$0xff]  ;;  %v284_v31 = vld [vmem:[%s6755_s24 + $0x350] sm:$0xff] }
  0x65   : > { %3322 = vmatprep.subr.bf16.mxu1 %v6654_v1  ;;  %4124 = vmatprep.subr.bf16.mxu0 %v6654_v1  ;;  %v5234_v43 = vcombine.low %v284_v31, %v288_v32 }
  0x66   : > { %2970 = vmatmul.mubr.bf16.gmra.mrb[16].mxu1 %v5158_v26  ;;  %3772 = vmatmul.mubr.bf16.gmra.mrb[16].mxu0 %v5162_v27  ;;  %v5218_v26 = vcombine.low %v268_v13, %v272_v14  ;;  %v5223_v27 = vcombine.high %v274_v21, %v278_v22  ;;  %v328_v13 = vld [vmem:[%s6755_s24 + $0x4b0] sm:$0xff] }
  0x67   : > { %2977 = vmatprep.mubr.bf16.mxu1 %v5167_v28  ;;  %3779 = vmatprep.mubr.bf16.mxu0 %v5171_v29  ;;  %v5227_v28 = vcombine.high %v276_v23, %v280_v24  ;;  %v282_v29 = vld [vmem:[%s6755_s24 + $0x340] sm:$0xff]  ;;  %v336_v21 = vld [vmem:[%s6755_s24 + $0x4f0] sm:$0xff]  ;;  %v5274_v23 = vcombine.low %v324_v12, %v328_v13 }
  0x68   : > { %3323 = vmatpush1.bf16.msra.mxu1 %v6629_v56  ;;  %4125 = vmatpush1.bf16.msra.mxu0 %v6630_v57  ;;  %v5231_v35 = vcombine.high %v282_v29, %v286_v30  ;;  %v5230_v42 = vcombine.low %v282_v29, %v286_v30  ;;  %v310_v56 = vld [vmem:[%s6755_s24 + $0x420] sm:$0xff]  ;;  %v308_v57 = vld [vmem:[%s6755_s24 + $0x410] sm:$0xff] }
  0x69   : > { %3324 = vmatprep.subr.bf16.mxu1 %v6654_v1  ;;  %4126 = vmatprep.subr.bf16.mxu0 %v6654_v1  ;;  %v5258_v6 = vcombine.low %v308_v57, %v312_v58  ;;  %v6638_v29 = vld [vmem:[%s7487_s1 + $0x1e0] sm:$0xff]   ;;  %v340_v30 = vld [vmem:[%s6755_s24 + $0x510] sm:$0xff] }
  0x6c   : > { %3325 = vmatpush1.bf16.msra.mxu1 %v6631_v19  ;;  %4127 = vmatpush1.bf16.msra.mxu0 %v6632_v20  ;;  %v334_v19 = vld [vmem:[%s6755_s24 + $0x4e0] sm:$0xff]  ;;  %v332_v20 = vld [vmem:[%s6755_s24 + $0x4d0] sm:$0xff] }
  0x6d   : > { %3326 = vmatprep.subr.bf16.mxu1 %v6654_v1  ;;  %4128 = vmatprep.subr.bf16.mxu0 %v6654_v1 }
  0x6e   : > { %2978 = vmatmul.mubr.bf16.gmra.mrb[20].mxu1 %v5166_v36  ;;  %3780 = vmatmul.mubr.bf16.gmra.mrb[20].mxu0 %v5170_v37  ;;  %v5235_v36 = vcombine.high %v284_v31, %v288_v32  ;;  %v6633_v37 = vld [vmem:[%s7487_s1 + $0xd0] sm:$0xff]  }
  0x6f   : > { %2985 = vmatprep.mubr.bf16.mxu1 %v5175_v38  ;;  %3787 = vmatprep.mubr.bf16.mxu0 %v5179_v39  ;;  %v290_v38 = vld [vmem:[%s6755_s24 + $0x380] sm:$0xff]  ;;  %v344_v31 = vld [vmem:[%s6755_s24 + $0x530] sm:$0xff] }
  0x70   : > { %v294_v39 = vld [vmem:[%s6755_s24 + $0x3a0] sm:$0xff]  ;;  %3327 = vmatpush1.bf16.msra.mxu1 %v6633_v37 }
  0x71   : > { %3328 = vmatprep.subr.bf16.mxu1 %v6654_v1  ;;  %v5238_v51 = vcombine.low %v290_v38, %v294_v39  ;;  %v350_v37 = vld [vmem:[%s6755_s24 + $0x560] sm:$0xff] }
  0x76   : > { %2986 = vmatmul.mubr.bf16.gmra.mrb[24].mxu1 %v5174_v44  ;;  %3788 = vmatmul.mubr.bf16.gmra.mrb[24].mxu0 %v5178_v45  ;;  %v5239_v44 = vcombine.high %v290_v38, %v294_v39  ;;  %v5243_v45 = vcombine.high %v292_v40, %v296_v41  ;;  %v348_v38 = vld [vmem:[%s6755_s24 + $0x550] sm:$0xff] }
  0x77   : > { %2993 = vmatprep.mubr.bf16.mxu1 %v5183_v46  ;;  %3795 = vmatprep.mubr.bf16.mxu0 %v5187_v47  ;;  %v6634_v46 = vld [vmem:[%s7487_s1 + $0x1d0] sm:$0xff]   ;;  %v298_v47 = vld [vmem:[%s6755_s24 + $0x3c0] sm:$0xff] }
  0x78   : > { %4129 = vmatpush1.bf16.msra.mxu0 %v6634_v46  ;;  %v5246_v59 = vcombine.low %v298_v47, %v302_v48  ;;  %v352_v39 = vld [vmem:[%s6755_s24 + $0x570] sm:$0xff] }
  0x79   : > { %4130 = vmatprep.subr.bf16.mxu0 %v6654_v1  ;;  %v356_v46 = vld [vmem:[%s6755_s24 + $0x590] sm:$0xff] }
  0x7e   : > { %2994 = vmatmul.mubr.bf16.gmra.mrb[28].mxu1 %v5182_v52  ;;  %3796 = vmatmul.mubr.bf16.gmra.mrb[28].mxu0 %v5186_v53  ;;  %v5242_v52 = vcombine.low %v292_v40, %v296_v41  ;;  %v5247_v53 = vcombine.high %v298_v47, %v302_v48  ;;  %v5290_v41 = vcombine.low %v340_v30, %v344_v31  ;;  %v360_v47 = vld [vmem:[%s6755_s24 + $0x5b0] sm:$0xff] }
  0x7f   : > { %3001 = vmatprep.mubr.bf16.mxu1 %v5191_v54  ;;  %3803 = vmatprep.mubr.bf16.mxu0 %v5195_v55  ;;  %v5251_v54 = vcombine.high %v300_v49, %v304_v50  ;;  %v306_v55 = vld [vmem:[%s6755_s24 + $0x400] sm:$0xff]  ;;  %v5298_v49 = vcombine.low %v348_v38, %v352_v39 }
  0x80   : > { %v5255_v61 = vcombine.high %v306_v55, %v310_v56  ;;  %v5254_v5 = vcombine.low %v306_v55, %v310_v56  ;;  %v366_v55 = vld [vmem:[%s6755_s24 + $0x5e0] sm:$0xff]  ;;  %v364_v56 = vld [vmem:[%s6755_s24 + $0x5d0] sm:$0xff] }
  0x86   : > { %3002 = vmatmul.mubr.bf16.gmra.mrb[32].mxu1 %v5190_v62  ;;  %3804 = vmatmul.mubr.bf16.gmra.mrb[32].mxu0 %v5194_v63  ;;  %v5259_v62 = vcombine.high %v308_v57, %v312_v58  ;;  %v6635_v63 = vld [vmem:[%s7487_s1 + $0xd8] sm:$0xff]   ;;  %v368_v57 = vld [vmem:[%s6755_s24 + $0x5f0] sm:$0xff] }
  0x87   : > { %3009 = vmatprep.mubr.bf16.mxu1 %v5199_v0  ;;  %3811 = vmatprep.mubr.bf16.mxu0 %v5203_v2  ;;  %v314_v0 = vld [vmem:[%s6755_s24 + $0x440] sm:$0xff] }
  0x88   : > { %v318_v2 = vld [vmem:[%s6755_s24 + $0x460] sm:$0xff]  ;;  %3329 = vmatpush1.bf16.msra.mxu1 %v6635_v63 }
  0x89   : > { %3330 = vmatprep.subr.bf16.mxu1 %v6654_v1  ;;  %v5262_v14 = vcombine.low %v314_v0, %v318_v2  ;;  %v374_v63 = vld [vmem:[%s6755_s24 + $0x620] sm:$0xff] }
  0x8e   : > { %3010 = vmatmul.mubr.bf16.gmra.mrb[36].mxu1 %v5198_v7  ;;  %3812 = vmatmul.mubr.bf16.gmra.mrb[36].mxu0 %v5202_v8  ;;  %v5263_v7 = vcombine.high %v314_v0, %v318_v2  ;;  %v5267_v8 = vcombine.high %v316_v3, %v320_v4  ;;  %v372_v0 = vld [vmem:[%s6755_s24 + $0x610] sm:$0xff] }
  0x8f   : > { %3017 = vmatprep.mubr.bf16.mxu1 %v5207_v9  ;;  %3819 = vmatprep.mubr.bf16.mxu0 %v5211_v10  ;;  %v6636_v9 = vld [vmem:[%s7487_s1 + $0x1d8] sm:$0xff]   ;;  %v322_v10 = vld [vmem:[%s6755_s24 + $0x480] sm:$0xff]  ;;  %v376_v2 = vld [vmem:[%s6755_s24 + $0x630] sm:$0xff] }
  0x90   : > { %4131 = vmatpush1.bf16.msra.mxu0 %v6636_v9  ;;  %v5270_v22 = vcombine.low %v322_v10, %v326_v11  ;;  %v380_v9 = vld [vmem:[%s6755_s24 + $0x650] sm:$0xff] }
  0x91   : > { %4132 = vmatprep.subr.bf16.mxu0 %v6654_v1 }
  0x94   : > { %4133 = vmatpush1.bf16.msra.mxu0 %v6638_v29 }
  0x95   : > { %4134 = vmatprep.subr.bf16.mxu0 %v6654_v1 }
  0x96   : > { %3018 = vmatmul.mubr.bf16.gmra.mrb[40].mxu1 %v5206_v15  ;;  %3820 = vmatmul.mubr.bf16.gmra.mrb[40].mxu0 %v5210_v16  ;;  %v5266_v15 = vcombine.low %v316_v3, %v320_v4  ;;  %v5271_v16 = vcombine.high %v322_v10, %v326_v11  ;;  %v5314_v4 = vcombine.low %v364_v56, %v368_v57  ;;  %v384_v10 = vld [vmem:[%s6755_s24 + $0x670] sm:$0xff] }
  0x97   : > { %3025 = vmatprep.mubr.bf16.mxu1 %v5215_v17  ;;  %3827 = vmatprep.mubr.bf16.mxu0 %v5219_v18  ;;  %v5275_v17 = vcombine.high %v324_v12, %v328_v13  ;;  %v330_v18 = vld [vmem:[%s6755_s24 + $0x4c0] sm:$0xff]  ;;  %v5322_v12 = vcombine.low %v372_v0, %v376_v2 }
  0x98   : > { %v5279_v24 = vcombine.high %v330_v18, %v334_v19  ;;  %v5278_v32 = vcombine.low %v330_v18, %v334_v19  ;;  %v390_v18 = vld [vmem:[%s6755_s24 + $0x6a0] sm:$0xff]  ;;  %v388_v19 = vld [vmem:[%s6755_s24 + $0x690] sm:$0xff] }
  0x9e   : > { %3026 = vmatmul.mubr.bf16.gmra.mrb[44].mxu1 %v5214_v25  ;;  %3828 = vmatmul.mubr.bf16.gmra.mrb[44].mxu0 %v5218_v26  ;;  %v5283_v25 = vcombine.high %v332_v20, %v336_v21  ;;  %v6637_v26 = vld [vmem:[%s7487_s1 + $0xe0] sm:$0xff]  }
  0x9f   : > { %3033 = vmatprep.mubr.bf16.mxu1 %v5223_v27  ;;  %3835 = vmatprep.mubr.bf16.mxu0 %v5227_v28  ;;  %v338_v27 = vld [vmem:[%s6755_s24 + $0x500] sm:$0xff] }
  0xa0   : > { %v342_v28 = vld [vmem:[%s6755_s24 + $0x520] sm:$0xff]  ;;  %3331 = vmatpush1.bf16.msra.mxu1 %v6637_v26 }
  0xa1   : > { %3332 = vmatprep.subr.bf16.mxu1 %v6654_v1  ;;  %v5286_v40 = vcombine.low %v338_v27, %v342_v28  ;;  %v398_v26 = vld [vmem:[%s6755_s24 + $0x6e0] sm:$0xff] }
  0xa6   : > { %3034 = vmatmul.mubr.bf16.gmra.mrb[48].mxu1 %v5222_v33  ;;  %3836 = vmatmul.mubr.bf16.gmra.mrb[48].mxu0 %v5226_v34  ;;  %v5282_v33 = vcombine.low %v332_v20, %v336_v21  ;;  %v5287_v34 = vcombine.high %v338_v27, %v342_v28  ;;  %v392_v20 = vld [vmem:[%s6755_s24 + $0x6b0] sm:$0xff] }
  0xa7   : > { %3041 = vmatprep.mubr.bf16.mxu1 %v5231_v35  ;;  %3843 = vmatprep.mubr.bf16.mxu0 %v5235_v36  ;;  %v5291_v35 = vcombine.high %v340_v30, %v344_v31  ;;  %v346_v36 = vld [vmem:[%s6755_s24 + $0x540] sm:$0xff]  ;;  %v396_v27 = vld [vmem:[%s6755_s24 + $0x6d0] sm:$0xff]  ;;  %v5338_v30 = vcombine.low %v388_v19, %v392_v20 }
  0xa8   : > { %v5294_v48 = vcombine.low %v346_v36, %v350_v37  ;;  %v400_v28 = vld [vmem:[%s6755_s24 + $0x6f0] sm:$0xff] }
  0xae   : > { %3042 = vmatmul.mubr.bf16.gmra.mrb[52].mxu1 %v5230_v42  ;;  %3844 = vmatmul.mubr.bf16.gmra.mrb[52].mxu0 %v5234_v43  ;;  %v5295_v42 = vcombine.high %v346_v36, %v350_v37  ;;  %v5299_v43 = vcombine.high %v348_v38, %v352_v39  ;;  %v5346_v37 = vcombine.low %v396_v27, %v400_v28 }
  0xaf   : > { %3049 = vmatprep.mubr.bf16.mxu1 %v5239_v44  ;;  %3851 = vmatprep.mubr.bf16.mxu0 %v5243_v45  ;;  %v354_v44 = vld [vmem:[%s6755_s24 + $0x580] sm:$0xff] }
  0xb0   : > { %v358_v45 = vld [vmem:[%s6755_s24 + $0x5a0] sm:$0xff] }
  0xb1   : > { %v5303_v50 = vcombine.high %v354_v44, %v358_v45  ;;  %v5302_v58 = vcombine.low %v354_v44, %v358_v45  ;;  %v412_v44 = vld [vmem:[%s6755_s24 + $0x750] sm:$0xff] }
  0xb2   : > { %v416_v45 = vld [vmem:[%s6755_s24 + $0x770] sm:$0xff] }
  0xb6   : > { %3050 = vmatmul.mubr.bf16.gmra.mrb[56].mxu1 %v5238_v51  ;;  %3852 = vmatmul.mubr.bf16.gmra.mrb[56].mxu0 %v5242_v52  ;;  %v5307_v51 = vcombine.high %v356_v46, %v360_v47  ;;  %v6639_v52 = vld [vmem:[%s7487_s1 + $0xe8] sm:$0xff]  }
  0xb7   : > { %3057 = vmatprep.mubr.bf16.mxu1 %v5247_v53  ;;  %3859 = vmatprep.mubr.bf16.mxu0 %v5251_v54  ;;  %v6640_v53 = vld [vmem:[%s7487_s1 + $0x1e8] sm:$0xff]   ;;  %v362_v54 = vld [vmem:[%s6755_s24 + $0x5c0] sm:$0xff] }
  0xb8   : > { %3333 = vmatpush1.bf16.msra.mxu1 %v6639_v52  ;;  %4135 = vmatpush1.bf16.msra.mxu0 %v6640_v53  ;;  %v5310_v3 = vcombine.low %v362_v54, %v366_v55  ;;  %v420_v52 = vld [vmem:[%s6755_s24 + $0x790] sm:$0xff] }
  0xb9   : > { %3334 = vmatprep.subr.bf16.mxu1 %v6654_v1  ;;  %4136 = vmatprep.subr.bf16.mxu0 %v6654_v1  ;;  %v424_v53 = vld [vmem:[%s6755_s24 + $0x7b0] sm:$0xff] }
  0xbe   : > { %3058 = vmatmul.mubr.bf16.gmra.mrb[60].mxu1 %v5246_v59  ;;  %3860 = vmatmul.mubr.bf16.gmra.mrb[60].mxu0 %v5250_v60  ;;  %v5306_v59 = vcombine.low %v356_v46, %v360_v47  ;;  %v5311_v60 = vcombine.high %v362_v54, %v366_v55  ;;  %v5362_v55 = vcombine.low %v412_v44, %v416_v45 }
  0xbf   : > { %3065 = vmatprep.mubr.bf16.mxu1 %v5255_v61  ;;  %3867 = vmatprep.mubr.bf16.mxu0 %v5259_v62  ;;  %v5315_v61 = vcombine.high %v364_v56, %v368_v57  ;;  %v370_v62 = vld [vmem:[%s6755_s24 + $0x600] sm:$0xff]  ;;  %v5371_v57 = vcombine.high %v420_v52, %v424_v53 }
  0xc0   : > { %v5318_v11 = vcombine.low %v370_v62, %v374_v63 }
  0xc6   : > { %3066 = vmatmul.mubr.bf16.gmra.mrb[64].mxu1 %v5254_v5  ;;  %3868 = vmatmul.mubr.bf16.gmra.mrb[64].mxu0 %v5258_v6  ;;  %v5319_v5 = vcombine.high %v370_v62, %v374_v63  ;;  %v5323_v6 = vcombine.high %v372_v0, %v376_v2  ;;  %v5370_v63 = vcombine.low %v420_v52, %v424_v53  ;;  %v484_v52 = vld [vmem:[%s6755_s24 + $0x990] sm:$0xff] }
  0xc7   : > { %3073 = vmatprep.mubr.bf16.mxu1 %v5263_v7  ;;  %3875 = vmatprep.mubr.bf16.mxu0 %v5267_v8  ;;  %v378_v7 = vld [vmem:[%s6755_s24 + $0x640] sm:$0xff]  ;;  %v488_v53 = vld [vmem:[%s6755_s24 + $0x9b0] sm:$0xff] }
  0xc8   : > { %v382_v8 = vld [vmem:[%s6755_s24 + $0x660] sm:$0xff] }
  0xc9   : > { %v5327_v13 = vcombine.high %v378_v7, %v382_v8  ;;  %v5326_v21 = vcombine.low %v378_v7, %v382_v8 }
  0xce   : > { %3074 = vmatmul.mubr.bf16.gmra.mrb[68].mxu1 %v5262_v14  ;;  %3876 = vmatmul.mubr.bf16.gmra.mrb[68].mxu0 %v5266_v15  ;;  %v5331_v14 = vcombine.high %v380_v9, %v384_v10  ;;  %v6641_v15 = vld [vmem:[%s7487_s1 + $0xf0] sm:$0xff]  }
  0xcf   : > { %3081 = vmatprep.mubr.bf16.mxu1 %v5271_v16  ;;  %3883 = vmatprep.mubr.bf16.mxu0 %v5275_v17  ;;  %v6642_v16 = vld [vmem:[%s7487_s1 + $0x1f0] sm:$0xff]   ;;  %v386_v17 = vld [vmem:[%s6755_s24 + $0x680] sm:$0xff] }
  0xd0   : > { %3335 = vmatpush1.bf16.msra.mxu1 %v6641_v15  ;;  %4137 = vmatpush1.bf16.msra.mxu0 %v6642_v16  ;;  %v5334_v29 = vcombine.low %v386_v17, %v390_v18 }
  0xd1   : > { %3336 = vmatprep.subr.bf16.mxu1 %v6654_v1  ;;  %4138 = vmatprep.subr.bf16.mxu0 %v6654_v1  ;;  %v402_v1 = vld [vmem:[%s6755_s24 + $0x700] sm:$0xff] }
  0xd6   : > { %3082 = vmatmul.mubr.bf16.gmra.mrb[72].mxu1 %v5270_v22  ;;  %3884 = vmatmul.mubr.bf16.gmra.mrb[72].mxu0 %v5274_v23  ;;  %v5330_v22 = vcombine.low %v380_v9, %v384_v10  ;;  %v5335_v23 = vcombine.high %v386_v17, %v390_v18 }
  0xd7   : > { %3089 = vmatprep.mubr.bf16.mxu1 %v5279_v24  ;;  %3891 = vmatprep.mubr.bf16.mxu0 %v5283_v25  ;;  %v5339_v24 = vcombine.high %v388_v19, %v392_v20  ;;  %v394_v25 = vld [vmem:[%s6755_s24 + $0x6c0] sm:$0xff] }
  0xd8   : > { %v5343_v31 = vcombine.high %v394_v25, %v398_v26  ;;  %v5342_v36 = vcombine.low %v394_v25, %v398_v26  ;;  %v450_v19 = vld [vmem:[%s6755_s24 + $0x880] sm:$0xff] }
  0xd9   : > { %v454_v20 = vld [vmem:[%s6755_s24 + $0x8a0] sm:$0xff] }
  0xda   : > { %v5399_v25 = vcombine.high %v450_v19, %v454_v20 }
  0xde   : > { %3090 = vmatmul.mubr.bf16.gmra.mrb[76].mxu1 %v5278_v32  ;;  %3892 = vmatmul.mubr.bf16.gmra.mrb[76].mxu0 %v5282_v33  ;;  %v5347_v32 = vcombine.high %v396_v27, %v400_v28  ;;  %v406_v33 = vld [vmem:[%s6755_s24 + $0x720] sm:$0xff] }
  0xdf   : > { %3097 = vmatprep.mubr.bf16.mxu1 %v5287_v34  ;;  %3899 = vmatprep.mubr.bf16.mxu0 %v5291_v35  ;;  %v404_v34 = vld [vmem:[%s6755_s24 + $0x710] sm:$0xff]  ;;  %v5351_v38 = vcombine.high %v402_v1, %v406_v33  ;;  %v5350_v46 = vcombine.low %v402_v1, %v406_v33  ;;  %v458_v27 = vld [vmem:[%s6755_s24 + $0x8c0] sm:$0xff] }
  0xe0   : > { %v408_v35 = vld [vmem:[%s6755_s24 + $0x730] sm:$0xff]  ;;  %v462_v28 = vld [vmem:[%s6755_s24 + $0x8e0] sm:$0xff] }
  0xe1   : > { %v5355_v39 = vcombine.high %v404_v34, %v408_v35  ;;  %v5354_v47 = vcombine.low %v404_v34, %v408_v35  ;;  %v5407_v1 = vcombine.high %v458_v27, %v462_v28  ;;  %v466_v34 = vld [vmem:[%s6755_s24 + $0x900] sm:$0xff] }
  0xe2   : > { %v470_v35 = vld [vmem:[%s6755_s24 + $0x920] sm:$0xff] }
  0xe6   : > { %3098 = vmatmul.mubr.bf16.gmra.mrb[80].mxu1 %v5286_v40  ;;  %3900 = vmatmul.mubr.bf16.gmra.mrb[80].mxu0 %v5290_v41  ;;  %v6643_v40 = vld [vmem:[%s7487_s1 + $0xf8] sm:$0xff]  }
  0xe7   : > { %3105 = vmatprep.mubr.bf16.mxu1 %v5295_v42  ;;  %3907 = vmatprep.mubr.bf16.mxu0 %v5299_v43  ;;  %v6644_v41 = vld [vmem:[%s7487_s1 + $0x1f8] sm:$0xff]   ;;  %v410_v42 = vld [vmem:[%s6755_s24 + $0x740] sm:$0xff] }
  0xe8   : > { %v414_v43 = vld [vmem:[%s6755_s24 + $0x760] sm:$0xff]  ;;  %3337 = vmatpush1.bf16.msra.mxu1 %v6643_v40  ;;  %4139 = vmatpush1.bf16.msra.mxu0 %v6644_v41  ;;  %v5415_v40 = vcombine.high %v466_v34, %v470_v35 }
  0xe9   : > { %v5358_v54 = vcombine.low %v410_v42, %v414_v43 }
  0xee   : > { %3106 = vmatmul.mubr.bf16.gmra.mrb[84].mxu1 %v5294_v48  ;;  %3908 = vmatmul.mubr.bf16.gmra.mrb[84].mxu0 %v5298_v49  ;;  %v5359_v48 = vcombine.high %v410_v42, %v414_v43  ;;  %v5363_v49 = vcombine.high %v412_v44, %v416_v45  ;;  %v474_v42 = vld [vmem:[%s6755_s24 + $0x940] sm:$0xff]  ;;  %v476_v44 = vld [vmem:[%s6755_s24 + $0x950] sm:$0xff] }
  0xef   : > { %3113 = vmatprep.mubr.bf16.mxu1 %v5303_v50  ;;  %3915 = vmatprep.mubr.bf16.mxu0 %v5307_v51  ;;  %v418_v50 = vld [vmem:[%s6755_s24 + $0x780] sm:$0xff]  ;;  %v480_v45 = vld [vmem:[%s6755_s24 + $0x970] sm:$0xff] }
  0xf0   : > { %v422_v51 = vld [vmem:[%s6755_s24 + $0x7a0] sm:$0xff] }
  0xf1   : > { %v5367_v56 = vcombine.high %v418_v50, %v422_v51  ;;  %v5366_v62 = vcombine.low %v418_v50, %v422_v51  ;;  %v478_v43 = vld [vmem:[%s6755_s24 + $0x960] sm:$0xff] }
  0xf2   : > { %v482_v50 = vld [vmem:[%s6755_s24 + $0x980] sm:$0xff] }
  0xf3   : > { %v486_v51 = vld [vmem:[%s6755_s24 + $0x9a0] sm:$0xff] }
  0xf6   : > { %3114 = vmatmul.mubr.bf16.gmra.mrb[88].mxu1 %v5302_v58  ;;  %3916 = vmatmul.mubr.bf16.gmra.mrb[88].mxu0 %v5306_v59  ;;  %v426_v58 = vld [vmem:[%s6755_s24 + $0x7c0] sm:$0xff] }
  0xf7   : > { %3121 = vmatprep.mubr.bf16.mxu1 %v5311_v60  ;;  %3923 = vmatprep.mubr.bf16.mxu0 %v5315_v61  ;;  %v430_v59 = vld [vmem:[%s6755_s24 + $0x7e0] sm:$0xff]  ;;  %v428_v60 = vld [vmem:[%s6755_s24 + $0x7d0] sm:$0xff] }
  0xf8   : > { %v432_v61 = vld [vmem:[%s6755_s24 + $0x7f0] sm:$0xff]  ;;  %v5375_v0 = vcombine.high %v426_v58, %v430_v59  ;;  %v5374_v7 = vcombine.low %v426_v58, %v430_v59  ;;  %v490_v58 = vld [vmem:[%s6755_s24 + $0x9c0] sm:$0xff] }
  0xf9   : > { %v5379_v2 = vcombine.high %v428_v60, %v432_v61  ;;  %v5378_v8 = vcombine.low %v428_v60, %v432_v61  ;;  %v494_v59 = vld [vmem:[%s6755_s24 + $0x9e0] sm:$0xff]  ;;  %v492_v60 = vld [vmem:[%s6755_s24 + $0x9d0] sm:$0xff] }
  0xfa   : > { %v496_v61 = vld [vmem:[%s6755_s24 + $0x9f0] sm:$0xff] }
  0xfe   : > { %3122 = vmatmul.mubr.bf16.gmra.mrb[92].mxu1 %v5310_v3  ;;  %3924 = vmatmul.mubr.bf16.gmra.mrb[92].mxu0 %v5314_v4  ;;  %v434_v3 = vld [vmem:[%s6755_s24 + $0x800] sm:$0xff] }
  0xff   : > { %3129 = vmatprep.mubr.bf16.mxu1 %v5319_v5  ;;  %3931 = vmatprep.mubr.bf16.mxu0 %v5323_v6  ;;  %v438_v4 = vld [vmem:[%s6755_s24 + $0x820] sm:$0xff]  ;;  %v436_v5 = vld [vmem:[%s6755_s24 + $0x810] sm:$0xff] }
 0x100   : > { %v440_v6 = vld [vmem:[%s6755_s24 + $0x830] sm:$0xff]  ;;  %v5383_v9 = vcombine.high %v434_v3, %v438_v4  ;;  %v5382_v15 = vcombine.low %v434_v3, %v438_v4  ;;  %v498_v3 = vld [vmem:[%s6755_s24 + $0xa00] sm:$0xff] }
 0x101   : > { %v5387_v10 = vcombine.high %v436_v5, %v440_v6  ;;  %v5386_v16 = vcombine.low %v436_v5, %v440_v6  ;;  %v502_v4 = vld [vmem:[%s6755_s24 + $0xa20] sm:$0xff]  ;;  %v500_v5 = vld [vmem:[%s6755_s24 + $0xa10] sm:$0xff] }
 0x102   : > { %v504_v6 = vld [vmem:[%s6755_s24 + $0xa30] sm:$0xff] }
 0x106   : > { %3130 = vmatmul.mubr.bf16.gmra.mrb[96].mxu1 %v5318_v11  ;;  %3932 = vmatmul.mubr.bf16.gmra.mrb[96].mxu0 %v5322_v12  ;;  %v442_v11 = vld [vmem:[%s6755_s24 + $0x840] sm:$0xff] }
 0x107   : > { %3137 = vmatprep.mubr.bf16.mxu1 %v5327_v13  ;;  %3939 = vmatprep.mubr.bf16.mxu0 %v5331_v14  ;;  %v446_v12 = vld [vmem:[%s6755_s24 + $0x860] sm:$0xff]  ;;  %v444_v13 = vld [vmem:[%s6755_s24 + $0x850] sm:$0xff] }
 0x108   : > { %v448_v14 = vld [vmem:[%s6755_s24 + $0x870] sm:$0xff]  ;;  %v5391_v17 = vcombine.high %v442_v11, %v446_v12 }
 0x109   : > { %v5395_v18 = vcombine.high %v444_v13, %v448_v14 }
 0x10e   : > { %3138 = vmatmul.mubr.bf16.gmra.mrb[100].mxu1 %v5326_v21  ;;  %3940 = vmatmul.mubr.bf16.gmra.mrb[100].mxu0 %v5330_v22  ;;  %v452_v21 = vld [vmem:[%s6755_s24 + $0x890] sm:$0xff] }
 0x10f   : > { %3145 = vmatprep.mubr.bf16.mxu1 %v5335_v23  ;;  %3947 = vmatprep.mubr.bf16.mxu0 %v5339_v24  ;;  %v456_v22 = vld [vmem:[%s6755_s24 + $0x8b0] sm:$0xff]  ;;  %v5390_v23 = vcombine.low %v442_v11, %v446_v12  ;;  %v5394_v24 = vcombine.low %v444_v13, %v448_v14  ;;  %v506_v11 = vld [vmem:[%s6755_s24 + $0xa40] sm:$0xff] }
 0x110   : > { %v5403_v26 = vcombine.high %v452_v21, %v456_v22  ;;  %v510_v12 = vld [vmem:[%s6755_s24 + $0xa60] sm:$0xff]  ;;  %v508_v13 = vld [vmem:[%s6755_s24 + $0xa50] sm:$0xff] }
 0x111   : > { %v512_v14 = vld [vmem:[%s6755_s24 + $0xa70] sm:$0xff] }
 0x116   : > { %3146 = vmatmul.mubr.bf16.gmra.mrb[104].mxu1 %v5334_v29  ;;  %3948 = vmatmul.mubr.bf16.gmra.mrb[104].mxu0 %v5338_v30  ;;  %v460_v29 = vld [vmem:[%s6755_s24 + $0x8d0] sm:$0xff] }
 0x117   : > { %3153 = vmatprep.mubr.bf16.mxu1 %v5343_v31  ;;  %3955 = vmatprep.mubr.bf16.mxu0 %v5347_v32  ;;  %v464_v30 = vld [vmem:[%s6755_s24 + $0x8f0] sm:$0xff]  ;;  %v5398_v31 = vcombine.low %v450_v19, %v454_v20  ;;  %v5402_v32 = vcombine.low %v452_v21, %v456_v22  ;;  %v514_v19 = vld [vmem:[%s6755_s24 + $0xa80] sm:$0xff] }
 0x118   : > { %v5411_v33 = vcombine.high %v460_v29, %v464_v30  ;;  %v518_v20 = vld [vmem:[%s6755_s24 + $0xaa0] sm:$0xff]  ;;  %v516_v21 = vld [vmem:[%s6755_s24 + $0xa90] sm:$0xff] }
 0x119   : > { %v520_v22 = vld [vmem:[%s6755_s24 + $0xab0] sm:$0xff] }
 0x11e   : > { %3154 = vmatmul.mubr.bf16.gmra.mrb[108].mxu1 %v5342_v36  ;;  %3956 = vmatmul.mubr.bf16.gmra.mrb[108].mxu0 %v5346_v37  ;;  %v468_v36 = vld [vmem:[%s6755_s24 + $0x910] sm:$0xff] }
 0x11f   : > { %3161 = vmatprep.mubr.bf16.mxu1 %v5351_v38  ;;  %3963 = vmatprep.mubr.bf16.mxu0 %v5355_v39  ;;  %v472_v37 = vld [vmem:[%s6755_s24 + $0x930] sm:$0xff]  ;;  %v5406_v38 = vcombine.low %v458_v27, %v462_v28  ;;  %v5410_v39 = vcombine.low %v460_v29, %v464_v30  ;;  %v522_v27 = vld [vmem:[%s6755_s24 + $0xac0] sm:$0xff] }
 0x120   : > { %v5419_v41 = vcombine.high %v468_v36, %v472_v37  ;;  %v526_v28 = vld [vmem:[%s6755_s24 + $0xae0] sm:$0xff]  ;;  %v524_v29 = vld [vmem:[%s6755_s24 + $0xad0] sm:$0xff] }
 0x121   : > { %v528_v30 = vld [vmem:[%s6755_s24 + $0xaf0] sm:$0xff] }
 0x126   : > { %3162 = vmatmul.mubr.bf16.gmra.mrb[112].mxu1 %v5350_v46  ;;  %3964 = vmatmul.mubr.bf16.gmra.mrb[112].mxu0 %v5354_v47  ;;  %v5414_v46 = vcombine.low %v466_v34, %v470_v35  ;;  %v5418_v47 = vcombine.low %v468_v36, %v472_v37  ;;  %v530_v34 = vld [vmem:[%s6755_s24 + $0xb00] sm:$0xff]  ;;  %v532_v36 = vld [vmem:[%s6755_s24 + $0xb10] sm:$0xff] }
 0x127   : > { %3169 = vmatprep.mubr.bf16.mxu1 %v5359_v48  ;;  %3971 = vmatprep.mubr.bf16.mxu0 %v5363_v49  ;;  %v5423_v48 = vcombine.high %v474_v42, %v478_v43  ;;  %v5427_v49 = vcombine.high %v476_v44, %v480_v45  ;;  %v534_v35 = vld [vmem:[%s6755_s24 + $0xb20] sm:$0xff]  ;;  %v536_v37 = vld [vmem:[%s6755_s24 + $0xb30] sm:$0xff] }
 0x12e   : > { %3170 = vmatmul.mubr.bf16.gmra.mrb[116].mxu1 %v5358_v54  ;;  %3972 = vmatmul.mubr.bf16.gmra.mrb[116].mxu0 %v5362_v55  ;;  %v5422_v54 = vcombine.low %v474_v42, %v478_v43  ;;  %v5426_v55 = vcombine.low %v476_v44, %v480_v45  ;;  %v538_v42 = vld [vmem:[%s6755_s24 + $0xb40] sm:$0xff]  ;;  %v540_v44 = vld [vmem:[%s6755_s24 + $0xb50] sm:$0xff] }
 0x12f   : > { %3177 = vmatprep.mubr.bf16.mxu1 %v5367_v56  ;;  %3979 = vmatprep.mubr.bf16.mxu0 %v5371_v57  ;;  %v5431_v56 = vcombine.high %v482_v50, %v486_v51  ;;  %v5435_v57 = vcombine.high %v484_v52, %v488_v53  ;;  %v542_v43 = vld [vmem:[%s6755_s24 + $0xb60] sm:$0xff]  ;;  %v544_v45 = vld [vmem:[%s6755_s24 + $0xb70] sm:$0xff] }
 0x136   : > { %3178 = vmatmul.mubr.bf16.gmra.mrb[120].mxu1 %v5366_v62  ;;  %3980 = vmatmul.mubr.bf16.gmra.mrb[120].mxu0 %v5370_v63  ;;  %v5430_v62 = vcombine.low %v482_v50, %v486_v51  ;;  %v5434_v63 = vcombine.low %v484_v52, %v488_v53  ;;  %v179_v50 = vld [vmem:[%s6755_s24 + $0x8] sm:$0xff]  ;;  %v181_v52 = vld [vmem:[%s6755_s24 + $0x18] sm:$0xff] }
 0x137   : > { %3185 = vmatprep.mubr.bf16.mxu1 %v5375_v0  ;;  %3987 = vmatprep.mubr.bf16.mxu0 %v5379_v2  ;;  %v5439_v0 = vcombine.high %v490_v58, %v494_v59  ;;  %v5443_v2 = vcombine.high %v492_v60, %v496_v61  ;;  %v183_v51 = vld [vmem:[%s6755_s24 + $0x28] sm:$0xff]  ;;  %v185_v53 = vld [vmem:[%s6755_s24 + $0x38] sm:$0xff] }
 0x13e   : > { %3186 = vmatmul.mubr.bf16.gmra.mrb[124].mxu1 %v5374_v7  ;;  %3988 = vmatmul.mubr.bf16.gmra.mrb[124].mxu0 %v5378_v8  ;;  %v5438_v7 = vcombine.low %v490_v58, %v494_v59  ;;  %v5442_v8 = vcombine.low %v492_v60, %v496_v61  ;;  %v187_v58 = vld [vmem:[%s6755_s24 + $0x48] sm:$0xff]  ;;  %v189_v60 = vld [vmem:[%s6755_s24 + $0x58] sm:$0xff] }
 0x13f   : > { %3193 = vmatprep.mubr.bf16.mxu1 %v5383_v9  ;;  %3995 = vmatprep.mubr.bf16.mxu0 %v5387_v10  ;;  %v5447_v9 = vcombine.high %v498_v3, %v502_v4  ;;  %v5451_v10 = vcombine.high %v500_v5, %v504_v6  ;;  %v191_v59 = vld [vmem:[%s6755_s24 + $0x68] sm:$0xff]  ;;  %v193_v61 = vld [vmem:[%s6755_s24 + $0x78] sm:$0xff] }
 0x146   : > { %3194 = vmatmul.mubr.bf16.gmra.mrb[128].mxu1 %v5382_v15  ;;  %3996 = vmatmul.mubr.bf16.gmra.mrb[128].mxu0 %v5386_v16  ;;  %v5446_v15 = vcombine.low %v498_v3, %v502_v4  ;;  %v5450_v16 = vcombine.low %v500_v5, %v504_v6  ;;  %v195_v3 = vld [vmem:[%s6755_s24 + $0x88] sm:$0xff]  ;;  %v197_v5 = vld [vmem:[%s6755_s24 + $0x98] sm:$0xff] }
 0x147   : > { %3201 = vmatprep.mubr.bf16.mxu1 %v5391_v17  ;;  %4003 = vmatprep.mubr.bf16.mxu0 %v5395_v18  ;;  %v5455_v17 = vcombine.high %v506_v11, %v510_v12  ;;  %v5459_v18 = vcombine.high %v508_v13, %v512_v14  ;;  %v199_v4 = vld [vmem:[%s6755_s24 + $0xa8] sm:$0xff]  ;;  %v201_v6 = vld [vmem:[%s6755_s24 + $0xb8] sm:$0xff] }
 0x14e   : > { %3202 = vmatmul.mubr.bf16.gmra.mrb[132].mxu1 %v5390_v23  ;;  %4004 = vmatmul.mubr.bf16.gmra.mrb[132].mxu0 %v5394_v24  ;;  %v5454_v23 = vcombine.low %v506_v11, %v510_v12  ;;  %v5458_v24 = vcombine.low %v508_v13, %v512_v14  ;;  %v203_v11 = vld [vmem:[%s6755_s24 + $0xc8] sm:$0xff]  ;;  %v205_v13 = vld [vmem:[%s6755_s24 + $0xd8] sm:$0xff] }
 0x14f   : > { %3209 = vmatprep.mubr.bf16.mxu1 %v5399_v25  ;;  %4011 = vmatprep.mubr.bf16.mxu0 %v5403_v26  ;;  %v5463_v25 = vcombine.high %v514_v19, %v518_v20  ;;  %v5467_v26 = vcombine.high %v516_v21, %v520_v22  ;;  %v207_v12 = vld [vmem:[%s6755_s24 + $0xe8] sm:$0xff]  ;;  %v209_v14 = vld [vmem:[%s6755_s24 + $0xf8] sm:$0xff] }
 0x156   : > { %3210 = vmatmul.mubr.bf16.gmra.mrb[136].mxu1 %v5398_v31  ;;  %4012 = vmatmul.mubr.bf16.gmra.mrb[136].mxu0 %v5402_v32  ;;  %v5462_v31 = vcombine.low %v514_v19, %v518_v20  ;;  %v5466_v32 = vcombine.low %v516_v21, %v520_v22  ;;  %v211_v19 = vld [vmem:[%s6755_s24 + $0x108] sm:$0xff]  ;;  %v213_v21 = vld [vmem:[%s6755_s24 + $0x118] sm:$0xff] }
 0x157   : > { %3217 = vmatprep.mubr.bf16.mxu1 %v5407_v1  ;;  %4019 = vmatprep.mubr.bf16.mxu0 %v5411_v33  ;;  %v5471_v1 = vcombine.high %v522_v27, %v526_v28  ;;  %v5475_v33 = vcombine.high %v524_v29, %v528_v30  ;;  %v215_v20 = vld [vmem:[%s6755_s24 + $0x128] sm:$0xff]  ;;  %v217_v22 = vld [vmem:[%s6755_s24 + $0x138] sm:$0xff] }
 0x15e   : > { %3218 = vmatmul.mubr.bf16.gmra.mrb[140].mxu1 %v5406_v38  ;;  %4020 = vmatmul.mubr.bf16.gmra.mrb[140].mxu0 %v5410_v39  ;;  %v5470_v38 = vcombine.low %v522_v27, %v526_v28  ;;  %v5474_v39 = vcombine.low %v524_v29, %v528_v30  ;;  %v219_v27 = vld [vmem:[%s6755_s24 + $0x148] sm:$0xff]  ;;  %v221_v29 = vld [vmem:[%s6755_s24 + $0x158] sm:$0xff] }
 0x15f   : > { %3225 = vmatprep.mubr.bf16.mxu1 %v5415_v40  ;;  %4027 = vmatprep.mubr.bf16.mxu0 %v5419_v41  ;;  %v5479_v40 = vcombine.high %v530_v34, %v534_v35  ;;  %v5483_v41 = vcombine.high %v532_v36, %v536_v37  ;;  %v223_v28 = vld [vmem:[%s6755_s24 + $0x168] sm:$0xff]  ;;  %v225_v30 = vld [vmem:[%s6755_s24 + $0x178] sm:$0xff] }
 0x166   : > { %3226 = vmatmul.mubr.bf16.gmra.mrb[144].mxu1 %v5414_v46  ;;  %4028 = vmatmul.mubr.bf16.gmra.mrb[144].mxu0 %v5418_v47  ;;  %v5478_v46 = vcombine.low %v530_v34, %v534_v35  ;;  %v5482_v47 = vcombine.low %v532_v36, %v536_v37  ;;  %v227_v34 = vld [vmem:[%s6755_s24 + $0x188] sm:$0xff]  ;;  %v229_v36 = vld [vmem:[%s6755_s24 + $0x198] sm:$0xff] }
 0x167   : > { %3233 = vmatprep.mubr.bf16.mxu1 %v5423_v48  ;;  %4035 = vmatprep.mubr.bf16.mxu0 %v5427_v49  ;;  %v5487_v48 = vcombine.high %v538_v42, %v542_v43  ;;  %v5491_v49 = vcombine.high %v540_v44, %v544_v45  ;;  %v231_v35 = vld [vmem:[%s6755_s24 + $0x1a8] sm:$0xff]  ;;  %v233_v37 = vld [vmem:[%s6755_s24 + $0x1b8] sm:$0xff] }
 0x16e   : > { %3234 = vmatmul.mubr.bf16.gmra.mrb[148].mxu1 %v5422_v54  ;;  %4036 = vmatmul.mubr.bf16.gmra.mrb[148].mxu0 %v5426_v55  ;;  %v5486_v54 = vcombine.low %v538_v42, %v542_v43  ;;  %v5490_v55 = vcombine.low %v540_v44, %v544_v45  ;;  %v235_v42 = vld [vmem:[%s6755_s24 + $0x1c8] sm:$0xff]  ;;  %v237_v44 = vld [vmem:[%s6755_s24 + $0x1d8] sm:$0xff] }
 0x16f   : > { %3241 = vmatprep.mubr.bf16.mxu1 %v5431_v56  ;;  %4043 = vmatprep.mubr.bf16.mxu0 %v5435_v57  ;;  %v5129_v56 = vcombine.high %v179_v50, %v183_v51  ;;  %v5133_v57 = vcombine.high %v181_v52, %v185_v53  ;;  %v239_v43 = vld [vmem:[%s6755_s24 + $0x1e8] sm:$0xff]  ;;  %v241_v45 = vld [vmem:[%s6755_s24 + $0x1f8] sm:$0xff] }
 0x176   : > { %3242 = vmatmul.mubr.bf16.gmra.mrb[152].mxu1 %v5430_v62  ;;  %4044 = vmatmul.mubr.bf16.gmra.mrb[152].mxu0 %v5434_v63  ;;  %v5128_v62 = vcombine.low %v179_v50, %v183_v51  ;;  %v5132_v63 = vcombine.low %v181_v52, %v185_v53  ;;  %v243_v50 = vld [vmem:[%s6755_s24 + $0x208] sm:$0xff]  ;;  %v245_v52 = vld [vmem:[%s6755_s24 + $0x218] sm:$0xff] }
 0x177   : > { %3249 = vmatprep.mubr.bf16.mxu1 %v5439_v0  ;;  %4051 = vmatprep.mubr.bf16.mxu0 %v5443_v2  ;;  %v5137_v0 = vcombine.high %v187_v58, %v191_v59  ;;  %v5141_v2 = vcombine.high %v189_v60, %v193_v61  ;;  %v247_v51 = vld [vmem:[%s6755_s24 + $0x228] sm:$0xff]  ;;  %v249_v53 = vld [vmem:[%s6755_s24 + $0x238] sm:$0xff] }
 0x17e   : > { %3250 = vmatmul.mubr.bf16.gmra.mrb[156].mxu1 %v5438_v7  ;;  %4052 = vmatmul.mubr.bf16.gmra.mrb[156].mxu0 %v5442_v8  ;;  %v5136_v7 = vcombine.low %v187_v58, %v191_v59  ;;  %v5140_v8 = vcombine.low %v189_v60, %v193_v61  ;;  %v251_v58 = vld [vmem:[%s6755_s24 + $0x248] sm:$0xff]  ;;  %v253_v60 = vld [vmem:[%s6755_s24 + $0x258] sm:$0xff] }
 0x17f   : > { %3257 = vmatprep.mubr.bf16.mxu1 %v5447_v9  ;;  %4059 = vmatprep.mubr.bf16.mxu0 %v5451_v10  ;;  %v5145_v9 = vcombine.high %v195_v3, %v199_v4  ;;  %v5149_v10 = vcombine.high %v197_v5, %v201_v6  ;;  %v255_v59 = vld [vmem:[%s6755_s24 + $0x268] sm:$0xff]  ;;  %v257_v61 = vld [vmem:[%s6755_s24 + $0x278] sm:$0xff] }
 0x186   : > { %3258 = vmatmul.mubr.bf16.gmra.mrb[160].mxu1 %v5446_v15  ;;  %4060 = vmatmul.mubr.bf16.gmra.mrb[160].mxu0 %v5450_v16  ;;  %v5144_v15 = vcombine.low %v195_v3, %v199_v4  ;;  %v5148_v16 = vcombine.low %v197_v5, %v201_v6  ;;  %v259_v3 = vld [vmem:[%s6755_s24 + $0x288] sm:$0xff]  ;;  %v261_v5 = vld [vmem:[%s6755_s24 + $0x298] sm:$0xff] }
 0x187   : > { %3265 = vmatprep.mubr.bf16.mxu1 %v5455_v17  ;;  %4067 = vmatprep.mubr.bf16.mxu0 %v5459_v18  ;;  %v5153_v17 = vcombine.high %v203_v11, %v207_v12  ;;  %v5157_v18 = vcombine.high %v205_v13, %v209_v14  ;;  %v263_v4 = vld [vmem:[%s6755_s24 + $0x2a8] sm:$0xff]  ;;  %v265_v6 = vld [vmem:[%s6755_s24 + $0x2b8] sm:$0xff] }
 0x18e   : > { %3266 = vmatmul.mubr.bf16.gmra.mrb[164].mxu1 %v5454_v23  ;;  %4068 = vmatmul.mubr.bf16.gmra.mrb[164].mxu0 %v5458_v24  ;;  %v5152_v23 = vcombine.low %v203_v11, %v207_v12  ;;  %v5156_v24 = vcombine.low %v205_v13, %v209_v14  ;;  %v267_v11 = vld [vmem:[%s6755_s24 + $0x2c8] sm:$0xff]  ;;  %v269_v13 = vld [vmem:[%s6755_s24 + $0x2d8] sm:$0xff] }
 0x18f   : > { %3273 = vmatprep.mubr.bf16.mxu1 %v5463_v25  ;;  %4075 = vmatprep.mubr.bf16.mxu0 %v5467_v26  ;;  %v5161_v25 = vcombine.high %v211_v19, %v215_v20  ;;  %v5165_v26 = vcombine.high %v213_v21, %v217_v22  ;;  %v271_v12 = vld [vmem:[%s6755_s24 + $0x2e8] sm:$0xff]  ;;  %v273_v14 = vld [vmem:[%s6755_s24 + $0x2f8] sm:$0xff] }
 0x196   : > { %3274 = vmatmul.mubr.bf16.gmra.mrb[168].mxu1 %v5462_v31  ;;  %4076 = vmatmul.mubr.bf16.gmra.mrb[168].mxu0 %v5466_v32  ;;  %v5160_v31 = vcombine.low %v211_v19, %v215_v20  ;;  %v5164_v32 = vcombine.low %v213_v21, %v217_v22  ;;  %v275_v19 = vld [vmem:[%s6755_s24 + $0x308] sm:$0xff]  ;;  %v277_v21 = vld [vmem:[%s6755_s24 + $0x318] sm:$0xff] }
 0x197   : > { %3281 = vmatprep.mubr.bf16.mxu1 %v5471_v1  ;;  %4083 = vmatprep.mubr.bf16.mxu0 %v5475_v33  ;;  %v5169_v1 = vcombine.high %v219_v27, %v223_v28  ;;  %v5173_v33 = vcombine.high %v221_v29, %v225_v30  ;;  %v279_v20 = vld [vmem:[%s6755_s24 + $0x328] sm:$0xff]  ;;  %v281_v22 = vld [vmem:[%s6755_s24 + $0x338] sm:$0xff] }
 0x19e   : > { %3282 = vmatmul.mubr.bf16.gmra.mrb[172].mxu1 %v5470_v38  ;;  %4084 = vmatmul.mubr.bf16.gmra.mrb[172].mxu0 %v5474_v39  ;;  %v5168_v38 = vcombine.low %v219_v27, %v223_v28  ;;  %v5172_v39 = vcombine.low %v221_v29, %v225_v30  ;;  %v283_v27 = vld [vmem:[%s6755_s24 + $0x348] sm:$0xff]  ;;  %v285_v29 = vld [vmem:[%s6755_s24 + $0x358] sm:$0xff] }
 0x19f   : > { %3289 = vmatprep.mubr.bf16.mxu1 %v5479_v40  ;;  %4091 = vmatprep.mubr.bf16.mxu0 %v5483_v41  ;;  %v5177_v40 = vcombine.high %v227_v34, %v231_v35  ;;  %v5181_v41 = vcombine.high %v229_v36, %v233_v37  ;;  %v287_v28 = vld [vmem:[%s6755_s24 + $0x368] sm:$0xff]  ;;  %v289_v30 = vld [vmem:[%s6755_s24 + $0x378] sm:$0xff] }
 0x1a6   : > { %3290 = vmatmul.mubr.bf16.gmra.mrb[176].mxu1 %v5478_v46  ;;  %4092 = vmatmul.mubr.bf16.gmra.mrb[176].mxu0 %v5482_v47  ;;  %v5176_v46 = vcombine.low %v227_v34, %v231_v35  ;;  %v5180_v47 = vcombine.low %v229_v36, %v233_v37  ;;  %v291_v34 = vld [vmem:[%s6755_s24 + $0x388] sm:$0xff]  ;;  %v293_v36 = vld [vmem:[%s6755_s24 + $0x398] sm:$0xff] }
 0x1a7   : > { %3297 = vmatprep.mubr.bf16.mxu1 %v5487_v48  ;;  %4099 = vmatprep.mubr.bf16.mxu0 %v5491_v49  ;;  %v5185_v48 = vcombine.high %v235_v42, %v239_v43  ;;  %v5189_v49 = vcombine.high %v237_v44, %v241_v45  ;;  %v295_v35 = vld [vmem:[%s6755_s24 + $0x3a8] sm:$0xff]  ;;  %v297_v37 = vld [vmem:[%s6755_s24 + $0x3b8] sm:$0xff] }
 0x1ae   : > { %3298 = vmatmul.mubr.bf16.gmra.mrb[180].mxu1 %v5486_v54  ;;  %4100 = vmatmul.mubr.bf16.gmra.mrb[180].mxu0 %v5490_v55  ;;  %v5184_v54 = vcombine.low %v235_v42, %v239_v43  ;;  %v5188_v55 = vcombine.low %v237_v44, %v241_v45  ;;  %v299_v42 = vld [vmem:[%s6755_s24 + $0x3c8] sm:$0xff]  ;;  %v301_v44 = vld [vmem:[%s6755_s24 + $0x3d8] sm:$0xff] }
 0x1af   : > { %3338 = vmatprep.mubr.bf16.mxu1 %v5129_v56  ;;  %4140 = vmatprep.mubr.bf16.mxu0 %v5133_v57  ;;  %v5193_v56 = vcombine.high %v243_v50, %v247_v51  ;;  %v5197_v57 = vcombine.high %v245_v52, %v249_v53  ;;  %v303_v43 = vld [vmem:[%s6755_s24 + $0x3e8] sm:$0xff]  ;;  %v305_v45 = vld [vmem:[%s6755_s24 + $0x3f8] sm:$0xff] }
 0x1b6   : > { %3339 = vmatmul.mubr.bf16.vlgmr.msra.gmra.mrb[0].mxu1 %v5128_v62  ;;  %4141 = vmatmul.mubr.bf16.vlgmr.msra.gmra.mrb[0].mxu0 %v5132_v63  ;;  %v5192_v62 = vcombine.low %v243_v50, %v247_v51  ;;  %v5196_v63 = vcombine.low %v245_v52, %v249_v53  ;;  %v307_v50 = vld [vmem:[%s6755_s24 + $0x408] sm:$0xff]  ;;  %v309_v52 = vld [vmem:[%s6755_s24 + $0x418] sm:$0xff] }
 0x1b7   : > { %3346 = vmatprep.mubr.bf16.mxu1 %v5137_v0  ;;  %4148 = vmatprep.mubr.bf16.mxu0 %v5141_v2  ;;  %v5201_v0 = vcombine.high %v251_v58, %v255_v59  ;;  %v5205_v2 = vcombine.high %v253_v60, %v257_v61  ;;  %v311_v51 = vld [vmem:[%s6755_s24 + $0x428] sm:$0xff]  ;;  %v313_v53 = vld [vmem:[%s6755_s24 + $0x438] sm:$0xff] }
 0x1be   : > { %3347 = vmatmul.mubr.bf16.gmra.mrb[4].mxu1 %v5136_v7  ;;  %4149 = vmatmul.mubr.bf16.gmra.mrb[4].mxu0 %v5140_v8  ;;  %v5200_v7 = vcombine.low %v251_v58, %v255_v59  ;;  %v5204_v8 = vcombine.low %v253_v60, %v257_v61  ;;  %v315_v58 = vld [vmem:[%s6755_s24 + $0x448] sm:$0xff]  ;;  %v317_v60 = vld [vmem:[%s6755_s24 + $0x458] sm:$0xff] }
 0x1bf   : > { %3354 = vmatprep.mubr.bf16.mxu1 %v5145_v9  ;;  %4156 = vmatprep.mubr.bf16.mxu0 %v5149_v10  ;;  %v5209_v9 = vcombine.high %v259_v3, %v263_v4  ;;  %v5213_v10 = vcombine.high %v261_v5, %v265_v6  ;;  %v319_v59 = vld [vmem:[%s6755_s24 + $0x468] sm:$0xff]  ;;  %v321_v61 = vld [vmem:[%s6755_s24 + $0x478] sm:$0xff] }
 0x1c6   : > { %3355 = vmatmul.mubr.bf16.gmra.mrb[8].mxu1 %v5144_v15  ;;  %4157 = vmatmul.mubr.bf16.gmra.mrb[8].mxu0 %v5148_v16  ;;  %v5208_v15 = vcombine.low %v259_v3, %v263_v4  ;;  %v5212_v16 = vcombine.low %v261_v5, %v265_v6  ;;  %v323_v3 = vld [vmem:[%s6755_s24 + $0x488] sm:$0xff]  ;;  %v325_v5 = vld [vmem:[%s6755_s24 + $0x498] sm:$0xff] }
 0x1c7   : > { %3362 = vmatprep.mubr.bf16.mxu1 %v5153_v17  ;;  %4164 = vmatprep.mubr.bf16.mxu0 %v5157_v18  ;;  %v5217_v17 = vcombine.high %v267_v11, %v271_v12  ;;  %v5221_v18 = vcombine.high %v269_v13, %v273_v14  ;;  %v327_v4 = vld [vmem:[%s6755_s24 + $0x4a8] sm:$0xff]  ;;  %v329_v6 = vld [vmem:[%s6755_s24 + $0x4b8] sm:$0xff] }
 0x1ce   : > { %3363 = vmatmul.mubr.bf16.gmra.mrb[12].mxu1 %v5152_v23  ;;  %4165 = vmatmul.mubr.bf16.gmra.mrb[12].mxu0 %v5156_v24  ;;  %v5216_v23 = vcombine.low %v267_v11, %v271_v12  ;;  %v5220_v24 = vcombine.low %v269_v13, %v273_v14  ;;  %v331_v11 = vld [vmem:[%s6755_s24 + $0x4c8] sm:$0xff]  ;;  %v333_v13 = vld [vmem:[%s6755_s24 + $0x4d8] sm:$0xff] }
 0x1cf   : > { %3370 = vmatprep.mubr.bf16.mxu1 %v5161_v25  ;;  %4172 = vmatprep.mubr.bf16.mxu0 %v5165_v26  ;;  %v5225_v25 = vcombine.high %v275_v19, %v279_v20  ;;  %v5229_v26 = vcombine.high %v277_v21, %v281_v22  ;;  %v335_v12 = vld [vmem:[%s6755_s24 + $0x4e8] sm:$0xff]  ;;  %v337_v14 = vld [vmem:[%s6755_s24 + $0x4f8] sm:$0xff] }
 0x1d6   : > { %3371 = vmatmul.mubr.bf16.gmra.mrb[16].mxu1 %v5160_v31  ;;  %4173 = vmatmul.mubr.bf16.gmra.mrb[16].mxu0 %v5164_v32  ;;  %v5224_v31 = vcombine.low %v275_v19, %v279_v20  ;;  %v5228_v32 = vcombine.low %v277_v21, %v281_v22  ;;  %v339_v19 = vld [vmem:[%s6755_s24 + $0x508] sm:$0xff]  ;;  %v341_v21 = vld [vmem:[%s6755_s24 + $0x518] sm:$0xff] }
 0x1d7   : > { %3378 = vmatprep.mubr.bf16.mxu1 %v5169_v1  ;;  %4180 = vmatprep.mubr.bf16.mxu0 %v5173_v33  ;;  %v5233_v1 = vcombine.high %v283_v27, %v287_v28  ;;  %v5237_v33 = vcombine.high %v285_v29, %v289_v30  ;;  %v343_v20 = vld [vmem:[%s6755_s24 + $0x528] sm:$0xff]  ;;  %v345_v22 = vld [vmem:[%s6755_s24 + $0x538] sm:$0xff] }
 0x1de   : > { %3379 = vmatmul.mubr.bf16.gmra.mrb[20].mxu1 %v5168_v38  ;;  %4181 = vmatmul.mubr.bf16.gmra.mrb[20].mxu0 %v5172_v39  ;;  %v5232_v38 = vcombine.low %v283_v27, %v287_v28  ;;  %v5236_v39 = vcombine.low %v285_v29, %v289_v30  ;;  %v347_v27 = vld [vmem:[%s6755_s24 + $0x548] sm:$0xff]  ;;  %v349_v29 = vld [vmem:[%s6755_s24 + $0x558] sm:$0xff] }
 0x1df   : > { %3386 = vmatprep.mubr.bf16.mxu1 %v5177_v40  ;;  %4188 = vmatprep.mubr.bf16.mxu0 %v5181_v41  ;;  %v5241_v40 = vcombine.high %v291_v34, %v295_v35  ;;  %v5245_v41 = vcombine.high %v293_v36, %v297_v37  ;;  %v351_v28 = vld [vmem:[%s6755_s24 + $0x568] sm:$0xff]  ;;  %v353_v30 = vld [vmem:[%s6755_s24 + $0x578] sm:$0xff] }
 0x1e6   : > { %3387 = vmatmul.mubr.bf16.gmra.mrb[24].mxu1 %v5176_v46  ;;  %4189 = vmatmul.mubr.bf16.gmra.mrb[24].mxu0 %v5180_v47  ;;  %v5240_v46 = vcombine.low %v291_v34, %v295_v35  ;;  %v5244_v47 = vcombine.low %v293_v36, %v297_v37  ;;  %v355_v34 = vld [vmem:[%s6755_s24 + $0x588] sm:$0xff]  ;;  %v357_v36 = vld [vmem:[%s6755_s24 + $0x598] sm:$0xff] }
 0x1e7   : > { %3394 = vmatprep.mubr.bf16.mxu1 %v5185_v48  ;;  %4196 = vmatprep.mubr.bf16.mxu0 %v5189_v49  ;;  %v5249_v48 = vcombine.high %v299_v42, %v303_v43  ;;  %v5253_v49 = vcombine.high %v301_v44, %v305_v45  ;;  %v359_v35 = vld [vmem:[%s6755_s24 + $0x5a8] sm:$0xff]  ;;  %v361_v37 = vld [vmem:[%s6755_s24 + $0x5b8] sm:$0xff] }
 0x1ee   : > { %3395 = vmatmul.mubr.bf16.gmra.mrb[28].mxu1 %v5184_v54  ;;  %4197 = vmatmul.mubr.bf16.gmra.mrb[28].mxu0 %v5188_v55  ;;  %v5248_v54 = vcombine.low %v299_v42, %v303_v43  ;;  %v5252_v55 = vcombine.low %v301_v44, %v305_v45  ;;  %v363_v42 = vld [vmem:[%s6755_s24 + $0x5c8] sm:$0xff]  ;;  %v365_v44 = vld [vmem:[%s6755_s24 + $0x5d8] sm:$0xff] }
 0x1ef   : > { %3402 = vmatprep.mubr.bf16.mxu1 %v5193_v56  ;;  %4204 = vmatprep.mubr.bf16.mxu0 %v5197_v57  ;;  %v5257_v56 = vcombine.high %v307_v50, %v311_v51  ;;  %v5261_v57 = vcombine.high %v309_v52, %v313_v53  ;;  %v367_v43 = vld [vmem:[%s6755_s24 + $0x5e8] sm:$0xff]  ;;  %v369_v45 = vld [vmem:[%s6755_s24 + $0x5f8] sm:$0xff] }
 0x1f6   : > { %3403 = vmatmul.mubr.bf16.gmra.mrb[32].mxu1 %v5192_v62  ;;  %4205 = vmatmul.mubr.bf16.gmra.mrb[32].mxu0 %v5196_v63  ;;  %v5256_v62 = vcombine.low %v307_v50, %v311_v51  ;;  %v5260_v63 = vcombine.low %v309_v52, %v313_v53  ;;  %v371_v50 = vld [vmem:[%s6755_s24 + $0x608] sm:$0xff]  ;;  %v373_v52 = vld [vmem:[%s6755_s24 + $0x618] sm:$0xff] }
 0x1f7   : > { %3410 = vmatprep.mubr.bf16.mxu1 %v5201_v0  ;;  %4212 = vmatprep.mubr.bf16.mxu0 %v5205_v2  ;;  %v5265_v0 = vcombine.high %v315_v58, %v319_v59  ;;  %v5269_v2 = vcombine.high %v317_v60, %v321_v61  ;;  %v375_v51 = vld [vmem:[%s6755_s24 + $0x628] sm:$0xff]  ;;  %v377_v53 = vld [vmem:[%s6755_s24 + $0x638] sm:$0xff] }
 0x1fe   : > { %3411 = vmatmul.mubr.bf16.gmra.mrb[36].mxu1 %v5200_v7  ;;  %4213 = vmatmul.mubr.bf16.gmra.mrb[36].mxu0 %v5204_v8  ;;  %v5264_v7 = vcombine.low %v315_v58, %v319_v59  ;;  %v5268_v8 = vcombine.low %v317_v60, %v321_v61  ;;  %v379_v58 = vld [vmem:[%s6755_s24 + $0x648] sm:$0xff]  ;;  %v381_v60 = vld [vmem:[%s6755_s24 + $0x658] sm:$0xff] }
 0x1ff   : > { %3418 = vmatprep.mubr.bf16.mxu1 %v5209_v9  ;;  %4220 = vmatprep.mubr.bf16.mxu0 %v5213_v10  ;;  %v5273_v9 = vcombine.high %v323_v3, %v327_v4  ;;  %v5277_v10 = vcombine.high %v325_v5, %v329_v6  ;;  %v383_v59 = vld [vmem:[%s6755_s24 + $0x668] sm:$0xff]  ;;  %v385_v61 = vld [vmem:[%s6755_s24 + $0x678] sm:$0xff] }
 0x206   : > { %3419 = vmatmul.mubr.bf16.gmra.mrb[40].mxu1 %v5208_v15  ;;  %4221 = vmatmul.mubr.bf16.gmra.mrb[40].mxu0 %v5212_v16  ;;  %v5272_v15 = vcombine.low %v323_v3, %v327_v4  ;;  %v5276_v16 = vcombine.low %v325_v5, %v329_v6  ;;  %v387_v3 = vld [vmem:[%s6755_s24 + $0x688] sm:$0xff]  ;;  %v389_v5 = vld [vmem:[%s6755_s24 + $0x698] sm:$0xff] }
 0x207   : > { %3426 = vmatprep.mubr.bf16.mxu1 %v5217_v17  ;;  %4228 = vmatprep.mubr.bf16.mxu0 %v5221_v18  ;;  %v5281_v17 = vcombine.high %v331_v11, %v335_v12  ;;  %v5285_v18 = vcombine.high %v333_v13, %v337_v14  ;;  %v391_v4 = vld [vmem:[%s6755_s24 + $0x6a8] sm:$0xff]  ;;  %v393_v6 = vld [vmem:[%s6755_s24 + $0x6b8] sm:$0xff] }
 0x20e   : > { %3427 = vmatmul.mubr.bf16.gmra.mrb[44].mxu1 %v5216_v23  ;;  %4229 = vmatmul.mubr.bf16.gmra.mrb[44].mxu0 %v5220_v24  ;;  %v5280_v23 = vcombine.low %v331_v11, %v335_v12  ;;  %v5284_v24 = vcombine.low %v333_v13, %v337_v14  ;;  %v395_v11 = vld [vmem:[%s6755_s24 + $0x6c8] sm:$0xff]  ;;  %v397_v13 = vld [vmem:[%s6755_s24 + $0x6d8] sm:$0xff] }
 0x20f   : > { %3434 = vmatprep.mubr.bf16.mxu1 %v5225_v25  ;;  %4236 = vmatprep.mubr.bf16.mxu0 %v5229_v26  ;;  %v5289_v25 = vcombine.high %v339_v19, %v343_v20  ;;  %v5293_v26 = vcombine.high %v341_v21, %v345_v22  ;;  %v399_v12 = vld [vmem:[%s6755_s24 + $0x6e8] sm:$0xff]  ;;  %v401_v14 = vld [vmem:[%s6755_s24 + $0x6f8] sm:$0xff] }
 0x216   : > { %3435 = vmatmul.mubr.bf16.gmra.mrb[48].mxu1 %v5224_v31  ;;  %4237 = vmatmul.mubr.bf16.gmra.mrb[48].mxu0 %v5228_v32  ;;  %v5288_v31 = vcombine.low %v339_v19, %v343_v20  ;;  %v5292_v32 = vcombine.low %v341_v21, %v345_v22  ;;  %v7260_v19 = vld [vmem:[%s7488_s2] ss:$0 sm:$0xff]  ;;  %v403_v20 = vld [vmem:[%s6755_s24 + $0x708] sm:$0xff] }
 0x217   : > { %3442 = vmatprep.mubr.bf16.mxu1 %v5233_v1  ;;  %4244 = vmatprep.mubr.bf16.mxu0 %v5237_v33  ;;  %v5297_v1 = vcombine.high %v347_v27, %v351_v28  ;;  %v5301_v33 = vcombine.high %v349_v29, %v353_v30  ;;  %v407_v21 = vld [vmem:[%s6755_s24 + $0x728] sm:$0xff] }
 0x21e   : > { %3443 = vmatmul.mubr.bf16.gmra.mrb[52].mxu1 %v5232_v38  ;;  %4245 = vmatmul.mubr.bf16.gmra.mrb[52].mxu0 %v5236_v39  ;;  %v5296_v38 = vcombine.low %v347_v27, %v351_v28  ;;  %v5300_v39 = vcombine.low %v349_v29, %v353_v30  ;;  %v5344_v28 = vcombine.low %v395_v11, %v399_v12 }
 0x21f   : > { %3450 = vmatprep.mubr.bf16.mxu1 %v5241_v40  ;;  %4252 = vmatprep.mubr.bf16.mxu0 %v5245_v41  ;;  %v5305_v40 = vcombine.high %v355_v34, %v359_v35  ;;  %v5309_v41 = vcombine.high %v357_v36, %v361_v37 }
 0x226   : > { %3451 = vmatmul.mubr.bf16.gmra.mrb[56].mxu1 %v5240_v46  ;;  %4253 = vmatmul.mubr.bf16.gmra.mrb[56].mxu0 %v5244_v47  ;;  %v5304_v46 = vcombine.low %v355_v34, %v359_v35  ;;  %v5308_v47 = vcombine.low %v357_v36, %v361_v37 }
 0x227   : > { %3458 = vmatprep.mubr.bf16.mxu1 %v5249_v48  ;;  %4260 = vmatprep.mubr.bf16.mxu0 %v5253_v49  ;;  %v5313_v48 = vcombine.high %v363_v42, %v367_v43  ;;  %v5317_v49 = vcombine.high %v365_v44, %v369_v45 }
 0x22e   : > { %3459 = vmatmul.mubr.bf16.gmra.mrb[60].mxu1 %v5248_v54  ;;  %4261 = vmatmul.mubr.bf16.gmra.mrb[60].mxu0 %v5252_v55  ;;  %v5312_v54 = vcombine.low %v363_v42, %v367_v43  ;;  %v5316_v55 = vcombine.low %v365_v44, %v369_v45  ;;  %v415_v42 = vld [vmem:[%s6755_s24 + $0x768] sm:$0xff]  ;;  %v413_v44 = vld [vmem:[%s6755_s24 + $0x758] sm:$0xff] }
 0x22f   : > { %3466 = vmatprep.mubr.bf16.mxu1 %v5257_v56  ;;  %4268 = vmatprep.mubr.bf16.mxu0 %v5261_v57  ;;  %v5321_v56 = vcombine.high %v371_v50, %v375_v51  ;;  %v5325_v57 = vcombine.high %v373_v52, %v377_v53  ;;  %v417_v45 = vld [vmem:[%s6755_s24 + $0x778] sm:$0xff] }
 0x236   : > { %3467 = vmatmul.mubr.bf16.gmra.mrb[64].mxu1 %v5256_v62  ;;  %4269 = vmatmul.mubr.bf16.gmra.mrb[64].mxu0 %v5260_v63  ;;  %v5320_v62 = vcombine.low %v371_v50, %v375_v51  ;;  %v5324_v63 = vcombine.low %v373_v52, %v377_v53  ;;  %v5352_v50 = vcombine.low %v403_v20, %v407_v21 }
 0x237   : > { %3474 = vmatprep.mubr.bf16.mxu1 %v5265_v0  ;;  %4276 = vmatprep.mubr.bf16.mxu0 %v5269_v2  ;;  %v5329_v0 = vcombine.high %v379_v58, %v383_v59  ;;  %v5333_v2 = vcombine.high %v381_v60, %v385_v61 }
 0x23e   : > { %3475 = vmatmul.mubr.bf16.gmra.mrb[68].mxu1 %v5264_v7  ;;  %4277 = vmatmul.mubr.bf16.gmra.mrb[68].mxu0 %v5268_v8  ;;  %v5328_v7 = vcombine.low %v379_v58, %v383_v59  ;;  %v5332_v8 = vcombine.low %v381_v60, %v385_v61  ;;  %v5365_v59 = vcombine.high %v413_v44, %v417_v45 }
 0x23f   : > { %3482 = vmatprep.mubr.bf16.mxu1 %v5273_v9  ;;  %4284 = vmatprep.mubr.bf16.mxu0 %v5277_v10  ;;  %v5337_v9 = vcombine.high %v387_v3, %v391_v4  ;;  %v5341_v10 = vcombine.high %v389_v5, %v393_v6 }
 0x246   : > { %3483 = vmatmul.mubr.bf16.gmra.mrb[72].mxu1 %v5272_v15  ;;  %4285 = vmatmul.mubr.bf16.gmra.mrb[72].mxu0 %v5276_v16  ;;  %v5336_v15 = vcombine.low %v387_v3, %v391_v4  ;;  %v5340_v16 = vcombine.low %v389_v5, %v393_v6  ;;  %v421_v4 = vld [vmem:[%s6755_s24 + $0x798] sm:$0xff] }
 0x247   : > { %3490 = vmatprep.mubr.bf16.mxu1 %v5281_v17  ;;  %4292 = vmatprep.mubr.bf16.mxu0 %v5285_v18  ;;  %v5345_v17 = vcombine.high %v395_v11, %v399_v12  ;;  %v5349_v18 = vcombine.high %v397_v13, %v401_v14  ;;  %v425_v5 = vld [vmem:[%s6755_s24 + $0x7b8] sm:$0xff] }
 0x24e   : > { %3491 = vmatmul.mubr.bf16.gmra.mrb[76].mxu1 %v5280_v23  ;;  %4293 = vmatmul.mubr.bf16.gmra.mrb[76].mxu0 %v5284_v24  ;;  %v405_v23 = vld [vmem:[%s6755_s24 + $0x718] sm:$0xff] }
 0x24f   : > { %3498 = vmatprep.mubr.bf16.mxu1 %v5289_v25  ;;  %4300 = vmatprep.mubr.bf16.mxu0 %v5293_v26  ;;  %v409_v24 = vld [vmem:[%s6755_s24 + $0x738] sm:$0xff] }
 0x250   : > { %v5357_v36 = vcombine.high %v405_v23, %v409_v24  ;;  %v5356_v53 = vcombine.low %v405_v23, %v409_v24 }
 0x256   : > { %3499 = vmatmul.mubr.bf16.gmra.mrb[80].mxu1 %v5288_v31  ;;  %4301 = vmatmul.mubr.bf16.gmra.mrb[80].mxu0 %v5292_v32  ;;  %v5348_v31 = vcombine.low %v397_v13, %v401_v14  ;;  %v5353_v32 = vcombine.high %v403_v20, %v407_v21  ;;  %v5364_v13 = vcombine.low %v413_v44, %v417_v45 }
 0x257   : > { %3506 = vmatprep.mubr.bf16.mxu1 %v5297_v1  ;;  %4308 = vmatprep.mubr.bf16.mxu0 %v5301_v33  ;;  %v5373_v20 = vcombine.high %v421_v4, %v425_v5 }
 0x25e   : > { %3507 = vmatmul.mubr.bf16.gmra.mrb[84].mxu1 %v5296_v38  ;;  %4309 = vmatmul.mubr.bf16.gmra.mrb[84].mxu0 %v5300_v39 }
 0x25f   : > { %3514 = vmatprep.mubr.bf16.mxu1 %v5305_v40  ;;  %4316 = vmatprep.mubr.bf16.mxu0 %v5309_v41  ;;  %v411_v41 = vld [vmem:[%s6755_s24 + $0x748] sm:$0xff] }
 0x266   : > { %3515 = vmatmul.mubr.bf16.gmra.mrb[88].mxu1 %v5304_v46  ;;  %4317 = vmatmul.mubr.bf16.gmra.mrb[88].mxu0 %v5308_v47 }
 0x267   : > { %3522 = vmatprep.mubr.bf16.mxu1 %v5313_v48  ;;  %4324 = vmatprep.mubr.bf16.mxu0 %v5317_v49 }
 0x26e   : > { %3523 = vmatmul.mubr.bf16.gmra.mrb[92].mxu1 %v5312_v54  ;;  %4325 = vmatmul.mubr.bf16.gmra.mrb[92].mxu0 %v5316_v55  ;;  %v5361_v54 = vcombine.high %v411_v41, %v415_v42 }
 0x26f   : > { %3530 = vmatprep.mubr.bf16.mxu1 %v5321_v56  ;;  %4332 = vmatprep.mubr.bf16.mxu0 %v5325_v57 }
 0x276   : > { %3531 = vmatmul.mubr.bf16.gmra.mrb[96].mxu1 %v5320_v62  ;;  %4333 = vmatmul.mubr.bf16.gmra.mrb[96].mxu0 %v5324_v63 }
 0x277   : > { %3538 = vmatprep.mubr.bf16.mxu1 %v5329_v0  ;;  %4340 = vmatprep.mubr.bf16.mxu0 %v5333_v2  ;;  %v419_v0 = vld [vmem:[%s6755_s24 + $0x788] sm:$0xff] }
 0x278   : > { %v423_v2 = vld [vmem:[%s6755_s24 + $0x7a8] sm:$0xff] }
 0x279   : > { %v5369_v14 = vcombine.high %v419_v0, %v423_v2 }
 0x27e   : > { %3539 = vmatmul.mubr.bf16.gmra.mrb[100].mxu1 %v5328_v7  ;;  %4341 = vmatmul.mubr.bf16.gmra.mrb[100].mxu0 %v5332_v8 }
 0x27f   : > { %3546 = vmatprep.mubr.bf16.mxu1 %v5337_v9  ;;  %4348 = vmatprep.mubr.bf16.mxu0 %v5341_v10  ;;  %v5360_v10 = vcombine.low %v411_v41, %v415_v42 }
 0x286   : > { %3547 = vmatmul.mubr.bf16.gmra.mrb[104].mxu1 %v5336_v15  ;;  %4349 = vmatmul.mubr.bf16.gmra.mrb[104].mxu0 %v5340_v16 }
 0x287   : > { %3554 = vmatprep.mubr.bf16.mxu1 %v5345_v17  ;;  %4356 = vmatprep.mubr.bf16.mxu0 %v5349_v18 }
 0x289   : > { %v3340_v22 = vpop.f32.mrb[0].mxu1  ;;  %v4142_v26 = vpop.f32.mrb[0].mxu0 }
 0x28a   : > { %v6020_v25 = vadd.f32 %v7260_v19, %v3340_v22  ;;  %v3342_v27 = vpop.f32.mrb[1].mxu1  ;;  %v4144_v29 = vpop.f32.mrb[1].mxu0 }
 0x28b   : > { %v3343_v30 = vpop.f32.mrb[2].mxu1  ;;  %v4145_v34 = vpop.f32.mrb[2].mxu0  ;;  %v433_v29 = vld [vmem:[%s6755_s24 + $0x7f8] sm:$0xff] }
 0x28c   : > { %v6021_v1 = vadd.f32 %v6020_v25, %v4142_v26  ;;  %v6022_v33 = vadd.f32 %v7260_v19, %v3343_v30  ;;  %v3345_v35 = vpop.f32.mrb[3].mxu1  ;;  %v4147_v37 = vpop.f32.mrb[3].mxu0  ;;  %v427_v25 = vld [vmem:[%s6755_s24 + $0x7c8] sm:$0xff] }
 0x28d   : > { %v431_v26 = vld [vmem:[%s6755_s24 + $0x7e8] sm:$0xff] }
 0x28e   : > { %v6023_v38 = vadd.f32 %v6022_v33, %v4145_v34  ;;  %3555 = vmatmul.mubr.bf16.gmra.mrb[108].mxu1 %v5344_v28  ;;  %4357 = vmatmul.mubr.bf16.gmra.mrb[108].mxu0 %v5348_v31  ;;  %v4509_v39 = vmax.f32 %v6021_v1, 0.0  ;;  %v429_v28 = vld [vmem:[%s6755_s24 + $0x7d8] sm:$0xff]  ;;  %v5368_v33 = vcombine.low %v419_v0, %v423_v2  ;;  %v5377_v37 = vcombine.high %v427_v25, %v431_v26 }
 0x28f   : > { %3562 = vmatprep.mubr.bf16.mxu1 %v5353_v32  ;;  %4364 = vmatprep.mubr.bf16.mxu0 %v5357_v36  ;;  %v5372_v36 = vcombine.low %v421_v4, %v425_v5  ;;  %v5381_v42 = vcombine.high %v429_v28, %v433_v29 }
 0x290   : > { %v4510_v40 = vmax.f32 %v6023_v38, 0.0 }
 0x291   : > { %v3348_v43 = vpop.f32.mrb[4].mxu1  ;;  %v4150_v48 = vpop.f32.mrb[4].mxu0 }
 0x292   : > { %v5748_v46 = vpack.c.bf16 %v4510_v40, %v4509_v39  ;;  %v6024_v47 = vadd.f32 %v7260_v19, %v3348_v43  ;;  %v3350_v49 = vpop.f32.mrb[5].mxu1  ;;  %v4152_v51 = vpop.f32.mrb[5].mxu0 }
 0x293   : > { %v3351_v52 = vpop.f32.mrb[6].mxu1  ;;  %v4153_v57 = vpop.f32.mrb[6].mxu0  ;;  %v441_v51 = vld [vmem:[%s6755_s24 + $0x838] sm:$0xff] }
 0x294   : > { %5749 = vst [vmem:[%s7274_s30] sm:$0xff] %v5748_v46   ;;  %v6025_v55 = vadd.f32 %v6024_v47, %v4150_v48  ;;  %v6026_v56 = vadd.f32 %v7260_v19, %v3351_v52  ;;  %v3353_v58 = vpop.f32.mrb[7].mxu1  ;;  %v4155_v60 = vpop.f32.mrb[7].mxu0  ;;  %v435_v47 = vld [vmem:[%s6755_s24 + $0x808] sm:$0xff] }
 0x295   : > { %v439_v48 = vld [vmem:[%s6755_s24 + $0x828] sm:$0xff] }
 0x296   : > { %v6027_v61 = vadd.f32 %v6026_v56, %v4153_v57  ;;  %3563 = vmatmul.mubr.bf16.gmra.mrb[112].mxu1 %v5352_v50  ;;  %4365 = vmatmul.mubr.bf16.gmra.mrb[112].mxu0 %v5356_v53  ;;  %v4511_v62 = vmax.f32 %v6025_v55, 0.0  ;;  %v437_v50 = vld [vmem:[%s6755_s24 + $0x818] sm:$0xff]  ;;  %v5376_v56 = vcombine.low %v427_v25, %v431_v26  ;;  %v5385_v60 = vcombine.high %v435_v47, %v439_v48 }
 0x297   : > { %3570 = vmatprep.mubr.bf16.mxu1 %v5361_v54  ;;  %4372 = vmatprep.mubr.bf16.mxu0 %v5365_v59  ;;  %v5380_v59 = vcombine.low %v429_v28, %v433_v29  ;;  %v5389_v2 = vcombine.high %v437_v50, %v441_v51 }
 0x298   : > { %v4512_v63 = vmax.f32 %v6027_v61, 0.0 }
 0x299   : > { %v3356_v3 = vpop.f32.mrb[8].mxu1  ;;  %v4158_v8 = vpop.f32.mrb[8].mxu0 }
 0x29a   : > { %v5753_v6 = vpack.c.bf16 %v4512_v63, %v4511_v62  ;;  %v6028_v7 = vadd.f32 %v7260_v19, %v3356_v3  ;;  %v3358_v9 = vpop.f32.mrb[9].mxu1  ;;  %v4160_v11 = vpop.f32.mrb[9].mxu0 }
 0x29b   : > { %v3359_v12 = vpop.f32.mrb[10].mxu1  ;;  %v4161_v17 = vpop.f32.mrb[10].mxu0  ;;  %v449_v11 = vld [vmem:[%s6755_s24 + $0x878] sm:$0xff] }
 0x29c   : > { %5975 = vst [vmem:[%s7274_s30 + $0x8] sm:$0xff] %v5753_v6   ;;  %v6029_v15 = vadd.f32 %v6028_v7, %v4158_v8  ;;  %v6030_v16 = vadd.f32 %v7260_v19, %v3359_v12  ;;  %v3361_v18 = vpop.f32.mrb[11].mxu1  ;;  %v4163_v21 = vpop.f32.mrb[11].mxu0  ;;  %v443_v7 = vld [vmem:[%s6755_s24 + $0x848] sm:$0xff] }
 0x29d   : > { %v447_v8 = vld [vmem:[%s6755_s24 + $0x868] sm:$0xff] }
 0x29e   : > { %v6031_v22 = vadd.f32 %v6030_v16, %v4161_v17  ;;  %3571 = vmatmul.mubr.bf16.gmra.mrb[116].mxu1 %v5360_v10  ;;  %4373 = vmatmul.mubr.bf16.gmra.mrb[116].mxu0 %v5364_v13  ;;  %v4513_v23 = vmax.f32 %v6029_v15, 0.0  ;;  %v445_v10 = vld [vmem:[%s6755_s24 + $0x858] sm:$0xff]  ;;  %v5384_v16 = vcombine.low %v435_v47, %v439_v48  ;;  %v5393_v21 = vcombine.high %v443_v7, %v447_v8 }
 0x29f   : > { %3578 = vmatprep.mubr.bf16.mxu1 %v5369_v14  ;;  %4380 = vmatprep.mubr.bf16.mxu0 %v5373_v20  ;;  %v5388_v20 = vcombine.low %v437_v50, %v441_v51  ;;  %v5397_v26 = vcombine.high %v445_v10, %v449_v11 }
 0x2a0   : > { %v4514_v24 = vmax.f32 %v6031_v22, 0.0 }
 0x2a1   : > { %v3364_v27 = vpop.f32.mrb[12].mxu1  ;;  %v4166_v32 = vpop.f32.mrb[12].mxu0 }
 0x2a2   : > { %v5758_v30 = vpack.c.bf16 %v4514_v24, %v4513_v23  ;;  %v6032_v31 = vadd.f32 %v7260_v19, %v3364_v27  ;;  %v3366_v1 = vpop.f32.mrb[13].mxu1  ;;  %v4168_v34 = vpop.f32.mrb[13].mxu0 }
 0x2a3   : > { %v3367_v35 = vpop.f32.mrb[14].mxu1  ;;  %v4169_v40 = vpop.f32.mrb[14].mxu0  ;;  %v457_v34 = vld [vmem:[%s6755_s24 + $0x8b8] sm:$0xff] }
 0x2a4   : > { %5976 = vst [vmem:[%s7274_s30 + $0x10] sm:$0xff] %v5758_v30   ;;  %v6033_v38 = vadd.f32 %v6032_v31, %v4166_v32  ;;  %v6034_v39 = vadd.f32 %v7260_v19, %v3367_v35  ;;  %v3369_v41 = vpop.f32.mrb[15].mxu1  ;;  %v4171_v43 = vpop.f32.mrb[15].mxu0  ;;  %v451_v31 = vld [vmem:[%s6755_s24 + $0x888] sm:$0xff] }
 0x2a5   : > { %v455_v32 = vld [vmem:[%s6755_s24 + $0x8a8] sm:$0xff] }
 0x2a6   : > { %v6035_v44 = vadd.f32 %v6034_v39, %v4169_v40  ;;  %3579 = vmatmul.mubr.bf16.gmra.mrb[120].mxu1 %v5368_v33  ;;  %4381 = vmatmul.mubr.bf16.gmra.mrb[120].mxu0 %v5372_v36  ;;  %v4515_v45 = vmax.f32 %v6033_v38, 0.0  ;;  %v453_v33 = vld [vmem:[%s6755_s24 + $0x898] sm:$0xff]  ;;  %v5392_v39 = vcombine.low %v443_v7, %v447_v8  ;;  %v5401_v43 = vcombine.high %v451_v31, %v455_v32 }
 0x2a7   : > { %3586 = vmatprep.mubr.bf16.mxu1 %v5377_v37  ;;  %4388 = vmatprep.mubr.bf16.mxu0 %v5381_v42  ;;  %v5396_v42 = vcombine.low %v445_v10, %v449_v11  ;;  %v5405_v48 = vcombine.high %v453_v33, %v457_v34 }
 0x2a8   : > { %v4516_v46 = vmax.f32 %v6035_v44, 0.0 }
 0x2a9   : > { %v3372_v49 = vpop.f32.mrb[16].mxu1  ;;  %v4174_v54 = vpop.f32.mrb[16].mxu0 }
 0x2aa   : > { %v5763_v52 = vpack.c.bf16 %v4516_v46, %v4515_v45  ;;  %v6036_v53 = vadd.f32 %v7260_v19, %v3372_v49  ;;  %v3374_v55 = vpop.f32.mrb[17].mxu1  ;;  %v4176_v57 = vpop.f32.mrb[17].mxu0 }
 0x2ab   : > { %v3375_v58 = vpop.f32.mrb[18].mxu1  ;;  %v4177_v63 = vpop.f32.mrb[18].mxu0  ;;  %v465_v57 = vld [vmem:[%s6755_s24 + $0x8f8] sm:$0xff] }
 0x2ac   : > { %5977 = vst [vmem:[%s7274_s30 + $0x18] sm:$0xff] %v5763_v52   ;;  %v6037_v61 = vadd.f32 %v6036_v53, %v4174_v54  ;;  %v6038_v62 = vadd.f32 %v7260_v19, %v3375_v58  ;;  %v3377_v0 = vpop.f32.mrb[19].mxu1  ;;  %v4179_v3 = vpop.f32.mrb[19].mxu0  ;;  %v459_v53 = vld [vmem:[%s6755_s24 + $0x8c8] sm:$0xff] }
 0x2ad   : > { %v463_v54 = vld [vmem:[%s6755_s24 + $0x8e8] sm:$0xff] }
 0x2ae   : > { %v6039_v4 = vadd.f32 %v6038_v62, %v4177_v63  ;;  %3587 = vmatmul.mubr.bf16.gmra.mrb[124].mxu1 %v5376_v56  ;;  %4389 = vmatmul.mubr.bf16.gmra.mrb[124].mxu0 %v5380_v59  ;;  %v4517_v5 = vmax.f32 %v6037_v61, 0.0  ;;  %v461_v56 = vld [vmem:[%s6755_s24 + $0x8d8] sm:$0xff]  ;;  %v5400_v62 = vcombine.low %v451_v31, %v455_v32  ;;  %v5409_v3 = vcombine.high %v459_v53, %v463_v54 }
 0x2af   : > { %3594 = vmatprep.mubr.bf16.mxu1 %v5385_v60  ;;  %4396 = vmatprep.mubr.bf16.mxu0 %v5389_v2  ;;  %v5404_v2 = vcombine.low %v453_v33, %v457_v34  ;;  %v5413_v8 = vcombine.high %v461_v56, %v465_v57 }
 0x2b0   : > { %v4518_v6 = vmax.f32 %v6039_v4, 0.0 }
 0x2b1   : > { %v3380_v9 = vpop.f32.mrb[20].mxu1  ;;  %v4182_v14 = vpop.f32.mrb[20].mxu0 }
 0x2b2   : > { %v5768_v12 = vpack.c.bf16 %v4518_v6, %v4517_v5  ;;  %v6040_v13 = vadd.f32 %v7260_v19, %v3380_v9  ;;  %v3382_v15 = vpop.f32.mrb[21].mxu1  ;;  %v4184_v17 = vpop.f32.mrb[21].mxu0 }
 0x2b3   : > { %v3383_v18 = vpop.f32.mrb[22].mxu1  ;;  %v4185_v24 = vpop.f32.mrb[22].mxu0  ;;  %v473_v17 = vld [vmem:[%s6755_s24 + $0x938] sm:$0xff] }
 0x2b4   : > { %5978 = vst [vmem:[%s7274_s30 + $0x20] sm:$0xff] %v5768_v12   ;;  %v6041_v22 = vadd.f32 %v6040_v13, %v4182_v14  ;;  %v6042_v23 = vadd.f32 %v7260_v19, %v3383_v18  ;;  %v3385_v25 = vpop.f32.mrb[23].mxu1  ;;  %v4187_v27 = vpop.f32.mrb[23].mxu0  ;;  %v467_v13 = vld [vmem:[%s6755_s24 + $0x908] sm:$0xff] }
 0x2b5   : > { %v471_v14 = vld [vmem:[%s6755_s24 + $0x928] sm:$0xff] }
 0x2b6   : > { %v6043_v28 = vadd.f32 %v6042_v23, %v4185_v24  ;;  %3595 = vmatmul.mubr.bf16.gmra.mrb[128].mxu1 %v5384_v16  ;;  %4397 = vmatmul.mubr.bf16.gmra.mrb[128].mxu0 %v5388_v20  ;;  %v4519_v29 = vmax.f32 %v6041_v22, 0.0  ;;  %v469_v16 = vld [vmem:[%s6755_s24 + $0x918] sm:$0xff]  ;;  %v5408_v23 = vcombine.low %v459_v53, %v463_v54  ;;  %v5417_v27 = vcombine.high %v467_v13, %v471_v14 }
 0x2b7   : > { %3602 = vmatprep.mubr.bf16.mxu1 %v5393_v21  ;;  %4404 = vmatprep.mubr.bf16.mxu0 %v5397_v26  ;;  %v5412_v26 = vcombine.low %v461_v56, %v465_v57  ;;  %v5421_v32 = vcombine.high %v469_v16, %v473_v17 }
 0x2b8   : > { %v4520_v30 = vmax.f32 %v6043_v28, 0.0 }
 0x2b9   : > { %v3388_v1 = vpop.f32.mrb[24].mxu1  ;;  %v4190_v37 = vpop.f32.mrb[24].mxu0 }
 0x2ba   : > { %v5773_v35 = vpack.c.bf16 %v4520_v30, %v4519_v29  ;;  %v6044_v36 = vadd.f32 %v7260_v19, %v3388_v1  ;;  %v3390_v38 = vpop.f32.mrb[25].mxu1  ;;  %v4192_v40 = vpop.f32.mrb[25].mxu0 }
 0x2bb   : > { %v3391_v41 = vpop.f32.mrb[26].mxu1  ;;  %v4193_v46 = vpop.f32.mrb[26].mxu0  ;;  %v481_v40 = vld [vmem:[%s6755_s24 + $0x978] sm:$0xff] }
 0x2bc   : > { %5979 = vst [vmem:[%s7274_s30 + $0x28] sm:$0xff] %v5773_v35   ;;  %v6045_v44 = vadd.f32 %v6044_v36, %v4190_v37  ;;  %v6046_v45 = vadd.f32 %v7260_v19, %v3391_v41  ;;  %v3393_v47 = vpop.f32.mrb[27].mxu1  ;;  %v4195_v49 = vpop.f32.mrb[27].mxu0  ;;  %v475_v36 = vld [vmem:[%s6755_s24 + $0x948] sm:$0xff] }
 0x2bd   : > { %v479_v37 = vld [vmem:[%s6755_s24 + $0x968] sm:$0xff] }
 0x2be   : > { %v6047_v50 = vadd.f32 %v6046_v45, %v4193_v46  ;;  %3603 = vmatmul.mubr.bf16.gmra.mrb[132].mxu1 %v5392_v39  ;;  %4405 = vmatmul.mubr.bf16.gmra.mrb[132].mxu0 %v5396_v42  ;;  %v4521_v51 = vmax.f32 %v6045_v44, 0.0  ;;  %v477_v39 = vld [vmem:[%s6755_s24 + $0x958] sm:$0xff]  ;;  %v5416_v45 = vcombine.low %v467_v13, %v471_v14  ;;  %v5425_v49 = vcombine.high %v475_v36, %v479_v37 }
 0x2bf   : > { %3610 = vmatprep.mubr.bf16.mxu1 %v5401_v43  ;;  %4412 = vmatprep.mubr.bf16.mxu0 %v5405_v48  ;;  %v5420_v48 = vcombine.low %v469_v16, %v473_v17  ;;  %v5429_v54 = vcombine.high %v477_v39, %v481_v40 }
 0x2c0   : > { %v4522_v52 = vmax.f32 %v6047_v50, 0.0 }
 0x2c1   : > { %v3396_v55 = vpop.f32.mrb[28].mxu1  ;;  %v4198_v60 = vpop.f32.mrb[28].mxu0 }
 0x2c2   : > { %v5778_v58 = vpack.c.bf16 %v4522_v52, %v4521_v51  ;;  %v6048_v59 = vadd.f32 %v7260_v19, %v3396_v55  ;;  %v3398_v61 = vpop.f32.mrb[29].mxu1  ;;  %v4200_v63 = vpop.f32.mrb[29].mxu0 }
 0x2c3   : > { %v3399_v0 = vpop.f32.mrb[30].mxu1  ;;  %v4201_v6 = vpop.f32.mrb[30].mxu0  ;;  %v489_v63 = vld [vmem:[%s6755_s24 + $0x9b8] sm:$0xff] }
 0x2c4   : > { %5980 = vst [vmem:[%s7274_s30 + $0x30] sm:$0xff] %v5778_v58   ;;  %v6049_v4 = vadd.f32 %v6048_v59, %v4198_v60  ;;  %v6050_v5 = vadd.f32 %v7260_v19, %v3399_v0  ;;  %v3401_v7 = vpop.f32.mrb[31].mxu1  ;;  %v4203_v9 = vpop.f32.mrb[31].mxu0  ;;  %v483_v59 = vld [vmem:[%s6755_s24 + $0x988] sm:$0xff] }
 0x2c5   : > { %v487_v60 = vld [vmem:[%s6755_s24 + $0x9a8] sm:$0xff] }
 0x2c6   : > { %v6051_v10 = vadd.f32 %v6050_v5, %v4201_v6  ;;  %3611 = vmatmul.mubr.bf16.gmra.mrb[136].mxu1 %v5400_v62  ;;  %4413 = vmatmul.mubr.bf16.gmra.mrb[136].mxu0 %v5404_v2  ;;  %v4523_v11 = vmax.f32 %v6049_v4, 0.0  ;;  %v485_v62 = vld [vmem:[%s6755_s24 + $0x998] sm:$0xff]  ;;  %v5424_v5 = vcombine.low %v475_v36, %v479_v37  ;;  %v5433_v9 = vcombine.high %v483_v59, %v487_v60 }
 0x2c7   : > { %3618 = vmatprep.mubr.bf16.mxu1 %v5409_v3  ;;  %4420 = vmatprep.mubr.bf16.mxu0 %v5413_v8  ;;  %v5428_v8 = vcombine.low %v477_v39, %v481_v40  ;;  %v5437_v14 = vcombine.high %v485_v62, %v489_v63 }
 0x2c8   : > { %v4524_v12 = vmax.f32 %v6051_v10, 0.0 }
 0x2c9   : > { %v3404_v15 = vpop.f32.mrb[32].mxu1  ;;  %v4206_v21 = vpop.f32.mrb[32].mxu0 }
 0x2ca   : > { %v5783_v18 = vpack.c.bf16 %v4524_v12, %v4523_v11  ;;  %v6052_v20 = vadd.f32 %v7260_v19, %v3404_v15  ;;  %v3406_v22 = vpop.f32.mrb[33].mxu1  ;;  %v4208_v24 = vpop.f32.mrb[33].mxu0 }
 0x2cb   : > { %v3407_v25 = vpop.f32.mrb[34].mxu1  ;;  %v4209_v30 = vpop.f32.mrb[34].mxu0  ;;  %v497_v24 = vld [vmem:[%s6755_s24 + $0x9f8] sm:$0xff] }
 0x2cc   : > { %5981 = vst [vmem:[%s7274_s30 + $0x38] sm:$0xff] %v5783_v18   ;;  %v6053_v28 = vadd.f32 %v6052_v20, %v4206_v21  ;;  %v6054_v29 = vadd.f32 %v7260_v19, %v3407_v25  ;;  %v3409_v31 = vpop.f32.mrb[35].mxu1  ;;  %v4211_v1 = vpop.f32.mrb[35].mxu0  ;;  %v491_v20 = vld [vmem:[%s6755_s24 + $0x9c8] sm:$0xff] }
 0x2cd   : > { %v495_v21 = vld [vmem:[%s6755_s24 + $0x9e8] sm:$0xff] }
 0x2ce   : > { %v6055_v33 = vadd.f32 %v6054_v29, %v4209_v30  ;;  %3619 = vmatmul.mubr.bf16.gmra.mrb[140].mxu1 %v5408_v23  ;;  %4421 = vmatmul.mubr.bf16.gmra.mrb[140].mxu0 %v5412_v26  ;;  %v4525_v34 = vmax.f32 %v6053_v28, 0.0  ;;  %v493_v23 = vld [vmem:[%s6755_s24 + $0x9d8] sm:$0xff]  ;;  %v5432_v29 = vcombine.low %v483_v59, %v487_v60  ;;  %v5441_v1 = vcombine.high %v491_v20, %v495_v21 }
 0x2cf   : > { %3626 = vmatprep.mubr.bf16.mxu1 %v5417_v27  ;;  %4428 = vmatprep.mubr.bf16.mxu0 %v5421_v32  ;;  %v5436_v32 = vcombine.low %v485_v62, %v489_v63  ;;  %v5445_v37 = vcombine.high %v493_v23, %v497_v24 }
 0x2d0   : > { %v4526_v35 = vmax.f32 %v6055_v33, 0.0 }
 0x2d1   : > { %v3412_v38 = vpop.f32.mrb[36].mxu1  ;;  %v4214_v43 = vpop.f32.mrb[36].mxu0 }
 0x2d2   : > { %v5788_v41 = vpack.c.bf16 %v4526_v35, %v4525_v34  ;;  %v6056_v42 = vadd.f32 %v7260_v19, %v3412_v38  ;;  %v3414_v44 = vpop.f32.mrb[37].mxu1  ;;  %v4216_v46 = vpop.f32.mrb[37].mxu0 }
 0x2d3   : > { %v3415_v47 = vpop.f32.mrb[38].mxu1  ;;  %v4217_v52 = vpop.f32.mrb[38].mxu0  ;;  %v505_v46 = vld [vmem:[%s6755_s24 + $0xa38] sm:$0xff] }
 0x2d4   : > { %5982 = vst [vmem:[%s7274_s30 + $0x40] sm:$0xff] %v5788_v41   ;;  %v6057_v50 = vadd.f32 %v6056_v42, %v4214_v43  ;;  %v6058_v51 = vadd.f32 %v7260_v19, %v3415_v47  ;;  %v3417_v53 = vpop.f32.mrb[39].mxu1  ;;  %v4219_v55 = vpop.f32.mrb[39].mxu0  ;;  %v499_v42 = vld [vmem:[%s6755_s24 + $0xa08] sm:$0xff] }
 0x2d5   : > { %v503_v43 = vld [vmem:[%s6755_s24 + $0xa28] sm:$0xff] }
 0x2d6   : > { %v6059_v56 = vadd.f32 %v6058_v51, %v4217_v52  ;;  %3627 = vmatmul.mubr.bf16.gmra.mrb[144].mxu1 %v5416_v45  ;;  %4429 = vmatmul.mubr.bf16.gmra.mrb[144].mxu0 %v5420_v48  ;;  %v4527_v57 = vmax.f32 %v6057_v50, 0.0  ;;  %v501_v45 = vld [vmem:[%s6755_s24 + $0xa18] sm:$0xff]  ;;  %v5440_v51 = vcombine.low %v491_v20, %v495_v21  ;;  %v5449_v55 = vcombine.high %v499_v42, %v503_v43 }
 0x2d7   : > { %3634 = vmatprep.mubr.bf16.mxu1 %v5425_v49  ;;  %4436 = vmatprep.mubr.bf16.mxu0 %v5429_v54  ;;  %v5444_v54 = vcombine.low %v493_v23, %v497_v24  ;;  %v5453_v60 = vcombine.high %v501_v45, %v505_v46 }
 0x2d8   : > { %v4528_v58 = vmax.f32 %v6059_v56, 0.0 }
 0x2d9   : > { %v3420_v61 = vpop.f32.mrb[40].mxu1  ;;  %v4222_v3 = vpop.f32.mrb[40].mxu0 }
 0x2da   : > { %v5793_v0 = vpack.c.bf16 %v4528_v58, %v4527_v57  ;;  %v6060_v2 = vadd.f32 %v7260_v19, %v3420_v61  ;;  %v3422_v4 = vpop.f32.mrb[41].mxu1  ;;  %v4224_v6 = vpop.f32.mrb[41].mxu0 }
 0x2db   : > { %v3423_v7 = vpop.f32.mrb[42].mxu1  ;;  %v4225_v12 = vpop.f32.mrb[42].mxu0  ;;  %v513_v6 = vld [vmem:[%s6755_s24 + $0xa78] sm:$0xff] }
 0x2dc   : > { %5983 = vst [vmem:[%s7274_s30 + $0x48] sm:$0xff] %v5793_v0   ;;  %v6061_v10 = vadd.f32 %v6060_v2, %v4222_v3  ;;  %v6062_v11 = vadd.f32 %v7260_v19, %v3423_v7  ;;  %v3425_v13 = vpop.f32.mrb[43].mxu1  ;;  %v4227_v15 = vpop.f32.mrb[43].mxu0  ;;  %v507_v2 = vld [vmem:[%s6755_s24 + $0xa48] sm:$0xff] }
 0x2dd   : > { %v511_v3 = vld [vmem:[%s6755_s24 + $0xa68] sm:$0xff] }
 0x2de   : > { %v6063_v16 = vadd.f32 %v6062_v11, %v4225_v12  ;;  %3635 = vmatmul.mubr.bf16.gmra.mrb[148].mxu1 %v5424_v5  ;;  %4437 = vmatmul.mubr.bf16.gmra.mrb[148].mxu0 %v5428_v8  ;;  %v4529_v17 = vmax.f32 %v6061_v10, 0.0  ;;  %v509_v5 = vld [vmem:[%s6755_s24 + $0xa58] sm:$0xff]  ;;  %v5448_v11 = vcombine.low %v499_v42, %v503_v43  ;;  %v5457_v15 = vcombine.high %v507_v2, %v511_v3 }
 0x2df   : > { %3642 = vmatprep.mubr.bf16.mxu1 %v5433_v9  ;;  %4444 = vmatprep.mubr.bf16.mxu0 %v5437_v14  ;;  %v5452_v14 = vcombine.low %v501_v45, %v505_v46  ;;  %v5461_v21 = vcombine.high %v509_v5, %v513_v6 }
 0x2e0   : > { %v4530_v18 = vmax.f32 %v6063_v16, 0.0 }
 0x2e1   : > { %v3428_v22 = vpop.f32.mrb[44].mxu1  ;;  %v4230_v27 = vpop.f32.mrb[44].mxu0 }
 0x2e2   : > { %v5798_v25 = vpack.c.bf16 %v4530_v18, %v4529_v17  ;;  %v6064_v26 = vadd.f32 %v7260_v19, %v3428_v22  ;;  %v3430_v28 = vpop.f32.mrb[45].mxu1  ;;  %v4232_v30 = vpop.f32.mrb[45].mxu0 }
 0x2e3   : > { %v3431_v31 = vpop.f32.mrb[46].mxu1  ;;  %v4233_v35 = vpop.f32.mrb[46].mxu0  ;;  %v521_v30 = vld [vmem:[%s6755_s24 + $0xab8] sm:$0xff] }
 0x2e4   : > { %5984 = vst [vmem:[%s7274_s30 + $0x50] sm:$0xff] %v5798_v25   ;;  %v6065_v33 = vadd.f32 %v6064_v26, %v4230_v27  ;;  %v6066_v34 = vadd.f32 %v7260_v19, %v3431_v31  ;;  %v3433_v36 = vpop.f32.mrb[47].mxu1  ;;  %v4235_v38 = vpop.f32.mrb[47].mxu0  ;;  %v515_v26 = vld [vmem:[%s6755_s24 + $0xa88] sm:$0xff] }
 0x2e5   : > { %v519_v27 = vld [vmem:[%s6755_s24 + $0xaa8] sm:$0xff] }
 0x2e6   : > { %v6067_v39 = vadd.f32 %v6066_v34, %v4233_v35  ;;  %3643 = vmatmul.mubr.bf16.gmra.mrb[152].mxu1 %v5432_v29  ;;  %4445 = vmatmul.mubr.bf16.gmra.mrb[152].mxu0 %v5436_v32  ;;  %v4531_v40 = vmax.f32 %v6065_v33, 0.0  ;;  %v517_v29 = vld [vmem:[%s6755_s24 + $0xa98] sm:$0xff]  ;;  %v5456_v34 = vcombine.low %v507_v2, %v511_v3  ;;  %v5465_v38 = vcombine.high %v515_v26, %v519_v27 }
 0x2e7   : > { %3650 = vmatprep.mubr.bf16.mxu1 %v5441_v1  ;;  %4452 = vmatprep.mubr.bf16.mxu0 %v5445_v37  ;;  %v5460_v37 = vcombine.low %v509_v5, %v513_v6  ;;  %v5469_v43 = vcombine.high %v517_v29, %v521_v30 }
 0x2e8   : > { %v4532_v41 = vmax.f32 %v6067_v39, 0.0 }
 0x2e9   : > { %v3436_v44 = vpop.f32.mrb[48].mxu1  ;;  %v4238_v49 = vpop.f32.mrb[48].mxu0 }
 0x2ea   : > { %v5803_v47 = vpack.c.bf16 %v4532_v41, %v4531_v40  ;;  %v6068_v48 = vadd.f32 %v7260_v19, %v3436_v44  ;;  %v3438_v50 = vpop.f32.mrb[49].mxu1  ;;  %v4240_v52 = vpop.f32.mrb[49].mxu0 }
 0x2eb   : > { %v3439_v53 = vpop.f32.mrb[50].mxu1  ;;  %v4241_v58 = vpop.f32.mrb[50].mxu0  ;;  %v529_v52 = vld [vmem:[%s6755_s24 + $0xaf8] sm:$0xff] }
 0x2ec   : > { %5985 = vst [vmem:[%s7274_s30 + $0x58] sm:$0xff] %v5803_v47   ;;  %v6069_v56 = vadd.f32 %v6068_v48, %v4238_v49  ;;  %v6070_v57 = vadd.f32 %v7260_v19, %v3439_v53  ;;  %v3441_v59 = vpop.f32.mrb[51].mxu1  ;;  %v4243_v61 = vpop.f32.mrb[51].mxu0  ;;  %v523_v48 = vld [vmem:[%s6755_s24 + $0xac8] sm:$0xff] }
 0x2ed   : > { %v527_v49 = vld [vmem:[%s6755_s24 + $0xae8] sm:$0xff] }
 0x2ee   : > { %v6071_v62 = vadd.f32 %v6070_v57, %v4241_v58  ;;  %3651 = vmatmul.mubr.bf16.gmra.mrb[156].mxu1 %v5440_v51  ;;  %4453 = vmatmul.mubr.bf16.gmra.mrb[156].mxu0 %v5444_v54  ;;  %v4533_v63 = vmax.f32 %v6069_v56, 0.0  ;;  %v525_v51 = vld [vmem:[%s6755_s24 + $0xad8] sm:$0xff]  ;;  %v5464_v57 = vcombine.low %v515_v26, %v519_v27  ;;  %v5473_v61 = vcombine.high %v523_v48, %v527_v49 }
 0x2ef   : > { %3658 = vmatprep.mubr.bf16.mxu1 %v5449_v55  ;;  %4460 = vmatprep.mubr.bf16.mxu0 %v5453_v60  ;;  %v5468_v60 = vcombine.low %v517_v29, %v521_v30  ;;  %v5477_v3 = vcombine.high %v525_v51, %v529_v52 }
 0x2f0   : > { %v4534_v0 = vmax.f32 %v6071_v62, 0.0 }
 0x2f1   : > { %v3444_v4 = vpop.f32.mrb[52].mxu1  ;;  %v4246_v9 = vpop.f32.mrb[52].mxu0 }
 0x2f2   : > { %v5808_v7 = vpack.c.bf16 %v4534_v0, %v4533_v63  ;;  %v6072_v8 = vadd.f32 %v7260_v19, %v3444_v4  ;;  %v3446_v10 = vpop.f32.mrb[53].mxu1  ;;  %v4248_v12 = vpop.f32.mrb[53].mxu0 }
 0x2f3   : > { %v3447_v13 = vpop.f32.mrb[54].mxu1  ;;  %v4249_v18 = vpop.f32.mrb[54].mxu0  ;;  %v537_v12 = vld [vmem:[%s6755_s24 + $0xb38] sm:$0xff] }
 0x2f4   : > { %5986 = vst [vmem:[%s7274_s30 + $0x60] sm:$0xff] %v5808_v7   ;;  %v6073_v16 = vadd.f32 %v6072_v8, %v4246_v9  ;;  %v6074_v17 = vadd.f32 %v7260_v19, %v3447_v13  ;;  %v3449_v20 = vpop.f32.mrb[55].mxu1  ;;  %v4251_v22 = vpop.f32.mrb[55].mxu0  ;;  %v531_v8 = vld [vmem:[%s6755_s24 + $0xb08] sm:$0xff] }
 0x2f5   : > { %v535_v9 = vld [vmem:[%s6755_s24 + $0xb28] sm:$0xff] }
 0x2f6   : > { %v6075_v23 = vadd.f32 %v6074_v17, %v4249_v18  ;;  %3659 = vmatmul.mubr.bf16.gmra.mrb[160].mxu1 %v5448_v11  ;;  %4461 = vmatmul.mubr.bf16.gmra.mrb[160].mxu0 %v5452_v14  ;;  %v4535_v24 = vmax.f32 %v6073_v16, 0.0  ;;  %v533_v11 = vld [vmem:[%s6755_s24 + $0xb18] sm:$0xff]  ;;  %v5472_v17 = vcombine.low %v523_v48, %v527_v49  ;;  %v5481_v22 = vcombine.high %v531_v8, %v535_v9 }
 0x2f7   : > { %3666 = vmatprep.mubr.bf16.mxu1 %v5457_v15  ;;  %4468 = vmatprep.mubr.bf16.mxu0 %v5461_v21  ;;  %v5476_v21 = vcombine.low %v525_v51, %v529_v52  ;;  %v5485_v27 = vcombine.high %v533_v11, %v537_v12 }
 0x2f8   : > { %v4536_v25 = vmax.f32 %v6075_v23, 0.0 }
 0x2f9   : > { %v3452_v28 = vpop.f32.mrb[56].mxu1  ;;  %v4254_v1 = vpop.f32.mrb[56].mxu0 }
 0x2fa   : > { %v5813_v31 = vpack.c.bf16 %v4536_v25, %v4535_v24  ;;  %v6076_v32 = vadd.f32 %v7260_v19, %v3452_v28  ;;  %v3454_v33 = vpop.f32.mrb[57].mxu1  ;;  %v4256_v35 = vpop.f32.mrb[57].mxu0 }
 0x2fb   : > { %v3455_v36 = vpop.f32.mrb[58].mxu1  ;;  %v4257_v41 = vpop.f32.mrb[58].mxu0  ;;  %v545_v35 = vld [vmem:[%s6755_s24 + $0xb78] sm:$0xff] }
 0x2fc   : > { %5987 = vst [vmem:[%s7274_s30 + $0x68] sm:$0xff] %v5813_v31   ;;  %v6077_v39 = vadd.f32 %v6076_v32, %v4254_v1  ;;  %v6078_v40 = vadd.f32 %v7260_v19, %v3455_v36  ;;  %v3457_v42 = vpop.f32.mrb[59].mxu1  ;;  %v4259_v44 = vpop.f32.mrb[59].mxu0  ;;  %v539_v32 = vld [vmem:[%s6755_s24 + $0xb48] sm:$0xff] }
 0x2fd   : > { %v543_v1 = vld [vmem:[%s6755_s24 + $0xb68] sm:$0xff] }
 0x2fe   : > { %v6079_v45 = vadd.f32 %v6078_v40, %v4257_v41  ;;  %3667 = vmatmul.mubr.bf16.gmra.mrb[164].mxu1 %v5456_v34  ;;  %4469 = vmatmul.mubr.bf16.gmra.mrb[164].mxu0 %v5460_v37  ;;  %v4537_v46 = vmax.f32 %v6077_v39, 0.0  ;;  %v541_v34 = vld [vmem:[%s6755_s24 + $0xb58] sm:$0xff]  ;;  %v5480_v40 = vcombine.low %v531_v8, %v535_v9  ;;  %v5489_v44 = vcombine.high %v539_v32, %v543_v1 }
 0x2ff   : > { %3674 = vmatprep.mubr.bf16.mxu1 %v5465_v38  ;;  %4476 = vmatprep.mubr.bf16.mxu0 %v5469_v43  ;;  %v5484_v43 = vcombine.low %v533_v11, %v537_v12  ;;  %v5493_v49 = vcombine.high %v541_v34, %v545_v35 }
 0x300   : > { %v4538_v47 = vmax.f32 %v6079_v45, 0.0 }
 0x301   : > { %v3460_v50 = vpop.f32.mrb[60].mxu1  ;;  %v4262_v55 = vpop.f32.mrb[60].mxu0 }
 0x302   : > { %v5818_v53 = vpack.c.bf16 %v4538_v47, %v4537_v46  ;;  %v6080_v54 = vadd.f32 %v7260_v19, %v3460_v50  ;;  %v3462_v56 = vpop.f32.mrb[61].mxu1  ;;  %v4264_v58 = vpop.f32.mrb[61].mxu0 }
 0x303   : > { %v3463_v59 = vpop.f32.mrb[62].mxu1  ;;  %v4265_v0 = vpop.f32.mrb[62].mxu0 }
 0x304   : > { %5988 = vst [vmem:[%s7274_s30 + $0x70] sm:$0xff] %v5818_v53   ;;  %v6081_v62 = vadd.f32 %v6080_v54, %v4262_v55  ;;  %v6082_v63 = vadd.f32 %v7260_v19, %v3463_v59  ;;  %v3465_v2 = vpop.f32.mrb[63].mxu1  ;;  %v4267_v4 = vpop.f32.mrb[63].mxu0  ;;  %v5488_v59 = vcombine.low %v539_v32, %v543_v1 }
 0x306   : > { %v6083_v5 = vadd.f32 %v6082_v63, %v4265_v0  ;;  %3675 = vmatmul.mubr.bf16.gmra.mrb[168].mxu1 %v5464_v57  ;;  %4477 = vmatmul.mubr.bf16.gmra.mrb[168].mxu0 %v5468_v60  ;;  %v4539_v6 = vmax.f32 %v6081_v62, 0.0  ;;  %v5492_v62 = vcombine.low %v541_v34, %v545_v35  ;;  %v7398_v0 = vld [vmem:[%s7488_s2] ss:$0 sm:$0xff] }
 0x307   : > { %3682 = vmatprep.mubr.bf16.mxu1 %v5473_v61  ;;  %4484 = vmatprep.mubr.bf16.mxu0 %v5477_v3 }
 0x308   : > { %v4540_v7 = vmax.f32 %v6083_v5, 0.0 }
 0x309   : > { %v3468_v10 = vpop.f32.mrb[64].mxu1  ;;  %v4270_v15 = vpop.f32.mrb[64].mxu0 }
 0x30a   : > { %v5823_v13 = vpack.c.bf16 %v4540_v7, %v4539_v6  ;;  %v6084_v14 = vadd.f32 %v7260_v19, %v3468_v10  ;;  %v3470_v16 = vpop.f32.mrb[65].mxu1  ;;  %v4272_v18 = vpop.f32.mrb[65].mxu0 }
 0x30b   : > { %v3471_v20 = vpop.f32.mrb[66].mxu1  ;;  %v4273_v25 = vpop.f32.mrb[66].mxu0 }
 0x30c   : > { %5989 = vst [vmem:[%s7274_s30 + $0x78] sm:$0xff] %v5823_v13   ;;  %v6085_v23 = vadd.f32 %v6084_v14, %v4270_v15  ;;  %v6086_v24 = vadd.f32 %v7260_v19, %v3471_v20  ;;  %v3473_v26 = vpop.f32.mrb[67].mxu1  ;;  %v4275_v28 = vpop.f32.mrb[67].mxu0 }
 0x30e   : > { %v6087_v29 = vadd.f32 %v6086_v24, %v4273_v25  ;;  %3683 = vmatmul.mubr.bf16.gmra.mrb[172].mxu1 %v5472_v17  ;;  %4485 = vmatmul.mubr.bf16.gmra.mrb[172].mxu0 %v5476_v21  ;;  %v4541_v30 = vmax.f32 %v6085_v23, 0.0 }
 0x30f   : > { %3690 = vmatprep.mubr.bf16.mxu1 %v5481_v22  ;;  %4492 = vmatprep.mubr.bf16.mxu0 %v5485_v27 }
 0x310   : > { %v4542_v31 = vmax.f32 %v6087_v29, 0.0 }
 0x311   : > { %v3476_v33 = vpop.f32.mrb[68].mxu1  ;;  %v4278_v38 = vpop.f32.mrb[68].mxu0 }
 0x312   : > { %v5828_v36 = vpack.c.bf16 %v4542_v31, %v4541_v30  ;;  %v6088_v37 = vadd.f32 %v7260_v19, %v3476_v33  ;;  %v3478_v39 = vpop.f32.mrb[69].mxu1  ;;  %v4280_v41 = vpop.f32.mrb[69].mxu0 }
 0x313   : > { %v3479_v42 = vpop.f32.mrb[70].mxu1  ;;  %v4281_v47 = vpop.f32.mrb[70].mxu0 }
 0x314   : > { %5990 = vst [vmem:[%s7274_s30 + $0x80] sm:$0xff] %v5828_v36   ;;  %v6089_v45 = vadd.f32 %v6088_v37, %v4278_v38  ;;  %v6090_v46 = vadd.f32 %v7260_v19, %v3479_v42  ;;  %v3481_v48 = vpop.f32.mrb[71].mxu1  ;;  %v4283_v50 = vpop.f32.mrb[71].mxu0 }
 0x316   : > { %v6091_v51 = vadd.f32 %v6090_v46, %v4281_v47  ;;  %3691 = vmatmul.mubr.bf16.gmra.mrb[176].mxu1 %v5480_v40  ;;  %4493 = vmatmul.mubr.bf16.gmra.mrb[176].mxu0 %v5484_v43  ;;  %v4543_v52 = vmax.f32 %v6089_v45, 0.0 }
 0x317   : > { %3698 = vmatprep.mubr.bf16.mxu1 %v5489_v44  ;;  %4500 = vmatprep.mubr.bf16.mxu0 %v5493_v49 }
 0x318   : > { %v4544_v53 = vmax.f32 %v6091_v51, 0.0 }
 0x319   : > { %v3484_v54 = vpop.f32.mrb[72].mxu1  ;;  %v4286_v57 = vpop.f32.mrb[72].mxu0 }
 0x31a   : > { %v5833_v55 = vpack.c.bf16 %v4544_v53, %v4543_v52  ;;  %v6092_v56 = vadd.f32 %v7260_v19, %v3484_v54  ;;  %v3486_v58 = vpop.f32.mrb[73].mxu1  ;;  %v4288_v60 = vpop.f32.mrb[73].mxu0 }
 0x31b   : > { %v3487_v61 = vpop.f32.mrb[74].mxu1  ;;  %v4289_v3 = vpop.f32.mrb[74].mxu0 }
 0x31c   : > { %5991 = vst [vmem:[%s7274_s30 + $0x88] sm:$0xff] %v5833_v55   ;;  %v6093_v63 = vadd.f32 %v6092_v56, %v4286_v57  ;;  %v6094_v2 = vadd.f32 %v7398_v0, %v3487_v61  ;;  %v3489_v4 = vpop.f32.mrb[75].mxu1  ;;  %v4291_v5 = vpop.f32.mrb[75].mxu0 }
 0x31e   : > { %v6095_v19 = vadd.f32 %v6094_v2, %v4289_v3  ;;  %3699 = vmatmul.mubr.bf16.gmra.mrb[180].mxu1 %v5488_v59  ;;  %4501 = vmatmul.mubr.bf16.gmra.mrb[180].mxu0 %v5492_v62  ;;  %v4545_v6 = vmax.f32 %v6093_v63, 0.0 }
 0x320   : > { %v4546_v7 = vmax.f32 %v6095_v19, 0.0 }
 0x321   : > { %v3492_v8 = vpop.f32.mrb[76].mxu1  ;;  %v4294_v11 = vpop.f32.mrb[76].mxu0 }
 0x322   : > { %v5838_v9 = vpack.c.bf16 %v4546_v7, %v4545_v6  ;;  %v6096_v10 = vadd.f32 %v7398_v0, %v3492_v8  ;;  %v3494_v12 = vpop.f32.mrb[77].mxu1  ;;  %v4296_v13 = vpop.f32.mrb[77].mxu0 }
 0x323   : > { %v3495_v14 = vpop.f32.mrb[78].mxu1  ;;  %v4297_v17 = vpop.f32.mrb[78].mxu0 }
 0x324   : > { %5992 = vst [vmem:[%s7274_s30 + $0x90] sm:$0xff] %v5838_v9   ;;  %v6097_v15 = vadd.f32 %v6096_v10, %v4294_v11  ;;  %v6098_v16 = vadd.f32 %v7398_v0, %v3495_v14  ;;  %v3497_v18 = vpop.f32.mrb[79].mxu1  ;;  %v4299_v20 = vpop.f32.mrb[79].mxu0 }
 0x326   : > { %v6099_v21 = vadd.f32 %v6098_v16, %v4297_v17  ;;  %v4547_v22 = vmax.f32 %v6097_v15, 0.0 }
 0x328   : > { %v4548_v23 = vmax.f32 %v6099_v21, 0.0 }
 0x329   : > { %v3500_v24 = vpop.f32.mrb[80].mxu1  ;;  %v4302_v27 = vpop.f32.mrb[80].mxu0 }
 0x32a   : > { %v5843_v25 = vpack.c.bf16 %v4548_v23, %v4547_v22  ;;  %v6100_v26 = vadd.f32 %v7398_v0, %v3500_v24  ;;  %v3502_v28 = vpop.f32.mrb[81].mxu1  ;;  %v4304_v29 = vpop.f32.mrb[81].mxu0 }
 0x32b   : > { %v3503_v30 = vpop.f32.mrb[82].mxu1  ;;  %v4305_v1 = vpop.f32.mrb[82].mxu0 }
 0x32c   : > { %5993 = vst [vmem:[%s7274_s30 + $0x98] sm:$0xff] %v5843_v25   ;;  %v6101_v31 = vadd.f32 %v6100_v26, %v4302_v27  ;;  %v6102_v32 = vadd.f32 %v7398_v0, %v3503_v30  ;;  %v3505_v33 = vpop.f32.mrb[83].mxu1  ;;  %v4307_v34 = vpop.f32.mrb[83].mxu0 }
 0x32e   : > { %v6103_v35 = vadd.f32 %v6102_v32, %v4305_v1  ;;  %v4549_v36 = vmax.f32 %v6101_v31, 0.0 }
 0x330   : > { %v4550_v37 = vmax.f32 %v6103_v35, 0.0 }
 0x331   : > { %v3508_v38 = vpop.f32.mrb[84].mxu1  ;;  %v4310_v41 = vpop.f32.mrb[84].mxu0 }
 0x332   : > { %v5848_v39 = vpack.c.bf16 %v4550_v37, %v4549_v36  ;;  %v6104_v40 = vadd.f32 %v7398_v0, %v3508_v38  ;;  %v3510_v42 = vpop.f32.mrb[85].mxu1  ;;  %v4312_v43 = vpop.f32.mrb[85].mxu0 }
 0x333   : > { %v3511_v44 = vpop.f32.mrb[86].mxu1  ;;  %v4313_v47 = vpop.f32.mrb[86].mxu0 }
 0x334   : > { %5994 = vst [vmem:[%s7274_s30 + $0xa0] sm:$0xff] %v5848_v39   ;;  %v6105_v45 = vadd.f32 %v6104_v40, %v4310_v41  ;;  %v6106_v46 = vadd.f32 %v7398_v0, %v3511_v44  ;;  %v3513_v48 = vpop.f32.mrb[87].mxu1  ;;  %v4315_v49 = vpop.f32.mrb[87].mxu0 }
 0x336   : > { %v6107_v50 = vadd.f32 %v6106_v46, %v4313_v47  ;;  %v4551_v51 = vmax.f32 %v6105_v45, 0.0 }
 0x338   : > { %v4552_v52 = vmax.f32 %v6107_v50, 0.0 }
 0x339   : > { %v3516_v53 = vpop.f32.mrb[88].mxu1  ;;  %v4318_v56 = vpop.f32.mrb[88].mxu0 }
 0x33a   : > { %v5853_v54 = vpack.c.bf16 %v4552_v52, %v4551_v51  ;;  %v6108_v55 = vadd.f32 %v7398_v0, %v3516_v53  ;;  %v3518_v57 = vpop.f32.mrb[89].mxu1  ;;  %v4320_v58 = vpop.f32.mrb[89].mxu0 }
 0x33b   : > { %v3519_v59 = vpop.f32.mrb[90].mxu1  ;;  %v4321_v62 = vpop.f32.mrb[90].mxu0 }
 0x33c   : > { %5995 = vst [vmem:[%s7274_s30 + $0xa8] sm:$0xff] %v5853_v54   ;;  %v6109_v60 = vadd.f32 %v6108_v55, %v4318_v56  ;;  %v6110_v61 = vadd.f32 %v7398_v0, %v3519_v59  ;;  %v3521_v63 = vpop.f32.mrb[91].mxu1  ;;  %v4323_v2 = vpop.f32.mrb[91].mxu0 }
 0x33e   : > { %v6111_v3 = vadd.f32 %v6110_v61, %v4321_v62  ;;  %v4553_v4 = vmax.f32 %v6109_v60, 0.0 }
 0x340   : > { %v4554_v5 = vmax.f32 %v6111_v3, 0.0 }
 0x341   : > { %v3524_v19 = vpop.f32.mrb[92].mxu1  ;;  %v4326_v8 = vpop.f32.mrb[92].mxu0 }
 0x342   : > { %v5858_v6 = vpack.c.bf16 %v4554_v5, %v4553_v4  ;;  %v6112_v7 = vadd.f32 %v7398_v0, %v3524_v19  ;;  %v3526_v9 = vpop.f32.mrb[93].mxu1  ;;  %v4328_v10 = vpop.f32.mrb[93].mxu0 }
 0x343   : > { %v3527_v11 = vpop.f32.mrb[94].mxu1  ;;  %v4329_v14 = vpop.f32.mrb[94].mxu0 }
 0x344   : > { %5996 = vst [vmem:[%s7274_s30 + $0xb0] sm:$0xff] %v5858_v6   ;;  %v6113_v12 = vadd.f32 %v6112_v7, %v4326_v8  ;;  %v6114_v13 = vadd.f32 %v7398_v0, %v3527_v11  ;;  %v3529_v15 = vpop.f32.mrb[95].mxu1  ;;  %v4331_v16 = vpop.f32.mrb[95].mxu0 }
 0x346   : > { %v6115_v17 = vadd.f32 %v6114_v13, %v4329_v14  ;;  %v4555_v18 = vmax.f32 %v6113_v12, 0.0 }
 0x348   : > { %v4556_v20 = vmax.f32 %v6115_v17, 0.0 }
 0x349   : > { %v3532_v21 = vpop.f32.mrb[96].mxu1  ;;  %v4334_v24 = vpop.f32.mrb[96].mxu0 }
 0x34a   : > { %v5863_v22 = vpack.c.bf16 %v4556_v20, %v4555_v18  ;;  %v6116_v23 = vadd.f32 %v7398_v0, %v3532_v21  ;;  %v3534_v25 = vpop.f32.mrb[97].mxu1  ;;  %v4336_v26 = vpop.f32.mrb[97].mxu0 }
 0x34b   : > { %v3535_v27 = vpop.f32.mrb[98].mxu1  ;;  %v4337_v30 = vpop.f32.mrb[98].mxu0 }
 0x34c   : > { %5997 = vst [vmem:[%s7274_s30 + $0xb8] sm:$0xff] %v5863_v22   ;;  %v6117_v28 = vadd.f32 %v6116_v23, %v4334_v24  ;;  %v6118_v29 = vadd.f32 %v7398_v0, %v3535_v27  ;;  %v3537_v31 = vpop.f32.mrb[99].mxu1  ;;  %v4339_v32 = vpop.f32.mrb[99].mxu0 }
 0x34e   : > { %v6119_v1 = vadd.f32 %v6118_v29, %v4337_v30  ;;  %v4557_v33 = vmax.f32 %v6117_v28, 0.0 }
 0x350   : > { %v4558_v34 = vmax.f32 %v6119_v1, 0.0 }
 0x351   : > { %v3540_v35 = vpop.f32.mrb[100].mxu1  ;;  %v4342_v38 = vpop.f32.mrb[100].mxu0 }
 0x352   : > { %v5868_v36 = vpack.c.bf16 %v4558_v34, %v4557_v33  ;;  %v6120_v37 = vadd.f32 %v7398_v0, %v3540_v35  ;;  %v3542_v39 = vpop.f32.mrb[101].mxu1  ;;  %v4344_v40 = vpop.f32.mrb[101].mxu0 }
 0x353   : > { %v3543_v41 = vpop.f32.mrb[102].mxu1  ;;  %v4345_v44 = vpop.f32.mrb[102].mxu0 }
 0x354   : > { %5998 = vst [vmem:[%s7274_s30 + $0xc0] sm:$0xff] %v5868_v36   ;;  %v6121_v42 = vadd.f32 %v6120_v37, %v4342_v38  ;;  %v6122_v43 = vadd.f32 %v7398_v0, %v3543_v41  ;;  %v3545_v45 = vpop.f32.mrb[103].mxu1  ;;  %v4347_v46 = vpop.f32.mrb[103].mxu0 }
 0x356   : > { %v6123_v47 = vadd.f32 %v6122_v43, %v4345_v44  ;;  %v4559_v48 = vmax.f32 %v6121_v42, 0.0 }
 0x358   : > { %v4560_v49 = vmax.f32 %v6123_v47, 0.0 }
 0x359   : > { %v3548_v50 = vpop.f32.mrb[104].mxu1  ;;  %v4350_v53 = vpop.f32.mrb[104].mxu0 }
 0x35a   : > { %v5873_v51 = vpack.c.bf16 %v4560_v49, %v4559_v48  ;;  %v6124_v52 = vadd.f32 %v7398_v0, %v3548_v50  ;;  %v3550_v54 = vpop.f32.mrb[105].mxu1  ;;  %v4352_v55 = vpop.f32.mrb[105].mxu0 }
 0x35b   : > { %v3551_v56 = vpop.f32.mrb[106].mxu1  ;;  %v4353_v59 = vpop.f32.mrb[106].mxu0 }
 0x35c   : > { %5999 = vst [vmem:[%s7274_s30 + $0xc8] sm:$0xff] %v5873_v51   ;;  %v6125_v57 = vadd.f32 %v6124_v52, %v4350_v53  ;;  %v6126_v58 = vadd.f32 %v7398_v0, %v3551_v56  ;;  %v3553_v60 = vpop.f32.mrb[107].mxu1  ;;  %v4355_v61 = vpop.f32.mrb[107].mxu0 }
 0x35e   : > { %v6127_v62 = vadd.f32 %v6126_v58, %v4353_v59  ;;  %v4561_v63 = vmax.f32 %v6125_v57, 0.0 }
 0x360   : > { %v4562_v2 = vmax.f32 %v6127_v62, 0.0 }
 0x361   : > { %v3556_v3 = vpop.f32.mrb[108].mxu1  ;;  %v4358_v19 = vpop.f32.mrb[108].mxu0 }
 0x362   : > { %v5878_v4 = vpack.c.bf16 %v4562_v2, %v4561_v63  ;;  %v6128_v5 = vadd.f32 %v7398_v0, %v3556_v3  ;;  %v3558_v6 = vpop.f32.mrb[109].mxu1  ;;  %v4360_v7 = vpop.f32.mrb[109].mxu0 }
 0x363   : > { %v3559_v8 = vpop.f32.mrb[110].mxu1  ;;  %v4361_v11 = vpop.f32.mrb[110].mxu0 }
 0x364   : > { %6000 = vst [vmem:[%s7274_s30 + $0xd0] sm:$0xff] %v5878_v4   ;;  %v6129_v9 = vadd.f32 %v6128_v5, %v4358_v19  ;;  %v6130_v10 = vadd.f32 %v7398_v0, %v3559_v8  ;;  %v3561_v12 = vpop.f32.mrb[111].mxu1  ;;  %v4363_v13 = vpop.f32.mrb[111].mxu0 }
 0x366   : > { %v6131_v14 = vadd.f32 %v6130_v10, %v4361_v11  ;;  %v4563_v15 = vmax.f32 %v6129_v9, 0.0 }
 0x368   : > { %v4564_v16 = vmax.f32 %v6131_v14, 0.0 }
 0x369   : > { %v3564_v17 = vpop.f32.mrb[112].mxu1  ;;  %v4366_v21 = vpop.f32.mrb[112].mxu0 }
 0x36a   : > { %v5883_v18 = vpack.c.bf16 %v4564_v16, %v4563_v15  ;;  %v6132_v20 = vadd.f32 %v7398_v0, %v3564_v17  ;;  %v3566_v22 = vpop.f32.mrb[113].mxu1  ;;  %v4368_v23 = vpop.f32.mrb[113].mxu0 }
 0x36b   : > { %v3567_v24 = vpop.f32.mrb[114].mxu1  ;;  %v4369_v27 = vpop.f32.mrb[114].mxu0 }
 0x36c   : > { %6001 = vst [vmem:[%s7274_s30 + $0xd8] sm:$0xff] %v5883_v18   ;;  %v6133_v25 = vadd.f32 %v6132_v20, %v4366_v21  ;;  %v6134_v26 = vadd.f32 %v7398_v0, %v3567_v24  ;;  %v3569_v28 = vpop.f32.mrb[115].mxu1  ;;  %v4371_v29 = vpop.f32.mrb[115].mxu0 }
 0x36e   : > { %v6135_v30 = vadd.f32 %v6134_v26, %v4369_v27  ;;  %v4565_v31 = vmax.f32 %v6133_v25, 0.0 }
 0x370   : > { %v4566_v32 = vmax.f32 %v6135_v30, 0.0 }
 0x371   : > { %v3572_v1 = vpop.f32.mrb[116].mxu1  ;;  %v4374_v35 = vpop.f32.mrb[116].mxu0 }
 0x372   : > { %v5888_v33 = vpack.c.bf16 %v4566_v32, %v4565_v31  ;;  %v6136_v34 = vadd.f32 %v7398_v0, %v3572_v1  ;;  %v3574_v36 = vpop.f32.mrb[117].mxu1  ;;  %v4376_v37 = vpop.f32.mrb[117].mxu0 }
 0x373   : > { %v3575_v38 = vpop.f32.mrb[118].mxu1  ;;  %v4377_v41 = vpop.f32.mrb[118].mxu0 }
 0x374   : > { %6002 = vst [vmem:[%s7274_s30 + $0xe0] sm:$0xff] %v5888_v33   ;;  %v6137_v39 = vadd.f32 %v6136_v34, %v4374_v35  ;;  %v6138_v40 = vadd.f32 %v7398_v0, %v3575_v38  ;;  %v3577_v42 = vpop.f32.mrb[119].mxu1  ;;  %v4379_v43 = vpop.f32.mrb[119].mxu0 }
 0x376   : > { %v6139_v44 = vadd.f32 %v6138_v40, %v4377_v41  ;;  %v4567_v45 = vmax.f32 %v6137_v39, 0.0 }
 0x378   : > { %v4568_v46 = vmax.f32 %v6139_v44, 0.0 }
 0x379   : > { %v3580_v47 = vpop.f32.mrb[120].mxu1  ;;  %v4382_v50 = vpop.f32.mrb[120].mxu0 }
 0x37a   : > { %v5893_v48 = vpack.c.bf16 %v4568_v46, %v4567_v45  ;;  %v6140_v49 = vadd.f32 %v7398_v0, %v3580_v47  ;;  %v3582_v51 = vpop.f32.mrb[121].mxu1  ;;  %v4384_v52 = vpop.f32.mrb[121].mxu0 }
 0x37b   : > { %v3583_v53 = vpop.f32.mrb[122].mxu1  ;;  %v4385_v56 = vpop.f32.mrb[122].mxu0 }
 0x37c   : > { %6003 = vst [vmem:[%s7274_s30 + $0xe8] sm:$0xff] %v5893_v48   ;;  %v6141_v54 = vadd.f32 %v6140_v49, %v4382_v50  ;;  %v6142_v55 = vadd.f32 %v7398_v0, %v3583_v53  ;;  %v3585_v57 = vpop.f32.mrb[123].mxu1  ;;  %v4387_v58 = vpop.f32.mrb[123].mxu0 }
 0x37e   : > { %v6143_v59 = vadd.f32 %v6142_v55, %v4385_v56  ;;  %v4569_v60 = vmax.f32 %v6141_v54, 0.0 }
 0x380   : > { %v4570_v61 = vmax.f32 %v6143_v59, 0.0 }
 0x381   : > { %v3588_v62 = vpop.f32.mrb[124].mxu1  ;;  %v4390_v3 = vpop.f32.mrb[124].mxu0 }
 0x382   : > { %v5898_v63 = vpack.c.bf16 %v4570_v61, %v4569_v60  ;;  %v6144_v2 = vadd.f32 %v7398_v0, %v3588_v62  ;;  %v3590_v4 = vpop.f32.mrb[125].mxu1  ;;  %v4392_v5 = vpop.f32.mrb[125].mxu0 }
 0x383   : > { %v3591_v19 = vpop.f32.mrb[126].mxu1  ;;  %v4393_v8 = vpop.f32.mrb[126].mxu0 }
 0x384   : > { %6004 = vst [vmem:[%s7274_s30 + $0xf0] sm:$0xff] %v5898_v63   ;;  %v6145_v6 = vadd.f32 %v6144_v2, %v4390_v3  ;;  %v6146_v7 = vadd.f32 %v7398_v0, %v3591_v19  ;;  %v3593_v9 = vpop.f32.mrb[127].mxu1  ;;  %v4395_v10 = vpop.f32.mrb[127].mxu0 }
 0x386   : > { %v6147_v11 = vadd.f32 %v6146_v7, %v4393_v8  ;;  %v4571_v12 = vmax.f32 %v6145_v6, 0.0 }
 0x388   : > { %v4572_v13 = vmax.f32 %v6147_v11, 0.0 }
 0x389   : > { %v3596_v14 = vpop.f32.mrb[128].mxu1  ;;  %v4398_v17 = vpop.f32.mrb[128].mxu0 }
 0x38a   : > { %v5903_v15 = vpack.c.bf16 %v4572_v13, %v4571_v12  ;;  %v6148_v16 = vadd.f32 %v7398_v0, %v3596_v14  ;;  %v3598_v18 = vpop.f32.mrb[129].mxu1  ;;  %v4400_v20 = vpop.f32.mrb[129].mxu0 }
 0x38b   : > { %v3599_v21 = vpop.f32.mrb[130].mxu1  ;;  %v4401_v24 = vpop.f32.mrb[130].mxu0 }
 0x38c   : > { %6005 = vst [vmem:[%s7274_s30 + $0xf8] sm:$0xff] %v5903_v15   ;;  %v6149_v22 = vadd.f32 %v6148_v16, %v4398_v17  ;;  %v6150_v23 = vadd.f32 %v7398_v0, %v3599_v21  ;;  %v3601_v25 = vpop.f32.mrb[131].mxu1  ;;  %v4403_v26 = vpop.f32.mrb[131].mxu0 }
 0x38e   : > { %v6151_v27 = vadd.f32 %v6150_v23, %v4401_v24  ;;  %v4573_v28 = vmax.f32 %v6149_v22, 0.0 }
 0x390   : > { %v4574_v29 = vmax.f32 %v6151_v27, 0.0 }
 0x391   : > { %v3604_v30 = vpop.f32.mrb[132].mxu1  ;;  %v4406_v1 = vpop.f32.mrb[132].mxu0 }
 0x392   : > { %v5908_v31 = vpack.c.bf16 %v4574_v29, %v4573_v28  ;;  %v6152_v32 = vadd.f32 %v7398_v0, %v3604_v30  ;;  %v3606_v33 = vpop.f32.mrb[133].mxu1  ;;  %v4408_v34 = vpop.f32.mrb[133].mxu0 }
 0x393   : > { %v3607_v35 = vpop.f32.mrb[134].mxu1  ;;  %v4409_v38 = vpop.f32.mrb[134].mxu0 }
 0x394   : > { %6006 = vst [vmem:[%s7274_s30 + $0x100] sm:$0xff] %v5908_v31   ;;  %v6153_v36 = vadd.f32 %v6152_v32, %v4406_v1  ;;  %v6154_v37 = vadd.f32 %v7398_v0, %v3607_v35  ;;  %v3609_v39 = vpop.f32.mrb[135].mxu1  ;;  %v4411_v40 = vpop.f32.mrb[135].mxu0 }
 0x396   : > { %v6155_v41 = vadd.f32 %v6154_v37, %v4409_v38  ;;  %v4575_v42 = vmax.f32 %v6153_v36, 0.0 }
 0x398   : > { %v4576_v43 = vmax.f32 %v6155_v41, 0.0 }
 0x399   : > { %v3612_v44 = vpop.f32.mrb[136].mxu1  ;;  %v4414_v47 = vpop.f32.mrb[136].mxu0 }
 0x39a   : > { %v5913_v45 = vpack.c.bf16 %v4576_v43, %v4575_v42  ;;  %v6156_v46 = vadd.f32 %v7398_v0, %v3612_v44  ;;  %v3614_v48 = vpop.f32.mrb[137].mxu1  ;;  %v4416_v49 = vpop.f32.mrb[137].mxu0 }
 0x39b   : > { %v3615_v50 = vpop.f32.mrb[138].mxu1  ;;  %v4417_v53 = vpop.f32.mrb[138].mxu0 }
 0x39c   : > { %6007 = vst [vmem:[%s7274_s30 + $0x108] sm:$0xff] %v5913_v45   ;;  %v6157_v51 = vadd.f32 %v6156_v46, %v4414_v47  ;;  %v6158_v52 = vadd.f32 %v7398_v0, %v3615_v50  ;;  %v3617_v54 = vpop.f32.mrb[139].mxu1  ;;  %v4419_v55 = vpop.f32.mrb[139].mxu0 }
 0x39e   : > { %v6159_v56 = vadd.f32 %v6158_v52, %v4417_v53  ;;  %v4577_v57 = vmax.f32 %v6157_v51, 0.0 }
 0x3a0   : > { %v4578_v58 = vmax.f32 %v6159_v56, 0.0 }
 0x3a1   : > { %v3620_v59 = vpop.f32.mrb[140].mxu1  ;;  %v4422_v62 = vpop.f32.mrb[140].mxu0 }
 0x3a2   : > { %v5918_v60 = vpack.c.bf16 %v4578_v58, %v4577_v57  ;;  %v6160_v61 = vadd.f32 %v7398_v0, %v3620_v59  ;;  %v3622_v63 = vpop.f32.mrb[141].mxu1  ;;  %v4424_v2 = vpop.f32.mrb[141].mxu0 }
 0x3a3   : > { %v3623_v3 = vpop.f32.mrb[142].mxu1  ;;  %v4425_v19 = vpop.f32.mrb[142].mxu0 }
 0x3a4   : > { %6008 = vst [vmem:[%s7274_s30 + $0x110] sm:$0xff] %v5918_v60   ;;  %v6161_v4 = vadd.f32 %v6160_v61, %v4422_v62  ;;  %v6162_v5 = vadd.f32 %v7398_v0, %v3623_v3  ;;  %v3625_v6 = vpop.f32.mrb[143].mxu1  ;;  %v4427_v7 = vpop.f32.mrb[143].mxu0 }
 0x3a6   : > { %v6163_v8 = vadd.f32 %v6162_v5, %v4425_v19  ;;  %v4579_v9 = vmax.f32 %v6161_v4, 0.0 }
 0x3a8   : > { %v4580_v10 = vmax.f32 %v6163_v8, 0.0 }
 0x3a9   : > { %v3628_v11 = vpop.f32.mrb[144].mxu1  ;;  %v4430_v14 = vpop.f32.mrb[144].mxu0 }
 0x3aa   : > { %v5923_v12 = vpack.c.bf16 %v4580_v10, %v4579_v9  ;;  %v6164_v13 = vadd.f32 %v7398_v0, %v3628_v11  ;;  %v3630_v15 = vpop.f32.mrb[145].mxu1  ;;  %v4432_v16 = vpop.f32.mrb[145].mxu0 }
 0x3ab   : > { %v3631_v17 = vpop.f32.mrb[146].mxu1  ;;  %v4433_v21 = vpop.f32.mrb[146].mxu0 }
 0x3ac   : > { %6009 = vst [vmem:[%s7274_s30 + $0x118] sm:$0xff] %v5923_v12   ;;  %v6165_v18 = vadd.f32 %v6164_v13, %v4430_v14  ;;  %v6166_v20 = vadd.f32 %v7398_v0, %v3631_v17  ;;  %v3633_v22 = vpop.f32.mrb[147].mxu1  ;;  %v4435_v23 = vpop.f32.mrb[147].mxu0 }
 0x3ae   : > { %v6167_v24 = vadd.f32 %v6166_v20, %v4433_v21  ;;  %v4581_v25 = vmax.f32 %v6165_v18, 0.0 }
 0x3b0   : > { %v4582_v26 = vmax.f32 %v6167_v24, 0.0 }
 0x3b1   : > { %v3636_v27 = vpop.f32.mrb[148].mxu1  ;;  %v4438_v30 = vpop.f32.mrb[148].mxu0 }
 0x3b2   : > { %v5928_v28 = vpack.c.bf16 %v4582_v26, %v4581_v25  ;;  %v6168_v29 = vadd.f32 %v7398_v0, %v3636_v27  ;;  %v3638_v31 = vpop.f32.mrb[149].mxu1  ;;  %v4440_v32 = vpop.f32.mrb[149].mxu0 }
 0x3b3   : > { %v3639_v1 = vpop.f32.mrb[150].mxu1  ;;  %v4441_v35 = vpop.f32.mrb[150].mxu0 }
 0x3b4   : > { %6010 = vst [vmem:[%s7274_s30 + $0x120] sm:$0xff] %v5928_v28   ;;  %v6169_v33 = vadd.f32 %v6168_v29, %v4438_v30  ;;  %v6170_v34 = vadd.f32 %v7398_v0, %v3639_v1  ;;  %v3641_v36 = vpop.f32.mrb[151].mxu1  ;;  %v4443_v37 = vpop.f32.mrb[151].mxu0 }
 0x3b6   : > { %v6171_v38 = vadd.f32 %v6170_v34, %v4441_v35  ;;  %v4583_v39 = vmax.f32 %v6169_v33, 0.0 }
 0x3b8   : > { %v4584_v40 = vmax.f32 %v6171_v38, 0.0 }
 0x3b9   : > { %v3644_v41 = vpop.f32.mrb[152].mxu1  ;;  %v4446_v44 = vpop.f32.mrb[152].mxu0 }
 0x3ba   : > { %v5933_v42 = vpack.c.bf16 %v4584_v40, %v4583_v39  ;;  %v6172_v43 = vadd.f32 %v7398_v0, %v3644_v41  ;;  %v3646_v45 = vpop.f32.mrb[153].mxu1  ;;  %v4448_v46 = vpop.f32.mrb[153].mxu0 }
 0x3bb   : > { %v3647_v47 = vpop.f32.mrb[154].mxu1  ;;  %v4449_v50 = vpop.f32.mrb[154].mxu0 }
 0x3bc   : > { %6011 = vst [vmem:[%s7274_s30 + $0x128] sm:$0xff] %v5933_v42   ;;  %v6173_v48 = vadd.f32 %v6172_v43, %v4446_v44  ;;  %v6174_v49 = vadd.f32 %v7398_v0, %v3647_v47  ;;  %v3649_v51 = vpop.f32.mrb[155].mxu1  ;;  %v4451_v52 = vpop.f32.mrb[155].mxu0 }
 0x3be   : > { %v6175_v53 = vadd.f32 %v6174_v49, %v4449_v50  ;;  %v4585_v54 = vmax.f32 %v6173_v48, 0.0 }
 0x3c0   : > { %v4586_v55 = vmax.f32 %v6175_v53, 0.0 }
 0x3c1   : > { %v3652_v56 = vpop.f32.mrb[156].mxu1  ;;  %v4454_v59 = vpop.f32.mrb[156].mxu0 }
 0x3c2   : > { %v5938_v57 = vpack.c.bf16 %v4586_v55, %v4585_v54  ;;  %v6176_v58 = vadd.f32 %v7398_v0, %v3652_v56  ;;  %v3654_v60 = vpop.f32.mrb[157].mxu1  ;;  %v4456_v61 = vpop.f32.mrb[157].mxu0 }
 0x3c3   : > { %v3655_v62 = vpop.f32.mrb[158].mxu1  ;;  %v4457_v3 = vpop.f32.mrb[158].mxu0 }
 0x3c4   : > { %6012 = vst [vmem:[%s7274_s30 + $0x130] sm:$0xff] %v5938_v57   ;;  %v6177_v63 = vadd.f32 %v6176_v58, %v4454_v59  ;;  %v6178_v2 = vadd.f32 %v7398_v0, %v3655_v62  ;;  %v3657_v4 = vpop.f32.mrb[159].mxu1  ;;  %v4459_v5 = vpop.f32.mrb[159].mxu0 }
 0x3c6   : > { %v6179_v19 = vadd.f32 %v6178_v2, %v4457_v3  ;;  %v4587_v6 = vmax.f32 %v6177_v63, 0.0 }
 0x3c8   : > { %v4588_v7 = vmax.f32 %v6179_v19, 0.0 }
 0x3c9   : > { %v3660_v8 = vpop.f32.mrb[160].mxu1  ;;  %v4462_v11 = vpop.f32.mrb[160].mxu0 }
 0x3ca   : > { %v5943_v9 = vpack.c.bf16 %v4588_v7, %v4587_v6  ;;  %v6180_v10 = vadd.f32 %v7398_v0, %v3660_v8  ;;  %v3662_v12 = vpop.f32.mrb[161].mxu1  ;;  %v4464_v13 = vpop.f32.mrb[161].mxu0 }
 0x3cb   : > { %v3663_v14 = vpop.f32.mrb[162].mxu1  ;;  %v4465_v17 = vpop.f32.mrb[162].mxu0 }
 0x3cc   : > { %6013 = vst [vmem:[%s7274_s30 + $0x138] sm:$0xff] %v5943_v9   ;;  %v6181_v15 = vadd.f32 %v6180_v10, %v4462_v11  ;;  %v6182_v16 = vadd.f32 %v7398_v0, %v3663_v14  ;;  %v3665_v18 = vpop.f32.mrb[163].mxu1  ;;  %v4467_v20 = vpop.f32.mrb[163].mxu0 }
 0x3ce   : > { %v6183_v21 = vadd.f32 %v6182_v16, %v4465_v17  ;;  %v4589_v22 = vmax.f32 %v6181_v15, 0.0 }
 0x3d0   : > { %v4590_v23 = vmax.f32 %v6183_v21, 0.0 }
 0x3d1   : > { %v3668_v24 = vpop.f32.mrb[164].mxu1  ;;  %v4470_v27 = vpop.f32.mrb[164].mxu0 }
 0x3d2   : > { %v5948_v25 = vpack.c.bf16 %v4590_v23, %v4589_v22  ;;  %v6184_v26 = vadd.f32 %v7398_v0, %v3668_v24  ;;  %v3670_v28 = vpop.f32.mrb[165].mxu1  ;;  %v4472_v29 = vpop.f32.mrb[165].mxu0 }
 0x3d3   : > { %v3671_v30 = vpop.f32.mrb[166].mxu1  ;;  %v4473_v1 = vpop.f32.mrb[166].mxu0 }
 0x3d4   : > { %6014 = vst [vmem:[%s7274_s30 + $0x140] sm:$0xff] %v5948_v25   ;;  %v6185_v31 = vadd.f32 %v6184_v26, %v4470_v27  ;;  %v6186_v32 = vadd.f32 %v7398_v0, %v3671_v30  ;;  %v3673_v33 = vpop.f32.mrb[167].mxu1  ;;  %v4475_v34 = vpop.f32.mrb[167].mxu0 }
 0x3d6   : > { %v6187_v35 = vadd.f32 %v6186_v32, %v4473_v1  ;;  %v4591_v36 = vmax.f32 %v6185_v31, 0.0 }
 0x3d8   : > { %v4592_v37 = vmax.f32 %v6187_v35, 0.0 }
 0x3d9   : > { %v3676_v38 = vpop.f32.mrb[168].mxu1  ;;  %v4478_v41 = vpop.f32.mrb[168].mxu0 }
 0x3da   : > { %v5953_v39 = vpack.c.bf16 %v4592_v37, %v4591_v36  ;;  %v6188_v40 = vadd.f32 %v7398_v0, %v3676_v38  ;;  %v3678_v42 = vpop.f32.mrb[169].mxu1  ;;  %v4480_v43 = vpop.f32.mrb[169].mxu0 }
 0x3db   : > { %v3679_v44 = vpop.f32.mrb[170].mxu1  ;;  %v4481_v47 = vpop.f32.mrb[170].mxu0 }
 0x3dc   : > { %6015 = vst [vmem:[%s7274_s30 + $0x148] sm:$0xff] %v5953_v39   ;;  %v6189_v45 = vadd.f32 %v6188_v40, %v4478_v41  ;;  %v6190_v46 = vadd.f32 %v7398_v0, %v3679_v44  ;;  %v3681_v48 = vpop.f32.mrb[171].mxu1  ;;  %v4483_v49 = vpop.f32.mrb[171].mxu0 }
 0x3de   : > { %v6191_v50 = vadd.f32 %v6190_v46, %v4481_v47  ;;  %v4593_v51 = vmax.f32 %v6189_v45, 0.0 }
 0x3e0   : > { %v4594_v52 = vmax.f32 %v6191_v50, 0.0 }
 0x3e1   : > { %v3684_v53 = vpop.f32.mrb[172].mxu1  ;;  %v4486_v56 = vpop.f32.mrb[172].mxu0 }
 0x3e2   : > { %v5958_v54 = vpack.c.bf16 %v4594_v52, %v4593_v51  ;;  %v6192_v55 = vadd.f32 %v7398_v0, %v3684_v53  ;;  %v3686_v57 = vpop.f32.mrb[173].mxu1  ;;  %v4488_v58 = vpop.f32.mrb[173].mxu0 }
 0x3e3   : > { %v3687_v59 = vpop.f32.mrb[174].mxu1  ;;  %v4489_v62 = vpop.f32.mrb[174].mxu0 }
 0x3e4   : > { %6016 = vst [vmem:[%s7274_s30 + $0x150] sm:$0xff] %v5958_v54   ;;  %v6193_v60 = vadd.f32 %v6192_v55, %v4486_v56  ;;  %v6194_v61 = vadd.f32 %v7398_v0, %v3687_v59  ;;  %v3689_v63 = vpop.f32.mrb[175].mxu1  ;;  %v4491_v2 = vpop.f32.mrb[175].mxu0 }
 0x3e6   : > { %v6195_v3 = vadd.f32 %v6194_v61, %v4489_v62  ;;  %v4595_v4 = vmax.f32 %v6193_v60, 0.0 }
 0x3e8   : > { %v4596_v5 = vmax.f32 %v6195_v3, 0.0 }
 0x3e9   : > { %v3692_v19 = vpop.f32.mrb[176].mxu1  ;;  %v4494_v8 = vpop.f32.mrb[176].mxu0 }
 0x3ea   : > { %v5963_v6 = vpack.c.bf16 %v4596_v5, %v4595_v4  ;;  %v6196_v7 = vadd.f32 %v7398_v0, %v3692_v19  ;;  %v3694_v9 = vpop.f32.mrb[177].mxu1  ;;  %v4496_v10 = vpop.f32.mrb[177].mxu0 }
 0x3eb   : > { %v3695_v11 = vpop.f32.mrb[178].mxu1  ;;  %v4497_v14 = vpop.f32.mrb[178].mxu0 }
 0x3ec   : > { %6017 = vst [vmem:[%s7274_s30 + $0x158] sm:$0xff] %v5963_v6   ;;  %v6197_v12 = vadd.f32 %v6196_v7, %v4494_v8  ;;  %v6198_v13 = vadd.f32 %v7398_v0, %v3695_v11  ;;  %v3697_v15 = vpop.f32.mrb[179].mxu1  ;;  %v4499_v16 = vpop.f32.mrb[179].mxu0 }
 0x3ee   : > { %v6199_v17 = vadd.f32 %v6198_v13, %v4497_v14  ;;  %v4597_v18 = vmax.f32 %v6197_v12, 0.0 }
 0x3f0   : > { %v4598_v20 = vmax.f32 %v6199_v17, 0.0 }
 0x3f1   : > { %v3700_v21 = vpop.f32.mrb[180].mxu1  ;;  %v4502_v24 = vpop.f32.mrb[180].mxu0 }
 0x3f2   : > { %v5968_v22 = vpack.c.bf16 %v4598_v20, %v4597_v18  ;;  %v6200_v23 = vadd.f32 %v7398_v0, %v3700_v21  ;;  %v3702_v25 = vpop.f32.mrb[181].mxu1  ;;  %v4504_v26 = vpop.f32.mrb[181].mxu0 }
 0x3f3   : > { %v3703_v27 = vpop.f32.mrb[182].mxu1  ;;  %v4505_v30 = vpop.f32.mrb[182].mxu0 }
 0x3f4   : > { %6018 = vst [vmem:[%s7274_s30 + $0x160] sm:$0xff] %v5968_v22   ;;  %v6201_v28 = vadd.f32 %v6200_v23, %v4502_v24  ;;  %v6202_v29 = vadd.f32 %v7398_v0, %v3703_v27  ;;  %v3705_v31 = vpop.f32.mrb[183].mxu1  ;;  %v4507_v32 = vpop.f32.mrb[183].mxu0 }
 0x3f6   : > { %v6203_v1 = vadd.f32 %v6202_v29, %v4505_v30  ;;  %v4599_v33 = vmax.f32 %v6201_v28, 0.0 }
 0x3f8   : > { %v4600_v34 = vmax.f32 %v6203_v1, 0.0 }
 0x3fa   : > { %v5973_v35 = vpack.c.bf16 %v4600_v34, %v4599_v33 }
 0x3fc   : > { %6019 = vst [vmem:[%s7274_s30 + $0x168] sm:$0xff] %v5973_v35  }
 0x3fd PF: > { %s13_s12 = sadd.s32 1, %s6652_s12  }
 0x3fe   : > { %p10_p4 = scmp.ge.s32.totalorder %s13_s12, 4  }
 0x400   :  { %12 = sbr.rel (!%p10_p4) target bundleno = 1 (0x1), region = 62 }

// kernel: conv_encoder_hep_sl.5
= control target key start
LH: loop header
LB: loop body
LE: loop exit
PB: predicated region body
PF: predicated region fallthrough
CT: control target
= control target key end

     0   :  { %15 = vsyncpa [#allocation3], 0  ;;  %s9902_s0 = inlined_call_operand.vmem [shape: bf16[2,81,1024], index: 0, kind: input, shape index: {}]   ;;  %s9903_s1 = inlined_call_operand.vmem [shape: bf16[1024,128], index: 1, kind: input, shape index: {}]   ;;  %s9904_s2 = inlined_call_operand.vmem [shape: f32[1,128], index: 2, kind: input, shape index: {}]   ;;  %s9905_s3 = inlined_call_operand.vmem [shape: bf16[16,9,81], index: 3, kind: input, shape index: {}]   ;;  %s9906_s4 = inlined_call_operand.vmem [shape: bf16[16,128,128], index: 4, kind: input, shape index: {}]   ;;  %s9907_s5 = inlined_call_operand.vmem [shape: f32[1,128], index: 5, kind: input, shape index: {}]   ;;  %s9908_s6 = inlined_call_operand.vmem [shape: bf16[9,128,256], index: 6, kind: input, shape index: {}]   ;;  %s9909_s7 = inlined_call_operand.vmem [shape: f32[1,256], index: 7, kind: input, shape index: {}]   ;;  %s9910_s8 = inlined_call_operand.vmem [shape: bf16[256,128], index: 8, kind: input, shape index: {}]   ;;  %s9911_s9 = inlined_call_operand.vmem [shape: f32[1,128], index: 9, kind: input, shape index: {}]   ;;  %s9912_s10 = inlined_call_operand.hbm [shape: f32[2,1,128], index: 10, kind: output, shape index: {}]  }
   0x1   :  { %17 = vsyncpa [#allocation3 + $0x1], 0  ;;  %s8120_s13 = smov 0   ;;  %s8122_s14 = smov 0  }
   0x2   :  { %s8124_s15 = smov 0   ;;  %s8126_s16 = smov 0  }
   0x3 LB: > { %s8141_s17 = sadd.s32 4294967295, %s8059_s16   ;;  %s5604_s18 = sadd.s32 4294967294, %s8059_s16   ;;  %s8059_s16 = sphi %s8126_s16, %s9918_s16   ;;  %s8055_s15 = sphi %s8124_s15, %s9917_s15   ;;  %s8051_s14 = sphi %s8122_s14, %s9916_s14   ;;  %s8047_s13 = sphi %s8120_s13, %s9915_s13  }
   0x4   : > { %s8145_s19 = sadd.s32 1, %s8059_s16   ;;  %s245_s20 = sadd.s32 1, %s8055_s15 }
   0x5   : > { %s242_s21 = ssub.s32 %s8059_s16, %s8145_s19  ;;  %p255_p0 = scmp.ne.s32.totalorder %s8055_s15, %s8051_s14 }
   0x6   : > { %p243_p1 = scmp.eq.s32.totalorder %s242_s21, 0  ;;  %p256_p2 = scmp.eq.s32.totalorder %s8141_s17, 1 }
   0x7   : > { %p261_p3 = scmp.ne.s32.totalorder %s8051_s14, %s8047_s13  ;;  %p262_p4 = scmp.eq.s32.totalorder %s5604_s18, 1 }
   0x8   : > { %s8156_s22 = scalar_select %p243_p1, %s8055_s15, %s245_s20  }
   0x9   : > { %p8158_p5 = por %p256_p2, %p255_p0  ;;  %p8162_p6 = por %p262_p4, %p261_p3 }
   0xa   : > { %p5607_p7 = scmp.ge.s32.totalorder %s8059_s16, 1  ;;  %p315_p8 = scmp.lt.s32.totalorder %s8059_s16, 3 }
   0xc   : > { %p316_p9 = pnand %p5607_p7, %p315_p8 }
   0xd   : > { %v7549_v0 = vld [vmem:[%s9903_s1 + $0x40] sm:$0xff] (!%p316_p9)   ;;  %v7553_v4 = vld [vmem:[%s9903_s1 + $0x48] sm:$0xff] (!%p316_p9)   ;;  %v7557_v8 = vld [vmem:[%s9903_s1 + $0x50] sm:$0xff] (!%p316_p9)   ;;  %p352_p10 = scmp.lt.s32.totalorder (!%p316_p9), %s8141_s17, 1  ;;  %vm8062_vm0 = vmmov (!%p316_p9), 0   ;;  %vm1497_vm1 = vcmask (!%p316_p9), 1040384  }
   0xe   : > { %319 = sbr.rel (%p316_p9) target bundleno = 2918 (0xb66), region = 60  ;;  %v7550_v1 = vld [vmem:[%s9903_s1 + $0xc0] sm:$0xff] (!%p316_p9)   ;;  %6444 = vmatprep.subr.bf16.mxu0 (!%p316_p9), %v7549_v0  ;;  %v7554_v5 = vld [vmem:[%s9903_s1 + $0xc8] sm:$0xff] (!%p316_p9)   ;;  %v7558_v9 = vld [vmem:[%s9903_s1 + $0xd0] sm:$0xff] (!%p316_p9)   ;;  %vm1493_vm2 = vcmask (!%p316_p9), 662528   ;;  %s350_s11 = sand.u32 (!%p316_p9), 1, %s8051_s14  }
   0xf   : > { %v7551_v2 = vld [vmem:[%s9903_s1] sm:$0xff] (!%p316_p9)   ;;  %6496 = vmatprep.subr.bf16.mxu1 (!%p316_p9), %v7550_v1  ;;  %v7555_v6 = vld [vmem:[%s9903_s1 + $0x8] sm:$0xff] (!%p316_p9)   ;;  %v7559_v10 = vld [vmem:[%s9903_s1 + $0x10] sm:$0xff] (!%p316_p9)   ;;  %s351_s18 = scalar_lea.vmem (!%p316_p9), [#allocation2], %s350_s11 }
  0x10   : > { %v7552_v3 = vld [vmem:[%s9903_s1 + $0x80] sm:$0xff] (!%p316_p9)   ;;  %6445 = vmatpush3.bf16.msra.mxu0 (!%p316_p9), %v7551_v2  ;;  %v7556_v7 = vld [vmem:[%s9903_s1 + $0x88] sm:$0xff] (!%p316_p9)   ;;  %v7560_v11 = vld [vmem:[%s9903_s1 + $0x90] sm:$0xff] (!%p316_p9)   ;;  %s5549_s26 = sshll.u32 (!%p316_p9), %s351_s18, 4  ;;  %s9862_s26 = int_to_ptr.vmem [resolvable:$true] %s5549_s26 }
  0x11   : > { %6497 = vmatpush3.bf16.msra.mxu1 (!%p316_p9), %v7552_v3  ;;  %6446 = vmatprep.subr.bf16.mxu0 (!%p316_p9), %v7553_v4  ;;  %v7561_v12 = vld [vmem:[%s9903_s1 + $0x58] sm:$0xff] (!%p316_p9)   ;;  %v7565_v16 = vld [vmem:[%s9903_s1 + $0x60] sm:$0xff] (!%p316_p9)   ;;  %v7569_v20 = vld [vmem:[%s9903_s1 + $0x68] sm:$0xff] (!%p316_p9)   ;;  %s7997_s30 = scalar_lea.vmem (!%p316_p9), %s9862_s26, 16 }
  0x12   : > { %6498 = vmatprep.subr.bf16.mxu1 (!%p316_p9), %v7554_v5  ;;  %v7562_v13 = vld [vmem:[%s9903_s1 + $0xd8] sm:$0xff] (!%p316_p9)   ;;  %v7566_v17 = vld [vmem:[%s9903_s1 + $0xe0] sm:$0xff] (!%p316_p9)   ;;  %v7570_v21 = vld [vmem:[%s9903_s1 + $0xe8] sm:$0xff] (!%p316_p9)   ;;  %p7998_p11 = scmp.ne.s32.totalorder (!%p316_p9), %s9862_s26, %s7997_s30 }
  0x13   : > { %v7563_v14 = vld [vmem:[%s9903_s1 + $0x18] sm:$0xff] (!%p316_p9)   ;;  %v7567_v18 = vld [vmem:[%s9903_s1 + $0x20] sm:$0xff] (!%p316_p9)   ;;  %v7571_v22 = vld [vmem:[%s9903_s1 + $0x28] sm:$0xff] (!%p316_p9)  }
  0x14   : > { %6447 = vmatpush3.bf16.msra.mxu0 (!%p316_p9), %v7555_v6  ;;  %v7564_v15 = vld [vmem:[%s9903_s1 + $0x98] sm:$0xff] (!%p316_p9)   ;;  %v7568_v19 = vld [vmem:[%s9903_s1 + $0xa0] sm:$0xff] (!%p316_p9)   ;;  %v7572_v23 = vld [vmem:[%s9903_s1 + $0xa8] sm:$0xff] (!%p316_p9)   ;;  %p7999_p12 = pnand (!%p316_p9), %p7998_p11, %p8158_p5 }
  0x15   : > { %6499 = vmatpush3.bf16.msra.mxu1 %v7556_v7  ;;  %6448 = vmatprep.subr.bf16.mxu0 %v7557_v8  ;;  %s353_s25 = scalar_select %p352_p10, %s8141_s17, 1  ;;  %v7573_v24 = vld [vmem:[%s9903_s1 + $0x70] sm:$0xff]   ;;  %v7577_v28 = vld [vmem:[%s9903_s1 + $0x78] sm:$0xff]   ;;  %v7581_v40 = vld [vmem:[%s9903_s1 + $0x140] sm:$0xff]  }
  0x16   : > { %6500 = vmatprep.subr.bf16.mxu1 %v7558_v9  ;;  %v7574_v25 = vld [vmem:[%s9903_s1 + $0xf0] sm:$0xff]   ;;  %v7578_v29 = vld [vmem:[%s9903_s1 + $0xf8] sm:$0xff]   ;;  %v7582_v41 = vld [vmem:[%s9903_s1 + $0x100] sm:$0xff]   ;;  %p8000_p13 = pneg %p7999_p12 }
  0x17   : > { %s7506_s20 = smul.u32 352, %s353_s25  ;;  %v7575_v26 = vld [vmem:[%s9903_s1 + $0x30] sm:$0xff]   ;;  %v7579_v30 = vld [vmem:[%s9903_s1 + $0x38] sm:$0xff]   ;;  %v7583_v42 = vld [vmem:[%s9903_s1 + $0x1c0] sm:$0xff]   ;;  %s6441_s25 = sshll.u32 %s8141_s17, 4 }
  0x18   : > { %6449 = vmatpush3.bf16.msra.mxu0 %v7559_v10  ;;  %v7576_v27 = vld [vmem:[%s9903_s1 + $0xb0] sm:$0xff]   ;;  %v7580_v31 = vld [vmem:[%s9903_s1 + $0xb8] sm:$0xff]   ;;  %v7584_v43 = vld [vmem:[%s9903_s1 + $0x180] sm:$0xff]   ;;  %s9860_s29 = scalar_lea.hbm %s9912_s10, %s6441_s25  ;;  %s8064_s17 = smov [#allocation2]  }
  0x19   : > { %6501 = vmatpush3.bf16.msra.mxu1 %v7560_v11  ;;  %6450 = vmatprep.subr.bf16.mxu0 %v7561_v12  ;;  %s8263_s21 = scalar_lea.vmem %s9902_s0, %s7506_s20  ;;  %v7585_v50 = vld [vmem:[%s9903_s1 + $0x148] sm:$0xff]   ;;  %v7589_v62 = vld [vmem:[%s9903_s1 + $0x150] sm:$0xff]   ;;  %v7593_v3 = vld [vmem:[%s9903_s1 + $0x158] sm:$0xff]   ;;  %s5537_s20 = scalar_lea.sflag [#allocation3], %s350_s11 }
  0x1a   : > { %6502 = vmatprep.subr.bf16.mxu1 %v7562_v13  ;;  %v358_v32 = vld [vmem:[%s8263_s21] sm:$0xff]  ;;  %v359_v34 = vld [vmem:[%s8263_s21 + $0x8] sm:$0xff]  ;;  %v7590_v63 = vld [vmem:[%s9903_s1 + $0x110] sm:$0xff]   ;;  %s8001_s12 = sshll.u32 %s8064_s17, 4  ;;  %s8002_s12 = int_to_ptr.vmem [resolvable:$false] %s8001_s12 }
  0x1b   : > { %v362_v33 = vld [vmem:[%s8263_s21 + $0x20] sm:$0xff]  ;;  %v363_v37 = vld [vmem:[%s8263_s21 + $0x28] sm:$0xff]  ;;  %v7591_v0 = vld [vmem:[%s9903_s1 + $0x1d0] sm:$0xff]   ;;  %p8004_p0 = scmp.lt.s32.totalorder %s9862_s26, %s8002_s12 }
  0x1c   : > { %6451 = vmatpush3.bf16.msra.mxu0 %v7563_v14  ;;  %v5610_v35 = vcombine.low %v358_v32, %v362_v33  ;;  %v5611_v36 = vcombine.high %v358_v32, %v362_v33  ;;  %v5612_v38 = vcombine.low %v359_v34, %v363_v37  ;;  %v5613_v39 = vcombine.high %v359_v34, %v363_v37  ;;  %v366_v44 = vld [vmem:[%s8263_s21 + $0x40] sm:$0xff]  ;;  %v367_v47 = vld [vmem:[%s8263_s21 + $0x48] sm:$0xff]  ;;  %v7592_v1 = vld [vmem:[%s9903_s1 + $0x190] sm:$0xff]  }
  0x1d   : > { %6503 = vmatpush3.bf16.msra.mxu1 %v7564_v15  ;;  %6452 = vmatprep.subr.bf16.mxu0 %v7565_v16  ;;  %v370_v45 = vld [vmem:[%s8263_s21 + $0x60] sm:$0xff]  ;;  %v371_v48 = vld [vmem:[%s8263_s21 + $0x68] sm:$0xff]  ;;  %v7594_v5 = vld [vmem:[%s9903_s1 + $0x118] sm:$0xff]  }
  0x1e   : > { %6504 = vmatprep.subr.bf16.mxu1 %v7566_v17  ;;  %1181 = vmatprep.mubr.bf16.mxu0 %v5611_v36  ;;  %v5619_v46 = vcombine.high %v366_v44, %v370_v45  ;;  %v5621_v49 = vcombine.high %v367_v47, %v371_v48  ;;  %v5618_v51 = vcombine.low %v366_v44, %v370_v45  ;;  %v7586_v52 = vld [vmem:[%s9903_s1 + $0x108] sm:$0xff]   ;;  %v374_v56 = vld [vmem:[%s8263_s21 + $0x80] sm:$0xff]  ;;  %v7595_v12 = vld [vmem:[%s9903_s1 + $0x1d8] sm:$0xff]  }
  0x1f   : > { %1261 = vmatprep.mubr.bf16.mxu1 %v5613_v39  ;;  %v5620_v53 = vcombine.low %v367_v47, %v371_v48  ;;  %v7587_v54 = vld [vmem:[%s9903_s1 + $0x1c8] sm:$0xff]   ;;  %v378_v57 = vld [vmem:[%s8263_s21 + $0xa0] sm:$0xff]  ;;  %v7596_v13 = vld [vmem:[%s9903_s1 + $0x198] sm:$0xff]  }
  0x20   : > { %6453 = vmatpush3.bf16.msra.mxu0 %v7567_v18  ;;  %v7588_v55 = vld [vmem:[%s9903_s1 + $0x188] sm:$0xff]   ;;  %v5627_v60 = vcombine.high %v374_v56, %v378_v57  ;;  %v5626_v2 = vcombine.low %v374_v56, %v378_v57  ;;  %v382_v6 = vld [vmem:[%s8263_s21 + $0xc0] sm:$0xff]  ;;  %v7607_v33 = vld [vmem:[%s9903_s1 + $0x170] sm:$0xff]  }
  0x21   : > { %6505 = vmatpush3.bf16.msra.mxu1 %v7568_v19  ;;  %6454 = vmatprep.subr.bf16.mxu0 %v7569_v20  ;;  %v375_v58 = vld [vmem:[%s8263_s21 + $0x88] sm:$0xff]  ;;  %v386_v7 = vld [vmem:[%s8263_s21 + $0xe0] sm:$0xff]  ;;  %v7610_v36 = vld [vmem:[%s9903_s1 + $0x130] sm:$0xff]  }
  0x22   : > { %6506 = vmatprep.subr.bf16.mxu1 %v7570_v21  ;;  %v379_v59 = vld [vmem:[%s8263_s21 + $0xa8] sm:$0xff]  ;;  %v5635_v9 = vcombine.high %v382_v6, %v386_v7  ;;  %v7597_v14 = vld [vmem:[%s9903_s1 + $0x160] sm:$0xff]   ;;  %v5634_v16 = vcombine.low %v382_v6, %v386_v7  ;;  %v7612_v39 = vld [vmem:[%s9903_s1 + $0x1b0] sm:$0xff]  }
  0x23   : > { %v5629_v61 = vcombine.high %v375_v58, %v379_v59  ;;  %v5628_v4 = vcombine.low %v375_v58, %v379_v59  ;;  %v383_v8 = vld [vmem:[%s8263_s21 + $0xc8] sm:$0xff]  ;;  %v7598_v15 = vld [vmem:[%s9903_s1 + $0x120] sm:$0xff]   ;;  %v360_v44 = vld [vmem:[%s8263_s21 + $0x10] sm:$0xff] }
  0x24   : > { %6455 = vmatpush3.bf16.msra.mxu0 %v7571_v22  ;;  %v387_v10 = vld [vmem:[%s8263_s21 + $0xe8] sm:$0xff]  ;;  %v7599_v17 = vld [vmem:[%s9903_s1 + $0x1e0] sm:$0xff]   ;;  %v364_v45 = vld [vmem:[%s8263_s21 + $0x30] sm:$0xff] }
  0x25   : > { %6507 = vmatpush3.bf16.msra.mxu1 %v7572_v23  ;;  %6456 = vmatprep.subr.bf16.mxu0 %v7573_v24  ;;  %v5637_v11 = vcombine.high %v383_v8, %v387_v10  ;;  %v5636_v18 = vcombine.low %v383_v8, %v387_v10  ;;  %v7600_v19 = vld [vmem:[%s9903_s1 + $0x1a0] sm:$0xff]   ;;  %v391_v23 = vld [vmem:[%s8263_s21 + $0x108] sm:$0xff]  ;;  %v361_v47 = vld [vmem:[%s8263_s21 + $0x18] sm:$0xff]  ;;  %v5614_v56 = vcombine.low %v360_v44, %v364_v45 }
  0x26   : > { %6508 = vmatprep.subr.bf16.mxu1 %v7574_v25  ;;  %v390_v20 = vld [vmem:[%s8263_s21 + $0x100] sm:$0xff]  ;;  %v395_v24 = vld [vmem:[%s8263_s21 + $0x128] sm:$0xff]  ;;  %v365_v48 = vld [vmem:[%s8263_s21 + $0x38] sm:$0xff] }
  0x27   : > { %v394_v21 = vld [vmem:[%s8263_s21 + $0x120] sm:$0xff]  ;;  %v5645_v25 = vcombine.high %v391_v23, %v395_v24  ;;  %v5644_v34 = vcombine.low %v391_v23, %v395_v24  ;;  %v5616_v57 = vcombine.low %v361_v47, %v365_v48  ;;  %v385_v6 = vld [vmem:[%s8263_s21 + $0xd8] sm:$0xff] }
  0x28   : > { %6457 = vmatpush3.bf16.msra.mxu0 %v7575_v26  ;;  %v5643_v22 = vcombine.high %v390_v20, %v394_v21  ;;  %v7601_v26 = vld [vmem:[%s9903_s1 + $0x168] sm:$0xff]   ;;  %v5642_v32 = vcombine.low %v390_v20, %v394_v21  ;;  %v389_v7 = vld [vmem:[%s8263_s21 + $0xf8] sm:$0xff]  ;;  %v400_v20 = vld [vmem:[%s8263_s21 + $0x150] sm:$0x11] }
  0x29   : > { %6509 = vmatpush3.bf16.msra.mxu1 %v7576_v27  ;;  %6458 = vmatprep.subr.bf16.mxu0 %v7577_v28  ;;  %v7602_v27 = vld [vmem:[%s9903_s1 + $0x128] sm:$0xff]   ;;  %v401_v21 = vld [vmem:[%s8263_s21 + $0x158] sm:$0x11]  ;;  %v5655_v24 = vcombine.high %v400_v20, %v400_v20 }
  0x2a   : > { %6510 = vmatprep.subr.bf16.mxu1 %v7578_v29  ;;  %v7603_v28 = vld [vmem:[%s9903_s1 + $0x1e8] sm:$0xff]  }
  0x2b   : > { %v7604_v29 = vld [vmem:[%s9903_s1 + $0x1a8] sm:$0xff]  }
  0x2c   : > { %6459 = vmatpush3.bf16.msra.mxu0 %v7579_v30  ;;  %v398_v30 = vld [vmem:[%s8263_s21 + $0x140] sm:$0x11] }
  0x2d   : > { %6511 = vmatpush3.bf16.msra.mxu1 %v7580_v31  ;;  %6548 = vmatprep.subr.bf16.mxu0 %v7581_v40  ;;  %v399_v31 = vld [vmem:[%s8263_s21 + $0x148] sm:$0x11]  ;;  %v7613_v40 = vld [vmem:[%s9903_s1 + $0x178] sm:$0xff]  }
  0x2e   : > { %6600 = vmatprep.subr.bf16.mxu1 %v7583_v42  ;;  %v5653_v37 = vcombine.high %v399_v31, %v399_v31  ;;  %v7615_v42 = vld [vmem:[%s9903_s1 + $0x138] sm:$0xff]  }
  0x2f   : > { %1182 = vmatmul.mubr.bf16.vlgmr.msra.gmra.mrb[0].mxu0 %v5610_v35  ;;  %v5651_v35 = vcombine.high %v398_v30, %v398_v30 }
  0x30   : > { %1262 = vmatmul.mubr.bf16.vlgmr.msra.gmra.mrb[0].mxu1 %v5612_v38  ;;  %6549 = vmatpush3.bf16.msra.mxu0 %v7582_v41  ;;  %v7611_v38 = vld [vmem:[%s9903_s1 + $0x1f0] sm:$0xff]   ;;  %v7614_v41 = vld [vmem:[%s9903_s1 + $0x1f8] sm:$0xff]  }
  0x31   : > { %6601 = vmatpush3.bf16.msra.mxu1 %v7584_v43  ;;  %1189 = vmatprep.mubr.bf16.mxu0 %v5619_v46  ;;  %v7616_v43 = vld [vmem:[%s9903_s1 + $0x1b8] sm:$0xff]   ;;  %v5650_v46 = vcombine.low %v398_v30, %v398_v30 }
  0x32   : > { %1269 = vmatprep.mubr.bf16.mxu1 %v5621_v49  ;;  %6550 = vmatprep.subr.bf16.mxu0 %v7585_v50  ;;  %v5652_v49 = vcombine.low %v399_v31, %v399_v31  ;;  %v5615_v50 = vcombine.high %v360_v44, %v364_v45  ;;  %v8420_v31 = vld [vmem:[%s9904_s2] ss:$0 sm:$0xff] }
  0x33   : > { %6602 = vmatprep.subr.bf16.mxu1 %v7587_v54  ;;  %v369_v54 = vld [vmem:[%s8263_s21 + $0x58] sm:$0xff] }
  0x34   : > { %6551 = vmatpush3.bf16.msra.mxu0 %v7586_v52  ;;  %v368_v52 = vld [vmem:[%s8263_s21 + $0x50] sm:$0xff] }
  0x35   : > { %6603 = vmatpush3.bf16.msra.mxu1 %v7588_v55  ;;  %6552 = vmatprep.subr.bf16.mxu0 %v7589_v62  ;;  %v373_v55 = vld [vmem:[%s8263_s21 + $0x78] sm:$0xff] }
  0x36   : > { %6604 = vmatprep.subr.bf16.mxu1 %v7591_v0  ;;  %v5625_v59 = vcombine.high %v369_v54, %v373_v55  ;;  %v377_v62 = vld [vmem:[%s8263_s21 + $0x98] sm:$0xff] }
  0x37   : > { %1190 = vmatmul.mubr.bf16.gmra.mrb[4].mxu0 %v5618_v51  ;;  %v5617_v51 = vcombine.high %v361_v47, %v365_v48 }
  0x38   : > { %1270 = vmatmul.mubr.bf16.gmra.mrb[4].mxu1 %v5620_v53  ;;  %1197 = vmatprep.mubr.bf16.mxu0 %v5627_v60  ;;  %v372_v53 = vld [vmem:[%s8263_s21 + $0x70] sm:$0xff] }
  0x39   : > { %1277 = vmatprep.mubr.bf16.mxu1 %v5629_v61  ;;  %6553 = vmatpush3.bf16.msra.mxu0 %v7590_v63  ;;  %v5623_v58 = vcombine.high %v368_v52, %v372_v53  ;;  %v376_v60 = vld [vmem:[%s8263_s21 + $0x90] sm:$0xff]  ;;  %v381_v63 = vld [vmem:[%s8263_s21 + $0xb8] sm:$0xff]  ;;  %v5622_v0 = vcombine.low %v368_v52, %v372_v53  ;;  %v7626_v52 = vld [vmem:[%s9906_s4 + $0x40] sm:$0xff]  }
  0x3a   : > { %6605 = vmatpush3.bf16.msra.mxu1 %v7592_v1  ;;  %6554 = vmatprep.subr.bf16.mxu0 %v7593_v3  ;;  %v380_v61 = vld [vmem:[%s8263_s21 + $0xb0] sm:$0xff]  ;;  %v5624_v1 = vcombine.low %v369_v54, %v373_v55  ;;  %v5633_v3 = vcombine.high %v377_v62, %v381_v63 }
  0x3b   : > { %6606 = vmatprep.subr.bf16.mxu1 %v7595_v12  ;;  %v5630_v8 = vcombine.low %v376_v60, %v380_v61  ;;  %v392_v12 = vld [vmem:[%s8263_s21 + $0x110] sm:$0xff] }
  0x3d   : > { %6555 = vmatpush3.bf16.msra.mxu0 %v7594_v5  ;;  %v388_v5 = vld [vmem:[%s8263_s21 + $0xf0] sm:$0xff] }
  0x3e   : > { %6607 = vmatpush3.bf16.msra.mxu1 %v7596_v13  ;;  %6556 = vmatprep.subr.bf16.mxu0 %v7597_v14  ;;  %v396_v13 = vld [vmem:[%s8263_s21 + $0x130] sm:$0xff]  ;;  %v393_v14 = vld [vmem:[%s8263_s21 + $0x118] sm:$0xff] }
  0x3f   : > { %1198 = vmatmul.mubr.bf16.gmra.mrb[8].mxu0 %v5626_v2  ;;  %6608 = vmatprep.subr.bf16.mxu1 %v7599_v17  ;;  %v5631_v2 = vcombine.high %v376_v60, %v380_v61  ;;  %v5640_v17 = vcombine.low %v385_v6, %v389_v7 }
  0x40   : > { %1278 = vmatmul.mubr.bf16.gmra.mrb[8].mxu1 %v5628_v4  ;;  %1205 = vmatprep.mubr.bf16.mxu0 %v5635_v9  ;;  %v384_v4 = vld [vmem:[%s8263_s21 + $0xd0] sm:$0xff]  ;;  %v5632_v9 = vcombine.low %v377_v62, %v381_v63 }
  0x41   : > { %1285 = vmatprep.mubr.bf16.mxu1 %v5637_v11  ;;  %6557 = vmatpush3.bf16.msra.mxu0 %v7598_v15  ;;  %v5639_v10 = vcombine.high %v384_v4, %v388_v5  ;;  %v5641_v11 = vcombine.high %v385_v6, %v389_v7  ;;  %v397_v15 = vld [vmem:[%s8263_s21 + $0x138] sm:$0xff]  ;;  %s8003_s21 = scalar_lea.vmem %s8002_s12, 32 }
  0x42   : > { %6609 = vmatpush3.bf16.msra.mxu1 %v7600_v19  ;;  %6558 = vmatprep.subr.bf16.mxu0 %v7601_v26  ;;  %v5649_v19 = vcombine.high %v393_v14, %v397_v15  ;;  %v5648_v23 = vcombine.low %v393_v14, %v397_v15  ;;  %v5654_v26 = vcombine.low %v400_v20, %v400_v20  ;;  %v7631_v15 = vld [vmem:[%s9906_s4 + $0x50] sm:$0xff]   ;;  %p8005_p1 = scmp.lt.s32.totalorder %s8003_s21, %s7997_s30 }
  0x43   : > { %6610 = vmatprep.subr.bf16.mxu1 %v7603_v28  ;;  %v8061_v28 = vmov 0.0  }
  0x44   : > { %p8006_p2 = por %p8005_p1, %p8004_p0 }
  0x45   : > { %6559 = vmatpush3.bf16.msra.mxu0 %v7602_v27  ;;  %v5656_v27 = vcombine.low %v401_v21, %v401_v21 }
  0x46   : > { %6611 = vmatpush3.bf16.msra.mxu1 %v7604_v29  ;;  %6560 = vmatprep.subr.bf16.mxu0 %v7607_v33  ;;  %p8007_p3 = pnand %p8006_p2, %p8000_p13 }
  0x47   : > { %1206 = vmatmul.mubr.bf16.gmra.mrb[12].mxu0 %v5634_v16  ;;  %6612 = vmatprep.subr.bf16.mxu1 %v7611_v38  ;;  %v5638_v16 = vcombine.low %v384_v4, %v388_v5  ;;  %v7629_v5 = vld [vmem:[%s9906_s4 + $0x48] sm:$0xff]  }
  0x48   : > { %1286 = vmatmul.mubr.bf16.gmra.mrb[12].mxu1 %v5636_v18  ;;  %1213 = vmatprep.mubr.bf16.mxu0 %v5643_v22  ;;  %v5647_v18 = vcombine.high %v392_v12, %v396_v13  ;;  %v5646_v22 = vcombine.low %v392_v12, %v396_v13 }
  0x49   : > { %1293 = vmatprep.mubr.bf16.mxu1 %v5645_v25  ;;  %6561 = vmatpush3.bf16.msra.mxu0 %v7610_v36  ;;  %v5657_v25 = vcombine.high %v401_v21, %v401_v21 }
  0x4a   : > { %6613 = vmatpush3.bf16.msra.mxu1 %v7612_v39  ;;  %6562 = vmatprep.subr.bf16.mxu0 %v7613_v40 }
  0x4b   : > { %6614 = vmatprep.subr.bf16.mxu1 %v7614_v41 }
  0x4d   : > { %6563 = vmatpush3.bf16.msra.mxu0 %v7615_v42 }
  0x4e   : > { %6615 = vmatpush3.bf16.msra.mxu1 %v7616_v43  ;;  %6962 = vmatprep.subr.bf16.mxu0 %v8061_v28 }
  0x4f   : > { %1214 = vmatmul.mubr.bf16.gmra.mrb[16].mxu0 %v5642_v32  ;;  %6930 = vmatprep.subr.bf16.mxu1 %v8061_v28 }
  0x50   : > { %1294 = vmatmul.mubr.bf16.gmra.mrb[16].mxu1 %v5644_v34  ;;  %1221 = vmatprep.mubr.bf16.mxu0 %v5651_v35 }
  0x51   : > { %1301 = vmatprep.mubr.bf16.mxu1 %v5653_v37 }
  0x57   : > { %1222 = vmatmul.mubr.bf16.gmra.mrb[20].mxu0 %v5650_v46 }
  0x58   : > { %1302 = vmatmul.mubr.bf16.gmra.mrb[20].mxu1 %v5652_v49  ;;  %1341 = vmatprep.mubr.bf16.mxu0 %v5615_v50 }
  0x59   : > { %1421 = vmatprep.mubr.bf16.mxu1 %v5617_v51 }
  0x5f   : > { %1342 = vmatmul.mubr.bf16.vlgmr.msra.gmra.mrb[24].mxu0 %v5614_v56 }
  0x60   : > { %1422 = vmatmul.mubr.bf16.vlgmr.msra.gmra.mrb[24].mxu1 %v5616_v57  ;;  %1349 = vmatprep.mubr.bf16.mxu0 %v5623_v58 }
  0x61   : > { %1429 = vmatprep.mubr.bf16.mxu1 %v5625_v59  ;;  %6963 = vmatpush3.bf16.msra.mxu0 %v7626_v52 }
  0x62   : > { %6964 = vmatprep.subr.bf16.mxu0 %v8061_v28 }
  0x65   : > { %6965 = vmatpush3.bf16.msra.mxu0 %v7629_v5 }
  0x66   : > { %6966 = vmatprep.subr.bf16.mxu0 %v8061_v28 }
  0x67   : > { %1350 = vmatmul.mubr.bf16.gmra.mrb[28].mxu0 %v5622_v0 }
  0x68   : > { %1430 = vmatmul.mubr.bf16.gmra.mrb[28].mxu1 %v5624_v1  ;;  %1357 = vmatprep.mubr.bf16.mxu0 %v5631_v2 }
  0x69   : > { %1437 = vmatprep.mubr.bf16.mxu1 %v5633_v3  ;;  %6967 = vmatpush3.bf16.msra.mxu0 %v7631_v15 }
  0x6a   : > { %6968 = vmatprep.subr.bf16.mxu0 %v8061_v28 }
  0x6f   : > { %1358 = vmatmul.mubr.bf16.gmra.mrb[32].mxu0 %v5630_v8 }
  0x70   : > { %1438 = vmatmul.mubr.bf16.gmra.mrb[32].mxu1 %v5632_v9  ;;  %1365 = vmatprep.mubr.bf16.mxu0 %v5639_v10 }
  0x71   : > { %1445 = vmatprep.mubr.bf16.mxu1 %v5641_v11 }
  0x77   : > { %1366 = vmatmul.mubr.bf16.gmra.mrb[36].mxu0 %v5638_v16 }
  0x78   : > { %1446 = vmatmul.mubr.bf16.gmra.mrb[36].mxu1 %v5640_v17  ;;  %1373 = vmatprep.mubr.bf16.mxu0 %v5647_v18 }
  0x79   : > { %1453 = vmatprep.mubr.bf16.mxu1 %v5649_v19 }
  0x7f   : > { %1374 = vmatmul.mubr.bf16.gmra.mrb[40].mxu0 %v5646_v22 }
  0x80   : > { %1454 = vmatmul.mubr.bf16.gmra.mrb[40].mxu1 %v5648_v23  ;;  %1381 = vmatprep.mubr.bf16.mxu0 %v5655_v24 }
  0x81   : > { %1461 = vmatprep.mubr.bf16.mxu1 %v5657_v25 }
  0x87   : > { %1382 = vmatmul.mubr.bf16.gmra.mrb[44].mxu0 %v5654_v26 }
  0x88   : > { %1462 = vmatmul.mubr.bf16.gmra.mrb[44].mxu1 %v5656_v27  ;;  %6978 = vmatprep.mubr.msk.bf16.mxu0 %vm8062_vm0, %v8061_v28 }
  0x89   : > { %6942 = vmatprep.mubr.msk.bf16.mxu1 %vm8062_vm0, %v8061_v28 }
 0x102   : > { %v6460_v29 = vpop.f32.mrb[0].mxu0 }
 0x103   : > { %v6512_v30 = vpop.f32.mrb[0].mxu1  ;;  %v6461_v32 = vpop.f32.mrb[1].mxu0 }
 0x104   : > { %v6462_v33 = vadd.f32 %v6461_v32, %v6460_v29  ;;  %v6513_v34 = vpop.f32.mrb[1].mxu1  ;;  %v6463_v35 = vpop.f32.mrb[2].mxu0 }
 0x105   : > { %v6514_v36 = vadd.f32 %v6513_v34, %v6512_v30  ;;  %v6515_v37 = vpop.f32.mrb[2].mxu1  ;;  %v6464_v38 = vpop.f32.mrb[3].mxu0 }
 0x106   : > { %v1184_v39 = vadd.f32 %v6462_v33, %v8420_v31  ;;  %v6465_v40 = vadd.f32 %v6464_v38, %v6463_v35  ;;  %v6516_v41 = vpop.f32.mrb[3].mxu1 }
 0x107   : > { %v6517_v42 = vadd.f32 %v6516_v41, %v6515_v37 }
 0x108   : > { %v8423_v43 = vadd.f32 %v6514_v36, %v1184_v39  ;;  %v1187_v44 = vadd.f32 %v6465_v40, %v8420_v31 }
 0x10a   : > { %v8426_v45 = vadd.f32 %v6517_v42, %v1187_v44  ;;  %v6466_v46 = vpop.f32.mrb[4].mxu0 }
 0x10b   : > { %v6518_v47 = vpop.f32.mrb[4].mxu1  ;;  %v6467_v48 = vpop.f32.mrb[5].mxu0 }
 0x10c   : > { %v6468_v49 = vadd.f32 %v6467_v48, %v6466_v46  ;;  %v6519_v50 = vpop.f32.mrb[5].mxu1  ;;  %v6469_v51 = vpop.f32.mrb[6].mxu0 }
 0x10d   : > { %v6520_v53 = vadd.f32 %v6519_v50, %v6518_v47  ;;  %v6521_v54 = vpop.f32.mrb[6].mxu1  ;;  %v6470_v55 = vpop.f32.mrb[7].mxu0 }
 0x10e   : > { %v1192_v56 = vadd.f32 %v6468_v49, %v8420_v31  ;;  %v6471_v57 = vadd.f32 %v6470_v55, %v6469_v51  ;;  %v6522_v58 = vpop.f32.mrb[7].mxu1 }
 0x10f   : > { %v6523_v59 = vadd.f32 %v6522_v58, %v6521_v54 }
 0x110   : > { %v8433_v60 = vadd.f32 %v6520_v53, %v1192_v56  ;;  %v1195_v61 = vadd.f32 %v6471_v57, %v8420_v31 }
 0x112   : > { %v8436_v62 = vadd.f32 %v6523_v59, %v1195_v61  ;;  %v6472_v63 = vpop.f32.mrb[8].mxu0 }
 0x113   : > { %v6524_v0 = vpop.f32.mrb[8].mxu1  ;;  %v6473_v1 = vpop.f32.mrb[9].mxu0 }
 0x114   : > { %v6474_v2 = vadd.f32 %v6473_v1, %v6472_v63  ;;  %v6525_v3 = vpop.f32.mrb[9].mxu1  ;;  %v6475_v4 = vpop.f32.mrb[10].mxu0 }
 0x115   : > { %v6526_v6 = vadd.f32 %v6525_v3, %v6524_v0  ;;  %v6527_v7 = vpop.f32.mrb[10].mxu1  ;;  %v6476_v8 = vpop.f32.mrb[11].mxu0 }
 0x116   : > { %v1200_v9 = vadd.f32 %v6474_v2, %v8420_v31  ;;  %v6477_v10 = vadd.f32 %v6476_v8, %v6475_v4  ;;  %v6528_v11 = vpop.f32.mrb[11].mxu1 }
 0x117   : > { %v6529_v12 = vadd.f32 %v6528_v11, %v6527_v7 }
 0x118   : > { %v8443_v13 = vadd.f32 %v6526_v6, %v1200_v9  ;;  %v1203_v14 = vadd.f32 %v6477_v10, %v8420_v31 }
 0x11a   : > { %v8449_v16 = vadd.f32 %v6529_v12, %v1203_v14  ;;  %v6478_v17 = vpop.f32.mrb[12].mxu0 }
 0x11b   : > { %v6530_v18 = vpop.f32.mrb[12].mxu1  ;;  %v6479_v19 = vpop.f32.mrb[13].mxu0 }
 0x11c   : > { %v6480_v20 = vadd.f32 %v6479_v19, %v6478_v17  ;;  %v6531_v21 = vpop.f32.mrb[13].mxu1  ;;  %v6481_v22 = vpop.f32.mrb[14].mxu0 }
 0x11d   : > { %v6532_v23 = vadd.f32 %v6531_v21, %v6530_v18  ;;  %v6533_v24 = vpop.f32.mrb[14].mxu1  ;;  %v6482_v25 = vpop.f32.mrb[15].mxu0 }
 0x11e   : > { %v1208_v26 = vadd.f32 %v6480_v20, %v8420_v31  ;;  %v6483_v27 = vadd.f32 %v6482_v25, %v6481_v22  ;;  %v6534_v29 = vpop.f32.mrb[15].mxu1 }
 0x11f   : > { %v6535_v30 = vadd.f32 %v6534_v29, %v6533_v24 }
 0x120   : > { %v8453_v32 = vadd.f32 %v6532_v23, %v1208_v26  ;;  %v1211_v33 = vadd.f32 %v6483_v27, %v8420_v31 }
 0x122   : > { %v8456_v34 = vadd.f32 %v6535_v30, %v1211_v33  ;;  %v6484_v35 = vpop.f32.mrb[16].mxu0 }
 0x123   : > { %v6536_v36 = vpop.f32.mrb[16].mxu1  ;;  %v6485_v37 = vpop.f32.mrb[17].mxu0 }
 0x124   : > { %v6486_v38 = vadd.f32 %v6485_v37, %v6484_v35  ;;  %v6537_v39 = vpop.f32.mrb[17].mxu1  ;;  %v6487_v40 = vpop.f32.mrb[18].mxu0 }
 0x125   : > { %v6538_v41 = vadd.f32 %v6537_v39, %v6536_v36  ;;  %v6539_v42 = vpop.f32.mrb[18].mxu1  ;;  %v6488_v44 = vpop.f32.mrb[19].mxu0 }
 0x126   : > { %v1216_v46 = vadd.f32 %v6486_v38, %v8420_v31  ;;  %v6489_v47 = vadd.f32 %v6488_v44, %v6487_v40  ;;  %v6540_v48 = vpop.f32.mrb[19].mxu1 }
 0x127   : > { %v6541_v49 = vadd.f32 %v6540_v48, %v6539_v42 }
 0x128   : > { %v8459_v50 = vadd.f32 %v6538_v41, %v1216_v46  ;;  %v1219_v51 = vadd.f32 %v6489_v47, %v8420_v31 }
 0x12a   : > { %v8462_v52 = vadd.f32 %v6541_v49, %v1219_v51  ;;  %v6490_v53 = vpop.f32.mrb[20].mxu0 }
 0x12b   : > { %v6542_v54 = vpop.f32.mrb[20].mxu1  ;;  %v6491_v55 = vpop.f32.mrb[21].mxu0 }
 0x12c   : > { %v6492_v56 = vadd.f32 %v6491_v55, %v6490_v53  ;;  %v6543_v57 = vpop.f32.mrb[21].mxu1  ;;  %v6493_v58 = vpop.f32.mrb[22].mxu0 }
 0x12d   : > { %v6544_v59 = vadd.f32 %v6543_v57, %v6542_v54  ;;  %v6545_v61 = vpop.f32.mrb[22].mxu1  ;;  %v6494_v63 = vpop.f32.mrb[23].mxu0 }
 0x12e   : > { %v1224_v0 = vadd.f32 %v6492_v56, %v8420_v31  ;;  %v6546_v1 = vpop.f32.mrb[23].mxu1 }
 0x130   : > { %v8465_v2 = vadd.f32 %v6544_v59, %v1224_v0 }
 0x132   : > { %v6564_v3 = vpop.f32.mrb[24].mxu0 }
 0x133   : > { %v6616_v4 = vpop.f32.mrb[24].mxu1  ;;  %v6565_v5 = vpop.f32.mrb[25].mxu0 }
 0x134   : > { %v6566_v6 = vadd.f32 %v6565_v5, %v6564_v3  ;;  %v6617_v7 = vpop.f32.mrb[25].mxu1  ;;  %v6567_v8 = vpop.f32.mrb[26].mxu0 }
 0x135   : > { %v6618_v9 = vadd.f32 %v6617_v7, %v6616_v4  ;;  %v6619_v10 = vpop.f32.mrb[26].mxu1  ;;  %v6568_v11 = vpop.f32.mrb[27].mxu0 }
 0x136   : > { %v1344_v12 = vadd.f32 %v6566_v6, %v8423_v43  ;;  %v6569_v14 = vadd.f32 %v6568_v11, %v6567_v8  ;;  %v6620_v15 = vpop.f32.mrb[27].mxu1 }
 0x137   : > { %v6621_v17 = vadd.f32 %v6620_v15, %v6619_v10 }
 0x138   : > { %v1424_v18 = vadd.f32 %v6618_v9, %v1344_v12  ;;  %v1347_v31 = vadd.f32 %v6569_v14, %v8426_v45 }
 0x13a   : > { %v1427_v19 = vadd.f32 %v6621_v17, %v1347_v31  ;;  %v6570_v20 = vpop.f32.mrb[28].mxu0  ;;  %v1469_v23 = vmax.f32 %v1424_v18, 0.0 }
 0x13b   : > { %v6622_v21 = vpop.f32.mrb[28].mxu1  ;;  %v6571_v22 = vpop.f32.mrb[29].mxu0 }
 0x13c   : > { %v1470_v24 = vmax.f32 %v1427_v19, 0.0  ;;  %v6572_v25 = vadd.f32 %v6571_v22, %v6570_v20  ;;  %v6623_v26 = vpop.f32.mrb[29].mxu1  ;;  %v6573_v27 = vpop.f32.mrb[30].mxu0 }
 0x13d   : > { %v6624_v29 = vadd.f32 %v6623_v26, %v6622_v21  ;;  %v6625_v30 = vpop.f32.mrb[30].mxu1  ;;  %v6574_v33 = vpop.f32.mrb[31].mxu0 }
 0x13e   : > { %v8469_v35 = vpack.c.bf16 %v1470_v24, %v1469_v23  ;;  %v1352_v43 = vadd.f32 %v6572_v25, %v8433_v60  ;;  %v6575_v36 = vadd.f32 %v6574_v33, %v6573_v27  ;;  %v6626_v37 = vpop.f32.mrb[31].mxu1 }
 0x13f   : > { %v6627_v38 = vadd.f32 %v6626_v37, %v6625_v30 }
 0x140   : > { %v1432_v45 = vadd.f32 %v6624_v29, %v1352_v43  ;;  %v1355_v39 = vadd.f32 %v6575_v36, %v8436_v62  ;;  %6931 = vmatpush3.bf16.msra.mxu1 %v8469_v35 }
 0x141   : > { %6932 = vmatprep.subr.bf16.mxu1 %v8061_v28 }
 0x142   : > { %v1435_v40 = vadd.f32 %v6627_v38, %v1355_v39  ;;  %v6576_v41 = vpop.f32.mrb[32].mxu0  ;;  %v1471_v46 = vmax.f32 %v1432_v45, 0.0 }
 0x143   : > { %v6628_v42 = vpop.f32.mrb[32].mxu1  ;;  %v6577_v44 = vpop.f32.mrb[33].mxu0 }
 0x144   : > { %v1472_v47 = vmax.f32 %v1435_v40, 0.0  ;;  %v6578_v48 = vadd.f32 %v6577_v44, %v6576_v41  ;;  %v6629_v49 = vpop.f32.mrb[33].mxu1  ;;  %v6579_v51 = vpop.f32.mrb[34].mxu0 }
 0x145   : > { %v6630_v60 = vadd.f32 %v6629_v49, %v6628_v42  ;;  %v6631_v53 = vpop.f32.mrb[34].mxu1  ;;  %v6580_v54 = vpop.f32.mrb[35].mxu0 }
 0x146   : > { %v8475_v55 = vpack.c.bf16 %v1472_v47, %v1471_v46  ;;  %v1360_v62 = vadd.f32 %v6578_v48, %v8443_v13  ;;  %v6581_v56 = vadd.f32 %v6580_v54, %v6579_v51  ;;  %v6632_v57 = vpop.f32.mrb[35].mxu1 }
 0x147   : > { %v6633_v58 = vadd.f32 %v6632_v57, %v6631_v53 }
 0x148   : > { %v1440_v59 = vadd.f32 %v6630_v60, %v1360_v62  ;;  %v1363_v61 = vadd.f32 %v6581_v56, %v8449_v16  ;;  %6933 = vmatpush3.bf16.msra.mxu1 %v8475_v55  ;;  %v8063_v56 = vmov 0  }
 0x149   : > { %6934 = vmatprep.subr.bf16.mxu1 %v8061_v28  ;;  %v1499_v57 = vsel %vm1497_vm1, 65535, %v8063_v56 }
 0x14a   : > { %v1443_v63 = vadd.f32 %v6633_v58, %v1363_v61  ;;  %v6582_v0 = vpop.f32.mrb[36].mxu0  ;;  %v1473_v4 = vmax.f32 %v1440_v59, 0.0  ;;  %v7621_v61 = vld [vmem:[%s9905_s3] sm:$0x1f]  }
 0x14b   : > { %v6634_v1 = vpop.f32.mrb[36].mxu1  ;;  %v6583_v3 = vpop.f32.mrb[37].mxu0 }
 0x14c   : > { %v1474_v5 = vmax.f32 %v1443_v63, 0.0  ;;  %v6584_v6 = vadd.f32 %v6583_v3, %v6582_v0  ;;  %v6635_v7 = vpop.f32.mrb[37].mxu1  ;;  %v6585_v8 = vpop.f32.mrb[38].mxu0  ;;  %v7623_v63 = vld [vmem:[%s9906_s4] sm:$0xff]   ;;  %v7624_v0 = vld [vmem:[%s9906_s4 + $0x8] sm:$0xff]   ;;  %v7627_v3 = vld [vmem:[%s9906_s4 + $0x18] sm:$0xff]  }
 0x14d   : > { %v6636_v13 = vadd.f32 %v6635_v7, %v6634_v1  ;;  %v6637_v9 = vpop.f32.mrb[38].mxu1  ;;  %v6586_v10 = vpop.f32.mrb[39].mxu0  ;;  %v7625_v1 = vld [vmem:[%s9906_s4 + $0x10] sm:$0xff]   ;;  %v7633_v7 = vld [vmem:[%s9906_s4 + $0x38] sm:$0xff]  }
 0x14e   : > { %v8481_v11 = vpack.c.bf16 %v1474_v5, %v1473_v4  ;;  %v1368_v16 = vadd.f32 %v6584_v6, %v8453_v32  ;;  %v6587_v12 = vadd.f32 %v6586_v10, %v6585_v8  ;;  %v6638_v14 = vpop.f32.mrb[39].mxu1  ;;  %v7628_v4 = vld [vmem:[%s9906_s4 + $0x20] sm:$0xff]   ;;  %v7630_v5 = vld [vmem:[%s9906_s4 + $0x28] sm:$0xff]   ;;  %v7632_v6 = vld [vmem:[%s9906_s4 + $0x30] sm:$0xff]  }
 0x14f   : > { %v6639_v15 = vadd.f32 %v6638_v14, %v6637_v9  ;;  %v7634_v8 = vld [vmem:[%s9906_s4 + $0x58] sm:$0xff]   ;;  %v7636_v9 = vld [vmem:[%s9906_s4 + $0x68] sm:$0xff]   ;;  %v7637_v10 = vld [vmem:[%s9906_s4 + $0x70] sm:$0xff]  }
 0x150   : > { %v1448_v17 = vadd.f32 %v6636_v13, %v1368_v16  ;;  %v1371_v18 = vadd.f32 %v6587_v12, %v8456_v34  ;;  %6935 = vmatpush3.bf16.msra.mxu1 %v8481_v11  ;;  %6969 = vmatpush3.bf16.msra.mxu0 %v7634_v8  ;;  %v7635_v13 = vld [vmem:[%s9906_s4 + $0x60] sm:$0xff]   ;;  %v7638_v16 = vld [vmem:[%s9906_s4 + $0x78] sm:$0xff]  }
 0x151   : > { %6936 = vmatprep.subr.bf16.mxu1 %v8061_v28  ;;  %6970 = vmatprep.subr.bf16.mxu0 %v8061_v28 }
 0x152   : > { %v1451_v31 = vadd.f32 %v6639_v15, %v1371_v18  ;;  %v6588_v19 = vpop.f32.mrb[40].mxu0  ;;  %v1475_v22 = vmax.f32 %v1448_v17, 0.0 }
 0x153   : > { %v6640_v20 = vpop.f32.mrb[40].mxu1  ;;  %v6589_v21 = vpop.f32.mrb[41].mxu0 }
 0x154   : > { %v1476_v23 = vmax.f32 %v1451_v31, 0.0  ;;  %v6590_v24 = vadd.f32 %v6589_v21, %v6588_v19  ;;  %v6641_v25 = vpop.f32.mrb[41].mxu1  ;;  %v6591_v26 = vpop.f32.mrb[42].mxu0  ;;  %6971 = vmatpush3.bf16.msra.mxu0 %v7635_v13 }
 0x155   : > { %v6642_v32 = vadd.f32 %v6641_v25, %v6640_v20  ;;  %v6643_v27 = vpop.f32.mrb[42].mxu1  ;;  %v6592_v29 = vpop.f32.mrb[43].mxu0  ;;  %6972 = vmatprep.subr.bf16.mxu0 %v8061_v28  ;;  %v7643_v25 = vld [vmem:[%s9906_s4 + $0x80] sm:$0xff]  }
 0x156   : > { %v8487_v30 = vpack.c.bf16 %v1476_v23, %v1475_v22  ;;  %v1376_v34 = vadd.f32 %v6590_v24, %v8459_v50  ;;  %v6593_v33 = vadd.f32 %v6592_v29, %v6591_v26  ;;  %v6644_v43 = vpop.f32.mrb[43].mxu1  ;;  %v7639_v23 = vld [vmem:[%s9905_s3 + $0x10] sm:$0x1f]   ;;  %v7640_v24 = vld [vmem:[%s9905_s3 + $0x18] sm:$0x1f]  }
 0x157   : > { %v6645_v36 = vadd.f32 %v6644_v43, %v6643_v27  ;;  %v7641_v26 = vld [vmem:[%s9905_s3 + $0x20] sm:$0x1f]   ;;  %v7645_v27 = vld [vmem:[%s9906_s4 + $0x90] sm:$0xff]   ;;  %v7646_v29 = vld [vmem:[%s9906_s4 + $0x98] sm:$0xff]  }
 0x158   : > { %v1456_v37 = vadd.f32 %v6642_v32, %v1376_v34  ;;  %v1379_v38 = vadd.f32 %v6593_v33, %v8462_v52  ;;  %6937 = vmatpush3.bf16.msra.mxu1 %v8487_v30  ;;  %6973 = vmatpush3.bf16.msra.mxu0 %v7636_v9  ;;  %v7644_v32 = vld [vmem:[%s9906_s4 + $0x88] sm:$0xff]   ;;  %v7647_v33 = vld [vmem:[%s9906_s4 + $0xa0] sm:$0xff]  }
 0x159   : > { %6938 = vmatprep.subr.bf16.mxu1 %v8061_v28  ;;  %6974 = vmatprep.subr.bf16.mxu0 %v8061_v28  ;;  %v7642_v34 = vld [vmem:[%s9905_s3 + $0x28] sm:$0x1f]  }
 0x15a   : > { %v1459_v45 = vadd.f32 %v6645_v36, %v1379_v38  ;;  %v6594_v39 = vpop.f32.mrb[44].mxu0  ;;  %v1477_v42 = vmax.f32 %v1456_v37, 0.0  ;;  %v7648_v43 = vld [vmem:[%s9906_s4 + $0xa8] sm:$0xff]   ;;  %v7649_v36 = vld [vmem:[%s9906_s4 + $0xb0] sm:$0xff]   ;;  %v7650_v37 = vld [vmem:[%s9906_s4 + $0xb8] sm:$0xff]  }
 0x15b   : > { %v6646_v40 = vpop.f32.mrb[44].mxu1  ;;  %v6595_v41 = vpop.f32.mrb[45].mxu0  ;;  %v7662_v38 = vld [vmem:[%s9906_s4 + $0x140] sm:$0xff]  }
 0x15c   : > { %v1478_v44 = vmax.f32 %v1459_v45, 0.0  ;;  %v6596_v46 = vadd.f32 %v6595_v41, %v6594_v39  ;;  %v6647_v47 = vpop.f32.mrb[45].mxu1  ;;  %v6597_v48 = vpop.f32.mrb[46].mxu0  ;;  %6975 = vmatpush3.bf16.msra.mxu0 %v7637_v10  ;;  %v7664_v45 = vld [vmem:[%s9906_s4 + $0x148] sm:$0xff]   ;;  %v7666_v39 = vld [vmem:[%s9906_s4 + $0x150] sm:$0xff]   ;;  %v7670_v41 = vld [vmem:[%s9906_s4 + $0x160] sm:$0xff]  }
 0x15d   : > { %v6648_v50 = vadd.f32 %v6647_v47, %v6646_v40  ;;  %v6649_v49 = vpop.f32.mrb[46].mxu1  ;;  %v6598_v51 = vpop.f32.mrb[47].mxu0  ;;  %6976 = vmatprep.subr.bf16.mxu0 %v8061_v28  ;;  %v7668_v40 = vld [vmem:[%s9906_s4 + $0x158] sm:$0xff]   ;;  %v7657_v10 = vld [vmem:[%s9906_s4 + $0xf0] sm:$0xff]  }
 0x15e   : > { %v8493_v60 = vpack.c.bf16 %v1478_v44, %v1477_v42  ;;  %v1384_v52 = vadd.f32 %v6596_v46, %v8465_v2  ;;  %v6650_v53 = vpop.f32.mrb[47].mxu1  ;;  %v7622_v2 = vld [vmem:[%s9905_s3 + $0x8] sm:$0x1f]   ;;  %v7673_v44 = vld [vmem:[%s9906_s4 + $0x170] sm:$0xff]   ;;  %v7674_v46 = vld [vmem:[%s9906_s4 + $0x178] sm:$0xff]  }
 0x15f   : > { %v7672_v42 = vld [vmem:[%s9906_s4 + $0x168] sm:$0xff]  }
 0x160   : > { %v1464_v54 = vadd.f32 %v6648_v50, %v1384_v52  ;;  %6939 = vmatpush3.bf16.msra.mxu1 %v8493_v60  ;;  %6977 = vmatpush3.bf16.msra.mxu0 %v7638_v16 }
 0x161   : > { %6940 = vmatprep.subr.bf16.mxu1 %v8061_v28  ;;  %7002 = vmatprep.subr.bf16.mxu0 %v8061_v28 }
 0x162   : > { %v1479_v62 = vmax.f32 %v1464_v54, 0.0 }
 0x164   : > { %v1485_v58 = vpack.c.bf16 %v1479_v62, %v1479_v62 }
 0x166   : > { %v8499_v59 = vand.u32 %v1499_v57, %v1485_v58 }
 0x168   : > { %6941 = vmatpush3.bf16.msra.mxu1 %v8499_v59 }
 0x169   : > { %6946 = vmatprep.subr.bf16.mxu1 %v8061_v28 }
 0x16b   : > { %6943 = vmatmul.mubr.msk.bf16.vlgmr.msra.gmra.mrb[48].mxu1 %vm1493_vm2, %v7621_v61 }
 0x16c   : > { %6947 = vmatpush3.bf16.msra.mxu1 %v8469_v35  ;;  %6958 = vmatprep.mubr.msk.bf16.mxu1 %vm8062_vm0, %v8061_v28 }
 0x16d   : > { %6948 = vmatprep.subr.bf16.mxu1 %v8061_v28 }
 0x170   : > { %6949 = vmatpush3.bf16.msra.mxu1 %v8475_v55 }
 0x171   : > { %6950 = vmatprep.subr.bf16.mxu1 %v8061_v28 }
 0x174   : > { %6951 = vmatpush3.bf16.msra.mxu1 %v8481_v11 }
 0x175   : > { %6952 = vmatprep.subr.bf16.mxu1 %v8061_v28 }
 0x178   : > { %6953 = vmatpush3.bf16.msra.mxu1 %v8487_v30 }
 0x179   : > { %6954 = vmatprep.subr.bf16.mxu1 %v8061_v28 }
 0x17c   : > { %6955 = vmatpush3.bf16.msra.mxu1 %v8493_v60 }
 0x17d   : > { %6956 = vmatprep.subr.bf16.mxu1 %v8061_v28 }
 0x180   : > { %6957 = vmatpush3.bf16.msra.mxu1 %v8499_v59 }
 0x181   : > { %6982 = vmatprep.subr.bf16.mxu1 %v8061_v28 }
 0x183   : > { %6959 = vmatmul.mubr.msk.bf16.vlgmr.msra.gmra.mrb[52].mxu1 %vm1493_vm2, %v7622_v2 }
 0x184   : > { %6983 = vmatpush3.bf16.msra.mxu1 %v7623_v63  ;;  %6998 = vmatprep.mubr.msk.bf16.mxu1 %vm8062_vm0, %v8061_v28  ;;  %v7651_v63 = vld [vmem:[%s9906_s4 + $0xc0] sm:$0xff]  }
 0x185   : > { %6984 = vmatprep.subr.bf16.mxu1 %v8061_v28 }
 0x188   : > { %6985 = vmatpush3.bf16.msra.mxu1 %v7624_v0 }
 0x189   : > { %6986 = vmatprep.subr.bf16.mxu1 %v8061_v28 }
 0x18c   : > { %6987 = vmatpush3.bf16.msra.mxu1 %v7625_v1 }
 0x18d   : > { %6988 = vmatprep.subr.bf16.mxu1 %v8061_v28 }
 0x190   : > { %6989 = vmatpush3.bf16.msra.mxu1 %v7627_v3  ;;  %v7652_v3 = vld [vmem:[%s9906_s4 + $0xc8] sm:$0xff]  }
 0x191   : > { %6990 = vmatprep.subr.bf16.mxu1 %v8061_v28 }
 0x194   : > { %6991 = vmatpush3.bf16.msra.mxu1 %v7628_v4  ;;  %v7653_v4 = vld [vmem:[%s9906_s4 + $0xd0] sm:$0xff]  }
 0x195   : > { %6992 = vmatprep.subr.bf16.mxu1 %v8061_v28 }
 0x198   : > { %6993 = vmatpush3.bf16.msra.mxu1 %v7630_v5  ;;  %v7654_v5 = vld [vmem:[%s9906_s4 + $0xd8] sm:$0xff]  }
 0x199   : > { %6994 = vmatprep.subr.bf16.mxu1 %v8061_v28 }
 0x19c   : > { %6995 = vmatpush3.bf16.msra.mxu1 %v7632_v6  ;;  %v7655_v6 = vld [vmem:[%s9906_s4 + $0xe0] sm:$0xff]  }
 0x19d   : > { %6996 = vmatprep.subr.bf16.mxu1 %v8061_v28 }
 0x1a0   : > { %6997 = vmatpush3.bf16.msra.mxu1 %v7633_v7  ;;  %v7656_v7 = vld [vmem:[%s9906_s4 + $0xe8] sm:$0xff]  }
 0x1a1   : > { %7018 = vmatprep.subr.bf16.mxu1 %v8061_v28 }
 0x23e   : > { %v1537_v12 = vpop.f32.mrb[48].mxu1 }
 0x23f   : > { %v6944_v14 = vpop.f32.mrb[49].mxu1 }
 0x240   : > { %v1540_v15 = vpop.f32.mrb[50].mxu1  ;;  %v7658_v14 = vld [vmem:[%s9906_s4 + $0xf8] sm:$0xff]  }
 0x241   : > { %v1544_v17 = vpack.c.bf16 %v1540_v15, %v1537_v12  ;;  %v6945_v18 = vpop.f32.mrb[51].mxu1  ;;  %v7659_v15 = vld [vmem:[%s9906_s4 + $0x100] sm:$0xff]  }
 0x242   : > { %v7661_v18 = vld [vmem:[%s9906_s4 + $0x110] sm:$0xff]  }
 0x243   : > { %6999 = vmatmul.mubr.bf16.vlgmr.msra.gmra.mrb[56].mxu1 %v1544_v17  ;;  %v7660_v17 = vld [vmem:[%s9906_s4 + $0x108] sm:$0xff]  }
 0x244   : > { %7034 = vmatprep.mubr.msk.bf16.mxu1 %vm8062_vm0, %v8061_v28  ;;  %7019 = vmatpush3.bf16.msra.mxu1 %v7643_v25  ;;  %v7667_v25 = vld [vmem:[%s9906_s4 + $0x128] sm:$0xff]  }
 0x245   : > { %7020 = vmatprep.subr.bf16.mxu1 %v8061_v28 }
 0x248   : > { %7021 = vmatpush3.bf16.msra.mxu1 %v7644_v32  ;;  %v7671_v32 = vld [vmem:[%s9906_s4 + $0x138] sm:$0xff]  }
 0x249   : > { %7022 = vmatprep.subr.bf16.mxu1 %v8061_v28 }
 0x24c   : > { %7023 = vmatpush3.bf16.msra.mxu1 %v7645_v27 }
 0x24d   : > { %7024 = vmatprep.subr.bf16.mxu1 %v8061_v28 }
 0x250   : > { %7025 = vmatpush3.bf16.msra.mxu1 %v7646_v29 }
 0x251   : > { %7026 = vmatprep.subr.bf16.mxu1 %v8061_v28 }
 0x254   : > { %7027 = vmatpush3.bf16.msra.mxu1 %v7647_v33 }
 0x255   : > { %7028 = vmatprep.subr.bf16.mxu1 %v8061_v28 }
 0x256   : > { %v1606_v31 = vpop.f32.mrb[52].mxu1 }
 0x257   : > { %v6960_v19 = vpop.f32.mrb[53].mxu1 }
 0x258   : > { %v1609_v20 = vpop.f32.mrb[54].mxu1  ;;  %7029 = vmatpush3.bf16.msra.mxu1 %v7648_v43 }
 0x259   : > { %v1613_v21 = vpack.c.bf16 %v1609_v20, %v1606_v31  ;;  %v6961_v22 = vpop.f32.mrb[55].mxu1  ;;  %7030 = vmatprep.subr.bf16.mxu1 %v8061_v28  ;;  %v7663_v31 = vld [vmem:[%s9906_s4 + $0x118] sm:$0xff]  }
 0x25a   : > { %v7665_v22 = vld [vmem:[%s9906_s4 + $0x120] sm:$0xff]  }
 0x25b   : > { %6979 = vmatmul.mubr.bf16.vlgmr.msra.gmra.mrb[48].mxu0 %v1613_v21 }
 0x25c   : > { %7003 = vmatpush3.bf16.msra.mxu0 %v8469_v35  ;;  %7014 = vmatprep.mubr.msk.bf16.mxu0 %vm8062_vm0, %v8061_v28 }
 0x25d   : > { %7004 = vmatprep.subr.bf16.mxu0 %v8061_v28  ;;  %7031 = vmatpush3.bf16.msra.mxu1 %v7649_v36  ;;  %v7675_v36 = vld [vmem:[%s9905_s3 + $0x30] sm:$0x1f]  }
 0x25e   : > { %7032 = vmatprep.subr.bf16.mxu1 %v8061_v28 }
 0x260   : > { %7005 = vmatpush3.bf16.msra.mxu0 %v8475_v55 }
 0x261   : > { %7006 = vmatprep.subr.bf16.mxu0 %v8061_v28  ;;  %7033 = vmatpush3.bf16.msra.mxu1 %v7650_v37  ;;  %v7676_v37 = vld [vmem:[%s9905_s3 + $0x38] sm:$0x1f]  }
 0x262   : > { %7054 = vmatprep.subr.bf16.mxu1 %v8061_v28 }
 0x264   : > { %7007 = vmatpush3.bf16.msra.mxu0 %v8481_v11 }
 0x265   : > { %7008 = vmatprep.subr.bf16.mxu0 %v8061_v28 }
 0x268   : > { %7009 = vmatpush3.bf16.msra.mxu0 %v8487_v30 }
 0x269   : > { %7010 = vmatprep.subr.bf16.mxu0 %v8061_v28 }
 0x26c   : > { %7011 = vmatpush3.bf16.msra.mxu0 %v8493_v60 }
 0x26d   : > { %7012 = vmatprep.subr.bf16.mxu0 %v8061_v28 }
 0x270   : > { %7013 = vmatpush3.bf16.msra.mxu0 %v8499_v59 }
 0x271   : > { %7038 = vmatprep.subr.bf16.mxu0 %v8061_v28 }
 0x273   : > { %7015 = vmatmul.mubr.msk.bf16.vlgmr.msra.gmra.mrb[52].mxu0 %vm1493_vm2, %v7639_v23 }
 0x274   : > { %7039 = vmatpush3.bf16.msra.mxu0 %v8469_v35  ;;  %7050 = vmatprep.mubr.msk.bf16.mxu0 %vm8062_vm0, %v8061_v28 }
 0x275   : > { %7040 = vmatprep.subr.bf16.mxu0 %v8061_v28 }
 0x278   : > { %7041 = vmatpush3.bf16.msra.mxu0 %v8475_v55 }
 0x279   : > { %7042 = vmatprep.subr.bf16.mxu0 %v8061_v28 }
 0x27c   : > { %7043 = vmatpush3.bf16.msra.mxu0 %v8481_v11 }
 0x27d   : > { %7044 = vmatprep.subr.bf16.mxu0 %v8061_v28 }
 0x280   : > { %7045 = vmatpush3.bf16.msra.mxu0 %v8487_v30 }
 0x281   : > { %7046 = vmatprep.subr.bf16.mxu0 %v8061_v28 }
 0x284   : > { %7047 = vmatpush3.bf16.msra.mxu0 %v8493_v60 }
 0x285   : > { %7048 = vmatprep.subr.bf16.mxu0 %v8061_v28 }
 0x288   : > { %7049 = vmatpush3.bf16.msra.mxu0 %v8499_v59 }
 0x289   : > { %7074 = vmatprep.subr.bf16.mxu0 %v8061_v28 }
 0x28b   : > { %7051 = vmatmul.mubr.msk.bf16.vlgmr.msra.gmra.mrb[56].mxu0 %vm1493_vm2, %v7640_v24 }
 0x28c   : > { %7075 = vmatpush3.bf16.msra.mxu0 %v8469_v35  ;;  %7086 = vmatprep.mubr.msk.bf16.mxu0 %vm8062_vm0, %v8061_v28 }
 0x28d   : > { %7076 = vmatprep.subr.bf16.mxu0 %v8061_v28 }
 0x290   : > { %7077 = vmatpush3.bf16.msra.mxu0 %v8475_v55 }
 0x291   : > { %7078 = vmatprep.subr.bf16.mxu0 %v8061_v28 }
 0x294   : > { %7079 = vmatpush3.bf16.msra.mxu0 %v8481_v11 }
 0x295   : > { %7080 = vmatprep.subr.bf16.mxu0 %v8061_v28 }
 0x298   : > { %7081 = vmatpush3.bf16.msra.mxu0 %v8487_v30 }
 0x299   : > { %7082 = vmatprep.subr.bf16.mxu0 %v8061_v28 }
 0x29c   : > { %7083 = vmatpush3.bf16.msra.mxu0 %v8493_v60 }
 0x29d   : > { %7084 = vmatprep.subr.bf16.mxu0 %v8061_v28 }
 0x2a0   : > { %7085 = vmatpush3.bf16.msra.mxu0 %v8499_v59 }
 0x2a1   : > { %7110 = vmatprep.subr.bf16.mxu0 %v8061_v28 }
 0x2a3   : > { %7087 = vmatmul.mubr.msk.bf16.vlgmr.msra.gmra.mrb[60].mxu0 %vm1493_vm2, %v7641_v26  ;;  %v7669_v26 = vld [vmem:[%s9906_s4 + $0x130] sm:$0xff]  }
 0x2a4   : > { %7111 = vmatpush3.bf16.msra.mxu0 %v8469_v35  ;;  %7122 = vmatprep.mubr.msk.bf16.mxu0 %vm8062_vm0, %v8061_v28 }
 0x2a5   : > { %7112 = vmatprep.subr.bf16.mxu0 %v8061_v28 }
 0x2a8   : > { %7113 = vmatpush3.bf16.msra.mxu0 %v8475_v55 }
 0x2a9   : > { %7114 = vmatprep.subr.bf16.mxu0 %v8061_v28 }
 0x2ac   : > { %7115 = vmatpush3.bf16.msra.mxu0 %v8481_v11 }
 0x2ad   : > { %7116 = vmatprep.subr.bf16.mxu0 %v8061_v28 }
 0x2b0   : > { %7117 = vmatpush3.bf16.msra.mxu0 %v8487_v30 }
 0x2b1   : > { %7118 = vmatprep.subr.bf16.mxu0 %v8061_v28 }
 0x2b4   : > { %7119 = vmatpush3.bf16.msra.mxu0 %v8493_v60 }
 0x2b5   : > { %7120 = vmatprep.subr.bf16.mxu0 %v8061_v28 }
 0x2b8   : > { %7121 = vmatpush3.bf16.msra.mxu0 %v8499_v59 }
 0x2b9   : > { %7126 = vmatprep.subr.bf16.mxu0 %v8061_v28 }
 0x2bb   : > { %7123 = vmatmul.mubr.msk.bf16.vlgmr.msra.gmra.mrb[64].mxu0 %vm1493_vm2, %v7642_v34 }
 0x2bc   : > { %7142 = vmatprep.mubr.msk.bf16.mxu0 %vm8062_vm0, %v8061_v28  ;;  %7127 = vmatpush3.bf16.msra.mxu0 %v7662_v38  ;;  %v7677_v38 = vld [vmem:[%s9906_s4 + $0x180] sm:$0xff]  }
 0x2bd   : > { %7128 = vmatprep.subr.bf16.mxu0 %v8061_v28 }
 0x2c0   : > { %7129 = vmatpush3.bf16.msra.mxu0 %v7664_v45  ;;  %v7678_v45 = vld [vmem:[%s9906_s4 + $0x188] sm:$0xff]  }
 0x2c1   : > { %7130 = vmatprep.subr.bf16.mxu0 %v8061_v28 }
 0x2c4   : > { %7131 = vmatpush3.bf16.msra.mxu0 %v7666_v39  ;;  %v7679_v39 = vld [vmem:[%s9906_s4 + $0x190] sm:$0xff]  }
 0x2c5   : > { %7132 = vmatprep.subr.bf16.mxu0 %v8061_v28 }
 0x2c8   : > { %7133 = vmatpush3.bf16.msra.mxu0 %v7668_v40  ;;  %v7680_v40 = vld [vmem:[%s9906_s4 + $0x1c0] sm:$0xff]  }
 0x2c9   : > { %7134 = vmatprep.subr.bf16.mxu0 %v8061_v28 }
 0x2cc   : > { %7135 = vmatpush3.bf16.msra.mxu0 %v7670_v41  ;;  %v7681_v41 = vld [vmem:[%s9906_s4 + $0x198] sm:$0xff]  }
 0x2cd   : > { %7136 = vmatprep.subr.bf16.mxu0 %v8061_v28 }
 0x2d0   : > { %7137 = vmatpush3.bf16.msra.mxu0 %v7672_v42  ;;  %v7682_v42 = vld [vmem:[%s9906_s4 + $0x1c8] sm:$0xff]  }
 0x2d1   : > { %7138 = vmatprep.subr.bf16.mxu0 %v8061_v28 }
 0x2d4   : > { %7139 = vmatpush3.bf16.msra.mxu0 %v7673_v44  ;;  %v7683_v44 = vld [vmem:[%s9906_s4 + $0x1a0] sm:$0xff]  }
 0x2d5   : > { %7140 = vmatprep.subr.bf16.mxu0 %v8061_v28 }
 0x2d8   : > { %7141 = vmatpush3.bf16.msra.mxu0 %v7674_v46  ;;  %v7684_v46 = vld [vmem:[%s9906_s4 + $0x1d0] sm:$0xff]  }
 0x2d9   : > { %7182 = vmatprep.subr.bf16.mxu0 %v8061_v28 }
 0x316   : > { %v1802_v47 = vpop.f32.mrb[56].mxu1 }
 0x317   : > { %v7000_v48 = vpop.f32.mrb[57].mxu1 }
 0x318   : > { %v1805_v50 = vpop.f32.mrb[58].mxu1  ;;  %v7686_v48 = vld [vmem:[%s9906_s4 + $0x1d8] sm:$0xff]  }
 0x319   : > { %v7001_v49 = vpop.f32.mrb[59].mxu1 }
 0x31a   : > { %v7688_v49 = vld [vmem:[%s9906_s4 + $0x1e0] sm:$0xff]  }
 0x32e   : > { %v1713_v51 = vpop.f32.mrb[48].mxu0 }
 0x32f   : > { %v8719_v52 = vadd.f32 %v1802_v47, %v1713_v51  ;;  %v6980_v53 = vpop.f32.mrb[49].mxu0  ;;  %v7685_v47 = vld [vmem:[%s9906_s4 + $0x1a8] sm:$0xff]   ;;  %v7689_v51 = vld [vmem:[%s9906_s4 + $0x1b8] sm:$0xff]  }
 0x330   : > { %v1716_v54 = vpop.f32.mrb[50].mxu0  ;;  %v7690_v53 = vld [vmem:[%s9906_s4 + $0x1e8] sm:$0xff]  }
 0x331   : > { %v8721_v62 = vadd.f32 %v1805_v50, %v1716_v54  ;;  %v6981_v57 = vpop.f32.mrb[51].mxu0  ;;  %v7687_v50 = vld [vmem:[%s9906_s4 + $0x1b0] sm:$0xff]  }
 0x332   : > { %v7691_v54 = vld [vmem:[%s9906_s4 + $0x1f0] sm:$0xff]   ;;  %v7692_v57 = vld [vmem:[%s9906_s4 + $0x1f8] sm:$0xff]  }
 0x346   : > { %v1854_v58 = vpop.f32.mrb[52].mxu0 }
 0x347   : > { %v7016_v61 = vpop.f32.mrb[53].mxu0 }
 0x348   : > { %v1857_v2 = vpop.f32.mrb[54].mxu0 }
 0x349   : > { %v1861_v0 = vpack.c.bf16 %v1857_v2, %v1854_v58  ;;  %v7017_v1 = vpop.f32.mrb[55].mxu0 }
 0x34b   : > { %7035 = vmatmul.mubr.bf16.vlgmr.msra.gmra.mrb[60].mxu1 %v1861_v0 }
 0x34c   : > { %7055 = vmatpush3.bf16.msra.mxu1 %v7651_v63  ;;  %7070 = vmatprep.mubr.msk.bf16.mxu1 %vm8062_vm0, %v8061_v28 }
 0x34d   : > { %7056 = vmatprep.subr.bf16.mxu1 %v8061_v28 }
 0x350   : > { %7057 = vmatpush3.bf16.msra.mxu1 %v7652_v3 }
 0x351   : > { %7058 = vmatprep.subr.bf16.mxu1 %v8061_v28 }
 0x354   : > { %7059 = vmatpush3.bf16.msra.mxu1 %v7653_v4 }
 0x355   : > { %7060 = vmatprep.subr.bf16.mxu1 %v8061_v28 }
 0x358   : > { %7061 = vmatpush3.bf16.msra.mxu1 %v7654_v5 }
 0x359   : > { %7062 = vmatprep.subr.bf16.mxu1 %v8061_v28 }
 0x35c   : > { %7063 = vmatpush3.bf16.msra.mxu1 %v7655_v6 }
 0x35d   : > { %7064 = vmatprep.subr.bf16.mxu1 %v8061_v28 }
 0x35e   : > { %v2015_v8 = vpop.f32.mrb[56].mxu0 }
 0x35f   : > { %v7052_v13 = vpop.f32.mrb[57].mxu0 }
 0x360   : > { %7065 = vmatpush3.bf16.msra.mxu1 %v7656_v7  ;;  %v2018_v9 = vpop.f32.mrb[58].mxu0 }
 0x361   : > { %v2022_v16 = vpack.c.bf16 %v2018_v9, %v2015_v8  ;;  %7066 = vmatprep.subr.bf16.mxu1 %v8061_v28  ;;  %v7053_v12 = vpop.f32.mrb[59].mxu0 }
 0x364   : > { %7067 = vmatpush3.bf16.msra.mxu1 %v7657_v10 }
 0x365   : > { %7068 = vmatprep.subr.bf16.mxu1 %v8061_v28 }
 0x368   : > { %7069 = vmatpush3.bf16.msra.mxu1 %v7658_v14 }
 0x369   : > { %7090 = vmatprep.subr.bf16.mxu1 %v8061_v28 }
 0x36b   : > { %7071 = vmatmul.mubr.bf16.vlgmr.msra.gmra.mrb[64].mxu1 %v2022_v16 }
 0x36c   : > { %7091 = vmatpush3.bf16.msra.mxu1 %v7659_v15  ;;  %7106 = vmatprep.mubr.msk.bf16.mxu1 %vm8062_vm0, %v8061_v28 }
 0x36d   : > { %7092 = vmatprep.subr.bf16.mxu1 %v8061_v28 }
 0x370   : > { %7093 = vmatpush3.bf16.msra.mxu1 %v7660_v17 }
 0x371   : > { %7094 = vmatprep.subr.bf16.mxu1 %v8061_v28 }
 0x374   : > { %7095 = vmatpush3.bf16.msra.mxu1 %v7661_v18 }
 0x375   : > { %7096 = vmatprep.subr.bf16.mxu1 %v8061_v28 }
 0x376   : > { %v2176_v19 = vpop.f32.mrb[60].mxu0 }
 0x377   : > { %v7088_v20 = vpop.f32.mrb[61].mxu0 }
 0x378   : > { %7097 = vmatpush3.bf16.msra.mxu1 %v7663_v31  ;;  %v2179_v21 = vpop.f32.mrb[62].mxu0 }
 0x379   : > { %v2183_v23 = vpack.c.bf16 %v2179_v21, %v2176_v19  ;;  %7098 = vmatprep.subr.bf16.mxu1 %v8061_v28  ;;  %v7089_v24 = vpop.f32.mrb[63].mxu0 }
 0x37c   : > { %7099 = vmatpush3.bf16.msra.mxu1 %v7665_v22 }
 0x37d   : > { %7100 = vmatprep.subr.bf16.mxu1 %v8061_v28 }
 0x380   : > { %7101 = vmatpush3.bf16.msra.mxu1 %v7667_v25 }
 0x381   : > { %7102 = vmatprep.subr.bf16.mxu1 %v8061_v28 }
 0x384   : > { %7103 = vmatpush3.bf16.msra.mxu1 %v7669_v26 }
 0x385   : > { %7104 = vmatprep.subr.bf16.mxu1 %v8061_v28 }
 0x388   : > { %7105 = vmatpush3.bf16.msra.mxu1 %v7671_v32 }
 0x389   : > { %7146 = vmatprep.subr.bf16.mxu1 %v8061_v28 }
 0x38b   : > { %7107 = vmatmul.mubr.bf16.vlgmr.msra.gmra.mrb[68].mxu1 %v2183_v23 }
 0x38c   : > { %7147 = vmatpush3.bf16.msra.mxu1 %v8469_v35  ;;  %7158 = vmatprep.mubr.msk.bf16.mxu1 %vm8062_vm0, %v8061_v28 }
 0x38d   : > { %7148 = vmatprep.subr.bf16.mxu1 %v8061_v28 }
 0x38e   : > { %v2337_v27 = vpop.f32.mrb[64].mxu0 }
 0x38f   : > { %v7124_v29 = vpop.f32.mrb[65].mxu0 }
 0x390   : > { %7149 = vmatpush3.bf16.msra.mxu1 %v8475_v55  ;;  %v2340_v34 = vpop.f32.mrb[66].mxu0  ;;  %v7693_v29 = vld [vmem:[%s9905_s3 + $0x40] sm:$0x1f]  }
 0x391   : > { %v2344_v33 = vpack.c.bf16 %v2340_v34, %v2337_v27  ;;  %v7125_v43 = vpop.f32.mrb[67].mxu0  ;;  %7150 = vmatprep.subr.bf16.mxu1 %v8061_v28  ;;  %v7695_v34 = vld [vmem:[%s9906_s4 + $0x200] sm:$0xff]  }
 0x392   : > { %v7696_v43 = vld [vmem:[%s9906_s4 + $0x208] sm:$0xff]  }
 0x393   : > { %7143 = vmatmul.mubr.bf16.vlgmr.msra.gmra.mrb[68].mxu0 %v2344_v33  ;;  %v7694_v33 = vld [vmem:[%s9905_s3 + $0x48] sm:$0x1f]  }
 0x394   : > { %7151 = vmatpush3.bf16.msra.mxu1 %v8481_v11  ;;  %7183 = vmatpush3.bf16.msra.mxu0 %v8469_v35 }
 0x395   : > { %7152 = vmatprep.subr.bf16.mxu1 %v8061_v28  ;;  %7184 = vmatprep.subr.bf16.mxu0 %v8061_v28 }
 0x396   : > { %7194 = vmatprep.mubr.msk.bf16.mxu0 %vm8062_vm0, %v8061_v28 }
 0x398   : > { %7153 = vmatpush3.bf16.msra.mxu1 %v8487_v30  ;;  %7185 = vmatpush3.bf16.msra.mxu0 %v8475_v55 }
 0x399   : > { %7154 = vmatprep.subr.bf16.mxu1 %v8061_v28  ;;  %7186 = vmatprep.subr.bf16.mxu0 %v8061_v28 }
 0x39c   : > { %7155 = vmatpush3.bf16.msra.mxu1 %v8493_v60  ;;  %7187 = vmatpush3.bf16.msra.mxu0 %v8481_v11 }
 0x39d   : > { %7156 = vmatprep.subr.bf16.mxu1 %v8061_v28  ;;  %7188 = vmatprep.subr.bf16.mxu0 %v8061_v28 }
 0x3a0   : > { %7157 = vmatpush3.bf16.msra.mxu1 %v8499_v59  ;;  %7189 = vmatpush3.bf16.msra.mxu0 %v8487_v30 }
 0x3a1   : > { %7190 = vmatprep.subr.bf16.mxu0 %v8061_v28  ;;  %7162 = vmatprep.subr.bf16.mxu1 %v8061_v28 }
 0x3a3   : > { %7159 = vmatmul.mubr.msk.bf16.vlgmr.msra.gmra.mrb[72].mxu1 %vm1493_vm2, %v7675_v36  ;;  %v7697_v36 = vld [vmem:[%s9906_s4 + $0x210] sm:$0xff]  }
 0x3a4   : > { %7191 = vmatpush3.bf16.msra.mxu0 %v8493_v60  ;;  %7178 = vmatprep.mubr.msk.bf16.mxu1 %vm8062_vm0, %v8061_v28 }
 0x3a5   : > { %7192 = vmatprep.subr.bf16.mxu0 %v8061_v28  ;;  %7163 = vmatpush3.bf16.msra.mxu1 %v7677_v38  ;;  %v7699_v38 = vld [vmem:[%s9906_s4 + $0x218] sm:$0xff]  }
 0x3a6   : > { %7164 = vmatprep.subr.bf16.mxu1 %v8061_v28 }
 0x3a8   : > { %7193 = vmatpush3.bf16.msra.mxu0 %v8499_v59 }
 0x3a9   : > { %7198 = vmatprep.subr.bf16.mxu0 %v8061_v28  ;;  %7165 = vmatpush3.bf16.msra.mxu1 %v7678_v45  ;;  %v7700_v45 = vld [vmem:[%s9906_s4 + $0x248] sm:$0xff]  }
 0x3aa   : > { %7166 = vmatprep.subr.bf16.mxu1 %v8061_v28 }
 0x3ab   : > { %7195 = vmatmul.mubr.msk.bf16.vlgmr.msra.gmra.mrb[72].mxu0 %vm1493_vm2, %v7676_v37  ;;  %v7698_v37 = vld [vmem:[%s9906_s4 + $0x240] sm:$0xff]  }
 0x3ac   : > { %7214 = vmatprep.mubr.msk.bf16.mxu0 %vm8062_vm0, %v8061_v28  ;;  %7199 = vmatpush3.bf16.msra.mxu0 %v7680_v40  ;;  %v7702_v40 = vld [vmem:[%s9906_s4 + $0x250] sm:$0xff]  }
 0x3ad   : > { %7167 = vmatpush3.bf16.msra.mxu1 %v7679_v39  ;;  %7200 = vmatprep.subr.bf16.mxu0 %v8061_v28  ;;  %v7701_v39 = vld [vmem:[%s9906_s4 + $0x220] sm:$0xff]  }
 0x3ae   : > { %7168 = vmatprep.subr.bf16.mxu1 %v8061_v28 }
 0x3b0   : > { %7201 = vmatpush3.bf16.msra.mxu0 %v7682_v42  ;;  %v7704_v42 = vld [vmem:[%s9906_s4 + $0x258] sm:$0xff]  }
 0x3b1   : > { %7169 = vmatpush3.bf16.msra.mxu1 %v7681_v41  ;;  %7202 = vmatprep.subr.bf16.mxu0 %v8061_v28  ;;  %v7703_v41 = vld [vmem:[%s9906_s4 + $0x228] sm:$0xff]  }
 0x3b2   : > { %7170 = vmatprep.subr.bf16.mxu1 %v8061_v28 }
 0x3b4   : > { %7203 = vmatpush3.bf16.msra.mxu0 %v7684_v46  ;;  %v7706_v46 = vld [vmem:[%s9906_s4 + $0x260] sm:$0xff]  }
 0x3b5   : > { %7171 = vmatpush3.bf16.msra.mxu1 %v7683_v44  ;;  %7204 = vmatprep.subr.bf16.mxu0 %v8061_v28  ;;  %v7705_v44 = vld [vmem:[%s9906_s4 + $0x230] sm:$0xff]  }
 0x3b6   : > { %7172 = vmatprep.subr.bf16.mxu1 %v8061_v28 }
 0x3b8   : > { %7205 = vmatpush3.bf16.msra.mxu0 %v7686_v48  ;;  %v7708_v48 = vld [vmem:[%s9906_s4 + $0x268] sm:$0xff]  }
 0x3b9   : > { %7173 = vmatpush3.bf16.msra.mxu1 %v7685_v47  ;;  %7206 = vmatprep.subr.bf16.mxu0 %v8061_v28  ;;  %v7707_v47 = vld [vmem:[%s9906_s4 + $0x238] sm:$0xff]  }
 0x3ba   : > { %7174 = vmatprep.subr.bf16.mxu1 %v8061_v28 }
 0x3bc   : > { %7207 = vmatpush3.bf16.msra.mxu0 %v7688_v49  ;;  %v7710_v49 = vld [vmem:[%s9906_s4 + $0x278] sm:$0xff]  }
 0x3bd   : > { %7175 = vmatpush3.bf16.msra.mxu1 %v7687_v50  ;;  %7208 = vmatprep.subr.bf16.mxu0 %v8061_v28  ;;  %v7709_v50 = vld [vmem:[%s9906_s4 + $0x270] sm:$0xff]  }
 0x3be   : > { %7176 = vmatprep.subr.bf16.mxu1 %v8061_v28 }
 0x3c0   : > { %7209 = vmatpush3.bf16.msra.mxu0 %v7690_v53 }
 0x3c1   : > { %7177 = vmatpush3.bf16.msra.mxu1 %v7689_v51  ;;  %7210 = vmatprep.subr.bf16.mxu0 %v8061_v28 }
 0x3c2   : > { %7218 = vmatprep.subr.bf16.mxu1 %v8061_v28 }
 0x3c4   : > { %7211 = vmatpush3.bf16.msra.mxu0 %v7691_v54 }
 0x3c5   : > { %7212 = vmatprep.subr.bf16.mxu0 %v8061_v28 }
 0x3c8   : > { %7213 = vmatpush3.bf16.msra.mxu0 %v7692_v57 }
 0x3c9   : > { %7254 = vmatprep.subr.bf16.mxu0 %v8061_v28 }
 0x41e   : > { %v1961_v58 = vpop.f32.mrb[60].mxu1 }
 0x41f   : > { %v1968_v61 = vadd.f32 %v1961_v58, %v8719_v52  ;;  %v7036_v2 = vpop.f32.mrb[61].mxu1 }
 0x420   : > { %v1964_v63 = vpop.f32.mrb[62].mxu1 }
 0x421   : > { %v1969_v0 = vadd.f32 %v1964_v63, %v8721_v62  ;;  %v7037_v1 = vpop.f32.mrb[63].mxu1 }
 0x43e   : > { %v2122_v3 = vpop.f32.mrb[64].mxu1 }
 0x43f   : > { %v2129_v4 = vadd.f32 %v2122_v3, %v1968_v61  ;;  %v7072_v5 = vpop.f32.mrb[65].mxu1 }
 0x440   : > { %v2125_v6 = vpop.f32.mrb[66].mxu1 }
 0x441   : > { %v2130_v7 = vadd.f32 %v2125_v6, %v1969_v0  ;;  %v7073_v8 = vpop.f32.mrb[67].mxu1 }
 0x45e   : > { %v2283_v13 = vpop.f32.mrb[68].mxu1 }
 0x45f   : > { %v2290_v9 = vadd.f32 %v2283_v13, %v2129_v4  ;;  %v7108_v10 = vpop.f32.mrb[69].mxu1 }
 0x460   : > { %v2286_v16 = vpop.f32.mrb[70].mxu1 }
 0x461   : > { %v2291_v12 = vadd.f32 %v2286_v16, %v2130_v7  ;;  %v7109_v14 = vpop.f32.mrb[71].mxu1 }
 0x466   : > { %v2444_v15 = vpop.f32.mrb[68].mxu0 }
 0x467   : > { %v8897_v17 = vadd.f32 %v2444_v15, %v2290_v9  ;;  %v7144_v52 = vpop.f32.mrb[69].mxu0  ;;  %v7711_v15 = vld [vmem:[%s9905_s3 + $0x50] sm:$0x1f]  }
 0x468   : > { %v2447_v18 = vpop.f32.mrb[70].mxu0  ;;  %v7712_v52 = vld [vmem:[%s9905_s3 + $0x58] sm:$0x1f]  }
 0x469   : > { %v8899_v31 = vadd.f32 %v2447_v18, %v2291_v12  ;;  %v7145_v62 = vpop.f32.mrb[71].mxu0  ;;  %v7714_v18 = vld [vmem:[%s9906_s4 + $0x288] sm:$0xff]  }
 0x46a   : > { %v7716_v62 = vld [vmem:[%s9906_s4 + $0x2c0] sm:$0xff]  }
 0x476   : > { %v2498_v19 = vpop.f32.mrb[72].mxu1 }
 0x477   : > { %v7160_v20 = vpop.f32.mrb[73].mxu1 }
 0x478   : > { %v2501_v21 = vpop.f32.mrb[74].mxu1  ;;  %v7718_v20 = vld [vmem:[%s9906_s4 + $0x2c8] sm:$0xff]  }
 0x479   : > { %v2505_v22 = vpack.c.bf16 %v2501_v21, %v2498_v19  ;;  %v7161_v23 = vpop.f32.mrb[75].mxu1  ;;  %v7717_v19 = vld [vmem:[%s9906_s4 + $0x298] sm:$0xff]   ;;  %v7719_v21 = vld [vmem:[%s9906_s4 + $0x2a0] sm:$0xff]  }
 0x47a   : > { %v7721_v23 = vld [vmem:[%s9906_s4 + $0x2a8] sm:$0xff]  }
 0x47b   : > { %7179 = vmatmul.mubr.bf16.vlgmr.msra.gmra.mrb[76].mxu1 %v2505_v22  ;;  %v7720_v22 = vld [vmem:[%s9906_s4 + $0x2d0] sm:$0xff]  }
 0x47c   : > { %7219 = vmatpush3.bf16.msra.mxu1 %v8469_v35  ;;  %7230 = vmatprep.mubr.msk.bf16.mxu1 %vm8062_vm0, %v8061_v28 }
 0x47d   : > { %7220 = vmatprep.subr.bf16.mxu1 %v8061_v28 }
 0x47e   : > { %v2659_v24 = vpop.f32.mrb[72].mxu0 }
 0x47f   : > { %v7196_v25 = vpop.f32.mrb[73].mxu0 }
 0x480   : > { %7221 = vmatpush3.bf16.msra.mxu1 %v8475_v55  ;;  %v2662_v26 = vpop.f32.mrb[74].mxu0  ;;  %v7723_v25 = vld [vmem:[%s9906_s4 + $0x2b0] sm:$0xff]  }
 0x481   : > { %v2666_v32 = vpack.c.bf16 %v2662_v26, %v2659_v24  ;;  %v7197_v27 = vpop.f32.mrb[75].mxu0  ;;  %7222 = vmatprep.subr.bf16.mxu1 %v8061_v28  ;;  %v7722_v24 = vld [vmem:[%s9906_s4 + $0x2d8] sm:$0xff]   ;;  %v7724_v26 = vld [vmem:[%s9906_s4 + $0x2e0] sm:$0xff]  }
 0x482   : > { %v7726_v27 = vld [vmem:[%s9906_s4 + $0x2e8] sm:$0xff]  }
 0x483   : > { %7215 = vmatmul.mubr.bf16.vlgmr.msra.gmra.mrb[76].mxu0 %v2666_v32  ;;  %v7725_v32 = vld [vmem:[%s9906_s4 + $0x2b8] sm:$0xff]  }
 0x484   : > { %7223 = vmatpush3.bf16.msra.mxu1 %v8481_v11  ;;  %7255 = vmatpush3.bf16.msra.mxu0 %v8469_v35 }
 0x485   : > { %7224 = vmatprep.subr.bf16.mxu1 %v8061_v28  ;;  %7256 = vmatprep.subr.bf16.mxu0 %v8061_v28 }
 0x486   : > { %7266 = vmatprep.mubr.msk.bf16.mxu0 %vm8062_vm0, %v8061_v28 }
 0x488   : > { %7225 = vmatpush3.bf16.msra.mxu1 %v8487_v30  ;;  %7257 = vmatpush3.bf16.msra.mxu0 %v8475_v55 }
 0x489   : > { %7226 = vmatprep.subr.bf16.mxu1 %v8061_v28  ;;  %7258 = vmatprep.subr.bf16.mxu0 %v8061_v28 }
 0x48c   : > { %7227 = vmatpush3.bf16.msra.mxu1 %v8493_v60  ;;  %7259 = vmatpush3.bf16.msra.mxu0 %v8481_v11 }
 0x48d   : > { %7228 = vmatprep.subr.bf16.mxu1 %v8061_v28  ;;  %7260 = vmatprep.subr.bf16.mxu0 %v8061_v28 }
 0x490   : > { %7229 = vmatpush3.bf16.msra.mxu1 %v8499_v59  ;;  %7261 = vmatpush3.bf16.msra.mxu0 %v8487_v30 }
 0x491   : > { %7262 = vmatprep.subr.bf16.mxu0 %v8061_v28  ;;  %7234 = vmatprep.subr.bf16.mxu1 %v8061_v28 }
 0x493   : > { %7231 = vmatmul.mubr.msk.bf16.vlgmr.msra.gmra.mrb[80].mxu1 %vm1493_vm2, %v7693_v29  ;;  %v7727_v29 = vld [vmem:[%s9906_s4 + $0x2f0] sm:$0xff]  }
 0x494   : > { %7263 = vmatpush3.bf16.msra.mxu0 %v8493_v60  ;;  %7235 = vmatpush3.bf16.msra.mxu1 %v7695_v34  ;;  %v7728_v34 = vld [vmem:[%s9906_s4 + $0x2f8] sm:$0xff]  }
 0x495   : > { %7264 = vmatprep.subr.bf16.mxu0 %v8061_v28  ;;  %7236 = vmatprep.subr.bf16.mxu1 %v8061_v28 }
 0x496   : > { %7250 = vmatprep.mubr.msk.bf16.mxu1 %vm8062_vm0, %v8061_v28 }
 0x498   : > { %7265 = vmatpush3.bf16.msra.mxu0 %v8499_v59  ;;  %7237 = vmatpush3.bf16.msra.mxu1 %v7696_v43 }
 0x499   : > { %7270 = vmatprep.subr.bf16.mxu0 %v8061_v28  ;;  %7238 = vmatprep.subr.bf16.mxu1 %v8061_v28 }
 0x49b   : > { %7267 = vmatmul.mubr.msk.bf16.vlgmr.msra.gmra.mrb[80].mxu0 %vm1493_vm2, %v7694_v33 }
 0x49c   : > { %7286 = vmatprep.mubr.msk.bf16.mxu0 %vm8062_vm0, %v8061_v28  ;;  %7239 = vmatpush3.bf16.msra.mxu1 %v7697_v36 }
 0x49d   : > { %7271 = vmatpush3.bf16.msra.mxu0 %v7698_v37  ;;  %7240 = vmatprep.subr.bf16.mxu1 %v8061_v28 }
 0x49e   : > { %7272 = vmatprep.subr.bf16.mxu0 %v8061_v28 }
 0x4a0   : > { %7241 = vmatpush3.bf16.msra.mxu1 %v7699_v38 }
 0x4a1   : > { %7273 = vmatpush3.bf16.msra.mxu0 %v7700_v45  ;;  %7242 = vmatprep.subr.bf16.mxu1 %v8061_v28 }
 0x4a2   : > { %7274 = vmatprep.subr.bf16.mxu0 %v8061_v28 }
 0x4a4   : > { %7243 = vmatpush3.bf16.msra.mxu1 %v7701_v39 }
 0x4a5   : > { %7275 = vmatpush3.bf16.msra.mxu0 %v7702_v40  ;;  %7244 = vmatprep.subr.bf16.mxu1 %v8061_v28 }
 0x4a6   : > { %7276 = vmatprep.subr.bf16.mxu0 %v8061_v28 }
 0x4a8   : > { %7245 = vmatpush3.bf16.msra.mxu1 %v7703_v41 }
 0x4a9   : > { %7277 = vmatpush3.bf16.msra.mxu0 %v7704_v42  ;;  %7246 = vmatprep.subr.bf16.mxu1 %v8061_v28 }
 0x4aa   : > { %7278 = vmatprep.subr.bf16.mxu0 %v8061_v28 }
 0x4ac   : > { %7247 = vmatpush3.bf16.msra.mxu1 %v7705_v44 }
 0x4ad   : > { %7279 = vmatpush3.bf16.msra.mxu0 %v7706_v46  ;;  %7248 = vmatprep.subr.bf16.mxu1 %v8061_v28 }
 0x4ae   : > { %7280 = vmatprep.subr.bf16.mxu0 %v8061_v28 }
 0x4b0   : > { %7249 = vmatpush3.bf16.msra.mxu1 %v7707_v47 }
 0x4b1   : > { %7281 = vmatpush3.bf16.msra.mxu0 %v7708_v48  ;;  %7290 = vmatprep.subr.bf16.mxu1 %v8061_v28 }
 0x4b2   : > { %7282 = vmatprep.subr.bf16.mxu0 %v8061_v28 }
 0x4b5   : > { %7283 = vmatpush3.bf16.msra.mxu0 %v7709_v50 }
 0x4b6   : > { %7284 = vmatprep.subr.bf16.mxu0 %v8061_v28 }
 0x4b9   : > { %7285 = vmatpush3.bf16.msra.mxu0 %v7710_v49 }
 0x4ba   : > { %7326 = vmatprep.subr.bf16.mxu0 %v8061_v28 }
 0x54e   : > { %v2605_v51 = vpop.f32.mrb[76].mxu1 }
 0x54f   : > { %v2612_v53 = vadd.f32 %v2605_v51, %v8897_v17  ;;  %v7180_v54 = vpop.f32.mrb[77].mxu1  ;;  %v7713_v17 = vld [vmem:[%s9906_s4 + $0x280] sm:$0xff]  }
 0x550   : > { %v2608_v57 = vpop.f32.mrb[78].mxu1 }
 0x551   : > { %v2613_v58 = vadd.f32 %v2608_v57, %v8899_v31  ;;  %v7181_v61 = vpop.f32.mrb[79].mxu1  ;;  %v7715_v31 = vld [vmem:[%s9906_s4 + $0x290] sm:$0xff]  }
 0x556   : > { %v2766_v2 = vpop.f32.mrb[76].mxu0 }
 0x557   : > { %v9007_v63 = vadd.f32 %v2766_v2, %v2612_v53  ;;  %v7216_v0 = vpop.f32.mrb[77].mxu0  ;;  %v7729_v2 = vld [vmem:[%s9905_s3 + $0x60] sm:$0x1f]  }
 0x558   : > { %v2769_v1 = vpop.f32.mrb[78].mxu0  ;;  %v7730_v0 = vld [vmem:[%s9905_s3 + $0x68] sm:$0x1f]  }
 0x559   : > { %v9009_v3 = vadd.f32 %v2769_v1, %v2613_v58  ;;  %v7217_v4 = vpop.f32.mrb[79].mxu0  ;;  %v7732_v1 = vld [vmem:[%s9906_s4 + $0x308] sm:$0xff]  }
 0x55a   : > { %v7734_v4 = vld [vmem:[%s9906_s4 + $0x340] sm:$0xff]  }
 0x566   : > { %v2820_v5 = vpop.f32.mrb[80].mxu1 }
 0x567   : > { %v7232_v6 = vpop.f32.mrb[81].mxu1 }
 0x568   : > { %v2823_v7 = vpop.f32.mrb[82].mxu1  ;;  %v7736_v6 = vld [vmem:[%s9906_s4 + $0x348] sm:$0xff]  }
 0x569   : > { %v2827_v8 = vpack.c.bf16 %v2823_v7, %v2820_v5  ;;  %v7233_v13 = vpop.f32.mrb[83].mxu1  ;;  %v7735_v5 = vld [vmem:[%s9906_s4 + $0x318] sm:$0xff]   ;;  %v7737_v7 = vld [vmem:[%s9906_s4 + $0x320] sm:$0xff]  }
 0x56a   : > { %v7739_v13 = vld [vmem:[%s9906_s4 + $0x328] sm:$0xff]  }
 0x56b   : > { %7251 = vmatmul.mubr.bf16.vlgmr.msra.gmra.mrb[84].mxu1 %v2827_v8  ;;  %v7738_v8 = vld [vmem:[%s9906_s4 + $0x350] sm:$0xff]  }
 0x56c   : > { %7291 = vmatpush3.bf16.msra.mxu1 %v8469_v35  ;;  %7302 = vmatprep.mubr.msk.bf16.mxu1 %vm8062_vm0, %v8061_v28 }
 0x56d   : > { %7292 = vmatprep.subr.bf16.mxu1 %v8061_v28 }
 0x56e   : > { %v2981_v9 = vpop.f32.mrb[80].mxu0 }
 0x56f   : > { %v7268_v10 = vpop.f32.mrb[81].mxu0 }
 0x570   : > { %7293 = vmatpush3.bf16.msra.mxu1 %v8475_v55  ;;  %v2984_v16 = vpop.f32.mrb[82].mxu0  ;;  %v7741_v10 = vld [vmem:[%s9906_s4 + $0x330] sm:$0xff]  }
 0x571   : > { %v2988_v12 = vpack.c.bf16 %v2984_v16, %v2981_v9  ;;  %v7269_v14 = vpop.f32.mrb[83].mxu0  ;;  %7294 = vmatprep.subr.bf16.mxu1 %v8061_v28  ;;  %v7740_v9 = vld [vmem:[%s9906_s4 + $0x358] sm:$0xff]   ;;  %v7742_v16 = vld [vmem:[%s9906_s4 + $0x360] sm:$0xff]  }
 0x572   : > { %v7744_v14 = vld [vmem:[%s9906_s4 + $0x368] sm:$0xff]  }
 0x573   : > { %7287 = vmatmul.mubr.bf16.vlgmr.msra.gmra.mrb[84].mxu0 %v2988_v12  ;;  %v7743_v12 = vld [vmem:[%s9906_s4 + $0x338] sm:$0xff]  }
 0x574   : > { %7295 = vmatpush3.bf16.msra.mxu1 %v8481_v11  ;;  %7327 = vmatpush3.bf16.msra.mxu0 %v8469_v35 }
 0x575   : > { %7296 = vmatprep.subr.bf16.mxu1 %v8061_v28  ;;  %7328 = vmatprep.subr.bf16.mxu0 %v8061_v28 }
 0x576   : > { %7338 = vmatprep.mubr.msk.bf16.mxu0 %vm8062_vm0, %v8061_v28 }
 0x578   : > { %7297 = vmatpush3.bf16.msra.mxu1 %v8487_v30  ;;  %7329 = vmatpush3.bf16.msra.mxu0 %v8475_v55 }
 0x579   : > { %7298 = vmatprep.subr.bf16.mxu1 %v8061_v28  ;;  %7330 = vmatprep.subr.bf16.mxu0 %v8061_v28 }
 0x57c   : > { %7299 = vmatpush3.bf16.msra.mxu1 %v8493_v60  ;;  %7331 = vmatpush3.bf16.msra.mxu0 %v8481_v11 }
 0x57d   : > { %7300 = vmatprep.subr.bf16.mxu1 %v8061_v28  ;;  %7332 = vmatprep.subr.bf16.mxu0 %v8061_v28 }
 0x580   : > { %7301 = vmatpush3.bf16.msra.mxu1 %v8499_v59  ;;  %7333 = vmatpush3.bf16.msra.mxu0 %v8487_v30 }
 0x581   : > { %7334 = vmatprep.subr.bf16.mxu0 %v8061_v28  ;;  %7306 = vmatprep.subr.bf16.mxu1 %v8061_v28 }
 0x583   : > { %7303 = vmatmul.mubr.msk.bf16.vlgmr.msra.gmra.mrb[88].mxu1 %vm1493_vm2, %v7711_v15  ;;  %v7745_v15 = vld [vmem:[%s9906_s4 + $0x370] sm:$0xff]  }
 0x584   : > { %7335 = vmatpush3.bf16.msra.mxu0 %v8493_v60  ;;  %7307 = vmatpush3.bf16.msra.mxu1 %v7713_v17  ;;  %v7746_v17 = vld [vmem:[%s9906_s4 + $0x378] sm:$0xff]  }
 0x585   : > { %7336 = vmatprep.subr.bf16.mxu0 %v8061_v28  ;;  %7308 = vmatprep.subr.bf16.mxu1 %v8061_v28 }
 0x586   : > { %7322 = vmatprep.mubr.msk.bf16.mxu1 %vm8062_vm0, %v8061_v28 }
 0x588   : > { %7337 = vmatpush3.bf16.msra.mxu0 %v8499_v59  ;;  %7309 = vmatpush3.bf16.msra.mxu1 %v7714_v18 }
 0x589   : > { %7342 = vmatprep.subr.bf16.mxu0 %v8061_v28  ;;  %7310 = vmatprep.subr.bf16.mxu1 %v8061_v28 }
 0x58b   : > { %7339 = vmatmul.mubr.msk.bf16.vlgmr.msra.gmra.mrb[88].mxu0 %vm1493_vm2, %v7712_v52 }
 0x58c   : > { %7358 = vmatprep.mubr.msk.bf16.mxu0 %vm8062_vm0, %v8061_v28  ;;  %7311 = vmatpush3.bf16.msra.mxu1 %v7715_v31 }
 0x58d   : > { %7343 = vmatpush3.bf16.msra.mxu0 %v7716_v62  ;;  %7312 = vmatprep.subr.bf16.mxu1 %v8061_v28 }
 0x58e   : > { %7344 = vmatprep.subr.bf16.mxu0 %v8061_v28 }
 0x590   : > { %7313 = vmatpush3.bf16.msra.mxu1 %v7717_v19 }
 0x591   : > { %7345 = vmatpush3.bf16.msra.mxu0 %v7718_v20  ;;  %7314 = vmatprep.subr.bf16.mxu1 %v8061_v28 }
 0x592   : > { %7346 = vmatprep.subr.bf16.mxu0 %v8061_v28 }
 0x594   : > { %7315 = vmatpush3.bf16.msra.mxu1 %v7719_v21 }
 0x595   : > { %7347 = vmatpush3.bf16.msra.mxu0 %v7720_v22  ;;  %7316 = vmatprep.subr.bf16.mxu1 %v8061_v28 }
 0x596   : > { %7348 = vmatprep.subr.bf16.mxu0 %v8061_v28 }
 0x598   : > { %7317 = vmatpush3.bf16.msra.mxu1 %v7721_v23 }
 0x599   : > { %7349 = vmatpush3.bf16.msra.mxu0 %v7722_v24  ;;  %7318 = vmatprep.subr.bf16.mxu1 %v8061_v28 }
 0x59a   : > { %7350 = vmatprep.subr.bf16.mxu0 %v8061_v28 }
 0x59c   : > { %7319 = vmatpush3.bf16.msra.mxu1 %v7723_v25 }
 0x59d   : > { %7351 = vmatpush3.bf16.msra.mxu0 %v7724_v26  ;;  %7320 = vmatprep.subr.bf16.mxu1 %v8061_v28 }
 0x59e   : > { %7352 = vmatprep.subr.bf16.mxu0 %v8061_v28 }
 0x5a0   : > { %7321 = vmatpush3.bf16.msra.mxu1 %v7725_v32 }
 0x5a1   : > { %7353 = vmatpush3.bf16.msra.mxu0 %v7726_v27  ;;  %7362 = vmatprep.subr.bf16.mxu1 %v8061_v28 }
 0x5a2   : > { %7354 = vmatprep.subr.bf16.mxu0 %v8061_v28 }
 0x5a5   : > { %7355 = vmatpush3.bf16.msra.mxu0 %v7727_v29 }
 0x5a6   : > { %7356 = vmatprep.subr.bf16.mxu0 %v8061_v28 }
 0x5a9   : > { %7357 = vmatpush3.bf16.msra.mxu0 %v7728_v34 }
 0x5aa   : > { %7398 = vmatprep.subr.bf16.mxu0 %v8061_v28 }
 0x63e   : > { %v2927_v33 = vpop.f32.mrb[84].mxu1 }
 0x63f   : > { %v2934_v43 = vadd.f32 %v2927_v33, %v9007_v63  ;;  %v7252_v36 = vpop.f32.mrb[85].mxu1  ;;  %v7731_v63 = vld [vmem:[%s9906_s4 + $0x300] sm:$0xff]  }
 0x640   : > { %v2930_v37 = vpop.f32.mrb[86].mxu1 }
 0x641   : > { %v2935_v38 = vadd.f32 %v2930_v37, %v9009_v3  ;;  %v7253_v45 = vpop.f32.mrb[87].mxu1  ;;  %v7733_v3 = vld [vmem:[%s9906_s4 + $0x310] sm:$0xff]  }
 0x646   : > { %v3088_v39 = vpop.f32.mrb[84].mxu0 }
 0x647   : > { %v9117_v40 = vadd.f32 %v3088_v39, %v2934_v43  ;;  %v7288_v41 = vpop.f32.mrb[85].mxu0  ;;  %v7753_v39 = vld [vmem:[%s9906_s4 + $0x398] sm:$0xff]  }
 0x648   : > { %v3091_v42 = vpop.f32.mrb[86].mxu0  ;;  %v7755_v41 = vld [vmem:[%s9906_s4 + $0x3a0] sm:$0xff]  }
 0x649   : > { %v9119_v44 = vadd.f32 %v3091_v42, %v2935_v38  ;;  %v7289_v46 = vpop.f32.mrb[87].mxu0  ;;  %v7756_v42 = vld [vmem:[%s9906_s4 + $0x3d0] sm:$0xff]  }
 0x64a   : > { %v7758_v46 = vld [vmem:[%s9906_s4 + $0x3d8] sm:$0xff]  }
 0x656   : > { %v3142_v47 = vpop.f32.mrb[88].mxu1 }
 0x657   : > { %v7304_v48 = vpop.f32.mrb[89].mxu1 }
 0x658   : > { %v3145_v50 = vpop.f32.mrb[90].mxu1  ;;  %v7760_v48 = vld [vmem:[%s9906_s4 + $0x3e0] sm:$0xff]  }
 0x659   : > { %v3149_v49 = vpack.c.bf16 %v3145_v50, %v3142_v47  ;;  %v7305_v51 = vpop.f32.mrb[91].mxu1  ;;  %v7759_v47 = vld [vmem:[%s9906_s4 + $0x3b0] sm:$0xff]   ;;  %v7761_v50 = vld [vmem:[%s9906_s4 + $0x3b8] sm:$0xff]  }
 0x65a   : > { %v7763_v51 = vld [vmem:[%s9906_s4 + $0x3f0] sm:$0xff]  }
 0x65b   : > { %7323 = vmatmul.mubr.bf16.vlgmr.msra.gmra.mrb[92].mxu1 %v3149_v49  ;;  %v7762_v49 = vld [vmem:[%s9906_s4 + $0x3e8] sm:$0xff]  }
 0x65c   : > { %7363 = vmatpush3.bf16.msra.mxu1 %v8469_v35  ;;  %7374 = vmatprep.mubr.msk.bf16.mxu1 %vm8062_vm0, %v8061_v28 }
 0x65d   : > { %7364 = vmatprep.subr.bf16.mxu1 %v8061_v28 }
 0x65e   : > { %v3303_v53 = vpop.f32.mrb[88].mxu0 }
 0x65f   : > { %v7340_v54 = vpop.f32.mrb[89].mxu0 }
 0x660   : > { %7365 = vmatpush3.bf16.msra.mxu1 %v8475_v55  ;;  %v3306_v57 = vpop.f32.mrb[90].mxu0  ;;  %v7767_v54 = vld [vmem:[%s9908_s6 + $0x4] ss:$8 sps:$4 sm:$0xff]  }
 0x661   : > { %v3310_v58 = vpack.c.bf16 %v3306_v57, %v3303_v53  ;;  %v7341_v61 = vpop.f32.mrb[91].mxu0  ;;  %7366 = vmatprep.subr.bf16.mxu1 %v8061_v28  ;;  %v7764_v53 = vld [vmem:[%s9906_s4 + $0x3f8] sm:$0xff]   ;;  %v7770_v57 = vld [vmem:[%s9908_s6 + $0x84] ss:$8 sps:$4 sm:$0xff]  }
 0x663   : > { %7359 = vmatmul.mubr.bf16.vlgmr.msra.gmra.mrb[92].mxu0 %v3310_v58 }
 0x664   : > { %7367 = vmatpush3.bf16.msra.mxu1 %v8481_v11  ;;  %7399 = vmatpush3.bf16.msra.mxu0 %v8469_v35 }
 0x665   : > { %7368 = vmatprep.subr.bf16.mxu1 %v8061_v28  ;;  %7400 = vmatprep.subr.bf16.mxu0 %v8061_v28 }
 0x666   : > { %7410 = vmatprep.mubr.msk.bf16.mxu0 %vm8062_vm0, %v8061_v28 }
 0x668   : > { %7369 = vmatpush3.bf16.msra.mxu1 %v8487_v30  ;;  %7401 = vmatpush3.bf16.msra.mxu0 %v8475_v55 }
 0x669   : > { %7370 = vmatprep.subr.bf16.mxu1 %v8061_v28  ;;  %7402 = vmatprep.subr.bf16.mxu0 %v8061_v28 }
 0x66c   : > { %7371 = vmatpush3.bf16.msra.mxu1 %v8493_v60  ;;  %7403 = vmatpush3.bf16.msra.mxu0 %v8481_v11 }
 0x66d   : > { %7372 = vmatprep.subr.bf16.mxu1 %v8061_v28  ;;  %7404 = vmatprep.subr.bf16.mxu0 %v8061_v28 }
 0x670   : > { %7373 = vmatpush3.bf16.msra.mxu1 %v8499_v59  ;;  %7405 = vmatpush3.bf16.msra.mxu0 %v8487_v30 }
 0x671   : > { %7406 = vmatprep.subr.bf16.mxu0 %v8061_v28  ;;  %7378 = vmatprep.subr.bf16.mxu1 %v8061_v28 }
 0x673   : > { %7375 = vmatmul.mubr.msk.bf16.vlgmr.msra.gmra.mrb[96].mxu1 %vm1493_vm2, %v7729_v2 }
 0x674   : > { %7407 = vmatpush3.bf16.msra.mxu0 %v8493_v60  ;;  %7379 = vmatpush3.bf16.msra.mxu1 %v7731_v63 }
 0x675   : > { %7408 = vmatprep.subr.bf16.mxu0 %v8061_v28  ;;  %7380 = vmatprep.subr.bf16.mxu1 %v8061_v28 }
 0x676   : > { %7394 = vmatprep.mubr.msk.bf16.mxu1 %vm8062_vm0, %v8061_v28 }
 0x678   : > { %7409 = vmatpush3.bf16.msra.mxu0 %v8499_v59  ;;  %7381 = vmatpush3.bf16.msra.mxu1 %v7732_v1 }
 0x679   : > { %7414 = vmatprep.subr.bf16.mxu0 %v8061_v28  ;;  %7382 = vmatprep.subr.bf16.mxu1 %v8061_v28 }
 0x67b   : > { %7411 = vmatmul.mubr.msk.bf16.vlgmr.msra.gmra.mrb[96].mxu0 %vm1493_vm2, %v7730_v0 }
 0x67c   : > { %7430 = vmatprep.mubr.msk.bf16.mxu0 %vm8062_vm0, %v8061_v28  ;;  %7383 = vmatpush3.bf16.msra.mxu1 %v7733_v3 }
 0x67d   : > { %7415 = vmatpush3.bf16.msra.mxu0 %v7734_v4  ;;  %7384 = vmatprep.subr.bf16.mxu1 %v8061_v28 }
 0x67e   : > { %7416 = vmatprep.subr.bf16.mxu0 %v8061_v28 }
 0x680   : > { %7385 = vmatpush3.bf16.msra.mxu1 %v7735_v5 }
 0x681   : > { %7417 = vmatpush3.bf16.msra.mxu0 %v7736_v6  ;;  %7386 = vmatprep.subr.bf16.mxu1 %v8061_v28 }
 0x682   : > { %7418 = vmatprep.subr.bf16.mxu0 %v8061_v28 }
 0x684   : > { %7387 = vmatpush3.bf16.msra.mxu1 %v7737_v7 }
 0x685   : > { %7419 = vmatpush3.bf16.msra.mxu0 %v7738_v8  ;;  %7388 = vmatprep.subr.bf16.mxu1 %v8061_v28 }
 0x686   : > { %7420 = vmatprep.subr.bf16.mxu0 %v8061_v28 }
 0x688   : > { %7389 = vmatpush3.bf16.msra.mxu1 %v7739_v13 }
 0x689   : > { %7421 = vmatpush3.bf16.msra.mxu0 %v7740_v9  ;;  %7390 = vmatprep.subr.bf16.mxu1 %v8061_v28 }
 0x68a   : > { %7422 = vmatprep.subr.bf16.mxu0 %v8061_v28 }
 0x68c   : > { %7391 = vmatpush3.bf16.msra.mxu1 %v7741_v10  ;;  %v7768_v10 = vld [vmem:[%s9908_s6 + $0x80] ss:$8 sps:$4 sm:$0xff]  }
 0x68d   : > { %7423 = vmatpush3.bf16.msra.mxu0 %v7742_v16  ;;  %7392 = vmatprep.subr.bf16.mxu1 %v8061_v28 }
 0x68e   : > { %7424 = vmatprep.subr.bf16.mxu0 %v8061_v28 }
 0x690   : > { %7393 = vmatpush3.bf16.msra.mxu1 %v7743_v12 }
 0x691   : > { %7425 = vmatpush3.bf16.msra.mxu0 %v7744_v14  ;;  %7434 = vmatprep.subr.bf16.mxu1 %v8061_v28  ;;  %v7776_v14 = vld [vmem:[%s9908_s6 + $0x94] ss:$8 sps:$4 sm:$0xff]  }
 0x692   : > { %7426 = vmatprep.subr.bf16.mxu0 %v8061_v28 }
 0x695   : > { %7427 = vmatpush3.bf16.msra.mxu0 %v7745_v15  ;;  %v7774_v15 = vld [vmem:[%s9908_s6 + $0x90] ss:$8 sps:$4 sm:$0xff]  }
 0x696   : > { %7428 = vmatprep.subr.bf16.mxu0 %v8061_v28 }
 0x699   : > { %7429 = vmatpush3.bf16.msra.mxu0 %v7746_v17  ;;  %v7782_v17 = vld [vmem:[%s9908_s6 + $0xa4] ss:$8 sps:$4 sm:$0xff]  }
 0x69a   : > { %7470 = vmatprep.subr.bf16.mxu0 %v8061_v28 }
 0x72e   : > { %v3249_v52 = vpop.f32.mrb[92].mxu1 }
 0x72f   : > { %v3256_v18 = vadd.f32 %v3249_v52, %v9117_v40  ;;  %v7324_v31 = vpop.f32.mrb[93].mxu1  ;;  %v7754_v40 = vld [vmem:[%s9906_s4 + $0x3c8] sm:$0xff]  }
 0x730   : > { %v3252_v62 = vpop.f32.mrb[94].mxu1 }
 0x731   : > { %v3257_v19 = vadd.f32 %v3252_v62, %v9119_v44  ;;  %v7325_v20 = vpop.f32.mrb[95].mxu1  ;;  %v7757_v44 = vld [vmem:[%s9906_s4 + $0x3a8] sm:$0xff]  }
 0x732   : > { %v7765_v62 = vld [vmem:[%s9908_s6] ss:$8 sps:$4 sm:$0xff]  }
 0x736   : > { %v3410_v21 = vpop.f32.mrb[92].mxu0 }
 0x737   : > { %v9227_v22 = vadd.f32 %v3410_v21, %v3256_v18  ;;  %v7360_v23 = vpop.f32.mrb[93].mxu0 }
 0x738   : > { %v3413_v24 = vpop.f32.mrb[94].mxu0  ;;  %v7788_v23 = vld [vmem:[%s9908_s6 + $0xb4] ss:$8 sps:$4 sm:$0xff]  }
 0x739   : > { %v9229_v25 = vadd.f32 %v3413_v24, %v3257_v19  ;;  %v7361_v26 = vpop.f32.mrb[95].mxu0  ;;  %v7780_v19 = vld [vmem:[%s9908_s6 + $0xa0] ss:$8 sps:$4 sm:$0xff]   ;;  %v7771_v24 = vld [vmem:[%s9908_s6 + $0x10] ss:$8 sps:$4 sm:$0xff]  }
 0x73a   : > { %v7779_v26 = vld [vmem:[%s9908_s6 + $0x24] ss:$8 sps:$4 sm:$0xff]  }
 0x746   : > { %v3464_v32 = vpop.f32.mrb[96].mxu1 }
 0x747   : > { %v7376_v27 = vpop.f32.mrb[97].mxu1 }
 0x748   : > { %v3467_v29 = vpop.f32.mrb[98].mxu1  ;;  %v7785_v27 = vld [vmem:[%s9908_s6 + $0x34] ss:$8 sps:$4 sm:$0xff]  }
 0x749   : > { %v3471_v34 = vpack.c.bf16 %v3467_v29, %v3464_v32  ;;  %v7377_v33 = vpop.f32.mrb[99].mxu1  ;;  %v7777_v32 = vld [vmem:[%s9908_s6 + $0x20] ss:$8 sps:$4 sm:$0xff]   ;;  %v7783_v29 = vld [vmem:[%s9908_s6 + $0x30] ss:$8 sps:$4 sm:$0xff]  }
 0x74a   : > { %v7789_v33 = vld [vmem:[%s9908_s6 + $0x40] ss:$8 sps:$4 sm:$0xff]  }
 0x74b   : > { %7395 = vmatmul.mubr.bf16.vlgmr.msra.gmra.mrb[100].mxu1 %v3471_v34  ;;  %v7791_v34 = vld [vmem:[%s9908_s6 + $0x44] ss:$8 sps:$4 sm:$0xff]  }
 0x74c   : > { %7435 = vmatpush3.bf16.msra.mxu1 %v8469_v35  ;;  %7446 = vmatprep.mubr.msk.bf16.mxu1 %vm8062_vm0, %v8061_v28 }
 0x74d   : > { %7436 = vmatprep.subr.bf16.mxu1 %v8061_v28 }
 0x74e   : > { %v3625_v43 = vpop.f32.mrb[96].mxu0 }
 0x74f   : > { %v7412_v36 = vpop.f32.mrb[97].mxu0 }
 0x750   : > { %7437 = vmatpush3.bf16.msra.mxu1 %v8475_v55  ;;  %v3628_v37 = vpop.f32.mrb[98].mxu0  ;;  %v7792_v36 = vld [vmem:[%s9908_s6 + $0xc0] ss:$8 sps:$4 sm:$0xff]  }
 0x751   : > { %v3632_v38 = vpack.c.bf16 %v3628_v37, %v3625_v43  ;;  %v7413_v45 = vpop.f32.mrb[99].mxu0  ;;  %7438 = vmatprep.subr.bf16.mxu1 %v8061_v28  ;;  %v7794_v43 = vld [vmem:[%s9908_s6 + $0xc4] ss:$8 sps:$4 sm:$0xff]   ;;  %v7797_v37 = vld [vmem:[%s9908_s6 + $0x54] ss:$8 sps:$4 sm:$0xff]  }
 0x752   : > { %v7798_v45 = vld [vmem:[%s9908_s6 + $0xd0] ss:$8 sps:$4 sm:$0xff]  }
 0x753   : > { %7431 = vmatmul.mubr.bf16.vlgmr.msra.gmra.mrb[100].mxu0 %v3632_v38  ;;  %v7795_v38 = vld [vmem:[%s9908_s6 + $0x50] ss:$8 sps:$4 sm:$0xff]  }
 0x754   : > { %7439 = vmatpush3.bf16.msra.mxu1 %v8481_v11  ;;  %7471 = vmatpush3.bf16.msra.mxu0 %v8469_v35  ;;  %v7747_v35 = vld [vmem:[%s9905_s3 + $0x70] sm:$0x1f]  }
 0x755   : > { %7440 = vmatprep.subr.bf16.mxu1 %v8061_v28  ;;  %7472 = vmatprep.subr.bf16.mxu0 %v8061_v28 }
 0x756   : > { %7482 = vmatprep.mubr.msk.bf16.mxu0 %vm8062_vm0, %v8061_v28 }
 0x758   : > { %7441 = vmatpush3.bf16.msra.mxu1 %v8487_v30  ;;  %7473 = vmatpush3.bf16.msra.mxu0 %v8475_v55  ;;  %v7749_v55 = vld [vmem:[%s9906_s4 + $0x380] sm:$0xff]  }
 0x759   : > { %7442 = vmatprep.subr.bf16.mxu1 %v8061_v28  ;;  %7474 = vmatprep.subr.bf16.mxu0 %v8061_v28 }
 0x75c   : > { %7443 = vmatpush3.bf16.msra.mxu1 %v8493_v60  ;;  %7475 = vmatpush3.bf16.msra.mxu0 %v8481_v11  ;;  %v7748_v11 = vld [vmem:[%s9905_s3 + $0x78] sm:$0x1f]  }
 0x75d   : > { %7444 = vmatprep.subr.bf16.mxu1 %v8061_v28  ;;  %7476 = vmatprep.subr.bf16.mxu0 %v8061_v28 }
 0x760   : > { %7445 = vmatpush3.bf16.msra.mxu1 %v8499_v59  ;;  %7477 = vmatpush3.bf16.msra.mxu0 %v8487_v30  ;;  %v7750_v30 = vld [vmem:[%s9906_s4 + $0x388] sm:$0xff]  }
 0x761   : > { %7478 = vmatprep.subr.bf16.mxu0 %v8061_v28  ;;  %7450 = vmatprep.subr.bf16.mxu1 %v8061_v28 }
 0x763   : > { %7447 = vmatmul.mubr.msk.bf16.vlgmr.msra.gmra.mrb[104].mxu1 %vm1493_vm2, %v7747_v35  ;;  %v7800_v35 = vld [vmem:[%s9908_s6 + $0xd4] ss:$8 sps:$4 sm:$0xff]  }
 0x764   : > { %7479 = vmatpush3.bf16.msra.mxu0 %v8493_v60  ;;  %7451 = vmatpush3.bf16.msra.mxu1 %v7749_v55  ;;  %v7751_v60 = vld [vmem:[%s9906_s4 + $0x390] sm:$0xff]   ;;  %v7803_v55 = vld [vmem:[%s9908_s6 + $0x64] ss:$8 sps:$4 sm:$0xff]  }
 0x765   : > { %7480 = vmatprep.subr.bf16.mxu0 %v8061_v28  ;;  %7452 = vmatprep.subr.bf16.mxu1 %v8061_v28 }
 0x766   : > { %7466 = vmatprep.mubr.msk.bf16.mxu1 %vm8062_vm0, %v8061_v28 }
 0x768   : > { %7481 = vmatpush3.bf16.msra.mxu0 %v8499_v59  ;;  %7453 = vmatpush3.bf16.msra.mxu1 %v7750_v30  ;;  %v7752_v59 = vld [vmem:[%s9906_s4 + $0x3c0] sm:$0xff]  }
 0x769   : > { %7486 = vmatprep.subr.bf16.mxu0 %v8061_v28  ;;  %7454 = vmatprep.subr.bf16.mxu1 %v8061_v28  ;;  %v7806_v30 = vld [vmem:[%s9908_s6 + $0xe4] ss:$8 sps:$4 sm:$0xff]  }
 0x76b   : > { %7483 = vmatmul.mubr.msk.bf16.vlgmr.msra.gmra.mrb[104].mxu0 %vm1493_vm2, %v7748_v11  ;;  %v7801_v11 = vld [vmem:[%s9908_s6 + $0x60] ss:$8 sps:$4 sm:$0xff]  }
 0x76c   : > { %7502 = vmatprep.mubr.msk.bf16.mxu0 %vm8062_vm0, %v8061_v28  ;;  %7487 = vmatpush3.bf16.msra.mxu0 %v7752_v59  ;;  %v7809_v59 = vld [vmem:[%s9908_s6 + $0x74] ss:$8 sps:$4 sm:$0xff]  }
 0x76d   : > { %7455 = vmatpush3.bf16.msra.mxu1 %v7751_v60  ;;  %7488 = vmatprep.subr.bf16.mxu0 %v8061_v28  ;;  %v7804_v60 = vld [vmem:[%s9908_s6 + $0xe0] ss:$8 sps:$4 sm:$0xff]  }
 0x76e   : > { %7456 = vmatprep.subr.bf16.mxu1 %v8061_v28 }
 0x770   : > { %7489 = vmatpush3.bf16.msra.mxu0 %v7754_v40  ;;  %v7812_v40 = vld [vmem:[%s9908_s6 + $0xf4] ss:$8 sps:$4 sm:$0xff]  }
 0x771   : > { %7457 = vmatpush3.bf16.msra.mxu1 %v7753_v39  ;;  %7490 = vmatprep.subr.bf16.mxu0 %v8061_v28  ;;  %v7807_v39 = vld [vmem:[%s9908_s6 + $0x70] ss:$8 sps:$4 sm:$0xff]  }
 0x772   : > { %7458 = vmatprep.subr.bf16.mxu1 %v8061_v28 }
 0x774   : > { %7491 = vmatpush3.bf16.msra.mxu0 %v7756_v42  ;;  %v7815_v42 = vld [vmem:[%s9908_s6 + $0x184] ss:$8 sps:$4 sm:$0xff]  }
 0x775   : > { %7459 = vmatpush3.bf16.msra.mxu1 %v7755_v41  ;;  %7492 = vmatprep.subr.bf16.mxu0 %v8061_v28  ;;  %v7810_v41 = vld [vmem:[%s9908_s6 + $0xf0] ss:$8 sps:$4 sm:$0xff]  }
 0x776   : > { %7460 = vmatprep.subr.bf16.mxu1 %v8061_v28 }
 0x778   : > { %7493 = vmatpush3.bf16.msra.mxu0 %v7758_v46 }
 0x779   : > { %7461 = vmatpush3.bf16.msra.mxu1 %v7757_v44  ;;  %7494 = vmatprep.subr.bf16.mxu0 %v8061_v28  ;;  %v7818_v44 = vld [vmem:[%s9908_s6 + $0x104] ss:$8 sps:$4 sm:$0xff]  }
 0x77a   : > { %7462 = vmatprep.subr.bf16.mxu1 %v8061_v28 }
 0x77c   : > { %7495 = vmatpush3.bf16.msra.mxu0 %v7760_v48 }
 0x77d   : > { %7463 = vmatpush3.bf16.msra.mxu1 %v7759_v47  ;;  %7496 = vmatprep.subr.bf16.mxu0 %v8061_v28 }
 0x77e   : > { %7464 = vmatprep.subr.bf16.mxu1 %v8061_v28 }
 0x780   : > { %7497 = vmatpush3.bf16.msra.mxu0 %v7762_v49 }
 0x781   : > { %7465 = vmatpush3.bf16.msra.mxu1 %v7761_v50  ;;  %7498 = vmatprep.subr.bf16.mxu0 %v8061_v28 }
 0x782   : > { %4192 = vmatprep.subr.bf16.mxu1 %v7770_v57 }
 0x784   : > { %7499 = vmatpush3.bf16.msra.mxu0 %v7763_v51 }
 0x785   : > { %7500 = vmatprep.subr.bf16.mxu0 %v8061_v28 }
 0x788   : > { %7501 = vmatpush3.bf16.msra.mxu0 %v7764_v53 }
 0x789   : > { %4313 = vmatprep.subr.bf16.mxu0 %v7767_v54  ;;  %v6152_v54 = vld [vmem:[%s9907_s5] ss:$0 sm:$0xff] }
 0x81e   : > { %v3571_v58 = vpop.f32.mrb[100].mxu1 }
 0x81f   : > { %v3578_v61 = vadd.f32 %v3571_v58, %v9227_v22  ;;  %v7396_v2 = vpop.f32.mrb[101].mxu1  ;;  %v7773_v22 = vld [vmem:[%s9908_s6 + $0x14] ss:$8 sps:$4 sm:$0xff]  }
 0x820   : > { %v3574_v28 = vpop.f32.mrb[102].mxu1 }
 0x821   : > { %v3579_v63 = vadd.f32 %v3574_v28, %v9229_v25  ;;  %v7397_v0 = vpop.f32.mrb[103].mxu1  ;;  %v7786_v25 = vld [vmem:[%s9908_s6 + $0xb0] ss:$8 sps:$4 sm:$0xff]  }
 0x826   : > { %v3732_v1 = vpop.f32.mrb[100].mxu0 }
 0x827   : > { %v9341_v3 = vadd.f32 %v3732_v1, %v3578_v61  ;;  %v7432_v4 = vpop.f32.mrb[101].mxu0 }
 0x828   : > { %v3735_v5 = vpop.f32.mrb[102].mxu0 }
 0x829   : > { %v9343_v6 = vadd.f32 %v3735_v5, %v3579_v63  ;;  %v7433_v7 = vpop.f32.mrb[103].mxu0  ;;  %v7821_v5 = vld [vmem:[%s9908_s6 + $0x194] ss:$8 sps:$4 sm:$0xff]  }
 0x836   : > { %v3786_v8 = vpop.f32.mrb[104].mxu1 }
 0x837   : > { %v7448_v13 = vpop.f32.mrb[105].mxu1 }
 0x838   : > { %v3789_v9 = vpop.f32.mrb[106].mxu1  ;;  %v7819_v13 = vld [vmem:[%s9908_s6 + $0x190] ss:$8 sps:$4 sm:$0xff]  }
 0x839   : > { %v3793_v16 = vpack.c.bf16 %v3789_v9, %v3786_v8  ;;  %v7449_v12 = vpop.f32.mrb[107].mxu1  ;;  %v7824_v8 = vld [vmem:[%s9908_s6 + $0x114] ss:$8 sps:$4 sm:$0xff]   ;;  %v7827_v9 = vld [vmem:[%s9908_s6 + $0x1a4] ss:$8 sps:$4 sm:$0xff]  }
 0x83a   : > { %v7825_v12 = vld [vmem:[%s9908_s6 + $0x1a0] ss:$8 sps:$4 sm:$0xff]  }
 0x83b   : > { %7467 = vmatmul.mubr.bf16.vlgmr.msra.gmra.mrb[108].mxu1 %v3793_v16  ;;  %v7830_v16 = vld [vmem:[%s9908_s6 + $0x124] ss:$8 sps:$4 sm:$0xff]  }
 0x83c   : > { %4193 = vmatpush1.bf16.msra.mxu1 %v7768_v10  ;;  %4224 = vmatprep.mubr.bf16.mxu1 %v8063_v56  ;;  %v7822_v10 = vld [vmem:[%s9908_s6 + $0x110] ss:$8 sps:$4 sm:$0xff]  }
 0x83d   : > { %4194 = vmatprep.subr.bf16.mxu1 %v7776_v14  ;;  %v7833_v14 = vld [vmem:[%s9908_s6 + $0x1b4] ss:$8 sps:$4 sm:$0xff]  }
 0x83e   : > { %v3947_v52 = vpop.f32.mrb[104].mxu0 }
 0x83f   : > { %v7484_v18 = vpop.f32.mrb[105].mxu0 }
 0x840   : > { %v3950_v31 = vpop.f32.mrb[106].mxu0  ;;  %4195 = vmatpush1.bf16.msra.mxu1 %v7774_v15  ;;  %v7828_v15 = vld [vmem:[%s9908_s6 + $0x120] ss:$8 sps:$4 sm:$0xff]   ;;  %v7839_v18 = vld [vmem:[%s9908_s6 + $0x1c4] ss:$8 sps:$4 sm:$0xff]  }
 0x841   : > { %v3954_v20 = vpack.c.bf16 %v3950_v31, %v3947_v52  ;;  %v7485_v21 = vpop.f32.mrb[107].mxu0  ;;  %4196 = vmatprep.subr.bf16.mxu1 %v7782_v17  ;;  %v7836_v17 = vld [vmem:[%s9908_s6 + $0x134] ss:$8 sps:$4 sm:$0xff]   ;;  %v7831_v52 = vld [vmem:[%s9908_s6 + $0x1b0] ss:$8 sps:$4 sm:$0xff]  }
 0x842   : > { %v7834_v31 = vld [vmem:[%s9908_s6 + $0x130] ss:$8 sps:$4 sm:$0xff]   ;;  %v7840_v21 = vld [vmem:[%s9908_s6 + $0x140] ss:$8 sps:$4 sm:$0xff]  }
 0x843   : > { %7503 = vmatmul.mubr.bf16.vlgmr.msra.gmra.mrb[108].mxu0 %v3954_v20  ;;  %v7845_v20 = vld [vmem:[%s9908_s6 + $0x1d4] ss:$8 sps:$4 sm:$0xff]  }
 0x844   : > { %4314 = vmatpush1.bf16.msra.mxu0 %v7765_v62  ;;  %4197 = vmatpush1.bf16.msra.mxu1 %v7780_v19  ;;  %v7842_v62 = vld [vmem:[%s9908_s6 + $0x144] ss:$8 sps:$4 sm:$0xff]   ;;  %v7837_v19 = vld [vmem:[%s9908_s6 + $0x1c0] ss:$8 sps:$4 sm:$0xff]  }
 0x845   : > { %4315 = vmatprep.subr.bf16.mxu0 %v7773_v22  ;;  %4198 = vmatprep.subr.bf16.mxu1 %v7788_v23  ;;  %v7848_v22 = vld [vmem:[%s9908_s6 + $0x154] ss:$8 sps:$4 sm:$0xff]   ;;  %v7843_v23 = vld [vmem:[%s9908_s6 + $0x1d0] ss:$8 sps:$4 sm:$0xff]  }
 0x846   : > { %4345 = vmatprep.mubr.bf16.mxu0 %v8063_v56 }
 0x848   : > { %4316 = vmatpush1.bf16.msra.mxu0 %v7771_v24  ;;  %4199 = vmatpush1.bf16.msra.mxu1 %v7786_v25  ;;  %v7851_v24 = vld [vmem:[%s9908_s6 + $0x1e4] ss:$8 sps:$4 sm:$0xff]   ;;  %v7846_v25 = vld [vmem:[%s9908_s6 + $0x150] ss:$8 sps:$4 sm:$0xff]  }
 0x849   : > { %4317 = vmatprep.subr.bf16.mxu0 %v7779_v26  ;;  %4200 = vmatprep.subr.bf16.mxu1 %v7794_v43  ;;  %v7854_v26 = vld [vmem:[%s9908_s6 + $0x164] ss:$8 sps:$4 sm:$0xff]  }
 0x84a   : > { %v7863_v43 = vld [vmem:[%s9908_s6 + $0x284] ss:$8 sps:$4 sm:$0xff]  }
 0x84c   : > { %4318 = vmatpush1.bf16.msra.mxu0 %v7777_v32  ;;  %4201 = vmatpush1.bf16.msra.mxu1 %v7792_v36  ;;  %v7849_v32 = vld [vmem:[%s9908_s6 + $0x1e0] ss:$8 sps:$4 sm:$0xff]   ;;  %v7858_v36 = vld [vmem:[%s9908_s6 + $0x170] ss:$8 sps:$4 sm:$0xff]  }
 0x84d   : > { %4319 = vmatprep.subr.bf16.mxu0 %v7785_v27  ;;  %4202 = vmatprep.subr.bf16.mxu1 %v7800_v35  ;;  %v7857_v27 = vld [vmem:[%s9908_s6 + $0x1f4] ss:$8 sps:$4 sm:$0xff]  }
 0x84e   : > { %v7869_v35 = vld [vmem:[%s9908_s6 + $0x294] ss:$8 sps:$4 sm:$0xff]  }
 0x850   : > { %4320 = vmatpush1.bf16.msra.mxu0 %v7783_v29  ;;  %4203 = vmatpush1.bf16.msra.mxu1 %v7798_v45  ;;  %v7852_v29 = vld [vmem:[%s9908_s6 + $0x160] ss:$8 sps:$4 sm:$0xff]  }
 0x851   : > { %4321 = vmatprep.subr.bf16.mxu0 %v7791_v34  ;;  %4204 = vmatprep.subr.bf16.mxu1 %v7806_v30  ;;  %v7860_v34 = vld [vmem:[%s9908_s6 + $0x174] ss:$8 sps:$4 sm:$0xff]  }
 0x852   : > { %v7872_v30 = vld [vmem:[%s9908_s6 + $0x214] ss:$8 sps:$4 sm:$0xff]  }
 0x854   : > { %4322 = vmatpush1.bf16.msra.mxu0 %v7789_v33  ;;  %4205 = vmatpush1.bf16.msra.mxu1 %v7804_v60  ;;  %v7855_v33 = vld [vmem:[%s9908_s6 + $0x1f0] ss:$8 sps:$4 sm:$0xff]  }
 0x855   : > { %4323 = vmatprep.subr.bf16.mxu0 %v7797_v37  ;;  %4206 = vmatprep.subr.bf16.mxu1 %v7812_v40  ;;  %v7866_v37 = vld [vmem:[%s9908_s6 + $0x204] ss:$8 sps:$4 sm:$0xff]   ;;  %v7867_v60 = vld [vmem:[%s9908_s6 + $0x290] ss:$8 sps:$4 sm:$0xff]  }
 0x856   : > { %v7878_v40 = vld [vmem:[%s9908_s6 + $0x224] ss:$8 sps:$4 sm:$0xff]  }
 0x858   : > { %4324 = vmatpush1.bf16.msra.mxu0 %v7795_v38  ;;  %4207 = vmatpush1.bf16.msra.mxu1 %v7810_v41  ;;  %v7861_v38 = vld [vmem:[%s9908_s6 + $0x280] ss:$8 sps:$4 sm:$0xff]  }
 0x859   : > { %4325 = vmatprep.subr.bf16.mxu0 %v7803_v55  ;;  %4454 = vmatprep.subr.bf16.mxu1 %v7818_v44  ;;  %v7864_v55 = vld [vmem:[%s9908_s6 + $0x200] ss:$8 sps:$4 sm:$0xff]  }
 0x85a   : > { %v7873_v41 = vld [vmem:[%s9908_s6 + $0x2a0] ss:$8 sps:$4 sm:$0xff]  }
 0x85b   : > { %v7876_v44 = vld [vmem:[%s9908_s6 + $0x220] ss:$8 sps:$4 sm:$0xff]  }
 0x85c   : > { %4326 = vmatpush1.bf16.msra.mxu0 %v7801_v11 }
 0x85d   : > { %4327 = vmatprep.subr.bf16.mxu0 %v7809_v59  ;;  %v7875_v59 = vld [vmem:[%s9908_s6 + $0x2a4] ss:$8 sps:$4 sm:$0xff]  }
 0x860   : > { %4328 = vmatpush1.bf16.msra.mxu0 %v7807_v39  ;;  %v7870_v39 = vld [vmem:[%s9908_s6 + $0x210] ss:$8 sps:$4 sm:$0xff]  }
 0x861   : > { %4596 = vmatprep.subr.bf16.mxu0 %v7815_v42  ;;  %v7881_v42 = vld [vmem:[%s9908_s6 + $0x2b4] ss:$8 sps:$4 sm:$0xff]  }
 0x90e   : > { %v3893_v46 = vpop.f32.mrb[108].mxu1 }
 0x90f   : > { %v3900_v47 = vadd.f32 %v3893_v46, %v9341_v3  ;;  %v7468_v48 = vpop.f32.mrb[109].mxu1  ;;  %v7813_v3 = vld [vmem:[%s9908_s6 + $0x180] ss:$8 sps:$4 sm:$0xff]   ;;  %v7884_v46 = vld [vmem:[%s9908_s6 + $0x234] ss:$8 sps:$4 sm:$0xff]  }
 0x910   : > { %v3896_v50 = vpop.f32.mrb[110].mxu1  ;;  %v7887_v48 = vld [vmem:[%s9908_s6 + $0x2c4] ss:$8 sps:$4 sm:$0xff]  }
 0x911   : > { %v3901_v49 = vadd.f32 %v3896_v50, %v9343_v6  ;;  %v7469_v51 = vpop.f32.mrb[111].mxu1  ;;  %v7816_v6 = vld [vmem:[%s9908_s6 + $0x100] ss:$8 sps:$4 sm:$0xff]   ;;  %v7882_v50 = vld [vmem:[%s9908_s6 + $0x230] ss:$8 sps:$4 sm:$0xff]  }
 0x912   : > { %v7885_v51 = vld [vmem:[%s9908_s6 + $0x2c0] ss:$8 sps:$4 sm:$0xff]  }
 0x916   : > { %v4054_v53 = vpop.f32.mrb[108].mxu0 }
 0x917   : > { %v4061_v57 = vadd.f32 %v4054_v53, %v3900_v47  ;;  %v7504_v58 = vpop.f32.mrb[109].mxu0  ;;  %v7879_v47 = vld [vmem:[%s9908_s6 + $0x2b0] ss:$8 sps:$4 sm:$0xff]   ;;  %v7893_v53 = vld [vmem:[%s9908_s6 + $0x2d4] ss:$8 sps:$4 sm:$0xff]  }
 0x918   : > { %v4057_v61 = vpop.f32.mrb[110].mxu0  ;;  %v7891_v58 = vld [vmem:[%s9908_s6 + $0x2d0] ss:$8 sps:$4 sm:$0xff]  }
 0x919   : > { %v4070_v2 = vadd.f32 %v6152_v54, %v4061_v57  ;;  %v4062_v28 = vadd.f32 %v4057_v61, %v3901_v49  ;;  %v7505_v63 = vpop.f32.mrb[111].mxu0  ;;  %v7890_v49 = vld [vmem:[%s9908_s6 + $0x244] ss:$8 sps:$4 sm:$0xff]   ;;  %v7896_v57 = vld [vmem:[%s9908_s6 + $0x254] ss:$8 sps:$4 sm:$0xff]  }
 0x91a   : > { %v7899_v61 = vld [vmem:[%s9908_s6 + $0x2e4] ss:$8 sps:$4 sm:$0xff]   ;;  %v7897_v63 = vld [vmem:[%s9908_s6 + $0x2e0] ss:$8 sps:$4 sm:$0xff]  }
 0x91b   : > { %v4072_v0 = vmax.f32 %v4070_v2, 0.0  ;;  %v9448_v1 = vadd.f32 %v6152_v54, %v4062_v28  ;;  %v7888_v54 = vld [vmem:[%s9908_s6 + $0x240] ss:$8 sps:$4 sm:$0xff]   ;;  %v7894_v2 = vld [vmem:[%s9908_s6 + $0x250] ss:$8 sps:$4 sm:$0xff]  }
 0x91c   : > { %v7902_v28 = vld [vmem:[%s9908_s6 + $0x264] ss:$8 sps:$4 sm:$0xff]  }
 0x91d   : > { %v9453_v4 = vpack.c.bf16 %v4072_v0, %v4072_v0  ;;  %v7905_v0 = vld [vmem:[%s9908_s6 + $0x2f4] ss:$8 sps:$4 sm:$0xff]  }
 0x91f   : > { %4346 = vmatmul.mubr.bf16.vlgmr.msra.gmra.mrb[112].mxu0 %v9453_v4  ;;  %v9463_v7 = vshrl.u32 %v9453_v4, 16  ;;  %v4372_v11 = vrot.slane %v9453_v4, 1 }
 0x920   : > { %4597 = vmatpush1.bf16.msra.mxu0 %v7813_v3  ;;  %4628 = vmatprep.mubr.bf16.mxu0 %v8063_v56  ;;  %v7900_v3 = vld [vmem:[%s9908_s6 + $0x260] ss:$8 sps:$4 sm:$0xff]  }
 0x921   : > { %4225 = vmatmul.mubr.bf16.vlgmr.msra.gmra.mrb[112].mxu1 %v9463_v7  ;;  %4598 = vmatprep.subr.bf16.mxu0 %v7821_v5  ;;  %v4514_v45 = vrot.slane %v9463_v7, 1  ;;  %v7908_v5 = vld [vmem:[%s9908_s6 + $0x274] ss:$8 sps:$4 sm:$0xff]  }
 0x922   : > { %4455 = vmatpush1.bf16.msra.mxu1 %v7816_v6  ;;  %4486 = vmatprep.mubr.bf16.mxu1 %v8063_v56  ;;  %v7903_v6 = vld [vmem:[%s9908_s6 + $0x2f0] ss:$8 sps:$4 sm:$0xff]  }
 0x923   : > { %4456 = vmatprep.subr.bf16.mxu1 %v7824_v8  ;;  %v7911_v8 = vld [vmem:[%s9908_s6 + $0x384] ss:$8 sps:$4 sm:$0xff]  }
 0x924   : > { %4599 = vmatpush1.bf16.msra.mxu0 %v7819_v13  ;;  %v7906_v13 = vld [vmem:[%s9908_s6 + $0x270] ss:$8 sps:$4 sm:$0xff]  }
 0x925   : > { %4600 = vmatprep.subr.bf16.mxu0 %v7827_v9  ;;  %v7914_v9 = vld [vmem:[%s9908_s6 + $0x304] ss:$8 sps:$4 sm:$0xff]  }
 0x926   : > { %4457 = vmatpush1.bf16.msra.mxu1 %v7822_v10  ;;  %v7909_v10 = vld [vmem:[%s9908_s6 + $0x380] ss:$8 sps:$4 sm:$0xff]  }
 0x927   : > { %4458 = vmatprep.subr.bf16.mxu1 %v7830_v16  ;;  %v4798_v16 = vrot.slane %v9463_v7, 2 }
 0x928   : > { %4601 = vmatpush1.bf16.msra.mxu0 %v7825_v12  ;;  %v7917_v12 = vld [vmem:[%s9908_s6 + $0x394] ss:$8 sps:$4 sm:$0xff]  }
 0x929   : > { %4602 = vmatprep.subr.bf16.mxu0 %v7833_v14  ;;  %v7912_v14 = vld [vmem:[%s9908_s6 + $0x300] ss:$8 sps:$4 sm:$0xff]  }
 0x92a   : > { %4459 = vmatpush1.bf16.msra.mxu1 %v7828_v15  ;;  %v4656_v15 = vrot.slane %v9453_v4, 2 }
 0x92b   : > { %4460 = vmatprep.subr.bf16.mxu1 %v7836_v17  ;;  %v7920_v17 = vld [vmem:[%s9908_s6 + $0x314] ss:$8 sps:$4 sm:$0xff]  }
 0x92c   : > { %4603 = vmatpush1.bf16.msra.mxu0 %v7831_v52  ;;  %v7915_v52 = vld [vmem:[%s9908_s6 + $0x390] ss:$8 sps:$4 sm:$0xff]  }
 0x92d   : > { %4604 = vmatprep.subr.bf16.mxu0 %v7839_v18  ;;  %v7923_v18 = vld [vmem:[%s9908_s6 + $0x3a4] ss:$8 sps:$4 sm:$0xff]  }
 0x92e   : > { %4461 = vmatpush1.bf16.msra.mxu1 %v7834_v31  ;;  %v7918_v31 = vld [vmem:[%s9908_s6 + $0x310] ss:$8 sps:$4 sm:$0xff]  }
 0x92f   : > { %4462 = vmatprep.subr.bf16.mxu1 %v7842_v62  ;;  %v7926_v62 = vld [vmem:[%s9908_s6 + $0x324] ss:$8 sps:$4 sm:$0xff]  }
 0x930   : > { %4605 = vmatpush1.bf16.msra.mxu0 %v7837_v19  ;;  %v7921_v19 = vld [vmem:[%s9908_s6 + $0x3a0] ss:$8 sps:$4 sm:$0xff]  }
 0x931   : > { %4606 = vmatprep.subr.bf16.mxu0 %v7845_v20  ;;  %v7929_v20 = vld [vmem:[%s9908_s6 + $0x3b4] ss:$8 sps:$4 sm:$0xff]  }
 0x932   : > { %4463 = vmatpush1.bf16.msra.mxu1 %v7840_v21  ;;  %v7924_v21 = vld [vmem:[%s9908_s6 + $0x320] ss:$8 sps:$4 sm:$0xff]  }
 0x933   : > { %4464 = vmatprep.subr.bf16.mxu1 %v7848_v22  ;;  %v7932_v22 = vld [vmem:[%s9908_s6 + $0x334] ss:$8 sps:$4 sm:$0xff]  }
 0x934   : > { %4607 = vmatpush1.bf16.msra.mxu0 %v7843_v23  ;;  %v7927_v23 = vld [vmem:[%s9908_s6 + $0x3b0] ss:$8 sps:$4 sm:$0xff]  }
 0x935   : > { %4608 = vmatprep.subr.bf16.mxu0 %v7851_v24  ;;  %v7935_v24 = vld [vmem:[%s9908_s6 + $0x3c4] ss:$8 sps:$4 sm:$0xff]  }
 0x936   : > { %4465 = vmatpush1.bf16.msra.mxu1 %v7846_v25  ;;  %v7930_v25 = vld [vmem:[%s9908_s6 + $0x330] ss:$8 sps:$4 sm:$0xff]  }
 0x937   : > { %4466 = vmatprep.subr.bf16.mxu1 %v7854_v26  ;;  %v7938_v26 = vld [vmem:[%s9908_s6 + $0x344] ss:$8 sps:$4 sm:$0xff]  }
 0x938   : > { %4609 = vmatpush1.bf16.msra.mxu0 %v7849_v32  ;;  %v7933_v32 = vld [vmem:[%s9908_s6 + $0x3c0] ss:$8 sps:$4 sm:$0xff]  }
 0x939   : > { %4610 = vmatprep.subr.bf16.mxu0 %v7857_v27  ;;  %v7941_v27 = vld [vmem:[%s9908_s6 + $0x3d4] ss:$8 sps:$4 sm:$0xff]  }
 0x93a   : > { %4467 = vmatpush1.bf16.msra.mxu1 %v7852_v29  ;;  %v7936_v29 = vld [vmem:[%s9908_s6 + $0x340] ss:$8 sps:$4 sm:$0xff]  }
 0x93b   : > { %4468 = vmatprep.subr.bf16.mxu1 %v7860_v34  ;;  %v7944_v34 = vld [vmem:[%s9908_s6 + $0x354] ss:$8 sps:$4 sm:$0xff]  }
 0x93c   : > { %4611 = vmatpush1.bf16.msra.mxu0 %v7855_v33  ;;  %v7939_v33 = vld [vmem:[%s9908_s6 + $0x3d0] ss:$8 sps:$4 sm:$0xff]  }
 0x93d   : > { %4880 = vmatprep.subr.bf16.mxu0 %v7863_v43  ;;  %v7947_v43 = vld [vmem:[%s9908_s6 + $0x3e4] ss:$8 sps:$4 sm:$0xff]  }
 0x93e   : > { %4469 = vmatpush1.bf16.msra.mxu1 %v7858_v36  ;;  %v7942_v36 = vld [vmem:[%s9908_s6 + $0x350] ss:$8 sps:$4 sm:$0xff]  }
 0x93f   : > { %4629 = vmatmul.mubr.bf16.vlgmr.msra.gmra.mrb[116].mxu0 %v4514_v45  ;;  %4738 = vmatprep.subr.bf16.mxu1 %v7866_v37  ;;  %v7950_v37 = vld [vmem:[%s9908_s6 + $0x364] ss:$8 sps:$4 sm:$0xff]   ;;  %v7953_v45 = vld [vmem:[%s9908_s6 + $0x3f4] ss:$8 sps:$4 sm:$0xff]  }
 0x940   : > { %4881 = vmatpush1.bf16.msra.mxu0 %v7861_v38  ;;  %4912 = vmatprep.mubr.bf16.mxu0 %v8063_v56  ;;  %v7945_v38 = vld [vmem:[%s9908_s6 + $0x3e0] ss:$8 sps:$4 sm:$0xff]  }
 0x941   : > { %4487 = vmatmul.mubr.bf16.vlgmr.msra.gmra.mrb[116].mxu1 %v4372_v11  ;;  %4882 = vmatprep.subr.bf16.mxu0 %v7869_v35  ;;  %v7948_v35 = vld [vmem:[%s9908_s6 + $0x360] ss:$8 sps:$4 sm:$0xff]   ;;  %v7951_v11 = vld [vmem:[%s9908_s6 + $0x3f0] ss:$8 sps:$4 sm:$0xff]  }
 0x942   : > { %4739 = vmatpush1.bf16.msra.mxu1 %v7864_v55  ;;  %4770 = vmatprep.mubr.bf16.mxu1 %v8063_v56  ;;  %v7956_v55 = vld [vmem:[%s9908_s6 + $0x374] ss:$8 sps:$4 sm:$0xff]  }
 0x943   : > { %4740 = vmatprep.subr.bf16.mxu1 %v7872_v30  ;;  %v7954_v30 = vld [vmem:[%s9908_s6 + $0x370] ss:$8 sps:$4 sm:$0xff]  }
 0x944   : > { %4883 = vmatpush1.bf16.msra.mxu0 %v7867_v60  ;;  %v7959_v60 = vld [vmem:[%s9908_s6 + $0x404] ss:$8 sps:$4 sm:$0xff]  }
 0x945   : > { %4884 = vmatprep.subr.bf16.mxu0 %v7875_v59  ;;  %v5082_v59 = vrot.slane %v9463_v7, 3  ;;  %v7965_v7 = vld [vmem:[%s9908_s6 + $0x424] ss:$8 sps:$4 sm:$0xff]  }
 0x946   : > { %4741 = vmatpush1.bf16.msra.mxu1 %v7870_v39  ;;  %v7957_v39 = vld [vmem:[%s9908_s6 + $0x400] ss:$8 sps:$4 sm:$0xff]  }
 0x947   : > { %4742 = vmatprep.subr.bf16.mxu1 %v7878_v40  ;;  %v4940_v40 = vrot.slane %v9453_v4, 3  ;;  %v7963_v4 = vld [vmem:[%s9908_s6 + $0x420] ss:$8 sps:$4 sm:$0xff]  }
 0x948   : > { %4885 = vmatpush1.bf16.msra.mxu0 %v7873_v41  ;;  %v7962_v41 = vld [vmem:[%s9908_s6 + $0x414] ss:$8 sps:$4 sm:$0xff]  }
 0x949   : > { %4886 = vmatprep.subr.bf16.mxu0 %v7881_v42  ;;  %v7960_v42 = vld [vmem:[%s9908_s6 + $0x410] ss:$8 sps:$4 sm:$0xff]  }
 0x94a   : > { %4743 = vmatpush1.bf16.msra.mxu1 %v7876_v44  ;;  %v7968_v44 = vld [vmem:[%s9908_s6 + $0x434] ss:$8 sps:$4 sm:$0xff]  }
 0x94b   : > { %4744 = vmatprep.subr.bf16.mxu1 %v7884_v46  ;;  %v7971_v46 = vld [vmem:[%s9908_s6 + $0x444] ss:$8 sps:$4 sm:$0xff]  }
 0x94c   : > { %4887 = vmatpush1.bf16.msra.mxu0 %v7879_v47  ;;  %v7969_v47 = vld [vmem:[%s9908_s6 + $0x440] ss:$8 sps:$4 sm:$0xff]  }
 0x94d   : > { %4888 = vmatprep.subr.bf16.mxu0 %v7887_v48  ;;  %v7974_v48 = vld [vmem:[%s9908_s6 + $0x454] ss:$8 sps:$4 sm:$0xff]  }
 0x94e   : > { %4745 = vmatpush1.bf16.msra.mxu1 %v7882_v50  ;;  %v7972_v50 = vld [vmem:[%s9908_s6 + $0x450] ss:$8 sps:$4 sm:$0xff]  }
 0x94f   : > { %4746 = vmatprep.subr.bf16.mxu1 %v7890_v49  ;;  %v7977_v49 = vld [vmem:[%s9908_s6 + $0x464] ss:$8 sps:$4 sm:$0xff]  }
 0x950   : > { %4889 = vmatpush1.bf16.msra.mxu0 %v7885_v51  ;;  %v7975_v51 = vld [vmem:[%s9908_s6 + $0x460] ss:$8 sps:$4 sm:$0xff]  }
 0x951   : > { %4890 = vmatprep.subr.bf16.mxu0 %v7893_v53  ;;  %v7980_v53 = vld [vmem:[%s9908_s6 + $0x474] ss:$8 sps:$4 sm:$0xff]  }
 0x952   : > { %4747 = vmatpush1.bf16.msra.mxu1 %v7888_v54  ;;  %v7978_v54 = vld [vmem:[%s9908_s6 + $0x470] ss:$8 sps:$4 sm:$0xff]  }
 0x953   : > { %4748 = vmatprep.subr.bf16.mxu1 %v7896_v57  ;;  %v4073_v57 = vmax.f32 %v9448_v1, 0.0  ;;  %v7984_v1 = vld [vmem:[%s9910_s8 + $0x8] sm:$0xff]  }
 0x954   : > { %4891 = vmatpush1.bf16.msra.mxu0 %v7891_v58 }
 0x955   : > { %4892 = vmatprep.subr.bf16.mxu0 %v7899_v61  ;;  %v5207_v58 = vpack.c.bf16 %v4073_v57, %v4073_v57  ;;  %v7981_v61 = vld [vmem:[%s9910_s8 + $0x40] sm:$0xff]   ;;  %v5350_v57 = vlaneseq }
 0x956   : > { %4749 = vmatpush1.bf16.msra.mxu1 %v7894_v2  ;;  %v7982_v2 = vld [vmem:[%s9910_s8] sm:$0xff]  }
 0x957   : > { %4750 = vmatprep.subr.bf16.mxu1 %v7902_v28  ;;  %v7983_v28 = vld [vmem:[%s9910_s8 + $0x48] sm:$0xff]  }
 0x958   : > { %4893 = vmatpush1.bf16.msra.mxu0 %v7897_v63  ;;  %v7985_v63 = vld [vmem:[%s9910_s8 + $0x50] sm:$0xff]  }
 0x959   : > { %4894 = vmatprep.subr.bf16.mxu0 %v7905_v0  ;;  %v7986_v0 = vld [vmem:[%s9910_s8 + $0x10] sm:$0xff]  }
 0x95a   : > { %4751 = vmatpush1.bf16.msra.mxu1 %v7900_v3  ;;  %v7987_v3 = vld [vmem:[%s9910_s8 + $0x58] sm:$0xff]  }
 0x95b   : > { %4752 = vmatprep.subr.bf16.mxu1 %v7908_v5  ;;  %v7988_v5 = vld [vmem:[%s9910_s8 + $0x18] sm:$0xff]  }
 0x95c   : > { %4895 = vmatpush1.bf16.msra.mxu0 %v7903_v6  ;;  %v7989_v6 = vld [vmem:[%s9910_s8 + $0x60] sm:$0xff]  }
 0x95d   : > { %5164 = vmatprep.subr.bf16.mxu0 %v7911_v8  ;;  %v7990_v8 = vld [vmem:[%s9910_s8 + $0x20] sm:$0xff]  }
 0x95e   : > { %4753 = vmatpush1.bf16.msra.mxu1 %v7906_v13  ;;  %v7991_v13 = vld [vmem:[%s9910_s8 + $0x68] sm:$0xff]  }
 0x95f   : > { %4913 = vmatmul.mubr.bf16.vlgmr.msra.gmra.mrb[120].mxu0 %v4798_v16  ;;  %5022 = vmatprep.subr.bf16.mxu1 %v7914_v9 }
 0x960   : > { %5165 = vmatpush1.bf16.msra.mxu0 %v7909_v10  ;;  %5196 = vmatprep.mubr.bf16.mxu0 %v8063_v56  ;;  %v7992_v10 = vld [vmem:[%s9910_s8 + $0x28] sm:$0xff]  }
 0x961   : > { %4771 = vmatmul.mubr.bf16.vlgmr.msra.gmra.mrb[120].mxu1 %v4656_v15  ;;  %5166 = vmatprep.subr.bf16.mxu0 %v7917_v12 }
 0x962   : > { %5023 = vmatpush1.bf16.msra.mxu1 %v7912_v14  ;;  %5054 = vmatprep.mubr.bf16.mxu1 %v8063_v56 }
 0x963   : > { %5024 = vmatprep.subr.bf16.mxu1 %v7920_v17 }
 0x964   : > { %5167 = vmatpush1.bf16.msra.mxu0 %v7915_v52 }
 0x965   : > { %5168 = vmatprep.subr.bf16.mxu0 %v7923_v18  ;;  %v7993_v18 = vld [vmem:[%s9910_s8 + $0x70] sm:$0xff]  }
 0x966   : > { %5025 = vmatpush1.bf16.msra.mxu1 %v7918_v31 }
 0x967   : > { %5026 = vmatprep.subr.bf16.mxu1 %v7926_v62 }
 0x968   : > { %5169 = vmatpush1.bf16.msra.mxu0 %v7921_v19  ;;  %v7994_v19 = vld [vmem:[%s9910_s8 + $0x30] sm:$0xff]  }
 0x969   : > { %5170 = vmatprep.subr.bf16.mxu0 %v7929_v20 }
 0x96a   : > { %5027 = vmatpush1.bf16.msra.mxu1 %v7924_v21  ;;  %v7995_v21 = vld [vmem:[%s9910_s8 + $0x78] sm:$0xff]  }
 0x96b   : > { %5028 = vmatprep.subr.bf16.mxu1 %v7932_v22  ;;  %v7996_v22 = vld [vmem:[%s9910_s8 + $0x38] sm:$0xff]  }
 0x96c   : > { %5171 = vmatpush1.bf16.msra.mxu0 %v7927_v23 }
 0x96d   : > { %5172 = vmatprep.subr.bf16.mxu0 %v7935_v24 }
 0x96e   : > { %5029 = vmatpush1.bf16.msra.mxu1 %v7930_v25 }
 0x96f   : > { %5030 = vmatprep.subr.bf16.mxu1 %v7938_v26 }
 0x970   : > { %5173 = vmatpush1.bf16.msra.mxu0 %v7933_v32 }
 0x971   : > { %5174 = vmatprep.subr.bf16.mxu0 %v7941_v27 }
 0x972   : > { %5031 = vmatpush1.bf16.msra.mxu1 %v7936_v29 }
 0x973   : > { %5032 = vmatprep.subr.bf16.mxu1 %v7944_v34 }
 0x974   : > { %5175 = vmatpush1.bf16.msra.mxu0 %v7939_v33 }
 0x975   : > { %5176 = vmatprep.subr.bf16.mxu0 %v7947_v43 }
 0x976   : > { %5033 = vmatpush1.bf16.msra.mxu1 %v7942_v36 }
 0x977   : > { %5034 = vmatprep.subr.bf16.mxu1 %v7950_v37 }
 0x978   : > { %5177 = vmatpush1.bf16.msra.mxu0 %v7945_v38 }
 0x979   : > { %5178 = vmatprep.subr.bf16.mxu0 %v7953_v45 }
 0x97a   : > { %5035 = vmatpush1.bf16.msra.mxu1 %v7948_v35 }
 0x97b   : > { %5036 = vmatprep.subr.bf16.mxu1 %v7956_v55 }
 0x97c   : > { %5179 = vmatpush1.bf16.msra.mxu0 %v7951_v11 }
 0x97d   : > { %6908 = vmatprep.subr.bf16.mxu0 %v7981_v61 }
 0x97e   : > { %5037 = vmatpush1.bf16.msra.mxu1 %v7954_v30 }
 0x97f   : > { %5197 = vmatmul.mubr.bf16.vlgmr.msra.gmra.mrb[124].mxu0 %v5082_v59  ;;  %5305 = vmatprep.subr.bf16.mxu1 %v7959_v60 }
 0x980   : > { %6909 = vmatpush3.bf16.msra.mxu0 %v7982_v2  ;;  %v5348_v2 = vld [vmem:[%s9909_s7] sm:$0x3] }
 0x981   : > { %5055 = vmatmul.mubr.bf16.vlgmr.msra.gmra.mrb[124].mxu1 %v4940_v40  ;;  %6910 = vmatprep.subr.bf16.mxu0 %v7983_v28 }
 0x982   : > { %5306 = vmatpush1.bf16.msra.mxu1 %v7957_v39  ;;  %5337 = vmatprep.mubr.bf16.mxu1 %v8063_v56  ;;  %v7966_v56 = vld [vmem:[%s9908_s6 + $0x430] ss:$8 sps:$4 sm:$0xff]  }
 0x983   : > { %5307 = vmatprep.subr.bf16.mxu1 %v7962_v41 }
 0x984   : > { %6911 = vmatpush3.bf16.msra.mxu0 %v7984_v1 }
 0x985   : > { %6912 = vmatprep.subr.bf16.mxu0 %v7985_v63 }
 0x986   : > { %5308 = vmatpush1.bf16.msra.mxu1 %v7960_v42 }
 0x987   : > { %5309 = vmatprep.subr.bf16.mxu1 %v7965_v7 }
 0x988   : > { %6913 = vmatpush3.bf16.msra.mxu0 %v7986_v0 }
 0x989   : > { %6914 = vmatprep.subr.bf16.mxu0 %v7987_v3 }
 0x98a   : > { %5310 = vmatpush1.bf16.msra.mxu1 %v7963_v4 }
 0x98b   : > { %5311 = vmatprep.subr.bf16.mxu1 %v7968_v44 }
 0x98c   : > { %6915 = vmatpush3.bf16.msra.mxu0 %v7988_v5 }
 0x98d   : > { %6916 = vmatprep.subr.bf16.mxu0 %v7989_v6 }
 0x98e   : > { %5312 = vmatpush1.bf16.msra.mxu1 %v7966_v56 }
 0x98f   : > { %5313 = vmatprep.subr.bf16.mxu1 %v7971_v46 }
 0x990   : > { %6917 = vmatpush3.bf16.msra.mxu0 %v7990_v8 }
 0x991   : > { %6918 = vmatprep.subr.bf16.mxu0 %v7991_v13 }
 0x992   : > { %5314 = vmatpush1.bf16.msra.mxu1 %v7969_v47 }
 0x993   : > { %5315 = vmatprep.subr.bf16.mxu1 %v7974_v48 }
 0x994   : > { %6919 = vmatpush3.bf16.msra.mxu0 %v7992_v10 }
 0x995   : > { %6920 = vmatprep.subr.bf16.mxu0 %v7993_v18 }
 0x996   : > { %5316 = vmatpush1.bf16.msra.mxu1 %v7972_v50 }
 0x997   : > { %5317 = vmatprep.subr.bf16.mxu1 %v7977_v49 }
 0x998   : > { %6921 = vmatpush3.bf16.msra.mxu0 %v7994_v19 }
 0x999   : > { %6922 = vmatprep.subr.bf16.mxu0 %v7995_v21 }
 0x99a   : > { %5318 = vmatpush1.bf16.msra.mxu1 %v7975_v51 }
 0x99b   : > { %5319 = vmatprep.subr.bf16.mxu1 %v7980_v53 }
 0x99c   : > { %6923 = vmatpush3.bf16.msra.mxu0 %v7996_v22 }
 0x99e   : > { %5320 = vmatpush1.bf16.msra.mxu1 %v7978_v54 }
 0x9a1   : > { %5338 = vmatmul.mubr.bf16.vlgmr.msra.gmra.mrb[128].mxu1 %v5207_v58  ;;  %v5351_v58 = vshrl.u32 %v5350_v57, 7 }
 0x9a3   : > { %v5352_v61 = vsub.s32 0, %v5351_v58  ;;  %v5356_v28 = vsub.s32 1, %v5351_v58 }
 0x9a5   : > { %v5353_v1 = vrot.slane %v5348_v2, %v5352_v61  ;;  %v5357_v0 = vrot.slane %v5348_v2, %v5356_v28 }
 0x9f2   : > { %v4347_v9 = vpop.f32.mrb[112].mxu0 }
 0x9f3   : > { %v4349_v16 = vpop.f32.mrb[113].mxu0 }
 0x9f4   : > { %v4226_v12 = vpop.f32.mrb[112].mxu1  ;;  %v4351_v14 = vpop.f32.mrb[114].mxu0 }
 0x9f5   : > { %v4348_v15 = vadd.f32 %v4347_v9, %v4226_v12  ;;  %v4228_v17 = vpop.f32.mrb[113].mxu1  ;;  %v4352_v52 = vpop.f32.mrb[115].mxu0 }
 0x9f6   : > { %v4350_v31 = vadd.f32 %v4349_v16, %v4228_v17  ;;  %v4230_v62 = vpop.f32.mrb[114].mxu1  ;;  %v5398_v52 = vld [vmem:[%s9911_s9] sm:$0x1] }
 0x9f7   : > { %v4231_v20 = vpop.f32.mrb[115].mxu1 }
 0xa12   : > { %v4630_v23 = vpop.f32.mrb[116].mxu0 }
 0xa13   : > { %v4632_v24 = vpop.f32.mrb[117].mxu0 }
 0xa14   : > { %v4488_v25 = vpop.f32.mrb[116].mxu1  ;;  %v4634_v26 = vpop.f32.mrb[118].mxu0 }
 0xa15   : > { %v4495_v32 = vadd.f32 %v4488_v25, %v4348_v15  ;;  %v4490_v27 = vpop.f32.mrb[117].mxu1  ;;  %v4635_v29 = vpop.f32.mrb[119].mxu0 }
 0xa16   : > { %v4496_v34 = vadd.f32 %v4490_v27, %v4350_v31  ;;  %v4492_v33 = vpop.f32.mrb[118].mxu1 }
 0xa17   : > { %v4493_v43 = vpop.f32.mrb[119].mxu1  ;;  %v4637_v36 = vadd.f32 %v4630_v23, %v4495_v32 }
 0xa18   : > { %v4638_v37 = vadd.f32 %v4632_v24, %v4496_v34 }
 0xa32   : > { %v4914_v38 = vpop.f32.mrb[120].mxu0 }
 0xa33   : > { %v4916_v45 = vpop.f32.mrb[121].mxu0 }
 0xa34   : > { %v4772_v35 = vpop.f32.mrb[120].mxu1  ;;  %v4918_v55 = vpop.f32.mrb[122].mxu0 }
 0xa35   : > { %v4779_v11 = vadd.f32 %v4772_v35, %v4637_v36  ;;  %v4774_v30 = vpop.f32.mrb[121].mxu1  ;;  %v4919_v60 = vpop.f32.mrb[123].mxu0 }
 0xa36   : > { %v4780_v59 = vadd.f32 %v4774_v30, %v4638_v37  ;;  %v4776_v39 = vpop.f32.mrb[122].mxu1 }
 0xa37   : > { %v4777_v40 = vpop.f32.mrb[123].mxu1  ;;  %v4921_v41 = vadd.f32 %v4914_v38, %v4779_v11 }
 0xa38   : > { %v4922_v42 = vadd.f32 %v4916_v45, %v4780_v59 }
 0xa52   : > { %v5198_v7 = vpop.f32.mrb[124].mxu0 }
 0xa53   : > { %v5200_v4 = vpop.f32.mrb[125].mxu0 }
 0xa54   : > { %v5056_v44 = vpop.f32.mrb[124].mxu1  ;;  %v5202_v56 = vpop.f32.mrb[126].mxu0 }
 0xa55   : > { %v5063_v46 = vadd.f32 %v5056_v44, %v4921_v41  ;;  %v5058_v47 = vpop.f32.mrb[125].mxu1  ;;  %v5203_v48 = vpop.f32.mrb[127].mxu0 }
 0xa56   : > { %v5064_v50 = vadd.f32 %v5058_v47, %v4922_v42  ;;  %v5060_v49 = vpop.f32.mrb[126].mxu1 }
 0xa57   : > { %v5061_v51 = vpop.f32.mrb[127].mxu1  ;;  %v5205_v53 = vadd.f32 %v5198_v7, %v5063_v46 }
 0xa58   : > { %v5206_v54 = vadd.f32 %v5200_v4, %v5064_v50 }
 0xa74   : > { %v5339_v63 = vpop.f32.mrb[128].mxu1 }
 0xa75   : > { %v5346_v3 = vadd.f32 %v5339_v63, %v5205_v53  ;;  %v5341_v5 = vpop.f32.mrb[129].mxu1 }
 0xa76   : > { %v5347_v6 = vadd.f32 %v5341_v5, %v5206_v54  ;;  %v5343_v8 = vpop.f32.mrb[130].mxu1 }
 0xa77   : > { %v5360_v13 = vadd.f32 %v5353_v1, %v5346_v3  ;;  %v5344_v9 = vpop.f32.mrb[131].mxu1 }
 0xa78   : > { %v5361_v10 = vadd.f32 %v5357_v0, %v5347_v6 }
 0xa79   : > { %v5362_v16 = vmax.f32 %v5360_v13, 0.0 }
 0xa7a   : > { %v5363_v12 = vmax.f32 %v5361_v10, 0.0 }
 0xa7b   : > { %v5364_v15 = vpack.c.bf16 %v5362_v16, %v5362_v16 }
 0xa7c   : > { %v5365_v14 = vpack.c.bf16 %v5363_v12, %v5363_v12 }
 0xa7e   : > { %5527 = vmatprep.mubr.bf16.mxu0 %v5365_v14 }
 0xa7f   : > { %5528 = vmatmul.mubr.bf16.vlgmr.msra.gmra.mrb[128].mxu0 %v5364_v15 }
 0xb52   : > { %v6924_v17 = vpop.f32.mrb[128].mxu0 }
 0xb53   : > { %v6925_v18 = vpop.f32.mrb[129].mxu0 }
 0xb54   : > { %v6926_v31 = vadd.f32 %v6925_v18, %v6924_v17  ;;  %v6927_v62 = vpop.f32.mrb[130].mxu0 }
 0xb55   : > { %v6928_v19 = vpop.f32.mrb[131].mxu0 }
 0xb56   : > { %v5530_v20 = vadd.f32 %v6926_v31, %v5398_v52 }
 0xb58   : > { %5535 = vst [vmem:[%s351_s18] sm:$0x1] %v5530_v20 }
 0xb59   : > { %8010 = shalt.err (!%p8007_p3)
}
 0xb5a   : > { %s8011_s11 = scalar_lea.hbm %s9860_s29, 16  ;;  %s8015_s27 = scalar_lea.hbm %s9912_s10, 32 }
 0xb5b   : > { %p8012_p4 = scmp.ne.s32.totalorder %s9860_s29, %s8011_s11  ;;  %p8016_p9 = scmp.lt.u32.totalorder %s9860_s29, %s9912_s10 }
 0xb5c   : > { %p8017_p10 = scmp.lt.u32.totalorder %s8015_s27, %s8011_s11  ;;  %p8019_p12 = scmp.lt.u32.totalorder %s8011_s11, %s9860_s29 }
 0xb5d   : > { %p8013_p7 = pnand %p8012_p4, %p8158_p5 }
 0xb5e   : > { %p8018_p11 = por %p8017_p10, %p8016_p9 }
 0xb5f   : > { %p8014_p8 = pneg %p8013_p7 }
 0xb60   : > { %p8020_p13 = por %p8019_p12, %p8018_p11 }
 0xb62   : > { %p8021_p0 = pnand %p8020_p13, %p8014_p8 }
 0xb64   : > { %8024 = shalt.err (!%p8021_p0)
}
 0xb65   : > { %7507 = dma.vmem_to_hbm [thread:$0]  (%p8158_p5), %s9862_s26, 16, %s9860_s29, %s5537_s20  }
 0xb66 PF: > { %p7513_p1 = scmp.ge.s32.totalorder %s8059_s16, 2  ;;  %s5561_s30 = sand.u32 1, %s8047_s13  }
 0xb67   : > { %s5562_s12 = scalar_lea.sflag [#allocation3], %s5561_s30 }
 0xb68   : > { %p7510_p2 = pnand %p7513_p1, %p8162_p6 }
 0xb6a   : > { %8042 = dma.done.wait (!%p7510_p2), %s5562_s12, 16  }
 0xb6b   : > { %8044 = vsyncadd (!%p7510_p2), %s5562_s12, 4294967280  ;;  %p20_p3 = scmp.ge.s32.totalorder %s8145_s19, 4   ;;  %s9915_s13 = smov %s8051_s14 }
 0xb6c   : > { %s9916_s14 = smov %s8055_s15  ;;  %s9917_s15 = smov %s8156_s22 }
 0xb6d   : > { %s9918_s16 = smov %s8145_s19  ;;  %22 = sbr.rel (!%p20_p3) target bundleno = 3 (0x3), region = 133 }
 0xb74   :  { %5566 = vsyncpa [#allocation3], 1 }
 0xb75   :  { %5568 = vsyncpa [#allocation3 + $0x1], 1 }

</bundles_post_ra>
